<compile_context>
chip_gen: v6e
topology: v6e:2x2x1
jax: 0.10.0
libtpu: 0.0.40
codegen_flags: <defaults>
</compile_context>

<pallas_src>
import math

import jax
import jax.numpy as jnp
from jax.experimental import pallas as pl
from jax.experimental.pallas import tpu as pltpu

CFG = dict(
    vocab=64,        # synthetic tiny vocab (real ByT5 vocab is 384)
    d_model=32,
    n_heads=4,
    d_kv=8,
    d_ff=64,
    n_layers=2,      # "keep_layer_count" -> truncated encoder
    rel_buckets=32,
    rel_max_dist=128,
    eps=1e-6,
)

LANE = 128   # fc3 / QKV outputs are written as full 128-lane slabs
BT = 8       # batch rows per grid step (fills MXU sublanes, amortizes step cost)


# ---------------------------------------------------------------------------
# In-kernel helpers (pure jnp, traced inside the Pallas body, f32 math)
# ---------------------------------------------------------------------------
def _rmsnorm(x, w, eps):
    # T5 LayerNorm: no mean subtraction, no bias.
    var = jnp.mean(x * x, axis=-1, keepdims=True)
    return x * jax.lax.rsqrt(var + eps) * w


def _gelu_new(x):
    # HF NewGELU (tanh approximation) used by ByT5's gated-gelu FFN.
    return 0.5 * x * (1.0 + jnp.tanh(
        0.7978845608028654 * (x + 0.044715 * x * x * x)))


# ---------------------------------------------------------------------------
# Fused encoder + regression-head kernel (one grid step == BT batch rows)
# ---------------------------------------------------------------------------
def _make_encoder_kernel(cfg, bt, seq):
    nh, dh, dff, L = cfg["n_heads"], cfg["d_kv"], cfg["d_ff"], cfg["n_layers"]
    d = cfg["d_model"]
    inner = nh * dh
    eps = cfg["eps"]
    rows = bt * seq

    def kernel(h_ref, bias_ref, ln_attn_ref, wqkv_ref, wo_ref,
               ln_ff_ref, wi_ref, wo_ff_ref, final_ln_ref,
               fc3w_ref, fc3b_ref, out_ref):
        # Residual stream in f32, flattened so every dense matmul sees
        # bt*seq rows (review #1).
        h = h_ref[...].reshape(rows, d)

        for l in range(L):                                      # static unroll
            # ---- self-attention sub-layer ------------------------------
            n = _rmsnorm(h, ln_attn_ref[l], eps).astype(jnp.bfloat16)
            qkv = jnp.dot(n, wqkv_ref[l],
                          preferred_element_type=jnp.float32)   # (rows, 128)
            q = qkv[:, :inner].astype(jnp.bfloat16).reshape(bt, seq, inner)
            k = qkv[:, inner:2 * inner].astype(jnp.bfloat16).reshape(bt, seq, inner)
            v = qkv[:, 2 * inner:3 * inner].astype(jnp.bfloat16).reshape(bt, seq, inner)
            wo_l = wo_ref[l]                                    # (inner, d) bf16

            attn = jnp.zeros((rows, d), jnp.float32)
            for hh in range(nh):                                # static unroll
                sl = slice(hh * dh, (hh + 1) * dh)
                qh, kh, vh = q[..., sl], k[..., sl], v[..., sl]  # (bt, S, dh)
                # T5 attention: no 1/sqrt(d) scaling; additive rel-pos bias.
                s = jnp.einsum("bqd,bkd->bqk", qh, kh,
                               preferred_element_type=jnp.float32)
                s = s + bias_ref[hh][None, :, :]                 # (bt, S, S)
                m = jnp.max(s, axis=-1, keepdims=True)
                p = jnp.exp(s - m)
                p = p * pl.reciprocal(
                    jnp.sum(p, axis=-1, keepdims=True), approx=True)
                ctx = jnp.einsum("bqk,bkd->bqd", p.astype(jnp.bfloat16), vh,
                                 preferred_element_type=jnp.float32)
                # Push each head through its slice of W_o and accumulate:
                # no lane-axis concatenate across heads (review #2).
                attn = attn + jnp.dot(
                    ctx.reshape(rows, dh).astype(jnp.bfloat16), wo_l[sl, :],
                    preferred_element_type=jnp.float32)
            h = h + attn

            # ---- gated-GELU feed-forward sub-layer ---------------------
            n = _rmsnorm(h, ln_ff_ref[l], eps).astype(jnp.bfloat16)
            hi = jnp.dot(n, wi_ref[l],
                         preferred_element_type=jnp.float32)    # (rows, 2*dff)
            g = (_gelu_new(hi[:, :dff]) * hi[:, dff:]).astype(jnp.bfloat16)
            h = h + jnp.dot(g, wo_ff_ref[l],
                            preferred_element_type=jnp.float32)

        # Token 0 only: slice BEFORE the final RMSNorm (review #8), then fc3.
        tok0 = h.reshape(bt, seq, d)[:, 0, :]                    # (bt, d)
        tok0 = _rmsnorm(tok0, final_ln_ref[...], eps).astype(jnp.bfloat16)
        out = jnp.dot(tok0, fc3w_ref[...],
                      preferred_element_type=jnp.float32)        # (bt, LANE)
        out_ref[...] = out + fc3b_ref[...]

    return kernel


# ---------------------------------------------------------------------------
# T5 relative position bias (integer bucketing is plain-JAX glue)
# ---------------------------------------------------------------------------
def _relative_position_bucket(relative_position, num_buckets, max_distance):
    num_buckets = num_buckets // 2
    buckets = (relative_position > 0).astype(jnp.int32) * num_buckets
    n = jnp.abs(relative_position)
    max_exact = num_buckets // 2
    is_small = n < max_exact
    n_f = jnp.maximum(n, 1).astype(jnp.float32)
    val_if_large = max_exact + (
        jnp.log(n_f / max_exact) / math.log(max_distance / max_exact)
        * (num_buckets - max_exact)
    ).astype(jnp.int32)
    val_if_large = jnp.minimum(val_if_large, num_buckets - 1)
    return buckets + jnp.where(is_small, n, val_if_large)


def compute_position_bias(rel_bias_weight, seq_len, cfg):
    ctx = jnp.arange(seq_len, dtype=jnp.int32)[:, None]
    mem = jnp.arange(seq_len, dtype=jnp.int32)[None, :]
    buckets = _relative_position_bucket(
        mem - ctx, cfg["rel_buckets"], cfg["rel_max_dist"])      # (S, S)
    values = jnp.take(rel_bias_weight, buckets, axis=0)          # (S, S, nh)
    return jnp.transpose(values, (2, 0, 1))                      # (nh, S, S)


# ---------------------------------------------------------------------------
# Parameters (deterministic synthetic init, pre-packed for the fused kernel)
# ---------------------------------------------------------------------------
def init_params(key, cfg):
    d, nh, dh, dff = cfg["d_model"], cfg["n_heads"], cfg["d_kv"], cfg["d_ff"]
    L = cfg["n_layers"]
    inner = nh * dh
    keys = jax.random.split(key, 8)

    def rnd(k, shape, scale=0.05):
        return jax.random.normal(k, shape, jnp.float32) * scale

    fc3_w = rnd(keys[2], (d, 2))
    fc3_b = rnd(keys[3], (2,))
    # Fused Q|K|V weight, zero-padded along lanes to a multiple of 128
    # (lane-dense MXU output, unmasked result store).
    qkv_lanes = ((3 * inner + LANE - 1) // LANE) * LANE
    wqkv = jnp.zeros((L, d, qkv_lanes), jnp.float32)
    wqkv = wqkv.at[:, :, :3 * inner].set(rnd(keys[4], (L, d, 3 * inner)))

    # MXU operands in bf16 (f32 accumulation in-kernel); norm weights, bias
    # table and fc3 bias stay f32 (VPU/EUP math is f32).
    return {
        "embed": rnd(keys[0], (cfg["vocab"], d)),
        "rel_bias": rnd(keys[1], (cfg["rel_buckets"], nh)),
        "final_ln": jnp.ones((1, d), jnp.float32),
        "fc3_w_pad": jnp.zeros((d, LANE), jnp.float32)
                        .at[:, :2].set(fc3_w).astype(jnp.bfloat16),
        "fc3_b_pad": jnp.zeros((1, LANE), jnp.float32).at[0, :2].set(fc3_b),
        "ln_attn": jnp.ones((L, 1, d), jnp.float32),
        "ln_ff": jnp.ones((L, 1, d), jnp.float32),
        "wqkv": wqkv.astype(jnp.bfloat16),                     # (L, d, 128)
        "wo": rnd(keys[5], (L, inner, d)).astype(jnp.bfloat16),
        "wi": rnd(keys[6], (L, d, 2 * dff)).astype(jnp.bfloat16),  # gate|up
        "wo_ff": rnd(keys[7], (L, dff, d)).astype(jnp.bfloat16),
    }


# ---------------------------------------------------------------------------
# Forward pass (mirrors ByT5_regressor.forward)
# ---------------------------------------------------------------------------
def byt5_regressor_forward(params, input_ids, cfg=CFG):
    B, _, S = input_ids.shape
    d, nh, dh, dff, L = (cfg["d_model"], cfg["n_heads"], cfg["d_kv"],
                         cfg["d_ff"], cfg["n_layers"])
    inner = nh * dh
    qkv_lanes = params["wqkv"].shape[-1]

    # plain-JAX glue: embedding gather + relative-position bias.
    ids = input_ids[:, 0, :]                                     # (B, S)
    h = jnp.take(params["embed"], ids, axis=0)                   # (B, S, d)
    bias = compute_position_bias(params["rel_bias"], S, cfg)     # (nh, S, S)

    # Block BT batch rows per grid step (review #1); zero-pad the batch so
    # every step sees a full, well-defined block (padded rows never mix with
    # valid rows — all per-row ops — and are sliced off afterwards).
    bt = BT
    b_pad = ((B + bt - 1) // bt) * bt
    if b_pad != B:
        h = jnp.pad(h, ((0, b_pad - B), (0, 0), (0, 0)))

    def const_spec(shape):
        zeros = (0,) * len(shape)
        return pl.BlockSpec(shape, lambda i, _z=zeros: _z)

    out_padded = pl.pallas_call(
        _make_encoder_kernel(cfg, bt, S),
        grid=(b_pad // bt,),
        in_specs=[
            pl.BlockSpec((bt, S, d), lambda i: (i, 0, 0)),       # hidden block
            const_spec((nh, S, S)),                              # rel. bias
            const_spec((L, 1, d)),                               # ln_attn
            const_spec((L, d, qkv_lanes)),                       # wqkv (padded)
            const_spec((L, inner, d)),                           # wo
            const_spec((L, 1, d)),                               # ln_ff
            const_spec((L, d, 2 * dff)),                         # wi (gate|up)
            const_spec((L, dff, d)),                             # wo_ff
            const_spec((1, d)),                                  # final_ln
            const_spec((d, LANE)),                               # fc3_w padded
            const_spec((1, LANE)),                               # fc3_b padded
        ],
        out_specs=pl.BlockSpec((bt, LANE), lambda i: (i, 0)),
        out_shape=jax.ShapeDtypeStruct((b_pad, LANE), jnp.float32),
        compiler_params=pltpu.CompilerParams(
            dimension_semantics=("parallel",)),
    )(h, bias,
      params["ln_attn"], params["wqkv"], params["wo"],
      params["ln_ff"], params["wi"], params["wo_ff"],
      params["final_ln"], params["fc3_w_pad"], params["fc3_b_pad"])

    return out_padded[:B, :2]                                    # (B, 2)


# ---------------------------------------------------------------------------
if __name__ == "__main__":
    key = jax.random.PRNGKey(0)
    pkey, ikey = jax.random.split(key)
    params = init_params(pkey, CFG)
    # module forward indexes input[:, 0, :] -> input is (B, 1, S) token ids
    input_ids = jax.random.randint(ikey, (2, 1, 8), 0, CFG["vocab"],
                                   dtype=jnp.int32)
    fwd = jax.jit(byt5_regressor_forward)
    out = fwd(params, input_ids)
    jax.block_until_ready(out)
    assert out.shape == (2, 2) and out.dtype == jnp.float32
    print("KERNEL_OK")
</pallas_src>

<mosaic_0001>
module attributes {stable_mosaic.version = 11 : i64} {
  func.func @kernel(%arg0: i32, %arg1: memref<8x8x32xf32, #tpu.memory_space<vmem>>, %arg2: memref<4x8x8xf32, #tpu.memory_space<vmem>>, %arg3: memref<2x1x32xf32, #tpu.memory_space<vmem>>, %arg4: memref<2x32x128xbf16, #tpu.memory_space<vmem>>, %arg5: memref<2x32x32xbf16, #tpu.memory_space<vmem>>, %arg6: memref<2x1x32xf32, #tpu.memory_space<vmem>>, %arg7: memref<2x32x128xbf16, #tpu.memory_space<vmem>>, %arg8: memref<2x64x32xbf16, #tpu.memory_space<vmem>>, %arg9: memref<1x32xf32, #tpu.memory_space<vmem>>, %arg10: memref<32x128xbf16, #tpu.memory_space<vmem>>, %arg11: memref<1x128xf32, #tpu.memory_space<vmem>>, %arg12: memref<8x128xf32, #tpu.memory_space<vmem>>) attributes {dimension_semantics = [#tpu.dimension_semantics<parallel>], iteration_bounds = array<i64: 1>, scalar_prefetch = 0 : i64, scratch_operands = 0 : i64, tpu.core_type = #tpu.core_type<tc>, window_params = [{transform_indices = @transform_0, window_bounds = array<i64: 8, 8, 32>}, {pipeline_mode = #tpu.pipeline_mode<synchronous>, transform_indices = @transform_1, window_bounds = array<i64: 4, 8, 8>}, {pipeline_mode = #tpu.pipeline_mode<synchronous>, transform_indices = @transform_2, window_bounds = array<i64: 2, 1, 32>}, {pipeline_mode = #tpu.pipeline_mode<synchronous>, transform_indices = @transform_3, window_bounds = array<i64: 2, 32, 128>}, {pipeline_mode = #tpu.pipeline_mode<synchronous>, transform_indices = @transform_4, window_bounds = array<i64: 2, 32, 32>}, {pipeline_mode = #tpu.pipeline_mode<synchronous>, transform_indices = @transform_5, window_bounds = array<i64: 2, 1, 32>}, {pipeline_mode = #tpu.pipeline_mode<synchronous>, transform_indices = @transform_6, window_bounds = array<i64: 2, 32, 128>}, {pipeline_mode = #tpu.pipeline_mode<synchronous>, transform_indices = @transform_7, window_bounds = array<i64: 2, 64, 32>}, {pipeline_mode = #tpu.pipeline_mode<synchronous>, transform_indices = @transform_8, window_bounds = array<i64: 1, 32>}, {pipeline_mode = #tpu.pipeline_mode<synchronous>, transform_indices = @transform_9, window_bounds = array<i64: 32, 128>}, {pipeline_mode = #tpu.pipeline_mode<synchronous>, transform_indices = @transform_10, window_bounds = array<i64: 1, 128>}, {transform_indices = @transform_11, window_bounds = array<i64: 8, 128>}]} {
    %c0 = arith.constant 0 : index
    %c0_0 = arith.constant 0 : index
    %c0_1 = arith.constant 0 : index
    %0 = vector.load %arg1[%c0, %c0_0, %c0_1] : memref<8x8x32xf32, #tpu.memory_space<vmem>>, vector<8x8x32xf32>
    %1 = vector.shape_cast %0 : vector<8x8x32xf32> to vector<64x32xf32>
    %c0_2 = arith.constant 0 : index
    %c0_3 = arith.constant 0 : index
    %c0_4 = arith.constant 0 : index
    %2 = vector.load %arg3[%c0_2, %c0_3, %c0_4] : memref<2x1x32xf32, #tpu.memory_space<vmem>>, vector<1x1x32xf32>
    %3 = vector.shape_cast %2 : vector<1x1x32xf32> to vector<1x32xf32>
    %4 = arith.mulf %1, %1 : vector<64x32xf32>
    %cst = arith.constant dense<0.000000e+00> : vector<64xf32>
    %5 = vector.multi_reduction <add>, %4, %cst [1] : vector<64x32xf32> to vector<64xf32>
    %6 = vector.shape_cast %5 : vector<64xf32> to vector<64x1xf32>
    %cst_5 = arith.constant 3.200000e+01 : f32
    %7 = vector.broadcast %cst_5 : f32 to vector<64x1xf32>
    %8 = arith.divf %6, %7 : vector<64x1xf32>
    %cst_6 = arith.constant 9.99999997E-7 : f32
    %9 = vector.broadcast %cst_6 : f32 to vector<64x1xf32>
    %10 = arith.addf %8, %9 : vector<64x1xf32>
    %11 = math.rsqrt %10 : vector<64x1xf32>
    %12 = vector.broadcast %11 : vector<64x1xf32> to vector<64x32xf32>
    %13 = arith.mulf %1, %12 : vector<64x32xf32>
    %14 = vector.broadcast %3 : vector<1x32xf32> to vector<64x32xf32>
    %15 = arith.mulf %13, %14 : vector<64x32xf32>
    %16 = arith.truncf %15 : vector<64x32xf32> to vector<64x32xbf16>
    %c0_7 = arith.constant 0 : index
    %c0_8 = arith.constant 0 : index
    %c0_9 = arith.constant 0 : index
    %17 = vector.load %arg4[%c0_7, %c0_8, %c0_9] : memref<2x32x128xbf16, #tpu.memory_space<vmem>>, vector<1x32x128xbf16>
    %18 = vector.shape_cast %17 : vector<1x32x128xbf16> to vector<32x128xbf16>
    %cst_10 = arith.constant dense<0.000000e+00> : vector<64x128xf32>
    %19 = tpu.matmul %16, %18, %cst_10 {dimension_numbers = #tpu.dot_dimension_numbers<[1], [0], [0], [1], [0, 0, 1, 1], [], []>} : vector<64x32xbf16>, vector<32x128xbf16>, vector<64x128xf32> -> vector<64x128xf32>
    %20 = vector.extract_strided_slice %19 {offsets = [0, 0], sizes = [64, 32], strides = [1, 1]} : vector<64x128xf32> to vector<64x32xf32>
    %21 = arith.truncf %20 : vector<64x32xf32> to vector<64x32xbf16>
    %22 = vector.shape_cast %21 : vector<64x32xbf16> to vector<8x8x32xbf16>
    %23 = vector.extract_strided_slice %19 {offsets = [0, 32], sizes = [64, 32], strides = [1, 1]} : vector<64x128xf32> to vector<64x32xf32>
    %24 = arith.truncf %23 : vector<64x32xf32> to vector<64x32xbf16>
    %25 = vector.shape_cast %24 : vector<64x32xbf16> to vector<8x8x32xbf16>
    %26 = vector.extract_strided_slice %19 {offsets = [0, 64], sizes = [64, 32], strides = [1, 1]} : vector<64x128xf32> to vector<64x32xf32>
    %27 = arith.truncf %26 : vector<64x32xf32> to vector<64x32xbf16>
    %28 = vector.shape_cast %27 : vector<64x32xbf16> to vector<8x8x32xbf16>
    %c0_11 = arith.constant 0 : index
    %c0_12 = arith.constant 0 : index
    %c0_13 = arith.constant 0 : index
    %29 = vector.load %arg5[%c0_11, %c0_12, %c0_13] : memref<2x32x32xbf16, #tpu.memory_space<vmem>>, vector<1x32x32xbf16>
    %30 = vector.shape_cast %29 : vector<1x32x32xbf16> to vector<32x32xbf16>
    %cst_14 = arith.constant 0.000000e+00 : f32
    %31 = vector.broadcast %cst_14 : f32 to vector<64x32xf32>
    %32 = vector.extract_strided_slice %22 {offsets = [0, 0, 0], sizes = [8, 8, 8], strides = [1, 1, 1]} : vector<8x8x32xbf16> to vector<8x8x8xbf16>
    %33 = vector.extract_strided_slice %25 {offsets = [0, 0, 0], sizes = [8, 8, 8], strides = [1, 1, 1]} : vector<8x8x32xbf16> to vector<8x8x8xbf16>
    %34 = vector.extract_strided_slice %28 {offsets = [0, 0, 0], sizes = [8, 8, 8], strides = [1, 1, 1]} : vector<8x8x32xbf16> to vector<8x8x8xbf16>
    "tpu.trace_start"() <{level = 10 : i32, message = "bqd,bkd->bqk"}> : () -> ()
    %cst_15 = arith.constant dense<0.000000e+00> : vector<8x8x8xf32>
    %35 = tpu.matmul %32, %33, %cst_15 {dimension_numbers = #tpu.dot_dimension_numbers<[2], [2], [1], [1], [0, 0, 0, 1, 1, 1], [0], [0]>} : vector<8x8x8xbf16>, vector<8x8x8xbf16>, vector<8x8x8xf32> -> vector<8x8x8xf32>
    "tpu.trace_stop"() : () -> ()
    %c0_16 = arith.constant 0 : index
    %c0_17 = arith.constant 0 : index
    %c0_18 = arith.constant 0 : index
    %36 = vector.load %arg2[%c0_16, %c0_17, %c0_18] : memref<4x8x8xf32, #tpu.memory_space<vmem>>, vector<1x8x8xf32>
    %37 = vector.shape_cast %36 : vector<1x8x8xf32> to vector<8x8xf32>
    %38 = vector.shape_cast %37 : vector<8x8xf32> to vector<1x8x8xf32>
    %39 = vector.broadcast %38 : vector<1x8x8xf32> to vector<8x8x8xf32>
    %40 = arith.addf %35, %39 : vector<8x8x8xf32>
    %cst_19 = arith.constant dense<0xFF800000> : vector<8x8xf32>
    %41 = vector.multi_reduction <maximumf>, %40, %cst_19 [2] : vector<8x8x8xf32> to vector<8x8xf32>
    %42 = vector.shape_cast %41 : vector<8x8xf32> to vector<8x8x1xf32>
    %43 = vector.broadcast %42 : vector<8x8x1xf32> to vector<8x8x8xf32>
    %44 = arith.subf %40, %43 : vector<8x8x8xf32>
    %45 = math.exp %44 : vector<8x8x8xf32>
    %cst_20 = arith.constant dense<0.000000e+00> : vector<8x8xf32>
    %46 = vector.multi_reduction <add>, %45, %cst_20 [2] : vector<8x8x8xf32> to vector<8x8xf32>
    %47 = vector.shape_cast %46 : vector<8x8xf32> to vector<8x8x1xf32>
    %48 = tpu.reciprocal %47 {approx = true} : vector<8x8x1xf32> -> vector<8x8x1xf32>
    %49 = vector.broadcast %48 : vector<8x8x1xf32> to vector<8x8x8xf32>
    %50 = arith.mulf %45, %49 : vector<8x8x8xf32>
    %51 = arith.truncf %50 : vector<8x8x8xf32> to vector<8x8x8xbf16>
    "tpu.trace_start"() <{level = 10 : i32, message = "bqk,bkd->bqd"}> : () -> ()
    %cst_21 = arith.constant dense<0.000000e+00> : vector<8x8x8xf32>
    %52 = tpu.matmul %51, %34, %cst_21 {dimension_numbers = #tpu.dot_dimension_numbers<[2], [1], [1], [2], [0, 0, 0, 1, 1, 2], [0], [0]>} : vector<8x8x8xbf16>, vector<8x8x8xbf16>, vector<8x8x8xf32> -> vector<8x8x8xf32>
    "tpu.trace_stop"() : () -> ()
    %53 = vector.shape_cast %52 : vector<8x8x8xf32> to vector<64x8xf32>
    %54 = arith.truncf %53 : vector<64x8xf32> to vector<64x8xbf16>
    %55 = vector.extract_strided_slice %30 {offsets = [0, 0], sizes = [8, 32], strides = [1, 1]} : vector<32x32xbf16> to vector<8x32xbf16>
    %cst_22 = arith.constant dense<0.000000e+00> : vector<64x32xf32>
    %56 = tpu.matmul %54, %55, %cst_22 {dimension_numbers = #tpu.dot_dimension_numbers<[1], [0], [0], [1], [0, 0, 1, 1], [], []>} : vector<64x8xbf16>, vector<8x32xbf16>, vector<64x32xf32> -> vector<64x32xf32>
    %57 = arith.addf %31, %56 : vector<64x32xf32>
    %58 = vector.extract_strided_slice %22 {offsets = [0, 0, 8], sizes = [8, 8, 8], strides = [1, 1, 1]} : vector<8x8x32xbf16> to vector<8x8x8xbf16>
    %59 = vector.extract_strided_slice %25 {offsets = [0, 0, 8], sizes = [8, 8, 8], strides = [1, 1, 1]} : vector<8x8x32xbf16> to vector<8x8x8xbf16>
    %60 = vector.extract_strided_slice %28 {offsets = [0, 0, 8], sizes = [8, 8, 8], strides = [1, 1, 1]} : vector<8x8x32xbf16> to vector<8x8x8xbf16>
    "tpu.trace_start"() <{level = 10 : i32, message = "bqd,bkd->bqk"}> : () -> ()
    %cst_23 = arith.constant dense<0.000000e+00> : vector<8x8x8xf32>
    %61 = tpu.matmul %58, %59, %cst_23 {dimension_numbers = #tpu.dot_dimension_numbers<[2], [2], [1], [1], [0, 0, 0, 1, 1, 1], [0], [0]>} : vector<8x8x8xbf16>, vector<8x8x8xbf16>, vector<8x8x8xf32> -> vector<8x8x8xf32>
    "tpu.trace_stop"() : () -> ()
    %c1 = arith.constant 1 : index
    %c0_24 = arith.constant 0 : index
    %c0_25 = arith.constant 0 : index
    %62 = vector.load %arg2[%c1, %c0_24, %c0_25] : memref<4x8x8xf32, #tpu.memory_space<vmem>>, vector<1x8x8xf32>
    %63 = vector.shape_cast %62 : vector<1x8x8xf32> to vector<8x8xf32>
    %64 = vector.shape_cast %63 : vector<8x8xf32> to vector<1x8x8xf32>
    %65 = vector.broadcast %64 : vector<1x8x8xf32> to vector<8x8x8xf32>
    %66 = arith.addf %61, %65 : vector<8x8x8xf32>
    %cst_26 = arith.constant dense<0xFF800000> : vector<8x8xf32>
    %67 = vector.multi_reduction <maximumf>, %66, %cst_26 [2] : vector<8x8x8xf32> to vector<8x8xf32>
    %68 = vector.shape_cast %67 : vector<8x8xf32> to vector<8x8x1xf32>
    %69 = vector.broadcast %68 : vector<8x8x1xf32> to vector<8x8x8xf32>
    %70 = arith.subf %66, %69 : vector<8x8x8xf32>
    %71 = math.exp %70 : vector<8x8x8xf32>
    %cst_27 = arith.constant dense<0.000000e+00> : vector<8x8xf32>
    %72 = vector.multi_reduction <add>, %71, %cst_27 [2] : vector<8x8x8xf32> to vector<8x8xf32>
    %73 = vector.shape_cast %72 : vector<8x8xf32> to vector<8x8x1xf32>
    %74 = tpu.reciprocal %73 {approx = true} : vector<8x8x1xf32> -> vector<8x8x1xf32>
    %75 = vector.broadcast %74 : vector<8x8x1xf32> to vector<8x8x8xf32>
    %76 = arith.mulf %71, %75 : vector<8x8x8xf32>
    %77 = arith.truncf %76 : vector<8x8x8xf32> to vector<8x8x8xbf16>
    "tpu.trace_start"() <{level = 10 : i32, message = "bqk,bkd->bqd"}> : () -> ()
    %cst_28 = arith.constant dense<0.000000e+00> : vector<8x8x8xf32>
    %78 = tpu.matmul %77, %60, %cst_28 {dimension_numbers = #tpu.dot_dimension_numbers<[2], [1], [1], [2], [0, 0, 0, 1, 1, 2], [0], [0]>} : vector<8x8x8xbf16>, vector<8x8x8xbf16>, vector<8x8x8xf32> -> vector<8x8x8xf32>
    "tpu.trace_stop"() : () -> ()
    %79 = vector.shape_cast %78 : vector<8x8x8xf32> to vector<64x8xf32>
    %80 = arith.truncf %79 : vector<64x8xf32> to vector<64x8xbf16>
    %81 = vector.extract_strided_slice %30 {offsets = [8, 0], sizes = [8, 32], strides = [1, 1]} : vector<32x32xbf16> to vector<8x32xbf16>
    %cst_29 = arith.constant dense<0.000000e+00> : vector<64x32xf32>
    %82 = tpu.matmul %80, %81, %cst_29 {dimension_numbers = #tpu.dot_dimension_numbers<[1], [0], [0], [1], [0, 0, 1, 1], [], []>} : vector<64x8xbf16>, vector<8x32xbf16>, vector<64x32xf32> -> vector<64x32xf32>
    %83 = arith.addf %57, %82 : vector<64x32xf32>
    %84 = vector.extract_strided_slice %22 {offsets = [0, 0, 16], sizes = [8, 8, 8], strides = [1, 1, 1]} : vector<8x8x32xbf16> to vector<8x8x8xbf16>
    %85 = vector.extract_strided_slice %25 {offsets = [0, 0, 16], sizes = [8, 8, 8], strides = [1, 1, 1]} : vector<8x8x32xbf16> to vector<8x8x8xbf16>
    %86 = vector.extract_strided_slice %28 {offsets = [0, 0, 16], sizes = [8, 8, 8], strides = [1, 1, 1]} : vector<8x8x32xbf16> to vector<8x8x8xbf16>
    "tpu.trace_start"() <{level = 10 : i32, message = "bqd,bkd->bqk"}> : () -> ()
    %cst_30 = arith.constant dense<0.000000e+00> : vector<8x8x8xf32>
    %87 = tpu.matmul %84, %85, %cst_30 {dimension_numbers = #tpu.dot_dimension_numbers<[2], [2], [1], [1], [0, 0, 0, 1, 1, 1], [0], [0]>} : vector<8x8x8xbf16>, vector<8x8x8xbf16>, vector<8x8x8xf32> -> vector<8x8x8xf32>
    "tpu.trace_stop"() : () -> ()
    %c2 = arith.constant 2 : index
    %c0_31 = arith.constant 0 : index
    %c0_32 = arith.constant 0 : index
    %88 = vector.load %arg2[%c2, %c0_31, %c0_32] : memref<4x8x8xf32, #tpu.memory_space<vmem>>, vector<1x8x8xf32>
    %89 = vector.shape_cast %88 : vector<1x8x8xf32> to vector<8x8xf32>
    %90 = vector.shape_cast %89 : vector<8x8xf32> to vector<1x8x8xf32>
    %91 = vector.broadcast %90 : vector<1x8x8xf32> to vector<8x8x8xf32>
    %92 = arith.addf %87, %91 : vector<8x8x8xf32>
    %cst_33 = arith.constant dense<0xFF800000> : vector<8x8xf32>
    %93 = vector.multi_reduction <maximumf>, %92, %cst_33 [2] : vector<8x8x8xf32> to vector<8x8xf32>
    %94 = vector.shape_cast %93 : vector<8x8xf32> to vector<8x8x1xf32>
    %95 = vector.broadcast %94 : vector<8x8x1xf32> to vector<8x8x8xf32>
    %96 = arith.subf %92, %95 : vector<8x8x8xf32>
    %97 = math.exp %96 : vector<8x8x8xf32>
    %cst_34 = arith.constant dense<0.000000e+00> : vector<8x8xf32>
    %98 = vector.multi_reduction <add>, %97, %cst_34 [2] : vector<8x8x8xf32> to vector<8x8xf32>
    %99 = vector.shape_cast %98 : vector<8x8xf32> to vector<8x8x1xf32>
    %100 = tpu.reciprocal %99 {approx = true} : vector<8x8x1xf32> -> vector<8x8x1xf32>
    %101 = vector.broadcast %100 : vector<8x8x1xf32> to vector<8x8x8xf32>
    %102 = arith.mulf %97, %101 : vector<8x8x8xf32>
    %103 = arith.truncf %102 : vector<8x8x8xf32> to vector<8x8x8xbf16>
    "tpu.trace_start"() <{level = 10 : i32, message = "bqk,bkd->bqd"}> : () -> ()
    %cst_35 = arith.constant dense<0.000000e+00> : vector<8x8x8xf32>
    %104 = tpu.matmul %103, %86, %cst_35 {dimension_numbers = #tpu.dot_dimension_numbers<[2], [1], [1], [2], [0, 0, 0, 1, 1, 2], [0], [0]>} : vector<8x8x8xbf16>, vector<8x8x8xbf16>, vector<8x8x8xf32> -> vector<8x8x8xf32>
    "tpu.trace_stop"() : () -> ()
    %105 = vector.shape_cast %104 : vector<8x8x8xf32> to vector<64x8xf32>
    %106 = arith.truncf %105 : vector<64x8xf32> to vector<64x8xbf16>
    %107 = vector.extract_strided_slice %30 {offsets = [16, 0], sizes = [8, 32], strides = [1, 1]} : vector<32x32xbf16> to vector<8x32xbf16>
    %cst_36 = arith.constant dense<0.000000e+00> : vector<64x32xf32>
    %108 = tpu.matmul %106, %107, %cst_36 {dimension_numbers = #tpu.dot_dimension_numbers<[1], [0], [0], [1], [0, 0, 1, 1], [], []>} : vector<64x8xbf16>, vector<8x32xbf16>, vector<64x32xf32> -> vector<64x32xf32>
    %109 = arith.addf %83, %108 : vector<64x32xf32>
    %110 = vector.extract_strided_slice %22 {offsets = [0, 0, 24], sizes = [8, 8, 8], strides = [1, 1, 1]} : vector<8x8x32xbf16> to vector<8x8x8xbf16>
    %111 = vector.extract_strided_slice %25 {offsets = [0, 0, 24], sizes = [8, 8, 8], strides = [1, 1, 1]} : vector<8x8x32xbf16> to vector<8x8x8xbf16>
    %112 = vector.extract_strided_slice %28 {offsets = [0, 0, 24], sizes = [8, 8, 8], strides = [1, 1, 1]} : vector<8x8x32xbf16> to vector<8x8x8xbf16>
    "tpu.trace_start"() <{level = 10 : i32, message = "bqd,bkd->bqk"}> : () -> ()
    %cst_37 = arith.constant dense<0.000000e+00> : vector<8x8x8xf32>
    %113 = tpu.matmul %110, %111, %cst_37 {dimension_numbers = #tpu.dot_dimension_numbers<[2], [2], [1], [1], [0, 0, 0, 1, 1, 1], [0], [0]>} : vector<8x8x8xbf16>, vector<8x8x8xbf16>, vector<8x8x8xf32> -> vector<8x8x8xf32>
    "tpu.trace_stop"() : () -> ()
    %c3 = arith.constant 3 : index
    %c0_38 = arith.constant 0 : index
    %c0_39 = arith.constant 0 : index
    %114 = vector.load %arg2[%c3, %c0_38, %c0_39] : memref<4x8x8xf32, #tpu.memory_space<vmem>>, vector<1x8x8xf32>
    %115 = vector.shape_cast %114 : vector<1x8x8xf32> to vector<8x8xf32>
    %116 = vector.shape_cast %115 : vector<8x8xf32> to vector<1x8x8xf32>
    %117 = vector.broadcast %116 : vector<1x8x8xf32> to vector<8x8x8xf32>
    %118 = arith.addf %113, %117 : vector<8x8x8xf32>
    %cst_40 = arith.constant dense<0xFF800000> : vector<8x8xf32>
    %119 = vector.multi_reduction <maximumf>, %118, %cst_40 [2] : vector<8x8x8xf32> to vector<8x8xf32>
    %120 = vector.shape_cast %119 : vector<8x8xf32> to vector<8x8x1xf32>
    %121 = vector.broadcast %120 : vector<8x8x1xf32> to vector<8x8x8xf32>
    %122 = arith.subf %118, %121 : vector<8x8x8xf32>
    %123 = math.exp %122 : vector<8x8x8xf32>
    %cst_41 = arith.constant dense<0.000000e+00> : vector<8x8xf32>
    %124 = vector.multi_reduction <add>, %123, %cst_41 [2] : vector<8x8x8xf32> to vector<8x8xf32>
    %125 = vector.shape_cast %124 : vector<8x8xf32> to vector<8x8x1xf32>
    %126 = tpu.reciprocal %125 {approx = true} : vector<8x8x1xf32> -> vector<8x8x1xf32>
    %127 = vector.broadcast %126 : vector<8x8x1xf32> to vector<8x8x8xf32>
    %128 = arith.mulf %123, %127 : vector<8x8x8xf32>
    %129 = arith.truncf %128 : vector<8x8x8xf32> to vector<8x8x8xbf16>
    "tpu.trace_start"() <{level = 10 : i32, message = "bqk,bkd->bqd"}> : () -> ()
    %cst_42 = arith.constant dense<0.000000e+00> : vector<8x8x8xf32>
    %130 = tpu.matmul %129, %112, %cst_42 {dimension_numbers = #tpu.dot_dimension_numbers<[2], [1], [1], [2], [0, 0, 0, 1, 1, 2], [0], [0]>} : vector<8x8x8xbf16>, vector<8x8x8xbf16>, vector<8x8x8xf32> -> vector<8x8x8xf32>
    "tpu.trace_stop"() : () -> ()
    %131 = vector.shape_cast %130 : vector<8x8x8xf32> to vector<64x8xf32>
    %132 = arith.truncf %131 : vector<64x8xf32> to vector<64x8xbf16>
    %133 = vector.extract_strided_slice %30 {offsets = [24, 0], sizes = [8, 32], strides = [1, 1]} : vector<32x32xbf16> to vector<8x32xbf16>
    %cst_43 = arith.constant dense<0.000000e+00> : vector<64x32xf32>
    %134 = tpu.matmul %132, %133, %cst_43 {dimension_numbers = #tpu.dot_dimension_numbers<[1], [0], [0], [1], [0, 0, 1, 1], [], []>} : vector<64x8xbf16>, vector<8x32xbf16>, vector<64x32xf32> -> vector<64x32xf32>
    %135 = arith.addf %109, %134 : vector<64x32xf32>
    %136 = arith.addf %1, %135 : vector<64x32xf32>
    %c0_44 = arith.constant 0 : index
    %c0_45 = arith.constant 0 : index
    %c0_46 = arith.constant 0 : index
    %137 = vector.load %arg6[%c0_44, %c0_45, %c0_46] : memref<2x1x32xf32, #tpu.memory_space<vmem>>, vector<1x1x32xf32>
    %138 = vector.shape_cast %137 : vector<1x1x32xf32> to vector<1x32xf32>
    %139 = arith.mulf %136, %136 : vector<64x32xf32>
    %cst_47 = arith.constant dense<0.000000e+00> : vector<64xf32>
    %140 = vector.multi_reduction <add>, %139, %cst_47 [1] : vector<64x32xf32> to vector<64xf32>
    %141 = vector.shape_cast %140 : vector<64xf32> to vector<64x1xf32>
    %cst_48 = arith.constant 3.200000e+01 : f32
    %142 = vector.broadcast %cst_48 : f32 to vector<64x1xf32>
    %143 = arith.divf %141, %142 : vector<64x1xf32>
    %cst_49 = arith.constant 9.99999997E-7 : f32
    %144 = vector.broadcast %cst_49 : f32 to vector<64x1xf32>
    %145 = arith.addf %143, %144 : vector<64x1xf32>
    %146 = math.rsqrt %145 : vector<64x1xf32>
    %147 = vector.broadcast %146 : vector<64x1xf32> to vector<64x32xf32>
    %148 = arith.mulf %136, %147 : vector<64x32xf32>
    %149 = vector.broadcast %138 : vector<1x32xf32> to vector<64x32xf32>
    %150 = arith.mulf %148, %149 : vector<64x32xf32>
    %151 = arith.truncf %150 : vector<64x32xf32> to vector<64x32xbf16>
    %c0_50 = arith.constant 0 : index
    %c0_51 = arith.constant 0 : index
    %c0_52 = arith.constant 0 : index
    %152 = vector.load %arg7[%c0_50, %c0_51, %c0_52] : memref<2x32x128xbf16, #tpu.memory_space<vmem>>, vector<1x32x128xbf16>
    %153 = vector.shape_cast %152 : vector<1x32x128xbf16> to vector<32x128xbf16>
    %cst_53 = arith.constant dense<0.000000e+00> : vector<64x128xf32>
    %154 = tpu.matmul %151, %153, %cst_53 {dimension_numbers = #tpu.dot_dimension_numbers<[1], [0], [0], [1], [0, 0, 1, 1], [], []>} : vector<64x32xbf16>, vector<32x128xbf16>, vector<64x128xf32> -> vector<64x128xf32>
    %155 = vector.extract_strided_slice %154 {offsets = [0, 0], sizes = [64, 64], strides = [1, 1]} : vector<64x128xf32> to vector<64x64xf32>
    %cst_54 = arith.constant 5.000000e-01 : f32
    %156 = vector.broadcast %cst_54 : f32 to vector<64x64xf32>
    %157 = arith.mulf %156, %155 : vector<64x64xf32>
    %cst_55 = arith.constant 4.471500e-02 : f32
    %158 = vector.broadcast %cst_55 : f32 to vector<64x64xf32>
    %159 = arith.mulf %158, %155 : vector<64x64xf32>
    %160 = arith.mulf %159, %155 : vector<64x64xf32>
    %161 = arith.mulf %160, %155 : vector<64x64xf32>
    %162 = arith.addf %155, %161 : vector<64x64xf32>
    %cst_56 = arith.constant 0.797884583 : f32
    %163 = vector.broadcast %cst_56 : f32 to vector<64x64xf32>
    %164 = arith.mulf %163, %162 : vector<64x64xf32>
    %165 = math.tanh %164 : vector<64x64xf32>
    %cst_57 = arith.constant 1.000000e+00 : f32
    %166 = vector.broadcast %cst_57 : f32 to vector<64x64xf32>
    %167 = arith.addf %166, %165 : vector<64x64xf32>
    %168 = arith.mulf %157, %167 : vector<64x64xf32>
    %169 = vector.extract_strided_slice %154 {offsets = [0, 64], sizes = [64, 64], strides = [1, 1]} : vector<64x128xf32> to vector<64x64xf32>
    %170 = arith.mulf %168, %169 : vector<64x64xf32>
    %171 = arith.truncf %170 : vector<64x64xf32> to vector<64x64xbf16>
    %c0_58 = arith.constant 0 : index
    %c0_59 = arith.constant 0 : index
    %c0_60 = arith.constant 0 : index
    %172 = vector.load %arg8[%c0_58, %c0_59, %c0_60] : memref<2x64x32xbf16, #tpu.memory_space<vmem>>, vector<1x64x32xbf16>
    %173 = vector.shape_cast %172 : vector<1x64x32xbf16> to vector<64x32xbf16>
    %cst_61 = arith.constant dense<0.000000e+00> : vector<64x32xf32>
    %174 = tpu.matmul %171, %173, %cst_61 {dimension_numbers = #tpu.dot_dimension_numbers<[1], [0], [0], [1], [0, 0, 1, 1], [], []>} : vector<64x64xbf16>, vector<64x32xbf16>, vector<64x32xf32> -> vector<64x32xf32>
    %175 = arith.addf %136, %174 : vector<64x32xf32>
    %c1_62 = arith.constant 1 : index
    %c0_63 = arith.constant 0 : index
    %c0_64 = arith.constant 0 : index
    %176 = vector.load %arg3[%c1_62, %c0_63, %c0_64] : memref<2x1x32xf32, #tpu.memory_space<vmem>>, vector<1x1x32xf32>
    %177 = vector.shape_cast %176 : vector<1x1x32xf32> to vector<1x32xf32>
    %178 = arith.mulf %175, %175 : vector<64x32xf32>
    %cst_65 = arith.constant dense<0.000000e+00> : vector<64xf32>
    %179 = vector.multi_reduction <add>, %178, %cst_65 [1] : vector<64x32xf32> to vector<64xf32>
    %180 = vector.shape_cast %179 : vector<64xf32> to vector<64x1xf32>
    %cst_66 = arith.constant 3.200000e+01 : f32
    %181 = vector.broadcast %cst_66 : f32 to vector<64x1xf32>
    %182 = arith.divf %180, %181 : vector<64x1xf32>
    %cst_67 = arith.constant 9.99999997E-7 : f32
    %183 = vector.broadcast %cst_67 : f32 to vector<64x1xf32>
    %184 = arith.addf %182, %183 : vector<64x1xf32>
    %185 = math.rsqrt %184 : vector<64x1xf32>
    %186 = vector.broadcast %185 : vector<64x1xf32> to vector<64x32xf32>
    %187 = arith.mulf %175, %186 : vector<64x32xf32>
    %188 = vector.broadcast %177 : vector<1x32xf32> to vector<64x32xf32>
    %189 = arith.mulf %187, %188 : vector<64x32xf32>
    %190 = arith.truncf %189 : vector<64x32xf32> to vector<64x32xbf16>
    %c1_68 = arith.constant 1 : index
    %c0_69 = arith.constant 0 : index
    %c0_70 = arith.constant 0 : index
    %191 = vector.load %arg4[%c1_68, %c0_69, %c0_70] : memref<2x32x128xbf16, #tpu.memory_space<vmem>>, vector<1x32x128xbf16>
    %192 = vector.shape_cast %191 : vector<1x32x128xbf16> to vector<32x128xbf16>
    %cst_71 = arith.constant dense<0.000000e+00> : vector<64x128xf32>
    %193 = tpu.matmul %190, %192, %cst_71 {dimension_numbers = #tpu.dot_dimension_numbers<[1], [0], [0], [1], [0, 0, 1, 1], [], []>} : vector<64x32xbf16>, vector<32x128xbf16>, vector<64x128xf32> -> vector<64x128xf32>
    %194 = vector.extract_strided_slice %193 {offsets = [0, 0], sizes = [64, 32], strides = [1, 1]} : vector<64x128xf32> to vector<64x32xf32>
    %195 = arith.truncf %194 : vector<64x32xf32> to vector<64x32xbf16>
    %196 = vector.shape_cast %195 : vector<64x32xbf16> to vector<8x8x32xbf16>
    %197 = vector.extract_strided_slice %193 {offsets = [0, 32], sizes = [64, 32], strides = [1, 1]} : vector<64x128xf32> to vector<64x32xf32>
    %198 = arith.truncf %197 : vector<64x32xf32> to vector<64x32xbf16>
    %199 = vector.shape_cast %198 : vector<64x32xbf16> to vector<8x8x32xbf16>
    %200 = vector.extract_strided_slice %193 {offsets = [0, 64], sizes = [64, 32], strides = [1, 1]} : vector<64x128xf32> to vector<64x32xf32>
    %201 = arith.truncf %200 : vector<64x32xf32> to vector<64x32xbf16>
    %202 = vector.shape_cast %201 : vector<64x32xbf16> to vector<8x8x32xbf16>
    %c1_72 = arith.constant 1 : index
    %c0_73 = arith.constant 0 : index
    %c0_74 = arith.constant 0 : index
    %203 = vector.load %arg5[%c1_72, %c0_73, %c0_74] : memref<2x32x32xbf16, #tpu.memory_space<vmem>>, vector<1x32x32xbf16>
    %204 = vector.shape_cast %203 : vector<1x32x32xbf16> to vector<32x32xbf16>
    %cst_75 = arith.constant 0.000000e+00 : f32
    %205 = vector.broadcast %cst_75 : f32 to vector<64x32xf32>
    %206 = vector.extract_strided_slice %196 {offsets = [0, 0, 0], sizes = [8, 8, 8], strides = [1, 1, 1]} : vector<8x8x32xbf16> to vector<8x8x8xbf16>
    %207 = vector.extract_strided_slice %199 {offsets = [0, 0, 0], sizes = [8, 8, 8], strides = [1, 1, 1]} : vector<8x8x32xbf16> to vector<8x8x8xbf16>
    %208 = vector.extract_strided_slice %202 {offsets = [0, 0, 0], sizes = [8, 8, 8], strides = [1, 1, 1]} : vector<8x8x32xbf16> to vector<8x8x8xbf16>
    "tpu.trace_start"() <{level = 10 : i32, message = "bqd,bkd->bqk"}> : () -> ()
    %cst_76 = arith.constant dense<0.000000e+00> : vector<8x8x8xf32>
    %209 = tpu.matmul %206, %207, %cst_76 {dimension_numbers = #tpu.dot_dimension_numbers<[2], [2], [1], [1], [0, 0, 0, 1, 1, 1], [0], [0]>} : vector<8x8x8xbf16>, vector<8x8x8xbf16>, vector<8x8x8xf32> -> vector<8x8x8xf32>
    "tpu.trace_stop"() : () -> ()
    %c0_77 = arith.constant 0 : index
    %c0_78 = arith.constant 0 : index
    %c0_79 = arith.constant 0 : index
    %210 = vector.load %arg2[%c0_77, %c0_78, %c0_79] : memref<4x8x8xf32, #tpu.memory_space<vmem>>, vector<1x8x8xf32>
    %211 = vector.shape_cast %210 : vector<1x8x8xf32> to vector<8x8xf32>
    %212 = vector.shape_cast %211 : vector<8x8xf32> to vector<1x8x8xf32>
    %213 = vector.broadcast %212 : vector<1x8x8xf32> to vector<8x8x8xf32>
    %214 = arith.addf %209, %213 : vector<8x8x8xf32>
    %cst_80 = arith.constant dense<0xFF800000> : vector<8x8xf32>
    %215 = vector.multi_reduction <maximumf>, %214, %cst_80 [2] : vector<8x8x8xf32> to vector<8x8xf32>
    %216 = vector.shape_cast %215 : vector<8x8xf32> to vector<8x8x1xf32>
    %217 = vector.broadcast %216 : vector<8x8x1xf32> to vector<8x8x8xf32>
    %218 = arith.subf %214, %217 : vector<8x8x8xf32>
    %219 = math.exp %218 : vector<8x8x8xf32>
    %cst_81 = arith.constant dense<0.000000e+00> : vector<8x8xf32>
    %220 = vector.multi_reduction <add>, %219, %cst_81 [2] : vector<8x8x8xf32> to vector<8x8xf32>
    %221 = vector.shape_cast %220 : vector<8x8xf32> to vector<8x8x1xf32>
    %222 = tpu.reciprocal %221 {approx = true} : vector<8x8x1xf32> -> vector<8x8x1xf32>
    %223 = vector.broadcast %222 : vector<8x8x1xf32> to vector<8x8x8xf32>
    %224 = arith.mulf %219, %223 : vector<8x8x8xf32>
    %225 = arith.truncf %224 : vector<8x8x8xf32> to vector<8x8x8xbf16>
    "tpu.trace_start"() <{level = 10 : i32, message = "bqk,bkd->bqd"}> : () -> ()
    %cst_82 = arith.constant dense<0.000000e+00> : vector<8x8x8xf32>
    %226 = tpu.matmul %225, %208, %cst_82 {dimension_numbers = #tpu.dot_dimension_numbers<[2], [1], [1], [2], [0, 0, 0, 1, 1, 2], [0], [0]>} : vector<8x8x8xbf16>, vector<8x8x8xbf16>, vector<8x8x8xf32> -> vector<8x8x8xf32>
    "tpu.trace_stop"() : () -> ()
    %227 = vector.shape_cast %226 : vector<8x8x8xf32> to vector<64x8xf32>
    %228 = arith.truncf %227 : vector<64x8xf32> to vector<64x8xbf16>
    %229 = vector.extract_strided_slice %204 {offsets = [0, 0], sizes = [8, 32], strides = [1, 1]} : vector<32x32xbf16> to vector<8x32xbf16>
    %cst_83 = arith.constant dense<0.000000e+00> : vector<64x32xf32>
    %230 = tpu.matmul %228, %229, %cst_83 {dimension_numbers = #tpu.dot_dimension_numbers<[1], [0], [0], [1], [0, 0, 1, 1], [], []>} : vector<64x8xbf16>, vector<8x32xbf16>, vector<64x32xf32> -> vector<64x32xf32>
    %231 = arith.addf %205, %230 : vector<64x32xf32>
    %232 = vector.extract_strided_slice %196 {offsets = [0, 0, 8], sizes = [8, 8, 8], strides = [1, 1, 1]} : vector<8x8x32xbf16> to vector<8x8x8xbf16>
    %233 = vector.extract_strided_slice %199 {offsets = [0, 0, 8], sizes = [8, 8, 8], strides = [1, 1, 1]} : vector<8x8x32xbf16> to vector<8x8x8xbf16>
    %234 = vector.extract_strided_slice %202 {offsets = [0, 0, 8], sizes = [8, 8, 8], strides = [1, 1, 1]} : vector<8x8x32xbf16> to vector<8x8x8xbf16>
    "tpu.trace_start"() <{level = 10 : i32, message = "bqd,bkd->bqk"}> : () -> ()
    %cst_84 = arith.constant dense<0.000000e+00> : vector<8x8x8xf32>
    %235 = tpu.matmul %232, %233, %cst_84 {dimension_numbers = #tpu.dot_dimension_numbers<[2], [2], [1], [1], [0, 0, 0, 1, 1, 1], [0], [0]>} : vector<8x8x8xbf16>, vector<8x8x8xbf16>, vector<8x8x8xf32> -> vector<8x8x8xf32>
    "tpu.trace_stop"() : () -> ()
    %c1_85 = arith.constant 1 : index
    %c0_86 = arith.constant 0 : index
    %c0_87 = arith.constant 0 : index
    %236 = vector.load %arg2[%c1_85, %c0_86, %c0_87] : memref<4x8x8xf32, #tpu.memory_space<vmem>>, vector<1x8x8xf32>
    %237 = vector.shape_cast %236 : vector<1x8x8xf32> to vector<8x8xf32>
    %238 = vector.shape_cast %237 : vector<8x8xf32> to vector<1x8x8xf32>
    %239 = vector.broadcast %238 : vector<1x8x8xf32> to vector<8x8x8xf32>
    %240 = arith.addf %235, %239 : vector<8x8x8xf32>
    %cst_88 = arith.constant dense<0xFF800000> : vector<8x8xf32>
    %241 = vector.multi_reduction <maximumf>, %240, %cst_88 [2] : vector<8x8x8xf32> to vector<8x8xf32>
    %242 = vector.shape_cast %241 : vector<8x8xf32> to vector<8x8x1xf32>
    %243 = vector.broadcast %242 : vector<8x8x1xf32> to vector<8x8x8xf32>
    %244 = arith.subf %240, %243 : vector<8x8x8xf32>
    %245 = math.exp %244 : vector<8x8x8xf32>
    %cst_89 = arith.constant dense<0.000000e+00> : vector<8x8xf32>
    %246 = vector.multi_reduction <add>, %245, %cst_89 [2] : vector<8x8x8xf32> to vector<8x8xf32>
    %247 = vector.shape_cast %246 : vector<8x8xf32> to vector<8x8x1xf32>
    %248 = tpu.reciprocal %247 {approx = true} : vector<8x8x1xf32> -> vector<8x8x1xf32>
    %249 = vector.broadcast %248 : vector<8x8x1xf32> to vector<8x8x8xf32>
    %250 = arith.mulf %245, %249 : vector<8x8x8xf32>
    %251 = arith.truncf %250 : vector<8x8x8xf32> to vector<8x8x8xbf16>
    "tpu.trace_start"() <{level = 10 : i32, message = "bqk,bkd->bqd"}> : () -> ()
    %cst_90 = arith.constant dense<0.000000e+00> : vector<8x8x8xf32>
    %252 = tpu.matmul %251, %234, %cst_90 {dimension_numbers = #tpu.dot_dimension_numbers<[2], [1], [1], [2], [0, 0, 0, 1, 1, 2], [0], [0]>} : vector<8x8x8xbf16>, vector<8x8x8xbf16>, vector<8x8x8xf32> -> vector<8x8x8xf32>
    "tpu.trace_stop"() : () -> ()
    %253 = vector.shape_cast %252 : vector<8x8x8xf32> to vector<64x8xf32>
    %254 = arith.truncf %253 : vector<64x8xf32> to vector<64x8xbf16>
    %255 = vector.extract_strided_slice %204 {offsets = [8, 0], sizes = [8, 32], strides = [1, 1]} : vector<32x32xbf16> to vector<8x32xbf16>
    %cst_91 = arith.constant dense<0.000000e+00> : vector<64x32xf32>
    %256 = tpu.matmul %254, %255, %cst_91 {dimension_numbers = #tpu.dot_dimension_numbers<[1], [0], [0], [1], [0, 0, 1, 1], [], []>} : vector<64x8xbf16>, vector<8x32xbf16>, vector<64x32xf32> -> vector<64x32xf32>
    %257 = arith.addf %231, %256 : vector<64x32xf32>
    %258 = vector.extract_strided_slice %196 {offsets = [0, 0, 16], sizes = [8, 8, 8], strides = [1, 1, 1]} : vector<8x8x32xbf16> to vector<8x8x8xbf16>
    %259 = vector.extract_strided_slice %199 {offsets = [0, 0, 16], sizes = [8, 8, 8], strides = [1, 1, 1]} : vector<8x8x32xbf16> to vector<8x8x8xbf16>
    %260 = vector.extract_strided_slice %202 {offsets = [0, 0, 16], sizes = [8, 8, 8], strides = [1, 1, 1]} : vector<8x8x32xbf16> to vector<8x8x8xbf16>
    "tpu.trace_start"() <{level = 10 : i32, message = "bqd,bkd->bqk"}> : () -> ()
    %cst_92 = arith.constant dense<0.000000e+00> : vector<8x8x8xf32>
    %261 = tpu.matmul %258, %259, %cst_92 {dimension_numbers = #tpu.dot_dimension_numbers<[2], [2], [1], [1], [0, 0, 0, 1, 1, 1], [0], [0]>} : vector<8x8x8xbf16>, vector<8x8x8xbf16>, vector<8x8x8xf32> -> vector<8x8x8xf32>
    "tpu.trace_stop"() : () -> ()
    %c2_93 = arith.constant 2 : index
    %c0_94 = arith.constant 0 : index
    %c0_95 = arith.constant 0 : index
    %262 = vector.load %arg2[%c2_93, %c0_94, %c0_95] : memref<4x8x8xf32, #tpu.memory_space<vmem>>, vector<1x8x8xf32>
    %263 = vector.shape_cast %262 : vector<1x8x8xf32> to vector<8x8xf32>
    %264 = vector.shape_cast %263 : vector<8x8xf32> to vector<1x8x8xf32>
    %265 = vector.broadcast %264 : vector<1x8x8xf32> to vector<8x8x8xf32>
    %266 = arith.addf %261, %265 : vector<8x8x8xf32>
    %cst_96 = arith.constant dense<0xFF800000> : vector<8x8xf32>
    %267 = vector.multi_reduction <maximumf>, %266, %cst_96 [2] : vector<8x8x8xf32> to vector<8x8xf32>
    %268 = vector.shape_cast %267 : vector<8x8xf32> to vector<8x8x1xf32>
    %269 = vector.broadcast %268 : vector<8x8x1xf32> to vector<8x8x8xf32>
    %270 = arith.subf %266, %269 : vector<8x8x8xf32>
    %271 = math.exp %270 : vector<8x8x8xf32>
    %cst_97 = arith.constant dense<0.000000e+00> : vector<8x8xf32>
    %272 = vector.multi_reduction <add>, %271, %cst_97 [2] : vector<8x8x8xf32> to vector<8x8xf32>
    %273 = vector.shape_cast %272 : vector<8x8xf32> to vector<8x8x1xf32>
    %274 = tpu.reciprocal %273 {approx = true} : vector<8x8x1xf32> -> vector<8x8x1xf32>
    %275 = vector.broadcast %274 : vector<8x8x1xf32> to vector<8x8x8xf32>
    %276 = arith.mulf %271, %275 : vector<8x8x8xf32>
    %277 = arith.truncf %276 : vector<8x8x8xf32> to vector<8x8x8xbf16>
    "tpu.trace_start"() <{level = 10 : i32, message = "bqk,bkd->bqd"}> : () -> ()
    %cst_98 = arith.constant dense<0.000000e+00> : vector<8x8x8xf32>
    %278 = tpu.matmul %277, %260, %cst_98 {dimension_numbers = #tpu.dot_dimension_numbers<[2], [1], [1], [2], [0, 0, 0, 1, 1, 2], [0], [0]>} : vector<8x8x8xbf16>, vector<8x8x8xbf16>, vector<8x8x8xf32> -> vector<8x8x8xf32>
    "tpu.trace_stop"() : () -> ()
    %279 = vector.shape_cast %278 : vector<8x8x8xf32> to vector<64x8xf32>
    %280 = arith.truncf %279 : vector<64x8xf32> to vector<64x8xbf16>
    %281 = vector.extract_strided_slice %204 {offsets = [16, 0], sizes = [8, 32], strides = [1, 1]} : vector<32x32xbf16> to vector<8x32xbf16>
    %cst_99 = arith.constant dense<0.000000e+00> : vector<64x32xf32>
    %282 = tpu.matmul %280, %281, %cst_99 {dimension_numbers = #tpu.dot_dimension_numbers<[1], [0], [0], [1], [0, 0, 1, 1], [], []>} : vector<64x8xbf16>, vector<8x32xbf16>, vector<64x32xf32> -> vector<64x32xf32>
    %283 = arith.addf %257, %282 : vector<64x32xf32>
    %284 = vector.extract_strided_slice %196 {offsets = [0, 0, 24], sizes = [8, 8, 8], strides = [1, 1, 1]} : vector<8x8x32xbf16> to vector<8x8x8xbf16>
    %285 = vector.extract_strided_slice %199 {offsets = [0, 0, 24], sizes = [8, 8, 8], strides = [1, 1, 1]} : vector<8x8x32xbf16> to vector<8x8x8xbf16>
    %286 = vector.extract_strided_slice %202 {offsets = [0, 0, 24], sizes = [8, 8, 8], strides = [1, 1, 1]} : vector<8x8x32xbf16> to vector<8x8x8xbf16>
    "tpu.trace_start"() <{level = 10 : i32, message = "bqd,bkd->bqk"}> : () -> ()
    %cst_100 = arith.constant dense<0.000000e+00> : vector<8x8x8xf32>
    %287 = tpu.matmul %284, %285, %cst_100 {dimension_numbers = #tpu.dot_dimension_numbers<[2], [2], [1], [1], [0, 0, 0, 1, 1, 1], [0], [0]>} : vector<8x8x8xbf16>, vector<8x8x8xbf16>, vector<8x8x8xf32> -> vector<8x8x8xf32>
    "tpu.trace_stop"() : () -> ()
    %c3_101 = arith.constant 3 : index
    %c0_102 = arith.constant 0 : index
    %c0_103 = arith.constant 0 : index
    %288 = vector.load %arg2[%c3_101, %c0_102, %c0_103] : memref<4x8x8xf32, #tpu.memory_space<vmem>>, vector<1x8x8xf32>
    %289 = vector.shape_cast %288 : vector<1x8x8xf32> to vector<8x8xf32>
    %290 = vector.shape_cast %289 : vector<8x8xf32> to vector<1x8x8xf32>
    %291 = vector.broadcast %290 : vector<1x8x8xf32> to vector<8x8x8xf32>
    %292 = arith.addf %287, %291 : vector<8x8x8xf32>
    %cst_104 = arith.constant dense<0xFF800000> : vector<8x8xf32>
    %293 = vector.multi_reduction <maximumf>, %292, %cst_104 [2] : vector<8x8x8xf32> to vector<8x8xf32>
    %294 = vector.shape_cast %293 : vector<8x8xf32> to vector<8x8x1xf32>
    %295 = vector.broadcast %294 : vector<8x8x1xf32> to vector<8x8x8xf32>
    %296 = arith.subf %292, %295 : vector<8x8x8xf32>
    %297 = math.exp %296 : vector<8x8x8xf32>
    %cst_105 = arith.constant dense<0.000000e+00> : vector<8x8xf32>
    %298 = vector.multi_reduction <add>, %297, %cst_105 [2] : vector<8x8x8xf32> to vector<8x8xf32>
    %299 = vector.shape_cast %298 : vector<8x8xf32> to vector<8x8x1xf32>
    %300 = tpu.reciprocal %299 {approx = true} : vector<8x8x1xf32> -> vector<8x8x1xf32>
    %301 = vector.broadcast %300 : vector<8x8x1xf32> to vector<8x8x8xf32>
    %302 = arith.mulf %297, %301 : vector<8x8x8xf32>
    %303 = arith.truncf %302 : vector<8x8x8xf32> to vector<8x8x8xbf16>
    "tpu.trace_start"() <{level = 10 : i32, message = "bqk,bkd->bqd"}> : () -> ()
    %cst_106 = arith.constant dense<0.000000e+00> : vector<8x8x8xf32>
    %304 = tpu.matmul %303, %286, %cst_106 {dimension_numbers = #tpu.dot_dimension_numbers<[2], [1], [1], [2], [0, 0, 0, 1, 1, 2], [0], [0]>} : vector<8x8x8xbf16>, vector<8x8x8xbf16>, vector<8x8x8xf32> -> vector<8x8x8xf32>
    "tpu.trace_stop"() : () -> ()
    %305 = vector.shape_cast %304 : vector<8x8x8xf32> to vector<64x8xf32>
    %306 = arith.truncf %305 : vector<64x8xf32> to vector<64x8xbf16>
    %307 = vector.extract_strided_slice %204 {offsets = [24, 0], sizes = [8, 32], strides = [1, 1]} : vector<32x32xbf16> to vector<8x32xbf16>
    %cst_107 = arith.constant dense<0.000000e+00> : vector<64x32xf32>
    %308 = tpu.matmul %306, %307, %cst_107 {dimension_numbers = #tpu.dot_dimension_numbers<[1], [0], [0], [1], [0, 0, 1, 1], [], []>} : vector<64x8xbf16>, vector<8x32xbf16>, vector<64x32xf32> -> vector<64x32xf32>
    %309 = arith.addf %283, %308 : vector<64x32xf32>
    %310 = arith.addf %175, %309 : vector<64x32xf32>
    %c1_108 = arith.constant 1 : index
    %c0_109 = arith.constant 0 : index
    %c0_110 = arith.constant 0 : index
    %311 = vector.load %arg6[%c1_108, %c0_109, %c0_110] : memref<2x1x32xf32, #tpu.memory_space<vmem>>, vector<1x1x32xf32>
    %312 = vector.shape_cast %311 : vector<1x1x32xf32> to vector<1x32xf32>
    %313 = arith.mulf %310, %310 : vector<64x32xf32>
    %cst_111 = arith.constant dense<0.000000e+00> : vector<64xf32>
    %314 = vector.multi_reduction <add>, %313, %cst_111 [1] : vector<64x32xf32> to vector<64xf32>
    %315 = vector.shape_cast %314 : vector<64xf32> to vector<64x1xf32>
    %cst_112 = arith.constant 3.200000e+01 : f32
    %316 = vector.broadcast %cst_112 : f32 to vector<64x1xf32>
    %317 = arith.divf %315, %316 : vector<64x1xf32>
    %cst_113 = arith.constant 9.99999997E-7 : f32
    %318 = vector.broadcast %cst_113 : f32 to vector<64x1xf32>
    %319 = arith.addf %317, %318 : vector<64x1xf32>
    %320 = math.rsqrt %319 : vector<64x1xf32>
    %321 = vector.broadcast %320 : vector<64x1xf32> to vector<64x32xf32>
    %322 = arith.mulf %310, %321 : vector<64x32xf32>
    %323 = vector.broadcast %312 : vector<1x32xf32> to vector<64x32xf32>
    %324 = arith.mulf %322, %323 : vector<64x32xf32>
    %325 = arith.truncf %324 : vector<64x32xf32> to vector<64x32xbf16>
    %c1_114 = arith.constant 1 : index
    %c0_115 = arith.constant 0 : index
    %c0_116 = arith.constant 0 : index
    %326 = vector.load %arg7[%c1_114, %c0_115, %c0_116] : memref<2x32x128xbf16, #tpu.memory_space<vmem>>, vector<1x32x128xbf16>
    %327 = vector.shape_cast %326 : vector<1x32x128xbf16> to vector<32x128xbf16>
    %cst_117 = arith.constant dense<0.000000e+00> : vector<64x128xf32>
    %328 = tpu.matmul %325, %327, %cst_117 {dimension_numbers = #tpu.dot_dimension_numbers<[1], [0], [0], [1], [0, 0, 1, 1], [], []>} : vector<64x32xbf16>, vector<32x128xbf16>, vector<64x128xf32> -> vector<64x128xf32>
    %329 = vector.extract_strided_slice %328 {offsets = [0, 0], sizes = [64, 64], strides = [1, 1]} : vector<64x128xf32> to vector<64x64xf32>
    %cst_118 = arith.constant 5.000000e-01 : f32
    %330 = vector.broadcast %cst_118 : f32 to vector<64x64xf32>
    %331 = arith.mulf %330, %329 : vector<64x64xf32>
    %cst_119 = arith.constant 4.471500e-02 : f32
    %332 = vector.broadcast %cst_119 : f32 to vector<64x64xf32>
    %333 = arith.mulf %332, %329 : vector<64x64xf32>
    %334 = arith.mulf %333, %329 : vector<64x64xf32>
    %335 = arith.mulf %334, %329 : vector<64x64xf32>
    %336 = arith.addf %329, %335 : vector<64x64xf32>
    %cst_120 = arith.constant 0.797884583 : f32
    %337 = vector.broadcast %cst_120 : f32 to vector<64x64xf32>
    %338 = arith.mulf %337, %336 : vector<64x64xf32>
    %339 = math.tanh %338 : vector<64x64xf32>
    %cst_121 = arith.constant 1.000000e+00 : f32
    %340 = vector.broadcast %cst_121 : f32 to vector<64x64xf32>
    %341 = arith.addf %340, %339 : vector<64x64xf32>
    %342 = arith.mulf %331, %341 : vector<64x64xf32>
    %343 = vector.extract_strided_slice %328 {offsets = [0, 64], sizes = [64, 64], strides = [1, 1]} : vector<64x128xf32> to vector<64x64xf32>
    %344 = arith.mulf %342, %343 : vector<64x64xf32>
    %345 = arith.truncf %344 : vector<64x64xf32> to vector<64x64xbf16>
    %c1_122 = arith.constant 1 : index
    %c0_123 = arith.constant 0 : index
    %c0_124 = arith.constant 0 : index
    %346 = vector.load %arg8[%c1_122, %c0_123, %c0_124] : memref<2x64x32xbf16, #tpu.memory_space<vmem>>, vector<1x64x32xbf16>
    %347 = vector.shape_cast %346 : vector<1x64x32xbf16> to vector<64x32xbf16>
    %cst_125 = arith.constant dense<0.000000e+00> : vector<64x32xf32>
    %348 = tpu.matmul %345, %347, %cst_125 {dimension_numbers = #tpu.dot_dimension_numbers<[1], [0], [0], [1], [0, 0, 1, 1], [], []>} : vector<64x64xbf16>, vector<64x32xbf16>, vector<64x32xf32> -> vector<64x32xf32>
    %349 = arith.addf %310, %348 : vector<64x32xf32>
    %350 = vector.shape_cast %349 : vector<64x32xf32> to vector<8x8x32xf32>
    %351 = vector.extract_strided_slice %350 {offsets = [0, 0, 0], sizes = [8, 1, 32], strides = [1, 1, 1]} : vector<8x8x32xf32> to vector<8x1x32xf32>
    %352 = vector.shape_cast %351 : vector<8x1x32xf32> to vector<8x32xf32>
    %c0_126 = arith.constant 0 : index
    %c0_127 = arith.constant 0 : index
    %353 = vector.load %arg9[%c0_126, %c0_127] : memref<1x32xf32, #tpu.memory_space<vmem>>, vector<1x32xf32>
    %354 = arith.mulf %352, %352 : vector<8x32xf32>
    %cst_128 = arith.constant dense<0.000000e+00> : vector<8xf32>
    %355 = vector.multi_reduction <add>, %354, %cst_128 [1] : vector<8x32xf32> to vector<8xf32>
    %356 = vector.shape_cast %355 : vector<8xf32> to vector<8x1xf32>
    %cst_129 = arith.constant 3.200000e+01 : f32
    %357 = vector.broadcast %cst_129 : f32 to vector<8x1xf32>
    %358 = arith.divf %356, %357 : vector<8x1xf32>
    %cst_130 = arith.constant 9.99999997E-7 : f32
    %359 = vector.broadcast %cst_130 : f32 to vector<8x1xf32>
    %360 = arith.addf %358, %359 : vector<8x1xf32>
    %361 = math.rsqrt %360 : vector<8x1xf32>
    %362 = vector.broadcast %361 : vector<8x1xf32> to vector<8x32xf32>
    %363 = arith.mulf %352, %362 : vector<8x32xf32>
    %364 = vector.broadcast %353 : vector<1x32xf32> to vector<8x32xf32>
    %365 = arith.mulf %363, %364 : vector<8x32xf32>
    %366 = arith.truncf %365 : vector<8x32xf32> to vector<8x32xbf16>
    %c0_131 = arith.constant 0 : index
    %c0_132 = arith.constant 0 : index
    %367 = vector.load %arg10[%c0_131, %c0_132] : memref<32x128xbf16, #tpu.memory_space<vmem>>, vector<32x128xbf16>
    %cst_133 = arith.constant dense<0.000000e+00> : vector<8x128xf32>
    %368 = tpu.matmul %366, %367, %cst_133 {dimension_numbers = #tpu.dot_dimension_numbers<[1], [0], [0], [1], [0, 0, 1, 1], [], []>} : vector<8x32xbf16>, vector<32x128xbf16>, vector<8x128xf32> -> vector<8x128xf32>
    %c0_134 = arith.constant 0 : index
    %c0_135 = arith.constant 0 : index
    %369 = vector.load %arg11[%c0_134, %c0_135] : memref<1x128xf32, #tpu.memory_space<vmem>>, vector<1x128xf32>
    %370 = vector.broadcast %369 : vector<1x128xf32> to vector<8x128xf32>
    %371 = arith.addf %368, %370 : vector<8x128xf32>
    %c0_136 = arith.constant 0 : index
    %c0_137 = arith.constant 0 : index
    %372 = vector.load %arg12[%c0_136, %c0_137] : memref<8x128xf32, #tpu.memory_space<vmem>>, vector<8x128xf32>
    tpu.vector_store %arg12[%c0_136, %c0_137], %371 {strides = array<i32>} : memref<8x128xf32, #tpu.memory_space<vmem>>, vector<8x128xf32>,
    return
  }
  func.func @transform_0(%arg0: i32) -> (i32, i32, i32) {
    %c0_i32 = arith.constant 0 : i32
    %c0_i32_0 = arith.constant 0 : i32
    %c0_i32_1 = arith.constant 0 : i32
    return %arg0, %c0_i32, %c0_i32_0 : i32, i32, i32
  }
  func.func @transform_1(%arg0: i32) -> (i32, i32, i32) {
    %c0_i32 = arith.constant 0 : i32
    %c0_i32_0 = arith.constant 0 : i32
    %c0_i32_1 = arith.constant 0 : i32
    %c0_i32_2 = arith.constant 0 : i32
    return %c0_i32, %c0_i32_0, %c0_i32_1 : i32, i32, i32
  }
  func.func @transform_2(%arg0: i32) -> (i32, i32, i32) {
    %c0_i32 = arith.constant 0 : i32
    %c0_i32_0 = arith.constant 0 : i32
    %c0_i32_1 = arith.constant 0 : i32
    %c0_i32_2 = arith.constant 0 : i32
    return %c0_i32, %c0_i32_0, %c0_i32_1 : i32, i32, i32
  }
  func.func @transform_3(%arg0: i32) -> (i32, i32, i32) {
    %c0_i32 = arith.constant 0 : i32
    %c0_i32_0 = arith.constant 0 : i32
    %c0_i32_1 = arith.constant 0 : i32
    %c0_i32_2 = arith.constant 0 : i32
    return %c0_i32, %c0_i32_0, %c0_i32_1 : i32, i32, i32
  }
  func.func @transform_4(%arg0: i32) -> (i32, i32, i32) {
    %c0_i32 = arith.constant 0 : i32
    %c0_i32_0 = arith.constant 0 : i32
    %c0_i32_1 = arith.constant 0 : i32
    %c0_i32_2 = arith.constant 0 : i32
    return %c0_i32, %c0_i32_0, %c0_i32_1 : i32, i32, i32
  }
  func.func @transform_5(%arg0: i32) -> (i32, i32, i32) {
    %c0_i32 = arith.constant 0 : i32
    %c0_i32_0 = arith.constant 0 : i32
    %c0_i32_1 = arith.constant 0 : i32
    %c0_i32_2 = arith.constant 0 : i32
    return %c0_i32, %c0_i32_0, %c0_i32_1 : i32, i32, i32
  }
  func.func @transform_6(%arg0: i32) -> (i32, i32, i32) {
    %c0_i32 = arith.constant 0 : i32
    %c0_i32_0 = arith.constant 0 : i32
    %c0_i32_1 = arith.constant 0 : i32
    %c0_i32_2 = arith.constant 0 : i32
    return %c0_i32, %c0_i32_0, %c0_i32_1 : i32, i32, i32
  }
  func.func @transform_7(%arg0: i32) -> (i32, i32, i32) {
    %c0_i32 = arith.constant 0 : i32
    %c0_i32_0 = arith.constant 0 : i32
    %c0_i32_1 = arith.constant 0 : i32
    %c0_i32_2 = arith.constant 0 : i32
    return %c0_i32, %c0_i32_0, %c0_i32_1 : i32, i32, i32
  }
  func.func @transform_8(%arg0: i32) -> (i32, i32) {
    %c0_i32 = arith.constant 0 : i32
    %c0_i32_0 = arith.constant 0 : i32
    %c0_i32_1 = arith.constant 0 : i32
    return %c0_i32, %c0_i32_0 : i32, i32
  }
  func.func @transform_9(%arg0: i32) -> (i32, i32) {
    %c0_i32 = arith.constant 0 : i32
    %c0_i32_0 = arith.constant 0 : i32
    %c0_i32_1 = arith.constant 0 : i32
    return %c0_i32, %c0_i32_0 : i32, i32
  }
  func.func @transform_10(%arg0: i32) -> (i32, i32) {
    %c0_i32 = arith.constant 0 : i32
    %c0_i32_0 = arith.constant 0 : i32
    %c0_i32_1 = arith.constant 0 : i32
    return %c0_i32, %c0_i32_0 : i32, i32
  }
  func.func @transform_11(%arg0: i32) -> (i32, i32) {
    %c0_i32 = arith.constant 0 : i32
    %c0_i32_0 = arith.constant 0 : i32
    return %arg0, %c0_i32 : i32, i32
  }
}

</mosaic_0001>

<bundles_post_ra>
// kernel: byt5_regressor_forward.1
= control target key start
LH: loop header
LB: loop body
LE: loop exit
PB: predicated region body
PF: predicated region fallthrough
CT: control target
= control target key end

     0   :  { %vm56_vm0 = vcmask 261120   ;;  %vm11162_vm1 = vmmov 0   ;;  %s11163_s20 = smov 96   ;;  %s11164_s21 = smov 64   ;;  %vm256_vm2 = vcmask 64512   ;;  %vm740_vm3 = vcmask 1043456   ;;  %s13601_s0 = inlined_call_operand.vmem [shape: f32[8,8,32], index: 0, kind: input, shape index: {}]   ;;  %s13602_s3 = inlined_call_operand.vmem [shape: bf16[2,32,128], index: 3, kind: input, shape index: {}]   ;;  %s13603_s2 = inlined_call_operand.vmem [shape: f32[2,1,32], index: 2, kind: input, shape index: {}]   ;;  %s13604_s1 = inlined_call_operand.vmem [shape: f32[4,8,8], index: 1, kind: input, shape index: {}]   ;;  %s13605_s4 = inlined_call_operand.vmem [shape: bf16[2,32,32], index: 4, kind: input, shape index: {}]   ;;  %s13606_s6 = inlined_call_operand.vmem [shape: bf16[2,32,128], index: 6, kind: input, shape index: {}]   ;;  %s13607_s5 = inlined_call_operand.vmem [shape: f32[2,1,32], index: 5, kind: input, shape index: {}]   ;;  %s13608_s7 = inlined_call_operand.vmem [shape: bf16[2,64,32], index: 7, kind: input, shape index: {}]   ;;  %s13609_s9 = inlined_call_operand.vmem [shape: bf16[32,128], index: 9, kind: input, shape index: {}]   ;;  %s13610_s8 = inlined_call_operand.vmem [shape: f32[1,32], index: 8, kind: input, shape index: {}]   ;;  %s13611_s10 = inlined_call_operand.vmem [shape: f32[1,128], index: 10, kind: input, shape index: {}]   ;;  %s13612_s11 = inlined_call_operand.vmem [shape: f32[8,128], index: 11, kind: output, shape index: {}]  }
   0x1   :  { %v11237_v0 = vld [vmem:[%s13601_s0 + $0x10] sm:$0xff]  ;;  %v11242_v1 = vld [vmem:[%s13601_s0] sm:$0xff]  ;;  %v11247_v2 = vld [vmem:[%s13601_s0 + $0x18] sm:$0xff]  ;;  %s11165_s24 = smov 88   ;;  %s11166_s25 = smov 120   ;;  %vm4450_vm4 = vcmask 523264  }
   0x2   :  { %v50_v3 = vmul.f32 %v11237_v0, %v11237_v0  ;;  %v48_v4 = vmul.f32 %v11242_v1, %v11242_v1  ;;  %v51_v5 = vmul.f32 %v11247_v2, %v11247_v2  ;;  %v11258_v6 = vld [vmem:[%s13601_s0 + $0x8] sm:$0xff]  ;;  %v11270_v9 = vld [vmem:[%s13601_s0 + $0x20] sm:$0xff]  ;;  %v11283_v16 = vld [vmem:[%s13601_s0 + $0x38] sm:$0xff]  ;;  %s11167_s28 = smov 56   ;;  %s11168_s29 = smov 80   ;;  %vm9041_vm5 = vcmask 1041409  }
   0x3   :  { %v49_v7 = vmul.f32 %v11258_v6, %v11258_v6  ;;  %v11265_v8 = vld [vmem:[%s13601_s0 + $0x28] sm:$0xff]  ;;  %v52_v15 = vmul.f32 %v11270_v9, %v11270_v9  ;;  %v11288_v17 = vld [vmem:[%s13601_s0 + $0x30] sm:$0xff]  ;;  %v55_v20 = vmul.f32 %v11283_v16, %v11283_v16  ;;  %v10782_v25 = vld [vmem:[%s13602_s3] sm:$0xff]   ;;  %s11169_s30 = smov 112   ;;  %s11170_s18 = smov 48   ;;  %vm9044_vm6 = vcmask 1042434  }
   0x4   :  { %v63_v10 = vsel %vm56_vm0, %v50_v3, 0.0  ;;  %v57_v11 = vsel %vm56_vm0, %v48_v4, 0.0  ;;  %v66_v12 = vsel %vm56_vm0, %v51_v5, 0.0  ;;  %v53_v14 = vmul.f32 %v11265_v8, %v11265_v8  ;;  %v10781_v24 = vld [vmem:[%s13602_s3 + $0x8] sm:$0xff]   ;;  %v9216_v54 = vld [vmem:[%s13603_s2] ss:$0 sm:$0xff] }
   0x5   :  { %64 = vadd.xlane.f32.xlu1 %v63_v10  ;;  %58 = vadd.xlane.f32.xlu0 %v57_v11  ;;  %v60_v13 = vsel %vm56_vm0, %v49_v7, 0.0  ;;  %v69_v19 = vsel %vm56_vm0, %v52_v15, 0.0  ;;  %v54_v21 = vmul.f32 %v11288_v17, %v11288_v17  ;;  %v78_v22 = vsel %vm56_vm0, %v55_v20, 0.0  ;;  %s11171_s19 = smov 104   ;;  %s11172_s22 = smov 72  }
   0x6   :  { %v72_v18 = vsel %vm56_vm0, %v53_v14, 0.0  ;;  %9824 = vmatprep.subr.bf16.mxu0 %v10781_v24  ;;  %s11173_s13 = smov 40   ;;  %vm9047_vm7 = vcmask 1043459   ;;  %vm9050_vm8 = vcmask 1044484   ;;  %vm9053_vm9 = vcmask 1045509  }
   0x7   :  { %v75_v23 = vsel %vm56_vm0, %v54_v21, 0.0  ;;  %9825 = vmatpush3.bf16.msra.mxu0 %v10781_v24  ;;  %vm9056_vm10 = vcmask 1046534   ;;  %vm9059_vm11 = vcmask 1047559  }
   0x8   :  { %9826 = vmatprep.subr.bf16.mxu0 %v10782_v25 }
   0x9   :  { %67 = vadd.xlane.f32.xlu1 %v66_v12  ;;  %61 = vadd.xlane.f32.xlu0 %v60_v13 }
   0xb   :  { %9827 = vmatpush3.bf16.msra.mxu0 %v10782_v25 }
   0xd   :  { %73 = vadd.xlane.f32.xlu1 %v72_v18  ;;  %70 = vadd.xlane.f32.xlu0 %v69_v19 }
  0x11   :  { %79 = vadd.xlane.f32.xlu1 %v78_v22  ;;  %76 = vadd.xlane.f32.xlu0 %v75_v23 }
  0x8e   :  { %v65_v26 = vpop.xlane.xlu1 %64  ;;  %v59_v27 = vpop.xlane.xlu0 %58 }
  0x8f   :  { %v84_v28 = vmul.f32 0.03125, %v65_v26  ;;  %v82_v29 = vmul.f32 0.03125, %v59_v27 }
  0x91   :  { %v92_v30 = vadd.f32 1e-06, %v84_v28  ;;  %v90_v31 = vadd.f32 1e-06, %v82_v29 }
  0x92   :  { %v68_v32 = vpop.xlane.xlu1 %67  ;;  %v62_v33 = vpop.xlane.xlu0 %61 }
  0x93   :  { %10799 = vrsqrt.f32 %v92_v30  ;;  %v85_v34 = vmul.f32 0.03125, %v68_v32  ;;  %v83_v35 = vmul.f32 0.03125, %v62_v33 }
  0x94   :  { %10801 = vrsqrt.f32 %v90_v31 }
  0x95   :  { %v93_v36 = vadd.f32 1e-06, %v85_v34  ;;  %v91_v37 = vadd.f32 1e-06, %v83_v35 }
  0x96   :  { %v74_v38 = vpop.xlane.xlu1 %73  ;;  %v71_v39 = vpop.xlane.xlu0 %70 }
  0x97   :  { %10803 = vrsqrt.f32 %v93_v36  ;;  %v87_v40 = vmul.f32 0.03125, %v74_v38  ;;  %v86_v41 = vmul.f32 0.03125, %v71_v39 }
  0x98   :  { %10805 = vrsqrt.f32 %v91_v37 }
  0x99   :  { %v95_v42 = vadd.f32 1e-06, %v87_v40  ;;  %v94_v43 = vadd.f32 1e-06, %v86_v41 }
  0x9a   :  { %v80_v44 = vpop.xlane.xlu1 %79  ;;  %v77_v45 = vpop.xlane.xlu0 %76 }
  0x9b   :  { %10807 = vrsqrt.f32 %v95_v42  ;;  %v89_v46 = vmul.f32 0.03125, %v80_v44  ;;  %v88_v47 = vmul.f32 0.03125, %v77_v45 }
  0x9c   :  { %10809 = vrsqrt.f32 %v94_v43 }
  0x9d   :  { %v97_v48 = vadd.f32 1e-06, %v89_v46  ;;  %v96_v49 = vadd.f32 1e-06, %v88_v47 }
  0x9f   :  { %10811 = vrsqrt.f32 %v97_v48 }
  0xa0   :  { %v10800_v50 = vpop.eup %10799  ;;  %10813 = vrsqrt.f32 %v96_v49 }
  0xa1   :  { %v10802_v51 = vpop.eup %10801  ;;  %v108_v52 = vmul.f32 %v10800_v50, %v11237_v0 }
  0xa2   :  { %v106_v55 = vmul.f32 %v10802_v51, %v11242_v1 }
  0xa3   :  { %v122_v59 = vmul.f32 %v9216_v54, %v108_v52 }
  0xa4   :  { %v10804_v53 = vpop.eup %10803  ;;  %v120_v62 = vmul.f32 %v9216_v54, %v106_v55 }
  0xa5   :  { %v10806_v56 = vpop.eup %10805  ;;  %v109_v57 = vmul.f32 %v10804_v53, %v11247_v2 }
  0xa6   :  { %v107_v58 = vmul.f32 %v10806_v56, %v11258_v6  ;;  %v253_v56 = vld [vmem:[%s13604_s1] sm:$0xff] }
  0xa7   :  { %v123_v60 = vmul.f32 %v9216_v54, %v109_v57 }
  0xa8   :  { %v10808_v61 = vpop.eup %10807  ;;  %v121_v63 = vmul.f32 %v9216_v54, %v107_v58 }
  0xa9   :  { %v10810_v3 = vpop.eup %10809  ;;  %v129_v4 = vpack.c.bf16 %v123_v60, %v122_v59  ;;  %v111_v0 = vmul.f32 %v10808_v61, %v11265_v8 }
  0xaa   :  { %v128_v5 = vpack.c.bf16 %v121_v63, %v120_v62  ;;  %v110_v7 = vmul.f32 %v10810_v3, %v11270_v9  ;;  %v11161_v9 = vmov 0.0  }
  0xab   :  { %v125_v10 = vmul.f32 %v9216_v54, %v111_v0  ;;  %9836 = vmatprep.subr.bf16.mxu1 %v11161_v9  ;;  %9848 = vmatprep.subr.bf16.mxu0 %v11161_v9 }
  0xac   :  { %v10812_v11 = vpop.eup %10811  ;;  %9828 = vmatprep.mubr.msk.bf16.mxu0 %vm56_vm0, %v128_v5  ;;  %v124_v1 = vmul.f32 %v9216_v54, %v110_v7  ;;  %9838 = vmatprep.mubr.msk.bf16.mxu1 %vm11162_vm1, %v11161_v9 }
  0xad   :  { %v10814_v2 = vpop.eup %10813  ;;  %9829 = vmatmul.mubr.msk.bf16.vlgmr.msra.gmra.mxu0 %vm56_vm0, %v129_v4  ;;  %v113_v6 = vmul.f32 %v10812_v11, %v11283_v16 }
  0xae   :  { %v130_v12 = vpack.c.bf16 %v125_v10, %v124_v1  ;;  %v112_v13 = vmul.f32 %v10814_v2, %v11288_v17 }
  0xaf   :  { %v127_v14 = vmul.f32 %v9216_v54, %v113_v6 }
  0xb0   :  { %9832 = vmatprep.mubr.msk.bf16.mxu0 %vm56_vm0, %v130_v12  ;;  %v126_v8 = vmul.f32 %v9216_v54, %v112_v13 }
  0xb2   :  { %v131_v15 = vpack.c.bf16 %v127_v14, %v126_v8 }
  0xb5   :  { %9833 = vmatmul.mubr.msk.bf16.gmra.mxu0 %vm56_vm0, %v131_v15 }
  0xb6   :  { %9850 = vmatprep.mubr.msk.bf16.mxu0 %vm11162_vm1, %v11161_v9 }
 0x16d   :  { %v9830_v16 = vpop.f32.mrf.mxu0 }
 0x16e   :  { %v11333_v24 = vpack.c.bf16 %v9830_v16, %v9830_v16 }
 0x16f   :  { %v194_v17 = vpop.f32.mrf.mxu0 }
 0x170   :  { %v11325_v18 = vpack.c.bf16 %v194_v17, %v194_v17 }
 0x171   :  { %v9831_v19 = vpop.f32.mrf.mxu0 }
 0x172   :  { %254 = vrot.lane.b32.xlu0 %v11325_v18, %s11163_s20  ;;  %v11343_v29 = vpack.c.bf16 %v9831_v19, %v9831_v19 }
 0x173   :  { %v197_v20 = vpop.f32.mrf.mxu0 }
 0x174   :  { %v11329_v21 = vpack.c.bf16 %v197_v20, %v197_v20 }
 0x175   :  { %v9834_v22 = vpop.f32.mrf.mxu0 }
 0x176   :  { %303 = vrot.lane.b32.xlu1 %v11329_v21, %s11163_s20  ;;  %v11337_v27 = vpack.c.bf16 %v9834_v22, %v9834_v22 }
 0x177   :  { %v210_v23 = vpop.f32.mrf.mxu0 }
 0x178   :  { %v11335_v25 = vpack.c.bf16 %v210_v23, %v210_v23 }
 0x179   :  { %v9835_v26 = vpop.f32.mrf.mxu0 }
 0x17a   :  { %351 = vrot.lane.b32.xlu1 %v11333_v24, %s11163_s20  ;;  %447 = vrot.lane.b32.xlu0 %v11335_v25, %s11163_s20  ;;  %v11351_v31 = vpack.c.bf16 %v9835_v26, %v9835_v26 }
 0x17b   :  { %v213_v28 = vpop.f32.mrf.mxu0 }
 0x17c   :  { %v11349_v30 = vpack.c.bf16 %v213_v28, %v213_v28 }
 0x17e   :  { %399 = vrot.lane.b32.xlu1 %v11343_v29, %s11163_s20  ;;  %543 = vrot.lane.b32.xlu0 %v11337_v27, %s11163_s20 }
 0x182   :  { %735 = vrot.lane.b32.xlu0 %v11325_v18, %s11164_s21  ;;  %495 = vrot.lane.b32.xlu1 %v11349_v30, %s11163_s20 }
 0x186   :  { %591 = vrot.lane.b32.xlu1 %v11351_v31, %s11163_s20 }
 0x18a   :  { %784 = vrot.lane.b32.xlu1 %v11329_v21, %s11164_s21 }
 0x18e   :  { %832 = vrot.lane.b32.xlu1 %v11333_v24, %s11164_s21 }
 0x192   :  { %880 = vrot.lane.b32.xlu1 %v11343_v29, %s11164_s21 }
 0x1e4   :  { %v255_v32 = vpop.permute.xlu0 %254 }
 0x1e5   :  { %v261_v33 = vsel %vm256_vm2, %v255_v32, 0 }
 0x1e6   :  { %9837 = vmatpush3.bf16.xpose.msra.mxu1 %v261_v33 }
 0x1e7   :  { %9842 = vmatprep.subr.bf16.mxu1 %v11161_v9 }
 0x1e8   :  { %v304_v34 = vpop.permute.xlu1 %303 }
 0x1e9   :  { %v309_v36 = vsel %vm256_vm2, %v304_v34, 0 }
 0x1ec   :  { %v352_v35 = vpop.permute.xlu1 %351  ;;  %v448_v38 = vpop.permute.xlu0 %447 }
 0x1ed   :  { %v357_v37 = vsel %vm256_vm2, %v352_v35, 0  ;;  %9839 = vmatmul.mubr.msk.bf16.vlgmr.msra.gmra.mxu1 %vm256_vm2, %v11325_v18  ;;  %v453_v40 = vsel %vm256_vm2, %v448_v38, 0 }
 0x1ee   :  { %9843 = vmatpush3.bf16.xpose.msra.mxu1 %v309_v36  ;;  %9849 = vmatpush3.bf16.xpose.msra.mxu0 %v357_v37 }
 0x1ef   :  { %9844 = vmatprep.mubr.msk.bf16.mxu1 %vm11162_vm1, %v11161_v9  ;;  %9854 = vmatprep.subr.bf16.mxu1 %v11161_v9 }
 0x1f0   :  { %9860 = vmatprep.subr.bf16.mxu0 %v11161_v9  ;;  %v400_v39 = vpop.permute.xlu1 %399  ;;  %v544_v42 = vpop.permute.xlu0 %543 }
 0x1f1   :  { %v405_v41 = vsel %vm256_vm2, %v400_v39, 0  ;;  %v549_v44 = vsel %vm256_vm2, %v544_v42, 0 }
 0x1f4   :  { %v496_v43 = vpop.permute.xlu1 %495  ;;  %v736_v46 = vpop.permute.xlu0 %735 }
 0x1f5   :  { %9845 = vmatmul.mubr.msk.bf16.vlgmr.msra.gmra.mxu1 %vm256_vm2, %v11329_v21  ;;  %9851 = vmatmul.mubr.msk.bf16.vlgmr.msra.gmra.mxu0 %vm256_vm2, %v11333_v24  ;;  %v501_v45 = vsel %vm256_vm2, %v496_v43, 0  ;;  %v742_v49 = vsel %vm740_vm3, %v736_v46, 0 }
 0x1f6   :  { %9855 = vmatpush3.bf16.xpose.msra.mxu1 %v405_v41  ;;  %9861 = vmatpush3.bf16.xpose.msra.mxu0 %v453_v40 }
 0x1f7   :  { %9862 = vmatprep.mubr.msk.bf16.mxu0 %vm11162_vm1, %v11161_v9  ;;  %9856 = vmatprep.mubr.msk.bf16.mxu1 %vm11162_vm1, %v11161_v9 }
 0x1f8   :  { %9866 = vmatprep.subr.bf16.mxu1 %v11161_v9  ;;  %9872 = vmatprep.subr.bf16.mxu0 %v11161_v9  ;;  %v592_v47 = vpop.permute.xlu1 %591 }
 0x1f9   :  { %v597_v48 = vsel %vm256_vm2, %v592_v47, 0 }
 0x1fc   :  { %v785_v50 = vpop.permute.xlu1 %784 }
 0x1fd   :  { %9857 = vmatmul.mubr.msk.bf16.vlgmr.msra.gmra.mxu1 %vm256_vm2, %v11343_v29  ;;  %9863 = vmatmul.mubr.msk.bf16.vlgmr.msra.gmra.mxu0 %vm256_vm2, %v11335_v25  ;;  %v790_v51 = vsel %vm740_vm3, %v785_v50, 0 }
 0x1fe   :  { %9867 = vmatpush3.bf16.xpose.msra.mxu1 %v501_v45  ;;  %9873 = vmatpush3.bf16.xpose.msra.mxu0 %v549_v44 }
 0x1ff   :  { %9868 = vmatprep.mubr.msk.bf16.mxu1 %vm11162_vm1, %v11161_v9  ;;  %9874 = vmatprep.mubr.msk.bf16.mxu0 %vm11162_vm1, %v11161_v9 }
 0x200   :  { %9878 = vmatprep.subr.bf16.mxu1 %v11161_v9  ;;  %9884 = vmatprep.subr.bf16.mxu0 %v11161_v9  ;;  %v11441_v46 = vpop.permute.xlu1 %832 }
 0x204   :  { %v11443_v47 = vpop.permute.xlu1 %880 }
 0x205   :  { %9869 = vmatmul.mubr.msk.bf16.vlgmr.msra.gmra.mxu1 %vm256_vm2, %v11349_v30  ;;  %9875 = vmatmul.mubr.msk.bf16.vlgmr.msra.gmra.mxu0 %vm256_vm2, %v11337_v27 }
 0x206   :  { %9879 = vmatpush3.bf16.xpose.msra.mxu1 %v597_v48  ;;  %9885 = vmatpush3.bf16.msra.mxu0 %v742_v49 }
 0x207   :  { %9880 = vmatprep.mubr.msk.bf16.mxu1 %vm11162_vm1, %v11161_v9  ;;  %9890 = vmatprep.subr.bf16.mxu1 %v11161_v9 }
 0x208   :  { %9886 = vmatprep.mubr.msk.bf16.mxu0 %vm11162_vm1, %v11161_v9  ;;  %9896 = vmatprep.subr.bf16.mxu0 %v11161_v9 }
 0x20d   :  { %9881 = vmatmul.mubr.msk.bf16.vlgmr.msra.gmra.mxu1 %vm256_vm2, %v11351_v31 }
 0x20e   :  { %9891 = vmatpush3.bf16.msra.mxu1 %v790_v51  ;;  %9892 = vmatprep.mubr.msk.bf16.mxu1 %vm11162_vm1, %v11161_v9 }
 0x20f   :  { %9902 = vmatprep.subr.bf16.mxu1 %v11161_v9 }
 0x2ad   :  { %v297_v52 = vpop.f32.mrf.mxu1 }
 0x2ae   :  { %v298_v63 = vadd.f32 %v297_v52, %v253_v56 }
 0x2af   :  { %v9840_v53 = vpop.f32.mrf.mxu1 }
 0x2b0   :  { %v639_v11 = vsel %vm256_vm2, %v298_v63, -inf }
 0x2b1   :  { %v300_v54 = vpop.f32.mrf.mxu1 }
 0x2b3   :  { %v9841_v55 = vpop.f32.mrf.mxu1 }
 0x2b5   :  { %v345_v57 = vpop.f32.mrf.mxu1  ;;  %v393_v58 = vpop.f32.mrf.mxu0 }
 0x2b6   :  { %v346_v59 = vadd.f32 %v345_v57, %v253_v56  ;;  %v394_v60 = vadd.f32 %v393_v58, %v253_v56 }
 0x2b7   :  { %v9846_v61 = vpop.f32.mrf.mxu1  ;;  %v9852_v62 = vpop.f32.mrf.mxu0 }
 0x2b8   :  { %v645_v3 = vsel %vm256_vm2, %v394_v60, -inf  ;;  %v642_v4 = vsel %vm256_vm2, %v346_v59, -inf }
 0x2b9   :  { %646 = vmax.xlane.f32.xlu0 %v645_v3  ;;  %v396_v0 = vpop.f32.mrf.mxu0  ;;  %643 = vmax.xlane.f32.xlu1 %v642_v4  ;;  %v348_v5 = vpop.f32.mrf.mxu1 }
 0x2bb   :  { %v9847_v7 = vpop.f32.mrf.mxu1  ;;  %v9853_v10 = vpop.f32.mrf.mxu0 }
 0x2bd   :  { %640 = vmax.xlane.f32.xlu0 %v639_v11  ;;  %v441_v1 = vpop.f32.mrf.mxu1  ;;  %v489_v2 = vpop.f32.mrf.mxu0 }
 0x2be   :  { %v490_v6 = vadd.f32 %v489_v2, %v253_v56  ;;  %v11423_v14 = vadd.f32 %v441_v1, %v253_v56 }
 0x2bf   :  { %v9858_v12 = vpop.f32.mrf.mxu1  ;;  %v9864_v13 = vpop.f32.mrf.mxu0 }
 0x2c0   :  { %v651_v8 = vsel %vm256_vm2, %v490_v6, -inf  ;;  %v648_v20 = vsel %vm256_vm2, %v11423_v14, -inf }
 0x2c1   :  { %v444_v15 = vpop.f32.mrf.mxu1  ;;  %652 = vmax.xlane.f32.xlu0 %v651_v8  ;;  %v492_v16 = vpop.f32.mrf.mxu0 }
 0x2c3   :  { %v9859_v17 = vpop.f32.mrf.mxu1  ;;  %v9865_v19 = vpop.f32.mrf.mxu0 }
 0x2c5   :  { %v537_v22 = vpop.f32.mrf.mxu1  ;;  %649 = vmax.xlane.f32.xlu0 %v648_v20  ;;  %v585_v23 = vpop.f32.mrf.mxu0 }
 0x2c6   :  { %v11428_v26 = vadd.f32 %v585_v23, %v253_v56  ;;  %v538_v42 = vadd.f32 %v537_v22, %v253_v56 }
 0x2c7   :  { %v9870_v28 = vpop.f32.mrf.mxu1  ;;  %v9876_v32 = vpop.f32.mrf.mxu0 }
 0x2c8   :  { %v657_v33 = vsel %vm256_vm2, %v11428_v26, -inf  ;;  %v654_v44 = vsel %vm256_vm2, %v538_v42, -inf }
 0x2c9   :  { %v540_v34 = vpop.f32.mrf.mxu1  ;;  %658 = vmax.xlane.f32.xlu0 %v657_v33  ;;  %v588_v35 = vpop.f32.mrf.mxu0 }
 0x2ca   :  { %976 = vrot.lane.b32.xlu1 %v11349_v30, %s11164_s21 }
 0x2cb   :  { %v9871_v36 = vpop.f32.mrf.mxu1  ;;  %v9877_v37 = vpop.f32.mrf.mxu0 }
 0x2cd   :  { %v633_v38 = vpop.f32.mrf.mxu1 }
 0x2ce   :  { %v11436_v43 = vadd.f32 %v633_v38, %v253_v56 }
 0x2cf   :  { %v9882_v39 = vpop.f32.mrf.mxu1 }
 0x2d0   :  { %v660_v45 = vsel %vm256_vm2, %v11436_v43, -inf }
 0x2d1   :  { %v636_v40 = vpop.f32.mrf.mxu1 }
 0x2d3   :  { %v9883_v41 = vpop.f32.mrf.mxu1 }
 0x2df   :  { %928 = vrot.lane.b32.xlu0 %v11335_v25, %s11164_s21 }
 0x2ee   :  { %655 = vmax.xlane.f32.xlu1 %v654_v44 }
 0x2f2   :  { %661 = vmax.xlane.f32.xlu1 %v660_v45 }
 0x342   :  { %v644_v48 = vpop.xlane.xlu1 %643  ;;  %v647_v49 = vpop.xlane.xlu0 %646 }
 0x343   :  { %v664_v50 = vsub.f32 %v346_v59, %v644_v48  ;;  %v665_v51 = vsub.f32 %v394_v60, %v647_v49  ;;  %v838_v49 = vsel %vm740_vm3, %v11441_v46, 0 }
 0x345   :  { %v673_v52 = vmul.f32 1.442695, %v664_v50  ;;  %v675_v53 = vmul.f32 1.442695, %v665_v51 }
 0x346   :  { %v641_v54 = vpop.xlane.xlu0 %640  ;;  %v11464_v11 = vpop.permute.xlu1 %976 }
 0x347   :  { %10815 = vpow2.f32 %v673_v52  ;;  %v663_v55 = vsub.f32 %v298_v63, %v641_v54 }
 0x348   :  { %10817 = vpow2.f32 %v675_v53 }
 0x349   :  { %v671_v56 = vmul.f32 1.442695, %v663_v55 }
 0x34a   :  { %v653_v57 = vpop.xlane.xlu0 %652 }
 0x34b   :  { %10819 = vpow2.f32 %v671_v56  ;;  %v667_v58 = vsub.f32 %v490_v6, %v653_v57 }
 0x34d   :  { %v679_v61 = vmul.f32 1.442695, %v667_v58 }
 0x34e   :  { %v650_v7 = vpop.xlane.xlu0 %649 }
 0x34f   :  { %10821 = vpow2.f32 %v679_v61  ;;  %v666_v10 = vsub.f32 %v11423_v14, %v650_v7 }
 0x351   :  { %v677_v1 = vmul.f32 1.442695, %v666_v10 }
 0x352   :  { %v659_v6 = vpop.xlane.xlu0 %658 }
 0x353   :  { %10823 = vpow2.f32 %v677_v1  ;;  %v669_v8 = vsub.f32 %v11428_v26, %v659_v6 }
 0x354   :  { %v11445_v62 = vpop.eup %10815 }
 0x355   :  { %v11447_v3 = vpop.eup %10817  ;;  %v690_v59 = vsel %vm256_vm2, %v11445_v62, 0.0  ;;  %v683_v15 = vmul.f32 1.442695, %v669_v8 }
 0x356   :  { %691 = vadd.xlane.f32.xlu1 %v690_v59  ;;  %v693_v60 = vsel %vm256_vm2, %v11447_v3, 0.0  ;;  %v929_v34 = vpop.permute.xlu0 %928 }
 0x357   :  { %694 = vadd.xlane.f32.xlu0 %v693_v60  ;;  %v934_v52 = vsel %vm740_vm3, %v929_v34, 0 }
 0x358   :  { %v11453_v63 = vpop.eup %10819 }
 0x359   :  { %v687_v4 = vsel %vm256_vm2, %v11453_v63, 0.0 }
 0x35b   :  { %688 = vadd.xlane.f32.xlu0 %v687_v4  ;;  %v982_v4 = vsel %vm740_vm3, %v11464_v11, 0 }
 0x35c   :  { %v11457_v0 = vpop.eup %10821 }
 0x35d   :  { %v699_v5 = vsel %vm256_vm2, %v11457_v0, 0.0 }
 0x35f   :  { %700 = vadd.xlane.f32.xlu0 %v699_v5 }
 0x360   :  { %v11469_v16 = vpop.eup %10823 }
 0x361   :  { %v696_v14 = vsel %vm256_vm2, %v11469_v16, 0.0 }
 0x367   :  { %1072 = vrot.lane.b32.xlu1 %v11351_v31, %s11164_s21 }
 0x375   :  { %1024 = vrot.lane.b32.xlu0 %v11337_v27, %s11164_s21 }
 0x377   :  { %v656_v2 = vpop.xlane.xlu1 %655 }
 0x378   :  { %v668_v12 = vsub.f32 %v538_v42, %v656_v2 }
 0x37a   :  { %v681_v13 = vmul.f32 1.442695, %v668_v12 }
 0x37b   :  { %v662_v23 = vpop.xlane.xlu1 %661 }
 0x37c   :  { %10825 = vpow2.f32 %v681_v13  ;;  %v670_v26 = vsub.f32 %v11436_v43, %v662_v23  ;;  %v886_v43 = vsel %vm740_vm3, %v11443_v47, 0 }
 0x37d   :  { %10827 = vpow2.f32 %v683_v15 }
 0x37e   :  { %v685_v28 = vmul.f32 1.442695, %v670_v26 }
 0x380   :  { %10829 = vpow2.f32 %v685_v28 }
 0x389   :  { %v11473_v17 = vpop.eup %10825 }
 0x38a   :  { %v702_v19 = vsel %vm256_vm2, %v11473_v17, 0.0  ;;  %v11477_v20 = vpop.eup %10827 }
 0x38b   :  { %697 = vadd.xlane.f32.xlu1 %v696_v14  ;;  %v705_v22 = vsel %vm256_vm2, %v11477_v20, 0.0 }
 0x38d   :  { %v11496_v32 = vpop.eup %10829 }
 0x38e   :  { %v708_v33 = vsel %vm256_vm2, %v11496_v32, 0.0 }
 0x38f   :  { %703 = vadd.xlane.f32.xlu1 %v702_v19 }
 0x394   :  { %706 = vadd.xlane.f32.xlu0 %v705_v22 }
 0x3a0   :  { %1178 = vrot.lane.b32.xlu1 %v11329_v21, %s11165_s24 }
 0x3aa   :  { %1128 = vrot.lane.b32.xlu0 %v11325_v18, %s11165_s24 }
 0x3ae   :  { %1126 = vrot.lane.b32.xlu0 %v11325_v18, %s11166_s25 }
 0x3b2   :  { %1228 = vrot.lane.b32.xlu0 %v11333_v24, %s11165_s24 }
 0x3b6   :  { %1226 = vrot.lane.b32.xlu0 %v11333_v24, %s11166_s25 }
 0x3ba   :  { %1328 = vrot.lane.b32.xlu0 %v11335_v25, %s11165_s24 }
 0x3be   :  { %1326 = vrot.lane.b32.xlu0 %v11335_v25, %s11166_s25 }
 0x3c2   :  { %1428 = vrot.lane.b32.xlu0 %v11337_v27, %s11165_s24 }
 0x3c4   :  { %709 = vadd.xlane.f32.xlu1 %v708_v33 }
 0x3c6   :  { %1426 = vrot.lane.b32.xlu0 %v11337_v27, %s11166_s25 }
 0x3d5   :  { %1176 = vrot.lane.b32.xlu1 %v11329_v21, %s11166_s25 }
 0x3d9   :  { %1278 = vrot.lane.b32.xlu1 %v11343_v29, %s11165_s24 }
 0x3dd   :  { %1276 = vrot.lane.b32.xlu1 %v11343_v29, %s11166_s25 }
 0x3df   :  { %v692_v35 = vpop.xlane.xlu1 %691 }
 0x3e0   :  { %10831 = vrcp.f32 %v692_v35  ;;  %v695_v36 = vpop.xlane.xlu0 %694 }
 0x3e1   :  { %1378 = vrot.lane.b32.xlu1 %v11349_v30, %s11165_s24 }
 0x3e3   :  { %v1073_v56 = vpop.permute.xlu1 %1072 }
 0x3e4   :  { %v689_v37 = vpop.xlane.xlu0 %688  ;;  %v1078_v12 = vsel %vm740_vm3, %v1073_v56, 0 }
 0x3e5   :  { %10833 = vrcp.f32 %v689_v37  ;;  %1376 = vrot.lane.b32.xlu1 %v11349_v30, %s11166_s25 }
 0x3e6   :  { %10835 = vrcp.f32 %v695_v36 }
 0x3e8   :  { %v701_v39 = vpop.xlane.xlu0 %700 }
 0x3e9   :  { %1478 = vrot.lane.b32.xlu1 %v11351_v31, %s11165_s24  ;;  %10837 = vrcp.f32 %v701_v39 }
 0x3ec   :  { %v1025_v53 = vpop.permute.xlu0 %1024 }
 0x3ed   :  { %v10832_v38 = vpop.eup %10831  ;;  %1476 = vrot.lane.b32.xlu1 %v11351_v31, %s11166_s25  ;;  %v1030_v55 = vsel %vm740_vm3, %v1025_v53, 0 }
 0x3ee   :  { %v720_v40 = vmul.f32 %v10832_v38, %v11445_v62 }
 0x3f0   :  { %v728_v41 = vpack.c.bf16 %v720_v40, %v720_v40 }
 0x3f2   :  { %v10834_v42 = vpop.eup %10833  ;;  %9893 = vmatmul.mubr.msk.bf16.vlgmr.msra.gmra.mxu1 %vm256_vm2, %v728_v41 }
 0x3f3   :  { %9903 = vmatpush3.bf16.msra.mxu1 %v886_v43  ;;  %v719_v44 = vmul.f32 %v10834_v42, %v11453_v63  ;;  %9904 = vmatprep.mubr.msk.bf16.mxu1 %vm11162_vm1, %v11161_v9  ;;  %v10836_v48 = vpop.eup %10835 }
 0x3f4   :  { %9914 = vmatprep.subr.bf16.mxu1 %v11161_v9  ;;  %v721_v47 = vmul.f32 %v10836_v48, %v11447_v3 }
 0x3f5   :  { %v727_v45 = vpack.c.bf16 %v719_v44, %v719_v44 }
 0x3f6   :  { %v729_v50 = vpack.c.bf16 %v721_v47, %v721_v47  ;;  %v10838_v51 = vpop.eup %10837 }
 0x3f7   :  { %9887 = vmatmul.mubr.msk.bf16.vlgmr.msra.gmra.mxu0 %vm256_vm2, %v727_v45  ;;  %v723_v46 = vmul.f32 %v10838_v51, %v11457_v0 }
 0x3f8   :  { %9897 = vmatpush3.bf16.msra.mxu0 %v838_v49  ;;  %9898 = vmatprep.mubr.msk.bf16.mxu0 %vm11162_vm1, %v11161_v9 }
 0x3f9   :  { %9908 = vmatprep.subr.bf16.mxu0 %v11161_v9  ;;  %v731_v54 = vpack.c.bf16 %v723_v46, %v723_v46 }
 0x3ff   :  { %9899 = vmatmul.mubr.msk.bf16.vlgmr.msra.gmra.mxu0 %vm256_vm2, %v729_v50 }
 0x400   :  { %9909 = vmatpush3.bf16.msra.mxu0 %v934_v52  ;;  %9910 = vmatprep.mubr.msk.bf16.mxu0 %vm11162_vm1, %v11161_v9 }
 0x401   :  { %9920 = vmatprep.subr.bf16.mxu0 %v11161_v9 }
 0x407   :  { %9911 = vmatmul.mubr.msk.bf16.vlgmr.msra.gmra.mxu0 %vm256_vm2, %v731_v54 }
 0x408   :  { %9921 = vmatpush3.bf16.msra.mxu0 %v1030_v55  ;;  %9922 = vmatprep.mubr.msk.bf16.mxu0 %vm11162_vm1, %v11161_v9 }
 0x409   :  { %9932 = vmatprep.subr.bf16.mxu0 %v11161_v9 }
 0x414   :  { %v698_v57 = vpop.xlane.xlu1 %697 }
 0x415   :  { %10839 = vrcp.f32 %v698_v57 }
 0x418   :  { %v704_v58 = vpop.xlane.xlu1 %703 }
 0x419   :  { %10841 = vrcp.f32 %v704_v58 }
 0x41d   :  { %v707_v61 = vpop.xlane.xlu0 %706 }
 0x41e   :  { %10843 = vrcp.f32 %v707_v61 }
 0x421   :  { %v1129_v62 = vpop.permute.xlu0 %1128 }
 0x422   :  { %v10840_v3 = vpop.eup %10839  ;;  %v1134_v11 = vsel %vm256_vm2, %v1129_v62, 0 }
 0x423   :  { %v722_v59 = vmul.f32 %v10840_v3, %v11469_v16 }
 0x425   :  { %v730_v60 = vpack.c.bf16 %v722_v59, %v722_v59  ;;  %v1127_v0 = vpop.permute.xlu0 %1126 }
 0x426   :  { %v10842_v63 = vpop.eup %10841 }
 0x427   :  { %9905 = vmatmul.mubr.msk.bf16.vlgmr.msra.gmra.mxu1 %vm256_vm2, %v730_v60  ;;  %v724_v5 = vmul.f32 %v10842_v63, %v11473_v17 }
 0x428   :  { %9915 = vmatpush3.bf16.msra.mxu1 %v982_v4  ;;  %9916 = vmatprep.mubr.msk.bf16.mxu1 %vm11162_vm1, %v11161_v9 }
 0x429   :  { %9926 = vmatprep.subr.bf16.mxu1 %v11161_v9  ;;  %v1229_v1 = vpop.permute.xlu0 %1228  ;;  %v732_v2 = vpack.c.bf16 %v724_v5, %v724_v5 }
 0x42a   :  { %v1234_v8 = vsel %vm256_vm2, %v1229_v1, 0 }
 0x42b   :  { %v10844_v7 = vpop.eup %10843 }
 0x42c   :  { %v725_v10 = vmul.f32 %v10844_v7, %v11477_v20  ;;  %v1179_v20 = vpop.permute.xlu1 %1178 }
 0x42d   :  { %v1227_v13 = vpop.permute.xlu0 %1226  ;;  %v1184_v36 = vsel %vm256_vm2, %v1179_v20, 0 }
 0x42e   :  { %v733_v6 = vpack.c.bf16 %v725_v10, %v725_v10 }
 0x42f   :  { %9917 = vmatmul.mubr.msk.bf16.vlgmr.msra.gmra.mxu1 %vm256_vm2, %v732_v2 }
 0x430   :  { %9923 = vmatmul.mubr.msk.bf16.vlgmr.msra.gmra.mxu0 %vm256_vm2, %v733_v6  ;;  %9927 = vmatpush3.bf16.msra.mxu1 %v1078_v12 }
 0x431   :  { %9933 = vmatpush3.bf16.xpose.msra.mxu0 %v1134_v11  ;;  %9934 = vmatprep.mubr.msk.bf16.mxu0 %vm11162_vm1, %v11161_v9  ;;  %v1329_v15 = vpop.permute.xlu0 %1328 }
 0x432   :  { %9944 = vmatprep.subr.bf16.mxu0 %v11161_v9  ;;  %9928 = vmatprep.mubr.msk.bf16.mxu1 %vm11162_vm1, %v11161_v9  ;;  %v1334_v14 = vsel %vm256_vm2, %v1329_v15, 0 }
 0x433   :  { %9938 = vmatprep.subr.bf16.mxu1 %v11161_v9 }
 0x435   :  { %v1327_v16 = vpop.permute.xlu0 %1326 }
 0x438   :  { %9935 = vmatmul.mubr.msk.bf16.vlgmr.msra.gmra.mxu0 %vm256_vm2, %v1127_v0 }
 0x439   :  { %9945 = vmatpush3.bf16.xpose.msra.mxu0 %v1234_v8  ;;  %9946 = vmatprep.mubr.msk.bf16.mxu0 %vm11162_vm1, %v11161_v9  ;;  %v1429_v17 = vpop.permute.xlu0 %1428 }
 0x43a   :  { %9956 = vmatprep.subr.bf16.mxu0 %v11161_v9  ;;  %v1434_v19 = vsel %vm256_vm2, %v1429_v17, 0 }
 0x43d   :  { %v1427_v23 = vpop.permute.xlu0 %1426 }
 0x440   :  { %9947 = vmatmul.mubr.msk.bf16.vlgmr.msra.gmra.mxu0 %vm256_vm2, %v1227_v13  ;;  %v11628_v13 = vld [vmem:[%s13604_s1 + $0x8] sm:$0xff] }
 0x441   :  { %9957 = vmatpush3.bf16.xpose.msra.mxu0 %v1334_v14  ;;  %9958 = vmatprep.mubr.msk.bf16.mxu0 %vm11162_vm1, %v11161_v9 }
 0x442   :  { %9968 = vmatprep.subr.bf16.mxu0 %v11161_v9 }
 0x448   :  { %9959 = vmatmul.mubr.msk.bf16.vlgmr.msra.gmra.mxu0 %vm256_vm2, %v1327_v16 }
 0x449   :  { %9969 = vmatpush3.bf16.xpose.msra.mxu0 %v1434_v19  ;;  %9970 = vmatprep.mubr.msk.bf16.mxu0 %vm11162_vm1, %v11161_v9 }
 0x44a   :  { %9980 = vmatprep.subr.bf16.mxu0 %v11161_v9 }
 0x44d   :  { %v710_v22 = vpop.xlane.xlu1 %709 }
 0x44e   :  { %10845 = vrcp.f32 %v710_v22 }
 0x450   :  { %9971 = vmatmul.mubr.msk.bf16.vlgmr.msra.gmra.mxu0 %vm256_vm2, %v1427_v23 }
 0x451   :  { %9982 = vmatprep.mubr.msk.bf16.mxu0 %vm11162_vm1, %v11161_v9  ;;  %v1177_v26 = vpop.permute.xlu1 %1176 }
 0x455   :  { %v1279_v34 = vpop.permute.xlu1 %1278 }
 0x456   :  { %v1284_v38 = vsel %vm256_vm2, %v1279_v34, 0 }
 0x459   :  { %v1277_v37 = vpop.permute.xlu1 %1276 }
 0x45b   :  { %v10846_v28 = vpop.eup %10845 }
 0x45c   :  { %v726_v33 = vmul.f32 %v10846_v28, %v11496_v32 }
 0x45d   :  { %v1379_v39 = vpop.permute.xlu1 %1378 }
 0x45e   :  { %v734_v35 = vpack.c.bf16 %v726_v33, %v726_v33  ;;  %v1384_v40 = vsel %vm256_vm2, %v1379_v39, 0 }
 0x460   :  { %9929 = vmatmul.mubr.msk.bf16.vlgmr.msra.gmra.mxu1 %vm256_vm2, %v734_v35 }
 0x461   :  { %9939 = vmatpush3.bf16.xpose.msra.mxu1 %v1184_v36  ;;  %9940 = vmatprep.mubr.msk.bf16.mxu1 %vm11162_vm1, %v11161_v9  ;;  %v1377_v32 = vpop.permute.xlu1 %1376 }
 0x462   :  { %9950 = vmatprep.subr.bf16.mxu1 %v11161_v9 }
 0x465   :  { %v1479_v41 = vpop.permute.xlu1 %1478 }
 0x466   :  { %v1484_v42 = vsel %vm256_vm2, %v1479_v41, 0 }
 0x468   :  { %9941 = vmatmul.mubr.msk.bf16.vlgmr.msra.gmra.mxu1 %vm256_vm2, %v1177_v26 }
 0x469   :  { %9951 = vmatpush3.bf16.xpose.msra.mxu1 %v1284_v38  ;;  %9952 = vmatprep.mubr.msk.bf16.mxu1 %vm11162_vm1, %v11161_v9  ;;  %v1477_v43 = vpop.permute.xlu1 %1476 }
 0x46a   :  { %9962 = vmatprep.subr.bf16.mxu1 %v11161_v9 }
 0x470   :  { %9953 = vmatmul.mubr.msk.bf16.vlgmr.msra.gmra.mxu1 %vm256_vm2, %v1277_v37 }
 0x471   :  { %9963 = vmatpush3.bf16.xpose.msra.mxu1 %v1384_v40  ;;  %9964 = vmatprep.mubr.msk.bf16.mxu1 %vm11162_vm1, %v11161_v9 }
 0x472   :  { %9974 = vmatprep.subr.bf16.mxu1 %v11161_v9 }
 0x478   :  { %9965 = vmatmul.mubr.msk.bf16.vlgmr.msra.gmra.mxu1 %vm256_vm2, %v1377_v32 }
 0x479   :  { %9975 = vmatpush3.bf16.xpose.msra.mxu1 %v1484_v42  ;;  %9976 = vmatprep.mubr.msk.bf16.mxu1 %vm11162_vm1, %v11161_v9 }
 0x47a   :  { %9986 = vmatprep.subr.bf16.mxu1 %v11161_v9 }
 0x480   :  { %9977 = vmatmul.mubr.msk.bf16.vlgmr.msra.gmra.mxu1 %vm256_vm2, %v1477_v43 }
 0x481   :  { %9988 = vmatprep.mubr.msk.bf16.mxu1 %vm11162_vm1, %v11161_v9 }
 0x4b2   :  { %v11605_v44 = vpop.f32.mrf.mxu1 }
 0x4b4   :  { %v9894_v45 = vpop.f32.mrf.mxu1 }
 0x4b6   :  { %v829_v48 = vpop.f32.mrf.mxu1 }
 0x4b7   :  { %v11607_v49 = vpop.f32.mrf.mxu0 }
 0x4b8   :  { %v1120_v47 = vpack.c.bf16 %v11605_v44, %v11607_v49  ;;  %v9895_v50 = vpop.f32.mrf.mxu1  ;;  %v250_v49 = vld [vmem:[%s13605_s4 + $0x4] sm:$0xf] }
 0x4b9   :  { %v9888_v51 = vpop.f32.mrf.mxu0 }
 0x4bb   :  { %v781_v52 = vpop.f32.mrf.mxu0 }
 0x4bd   :  { %v9889_v46 = vpop.f32.mrf.mxu0 }
 0x4bf   :  { %v11611_v53 = vpop.f32.mrf.mxu0 }
 0x4c1   :  { %v9900_v54 = vpop.f32.mrf.mxu0 }
 0x4c3   :  { %v877_v55 = vpop.f32.mrf.mxu0 }
 0x4c5   :  { %v9901_v56 = vpop.f32.mrf.mxu0 }
 0x4c7   :  { %v11613_v57 = vpop.f32.mrf.mxu0 }
 0x4c9   :  { %v9912_v58 = vpop.f32.mrf.mxu0 }
 0x4cb   :  { %v973_v61 = vpop.f32.mrf.mxu0 }
 0x4cd   :  { %v9913_v62 = vpop.f32.mrf.mxu0 }
 0x4e7   :  { %v11615_v3 = vpop.f32.mrf.mxu1 }
 0x4e8   :  { %v1121_v59 = vpack.c.bf16 %v11615_v3, %v11611_v53  ;;  %v2023_v53 = vsel %vm740_vm3, %v250_v49, 0 }
 0x4e9   :  { %v9906_v60 = vpop.f32.mrf.mxu1 }
 0x4eb   :  { %v925_v63 = vpop.f32.mrf.mxu1 }
 0x4ed   :  { %v9907_v4 = vpop.f32.mrf.mxu1 }
 0x4ef   :  { %v11619_v0 = vpop.f32.mrf.mxu1 }
 0x4f0   :  { %v1122_v5 = vpack.c.bf16 %v11619_v0, %v11613_v57  ;;  %v11623_v7 = vpop.f32.mrf.mxu0 }
 0x4f1   :  { %v9918_v10 = vpop.f32.mrf.mxu1 }
 0x4f2   :  { %v9924_v1 = vpop.f32.mrf.mxu0 }
 0x4f3   :  { %v1021_v2 = vpop.f32.mrf.mxu1 }
 0x4f4   :  { %v1069_v6 = vpop.f32.mrf.mxu0 }
 0x4f5   :  { %v9919_v12 = vpop.f32.mrf.mxu1 }
 0x4f6   :  { %v9925_v11 = vpop.f32.mrf.mxu0 }
 0x4f8   :  { %v1170_v8 = vpop.f32.mrf.mxu0 }
 0x4f9   :  { %v11631_v15 = vadd.f32 %v11628_v13, %v1170_v8 }
 0x4fa   :  { %v9936_v16 = vpop.f32.mrf.mxu0 }
 0x4fb   :  { %v1526_v14 = vsel %vm256_vm2, %v11631_v15, -inf }
 0x4fc   :  { %1527 = vmax.xlane.f32.xlu0 %v1526_v14  ;;  %v1173_v17 = vpop.f32.mrf.mxu0 }
 0x4fe   :  { %v9937_v19 = vpop.f32.mrf.mxu0 }
 0x500   :  { %v1270_v20 = vpop.f32.mrf.mxu0 }
 0x501   :  { %v11636_v22 = vadd.f32 %v11628_v13, %v1270_v20 }
 0x502   :  { %v9948_v23 = vpop.f32.mrf.mxu0 }
 0x503   :  { %v1532_v26 = vsel %vm256_vm2, %v11636_v22, -inf }
 0x504   :  { %1533 = vmax.xlane.f32.xlu0 %v1532_v26  ;;  %v1273_v28 = vpop.f32.mrf.mxu0 }
 0x506   :  { %v9949_v33 = vpop.f32.mrf.mxu0 }
 0x508   :  { %v1370_v34 = vpop.f32.mrf.mxu0 }
 0x509   :  { %v1371_v62 = vadd.f32 %v11628_v13, %v1370_v34 }
 0x50a   :  { %v9960_v35 = vpop.f32.mrf.mxu0 }
 0x50b   :  { %v1538_v1 = vsel %vm256_vm2, %v1371_v62, -inf }
 0x50c   :  { %v1373_v36 = vpop.f32.mrf.mxu0 }
 0x50e   :  { %v9961_v37 = vpop.f32.mrf.mxu0 }
 0x510   :  { %v1470_v38 = vpop.f32.mrf.mxu0 }
 0x511   :  { %v1471_v10 = vadd.f32 %v11628_v13, %v1470_v38 }
 0x512   :  { %v9972_v39 = vpop.f32.mrf.mxu0 }
 0x513   :  { %v1544_v8 = vsel %vm256_vm2, %v1471_v10, -inf }
 0x514   :  { %v1473_v32 = vpop.f32.mrf.mxu0 }
 0x516   :  { %v9973_v40 = vpop.f32.mrf.mxu0 }
 0x520   :  { %v11640_v41 = vpop.f32.mrf.mxu1 }
 0x521   :  { %v1123_v42 = vpack.c.bf16 %v11640_v41, %v11623_v7 }
 0x522   :  { %v9930_v43 = vpop.f32.mrf.mxu1 }
 0x524   :  { %v1117_v45 = vpop.f32.mrf.mxu1 }
 0x526   :  { %v9931_v48 = vpop.f32.mrf.mxu1 }
 0x528   :  { %v1220_v50 = vpop.f32.mrf.mxu1 }
 0x529   :  { %v1221_v51 = vadd.f32 %v11628_v13, %v1220_v50 }
 0x52a   :  { %v9942_v52 = vpop.f32.mrf.mxu1 }
 0x52b   :  { %v1529_v46 = vsel %vm256_vm2, %v1221_v51, -inf }
 0x52c   :  { %1530 = vmax.xlane.f32.xlu1 %v1529_v46  ;;  %v1223_v54 = vpop.f32.mrf.mxu1 }
 0x52e   :  { %v9943_v55 = vpop.f32.mrf.mxu1 }
 0x530   :  { %v1320_v56 = vpop.f32.mrf.mxu1 }
 0x531   :  { %v11647_v58 = vadd.f32 %v11628_v13, %v1320_v56 }
 0x532   :  { %v9954_v61 = vpop.f32.mrf.mxu1 }
 0x533   :  { %v1535_v60 = vsel %vm256_vm2, %v11647_v58, -inf }
 0x534   :  { %v1323_v63 = vpop.f32.mrf.mxu1  ;;  %1536 = vmax.xlane.f32.xlu0 %v1535_v60 }
 0x536   :  { %v9955_v4 = vpop.f32.mrf.mxu1 }
 0x538   :  { %v1420_v2 = vpop.f32.mrf.mxu1  ;;  %1539 = vmax.xlane.f32.xlu0 %v1538_v1 }
 0x539   :  { %v11655_v6 = vadd.f32 %v11628_v13, %v1420_v2 }
 0x53a   :  { %v9966_v12 = vpop.f32.mrf.mxu1 }
 0x53b   :  { %v1541_v11 = vsel %vm256_vm2, %v11655_v6, -inf }
 0x53c   :  { %1542 = vmax.xlane.f32.xlu1 %v1541_v11  ;;  %v1423_v16 = vpop.f32.mrf.mxu1  ;;  %1545 = vmax.xlane.f32.xlu0 %v1544_v8 }
 0x53e   :  { %v9967_v14 = vpop.f32.mrf.mxu1 }
 0x540   :  { %v1520_v17 = vpop.f32.mrf.mxu1 }
 0x541   :  { %v11667_v26 = vadd.f32 %v11628_v13, %v1520_v17 }
 0x542   :  { %v9978_v19 = vpop.f32.mrf.mxu1 }
 0x543   :  { %v1547_v28 = vsel %vm256_vm2, %v11667_v26, -inf }
 0x544   :  { %v1523_v20 = vpop.f32.mrf.mxu1 }
 0x546   :  { %v9979_v23 = vpop.f32.mrf.mxu1 }
 0x54d   :  { %1670 = vrot.lane.b32.xlu1 %v11329_v21, %s11167_s28 }
 0x551   :  { %1718 = vrot.lane.b32.xlu1 %v11333_v24, %s11167_s28 }
 0x552   :  { %1622 = vrot.lane.b32.xlu0 %v11325_v18, %s11167_s28 }
 0x575   :  { %1548 = vmax.xlane.f32.xlu1 %v1547_v28 }
 0x585   :  { %v1528_v33 = vpop.xlane.xlu0 %1527 }
 0x586   :  { %v1550_v34 = vsub.f32 %v11631_v15, %v1528_v33  ;;  %1766 = vrot.lane.b32.xlu1 %v11343_v29, %s11167_s28 }
 0x588   :  { %v1558_v35 = vmul.f32 1.442695, %v1550_v34 }
 0x58a   :  { %10847 = vpow2.f32 %v1558_v35 }
 0x58d   :  { %v1534_v36 = vpop.xlane.xlu0 %1533 }
 0x58e   :  { %v1552_v37 = vsub.f32 %v11636_v22, %v1534_v36 }
 0x590   :  { %v1562_v38 = vmul.f32 1.442695, %v1552_v37 }
 0x592   :  { %10849 = vpow2.f32 %v1562_v38 }
 0x597   :  { %v11675_v39 = vpop.eup %10847 }
 0x598   :  { %v1574_v13 = vsel %vm256_vm2, %v11675_v39, 0.0 }
 0x599   :  { %1575 = vadd.xlane.f32.xlu0 %v1574_v13 }
 0x59f   :  { %v11679_v32 = vpop.eup %10849 }
 0x5a0   :  { %v1580_v15 = vsel %vm256_vm2, %v11679_v32, 0.0 }
 0x5a1   :  { %1581 = vadd.xlane.f32.xlu0 %v1580_v15 }
 0x5b5   :  { %v1531_v40 = vpop.xlane.xlu1 %1530 }
 0x5b6   :  { %v1551_v43 = vsub.f32 %v1221_v51, %v1531_v40 }
 0x5b7   :  { %1814 = vrot.lane.b32.xlu0 %v11335_v25, %s11167_s28 }
 0x5b8   :  { %v1560_v22 = vmul.f32 1.442695, %v1551_v43 }
 0x5ba   :  { %10851 = vpow2.f32 %v1560_v22 }
 0x5bd   :  { %v1537_v45 = vpop.xlane.xlu0 %1536 }
 0x5be   :  { %v1553_v11 = vsub.f32 %v11647_v58, %v1537_v45 }
 0x5c0   :  { %v1564_v8 = vmul.f32 1.442695, %v1553_v11 }
 0x5c1   :  { %v1540_v48 = vpop.xlane.xlu0 %1539 }
 0x5c2   :  { %v1554_v50 = vsub.f32 %v1371_v62, %v1540_v48 }
 0x5c4   :  { %v1566_v52 = vmul.f32 1.442695, %v1554_v50 }
 0x5c5   :  { %v1543_v46 = vpop.xlane.xlu1 %1542  ;;  %v1546_v54 = vpop.xlane.xlu0 %1545 }
 0x5c6   :  { %10853 = vpow2.f32 %v1566_v52  ;;  %v1556_v55 = vsub.f32 %v1471_v10, %v1546_v54  ;;  %v1555_v16 = vsub.f32 %v11655_v6, %v1543_v46 }
 0x5c7   :  { %v11685_v56 = vpop.eup %10851 }
 0x5c8   :  { %v1570_v61 = vmul.f32 1.442695, %v1556_v55  ;;  %v1577_v60 = vsel %vm256_vm2, %v11685_v56, 0.0  ;;  %v1568_v14 = vmul.f32 1.442695, %v1555_v16 }
 0x5c9   :  { %1578 = vadd.xlane.f32.xlu1 %v1577_v60  ;;  %v1671_v51 = vpop.permute.xlu1 %1670  ;;  %v1623_v63 = vpop.permute.xlu0 %1622 }
 0x5ca   :  { %v1676_v4 = vsel %vm740_vm3, %v1671_v51, 0  ;;  %v1628_v1 = vsel %vm740_vm3, %v1623_v63, 0  ;;  %10855 = vpow2.f32 %v1570_v61 }
 0x5cb   :  { %9981 = vmatpush3.bf16.msra.mxu0 %v1628_v1  ;;  %9987 = vmatpush3.bf16.msra.mxu1 %v1676_v4  ;;  %10857 = vpow2.f32 %v1564_v8 }
 0x5cc   :  { %9992 = vmatprep.subr.bf16.mxu0 %v11161_v9  ;;  %9998 = vmatprep.subr.bf16.mxu1 %v11161_v9  ;;  %10859 = vpow2.f32 %v1568_v14 }
 0x5cd   :  { %v1719_v58 = vpop.permute.xlu1 %1718 }
 0x5ce   :  { %v1724_v15 = vsel %vm740_vm3, %v1719_v58, 0 }
 0x5d3   :  { %v11693_v62 = vpop.eup %10853 }
 0x5d4   :  { %v1586_v10 = vsel %vm256_vm2, %v11693_v62, 0.0 }
 0x5d6   :  { %1587 = vadd.xlane.f32.xlu0 %v1586_v10 }
 0x5d7   :  { %v11697_v2 = vpop.eup %10855 }
 0x5d8   :  { %v1592_v12 = vsel %vm256_vm2, %v11697_v2, 0.0  ;;  %v11711_v17 = vpop.eup %10857 }
 0x5d9   :  { %v1583_v6 = vsel %vm256_vm2, %v11711_v17, 0.0  ;;  %v11717_v19 = vpop.eup %10859 }
 0x5da   :  { %1593 = vadd.xlane.f32.xlu0 %v1592_v12  ;;  %1862 = vrot.lane.b32.xlu1 %v11349_v30, %s11167_s28  ;;  %v1589_v33 = vsel %vm256_vm2, %v11717_v19, 0.0 }
 0x5f0   :  { %1910 = vrot.lane.b32.xlu0 %v11337_v27, %s11167_s28 }
 0x5f4   :  { %2174 = vrot.lane.b32.xlu0 %v11325_v18, %s11168_s29 }
 0x5f8   :  { %2172 = vrot.lane.b32.xlu0 %v11325_v18, %s11169_s30 }
 0x5fc   :  { %2274 = vrot.lane.b32.xlu0 %v11333_v24, %s11168_s29 }
 0x5fe   :  { %v1549_v20 = vpop.xlane.xlu1 %1548  ;;  %1584 = vadd.xlane.f32.xlu1 %v1583_v6 }
 0x5ff   :  { %v1557_v23 = vsub.f32 %v11667_v26, %v1549_v20 }
 0x600   :  { %2272 = vrot.lane.b32.xlu0 %v11333_v24, %s11169_s30 }
 0x601   :  { %v1572_v28 = vmul.f32 1.442695, %v1557_v23 }
 0x602   :  { %1590 = vadd.xlane.f32.xlu1 %v1589_v33 }
 0x603   :  { %10861 = vpow2.f32 %v1572_v28 }
 0x604   :  { %2374 = vrot.lane.b32.xlu0 %v11335_v25, %s11168_s29 }
 0x608   :  { %2372 = vrot.lane.b32.xlu0 %v11335_v25, %s11169_s30 }
 0x60c   :  { %2474 = vrot.lane.b32.xlu0 %v11337_v27, %s11168_s29 }
 0x610   :  { %v11730_v34 = vpop.eup %10861  ;;  %2472 = vrot.lane.b32.xlu0 %v11337_v27, %s11169_s30 }
 0x611   :  { %v1595_v26 = vsel %vm256_vm2, %v11730_v34, 0.0 }
 0x612   :  { %1596 = vadd.xlane.f32.xlu1 %v1595_v26  ;;  %v249_v26 = vld [vmem:[%s13605_s4] sm:$0xf] }
 0x622   :  { %v1576_v35 = vpop.xlane.xlu0 %1575 }
 0x623   :  { %10863 = vrcp.f32 %v1576_v35  ;;  %1958 = vrot.lane.b32.xlu1 %v11351_v31, %s11167_s28 }
 0x627   :  { %2224 = vrot.lane.b32.xlu1 %v11329_v21, %s11168_s29 }
 0x62a   :  { %v1582_v36 = vpop.xlane.xlu0 %1581 }
 0x62b   :  { %10865 = vrcp.f32 %v1582_v36  ;;  %2222 = vrot.lane.b32.xlu1 %v11329_v21, %s11169_s30 }
 0x62e   :  { %v1815_v43 = vpop.permute.xlu0 %1814 }
 0x62f   :  { %2324 = vrot.lane.b32.xlu1 %v11343_v29, %s11168_s29  ;;  %v1820_v45 = vsel %vm740_vm3, %v1815_v43, 0 }
 0x630   :  { %v10864_v37 = vpop.eup %10863 }
 0x631   :  { %v1606_v38 = vmul.f32 %v10864_v37, %v11675_v39  ;;  %v2103_v37 = vsel %vm740_vm3, %v249_v26, 0 }
 0x633   :  { %2322 = vrot.lane.b32.xlu1 %v11343_v29, %s11169_s30  ;;  %v1614_v13 = vpack.c.bf16 %v1606_v38, %v1606_v38 }
 0x635   :  { %9983 = vmatmul.mubr.msk.bf16.vlgmr.msra.gmra.mxu0 %vm256_vm2, %v1614_v13 }
 0x636   :  { %9993 = vmatpush3.bf16.msra.mxu0 %v1724_v15  ;;  %9994 = vmatprep.mubr.msk.bf16.mxu0 %vm11162_vm1, %v11161_v9 }
 0x637   :  { %2424 = vrot.lane.b32.xlu1 %v11349_v30, %s11168_s29  ;;  %10004 = vmatprep.subr.bf16.mxu0 %v11161_v9 }
 0x638   :  { %v10866_v40 = vpop.eup %10865 }
 0x639   :  { %v1608_v39 = vmul.f32 %v10866_v40, %v11679_v32  ;;  %v1767_v32 = vpop.permute.xlu1 %1766 }
 0x63a   :  { %v1772_v61 = vsel %vm740_vm3, %v1767_v32, 0 }
 0x63b   :  { %2422 = vrot.lane.b32.xlu1 %v11349_v30, %s11169_s30  ;;  %v1616_v22 = vpack.c.bf16 %v1608_v39, %v1608_v39 }
 0x63d   :  { %9995 = vmatmul.mubr.msk.bf16.vlgmr.msra.gmra.mxu0 %vm256_vm2, %v1616_v22 }
 0x63e   :  { %10005 = vmatpush3.bf16.msra.mxu0 %v1820_v45  ;;  %10006 = vmatprep.mubr.msk.bf16.mxu0 %vm11162_vm1, %v11161_v9 }
 0x63f   :  { %2524 = vrot.lane.b32.xlu1 %v11351_v31, %s11168_s29  ;;  %10016 = vmatprep.subr.bf16.mxu0 %v11161_v9 }
 0x643   :  { %2522 = vrot.lane.b32.xlu1 %v11351_v31, %s11169_s30 }
 0x652   :  { %v1579_v48 = vpop.xlane.xlu1 %1578 }
 0x653   :  { %10867 = vrcp.f32 %v1579_v48 }
 0x656   :  { %v1863_v11 = vpop.permute.xlu1 %1862 }
 0x657   :  { %v1868_v20 = vsel %vm740_vm3, %v1863_v11, 0 }
 0x65f   :  { %v1588_v50 = vpop.xlane.xlu0 %1587 }
 0x660   :  { %v10868_v52 = vpop.eup %10867  ;;  %10869 = vrcp.f32 %v1588_v50 }
 0x661   :  { %v1607_v46 = vmul.f32 %v10868_v52, %v11685_v56 }
 0x663   :  { %v1594_v54 = vpop.xlane.xlu0 %1593  ;;  %v1615_v55 = vpack.c.bf16 %v1607_v46, %v1607_v46 }
 0x664   :  { %10871 = vrcp.f32 %v1594_v54 }
 0x665   :  { %9989 = vmatmul.mubr.msk.bf16.vlgmr.msra.gmra.mxu1 %vm256_vm2, %v1615_v55 }
 0x666   :  { %9999 = vmatpush3.bf16.msra.mxu1 %v1772_v61  ;;  %10000 = vmatprep.mubr.msk.bf16.mxu1 %vm11162_vm1, %v11161_v9 }
 0x667   :  { %10010 = vmatprep.subr.bf16.mxu1 %v11161_v9  ;;  %v1911_v63 = vpop.permute.xlu0 %1910 }
 0x668   :  { %v1916_v56 = vsel %vm740_vm3, %v1911_v63, 0 }
 0x66d   :  { %v10870_v60 = vpop.eup %10869 }
 0x66e   :  { %v1610_v51 = vmul.f32 %v10870_v60, %v11693_v62 }
 0x670   :  { %v1618_v4 = vpack.c.bf16 %v1610_v51, %v1610_v51 }
 0x671   :  { %v10872_v1 = vpop.eup %10871 }
 0x672   :  { %10007 = vmatmul.mubr.msk.bf16.vlgmr.msra.gmra.mxu0 %vm256_vm2, %v1618_v4  ;;  %v1612_v10 = vmul.f32 %v10872_v1, %v11697_v2 }
 0x673   :  { %10017 = vmatpush3.bf16.msra.mxu0 %v1916_v56  ;;  %10018 = vmatprep.mubr.msk.bf16.mxu0 %vm11162_vm1, %v11161_v9 }
 0x674   :  { %v1620_v12 = vpack.c.bf16 %v1612_v10, %v1612_v10  ;;  %10760 = vmatprep.subr.msk.bf16.mxu0 %vm740_vm3, %v250_v49  ;;  %v2175_v10 = vpop.permute.xlu0 %2174 }
 0x67a   :  { %10019 = vmatmul.mubr.msk.bf16.vlgmr.msra.gmra.mxu0 %vm256_vm2, %v1620_v12 }
 0x67b   :  { %10029 = vmatpush3.bf16.msra.mxu0 %v2023_v53 }
 0x67c   :  { %10048 = vmatprep.subr.bf16.mxu0 %v11161_v9 }
 0x687   :  { %v1585_v8 = vpop.xlane.xlu1 %1584 }
 0x688   :  { %10873 = vrcp.f32 %v1585_v8 }
 0x68b   :  { %v1591_v62 = vpop.xlane.xlu1 %1590 }
 0x68c   :  { %10875 = vrcp.f32 %v1591_v62  ;;  %v2180_v62 = vsel %vm256_vm2, %v2175_v10, 0 }
 0x695   :  { %v10874_v16 = vpop.eup %10873 }
 0x696   :  { %v1609_v14 = vmul.f32 %v10874_v16, %v11711_v17 }
 0x698   :  { %v1617_v58 = vpack.c.bf16 %v1609_v14, %v1609_v14 }
 0x699   :  { %v10876_v6 = vpop.eup %10875 }
 0x69a   :  { %10001 = vmatmul.mubr.msk.bf16.vlgmr.msra.gmra.mxu1 %vm256_vm2, %v1617_v58  ;;  %v1611_v2 = vmul.f32 %v10876_v6, %v11717_v19 }
 0x69b   :  { %10011 = vmatpush3.bf16.msra.mxu1 %v1868_v20  ;;  %v1597_v23 = vpop.xlane.xlu1 %1596  ;;  %10012 = vmatprep.mubr.msk.bf16.mxu1 %vm11162_vm1, %v11161_v9 }
 0x69c   :  { %10877 = vrcp.f32 %v1597_v23  ;;  %10022 = vmatprep.subr.bf16.mxu1 %v11161_v9  ;;  %v1619_v17 = vpack.c.bf16 %v1611_v2, %v1611_v2  ;;  %v2173_v2 = vpop.permute.xlu0 %2172 }
 0x69f   :  { %v1959_v28 = vpop.permute.xlu1 %1958 }
 0x6a0   :  { %v1964_v33 = vsel %vm740_vm3, %v1959_v28, 0 }
 0x6a2   :  { %10013 = vmatmul.mubr.msk.bf16.vlgmr.msra.gmra.mxu1 %vm256_vm2, %v1619_v17 }
 0x6a3   :  { %10023 = vmatpush3.bf16.msra.mxu1 %v1964_v33  ;;  %10024 = vmatprep.mubr.msk.bf16.mxu1 %vm11162_vm1, %v11161_v9  ;;  %v2225_v38 = vpop.permute.xlu1 %2224  ;;  %v2275_v33 = vpop.permute.xlu0 %2274 }
 0x6a4   :  { %10761 = vmatprep.subr.msk.bf16.mxu1 %vm740_vm3, %v249_v26  ;;  %v2230_v15 = vsel %vm256_vm2, %v2225_v38, 0 }
 0x6a7   :  { %v2223_v13 = vpop.permute.xlu1 %2222 }
 0x6a9   :  { %v10878_v35 = vpop.eup %10877 }
 0x6aa   :  { %v1613_v36 = vmul.f32 %v10878_v35, %v11730_v34 }
 0x6ab   :  { %v2325_v44 = vpop.permute.xlu1 %2324 }
 0x6ac   :  { %v1621_v19 = vpack.c.bf16 %v1613_v36, %v1613_v36  ;;  %v2330_v57 = vsel %vm256_vm2, %v2325_v44, 0 }
 0x6ae   :  { %10025 = vmatmul.mubr.msk.bf16.vlgmr.msra.gmra.mxu1 %vm256_vm2, %v1621_v19  ;;  %v2273_v19 = vpop.permute.xlu0 %2272 }
 0x6af   :  { %10040 = vmatprep.mubr.msk.bf16.mxu1 %vm256_vm2, %v1120_v47  ;;  %10039 = vmatpush3.bf16.msra.mxu1 %v2103_v37  ;;  %v2323_v47 = vpop.permute.xlu1 %2322 }
 0x6b0   :  { %10054 = vmatprep.subr.bf16.mxu1 %v11161_v9 }
 0x6b2   :  { %v2375_v44 = vpop.permute.xlu0 %2374 }
 0x6b3   :  { %v2425_v3 = vpop.permute.xlu1 %2424 }
 0x6b4   :  { %v2430_v0 = vsel %vm256_vm2, %v2425_v3, 0 }
 0x6b6   :  { %10041 = vmatmul.mubr.msk.bf16.vlgmr.msra.gmra.mxu1 %vm256_vm2, %v1121_v59 }
 0x6b7   :  { %10055 = vmatpush3.bf16.xpose.msra.mxu1 %v2230_v15  ;;  %10044 = vmatprep.mubr.msk.bf16.mxu1 %vm256_vm2, %v1122_v5  ;;  %v2423_v59 = vpop.permute.xlu1 %2422  ;;  %v2280_v15 = vsel %vm256_vm2, %v2275_v33, 0 }
 0x6b8   :  { %10066 = vmatprep.subr.bf16.mxu1 %v11161_v9 }
 0x6bb   :  { %v2525_v5 = vpop.permute.xlu1 %2524 }
 0x6bc   :  { %v2530_v7 = vsel %vm256_vm2, %v2525_v5, 0 }
 0x6be   :  { %10045 = vmatmul.mubr.msk.bf16.gmra.mxu1 %vm256_vm2, %v1123_v42 }
 0x6bf   :  { %10056 = vmatprep.mubr.msk.bf16.mxu1 %vm11162_vm1, %v11161_v9  ;;  %v2523_v41 = vpop.permute.xlu1 %2522 }
 0x6c6   :  { %10057 = vmatmul.mubr.msk.bf16.vlgmr.msra.gmra.mxu1 %vm256_vm2, %v2223_v13 }
 0x6c7   :  { %10067 = vmatpush3.bf16.xpose.msra.mxu1 %v2330_v57  ;;  %10068 = vmatprep.mubr.msk.bf16.mxu1 %vm11162_vm1, %v11161_v9  ;;  %v2373_v57 = vpop.permute.xlu0 %2372 }
 0x6c8   :  { %10078 = vmatprep.subr.bf16.mxu1 %v11161_v9 }
 0x6ce   :  { %10069 = vmatmul.mubr.msk.bf16.vlgmr.msra.gmra.mxu1 %vm256_vm2, %v2323_v47 }
 0x6cf   :  { %10079 = vmatpush3.bf16.xpose.msra.mxu1 %v2430_v0  ;;  %10080 = vmatprep.mubr.msk.bf16.mxu1 %vm11162_vm1, %v11161_v9 }
 0x6d0   :  { %10090 = vmatprep.subr.bf16.mxu1 %v11161_v9 }
 0x6d6   :  { %10081 = vmatmul.mubr.msk.bf16.vlgmr.msra.gmra.mxu1 %vm256_vm2, %v2423_v59  ;;  %v2380_v59 = vsel %vm256_vm2, %v2375_v44, 0 }
 0x6d7   :  { %10091 = vmatpush3.bf16.xpose.msra.mxu1 %v2530_v7  ;;  %10092 = vmatprep.mubr.msk.bf16.mxu1 %vm11162_vm1, %v11161_v9  ;;  %v11879_v7 = vld [vmem:[%s13604_s1 + $0x10] sm:$0xff] }
 0x6d8   :  { %10102 = vmatprep.subr.bf16.mxu1 %v11161_v9 }
 0x6de   :  { %10093 = vmatmul.mubr.msk.bf16.vlgmr.msra.gmra.mxu1 %vm256_vm2, %v2523_v41  ;;  %v2475_v41 = vpop.permute.xlu0 %2474 }
 0x6df   :  { %10104 = vmatprep.mubr.msk.bf16.mxu1 %vm11162_vm1, %v11161_v9 }
 0x6f5   :  { %v1664_v42 = vpop.f32.mrf.mxu0 }
 0x6f7   :  { %v9984_v34 = vpop.f32.mrf.mxu0 }
 0x6f9   :  { %v1667_v40 = vpop.f32.mrf.mxu0 }
 0x6fb   :  { %v9985_v39 = vpop.f32.mrf.mxu0 }
 0x6fc   :  { %v2480_v39 = vsel %vm256_vm2, %v2475_v41, 0 }
 0x6fd   :  { %v1760_v43 = vpop.f32.mrf.mxu0 }
 0x6ff   :  { %v9996_v22 = vpop.f32.mrf.mxu0 }
 0x701   :  { %v1763_v45 = vpop.f32.mrf.mxu0 }
 0x703   :  { %v9997_v32 = vpop.f32.mrf.mxu0 }
 0x725   :  { %v1712_v48 = vpop.f32.mrf.mxu1 }
 0x726   :  { %v2006_v50 = vpack.c.bf16 %v1712_v48, %v1664_v42 }
 0x727   :  { %v9990_v52 = vpop.f32.mrf.mxu1 }
 0x728   :  { %10030 = vmatprep.mubr.msk.bf16.mxu0 %vm256_vm2, %v2006_v50  ;;  %v2473_v50 = vpop.permute.xlu0 %2472 }
 0x729   :  { %v1715_v46 = vpop.f32.mrf.mxu1 }
 0x72b   :  { %v9991_v54 = vpop.f32.mrf.mxu1 }
 0x732   :  { %v1856_v55 = vpop.f32.mrf.mxu0 }
 0x734   :  { %v10008_v61 = vpop.f32.mrf.mxu0 }
 0x736   :  { %v1859_v60 = vpop.f32.mrf.mxu0 }
 0x738   :  { %v10009_v51 = vpop.f32.mrf.mxu0 }
 0x73a   :  { %v1952_v63 = vpop.f32.mrf.mxu0 }
 0x73c   :  { %v10020_v4 = vpop.f32.mrf.mxu0 }
 0x73e   :  { %v1955_v1 = vpop.f32.mrf.mxu0 }
 0x740   :  { %v10021_v56 = vpop.f32.mrf.mxu0 }
 0x75a   :  { %v1808_v12 = vpop.f32.mrf.mxu1 }
 0x75b   :  { %v2007_v11 = vpack.c.bf16 %v1808_v12, %v1760_v43 }
 0x75c   :  { %v10002_v8 = vpop.f32.mrf.mxu1 }
 0x75d   :  { %10031 = vmatmul.mubr.msk.bf16.vlgmr.msra.gmra.mxu0 %vm256_vm2, %v2007_v11 }
 0x75e   :  { %10049 = vmatpush3.bf16.xpose.msra.mxu0 %v2180_v62  ;;  %v1811_v16 = vpop.f32.mrf.mxu1 }
 0x75f   :  { %10060 = vmatprep.subr.bf16.mxu0 %v11161_v9 }
 0x760   :  { %v10003_v14 = vpop.f32.mrf.mxu1 }
 0x762   :  { %v1904_v58 = vpop.f32.mrf.mxu1 }
 0x763   :  { %v2008_v6 = vpack.c.bf16 %v1904_v58, %v1856_v55 }
 0x764   :  { %v10014_v20 = vpop.f32.mrf.mxu1 }
 0x765   :  { %10034 = vmatprep.mubr.msk.bf16.mxu0 %vm256_vm2, %v2008_v6 }
 0x766   :  { %v1907_v23 = vpop.f32.mrf.mxu1 }
 0x768   :  { %v10015_v28 = vpop.f32.mrf.mxu1 }
 0x76e   :  { %v2000_v17 = vpop.f32.mrf.mxu1 }
 0x76f   :  { %v2009_v26 = vpack.c.bf16 %v2000_v17, %v1952_v63 }
 0x770   :  { %v10026_v35 = vpop.f32.mrf.mxu1 }
 0x771   :  { %10035 = vmatmul.mubr.msk.bf16.gmra.mxu0 %vm256_vm2, %v2009_v26 }
 0x772   :  { %v2003_v36 = vpop.f32.mrf.mxu1  ;;  %10050 = vmatprep.mubr.msk.bf16.mxu0 %vm11162_vm1, %v11161_v9 }
 0x774   :  { %v10027_v37 = vpop.f32.mrf.mxu1 }
 0x776   :  { %v11850_v38 = vpop.f32.mrf.mxu1 }
 0x778   :  { %v11852_v13 = vpop.f32.mrf.mxu1 }
 0x779   :  { %10051 = vmatmul.mubr.msk.bf16.vlgmr.msra.gmra.mxu0 %vm256_vm2, %v2173_v2 }
 0x77a   :  { %10061 = vmatpush3.bf16.xpose.msra.mxu0 %v2280_v15  ;;  %v11856_v49 = vpop.f32.mrf.mxu1  ;;  %10062 = vmatprep.mubr.msk.bf16.mxu0 %vm11162_vm1, %v11161_v9 }
 0x77b   :  { %10072 = vmatprep.subr.bf16.mxu0 %v11161_v9 }
 0x77c   :  { %v11861_v47 = vpop.f32.mrf.mxu1 }
 0x77e   :  { %v11863_v53 = vpop.f32.mrf.mxu1 }
 0x780   :  { %v11865_v3 = vpop.f32.mrf.mxu1 }
 0x781   :  { %10063 = vmatmul.mubr.msk.bf16.vlgmr.msra.gmra.mxu0 %vm256_vm2, %v2273_v19 }
 0x782   :  { %10073 = vmatpush3.bf16.xpose.msra.mxu0 %v2380_v59  ;;  %v11869_v0 = vpop.f32.mrf.mxu1  ;;  %10074 = vmatprep.mubr.msk.bf16.mxu0 %vm11162_vm1, %v11161_v9 }
 0x783   :  { %10084 = vmatprep.subr.bf16.mxu0 %v11161_v9 }
 0x784   :  { %v11874_v5 = vpop.f32.mrf.mxu1 }
 0x786   :  { %v2266_v42 = vpop.f32.mrf.mxu1 }
 0x787   :  { %v2267_v34 = vadd.f32 %v11879_v7, %v2266_v42 }
 0x788   :  { %v10058_v40 = vpop.f32.mrf.mxu1 }
 0x789   :  { %10075 = vmatmul.mubr.msk.bf16.vlgmr.msra.gmra.mxu0 %vm256_vm2, %v2373_v57  ;;  %v2575_v43 = vsel %vm256_vm2, %v2267_v34, -inf }
 0x78a   :  { %10085 = vmatpush3.bf16.xpose.msra.mxu0 %v2480_v39  ;;  %2576 = vmax.xlane.f32.xlu1 %v2575_v43  ;;  %v2269_v22 = vpop.f32.mrf.mxu1 }
 0x78b   :  { %10086 = vmatprep.mubr.msk.bf16.mxu0 %vm11162_vm1, %v11161_v9  ;;  %10096 = vmatprep.subr.bf16.mxu0 %v11161_v9 }
 0x78c   :  { %v10059_v45 = vpop.f32.mrf.mxu1 }
 0x78e   :  { %v2366_v32 = vpop.f32.mrf.mxu1 }
 0x78f   :  { %v2367_v48 = vadd.f32 %v11879_v7, %v2366_v32 }
 0x790   :  { %v10070_v52 = vpop.f32.mrf.mxu1 }
 0x791   :  { %10087 = vmatmul.mubr.msk.bf16.vlgmr.msra.gmra.mxu0 %vm256_vm2, %v2473_v50  ;;  %v2581_v46 = vsel %vm256_vm2, %v2367_v48, -inf }
 0x792   :  { %v2369_v54 = vpop.f32.mrf.mxu1  ;;  %2582 = vmax.xlane.f32.xlu0 %v2581_v46  ;;  %10098 = vmatprep.mubr.msk.bf16.mxu0 %vm11162_vm1, %v11161_v9 }
 0x794   :  { %v10071_v55 = vpop.f32.mrf.mxu1 }
 0x796   :  { %v2466_v61 = vpop.f32.mrf.mxu1 }
 0x797   :  { %v2467_v60 = vadd.f32 %v11879_v7, %v2466_v61 }
 0x798   :  { %v10082_v51 = vpop.f32.mrf.mxu1 }
 0x799   :  { %v2587_v63 = vsel %vm256_vm2, %v2467_v60, -inf }
 0x79a   :  { %2588 = vmax.xlane.f32.xlu1 %v2587_v63  ;;  %v2469_v4 = vpop.f32.mrf.mxu1 }
 0x79c   :  { %v10083_v1 = vpop.f32.mrf.mxu1 }
 0x79e   :  { %v2566_v56 = vpop.f32.mrf.mxu1 }
 0x79f   :  { %v2567_v10 = vadd.f32 %v11879_v7, %v2566_v56 }
 0x7a0   :  { %v10094_v12 = vpop.f32.mrf.mxu1 }
 0x7a1   :  { %v2593_v11 = vsel %vm256_vm2, %v2567_v10, -inf }
 0x7a2   :  { %2594 = vmax.xlane.f32.xlu1 %v2593_v11  ;;  %v2569_v8 = vpop.f32.mrf.mxu1 }
 0x7a4   :  { %v10095_v62 = vpop.f32.mrf.mxu1 }
 0x813   :  { %v2577_v16 = vpop.xlane.xlu1 %2576 }
 0x814   :  { %v2597_v14 = vsub.f32 %v2267_v34, %v2577_v16 }
 0x816   :  { %v2606_v58 = vmul.f32 1.442695, %v2597_v14 }
 0x818   :  { %10879 = vpow2.f32 %v2606_v58 }
 0x81b   :  { %v2583_v6 = vpop.xlane.xlu0 %2582 }
 0x81c   :  { %v2599_v20 = vsub.f32 %v2367_v48, %v2583_v6 }
 0x81d   :  { %v11897_v2 = vpop.f32.mrf.mxu0 }
 0x81e   :  { %v2610_v23 = vmul.f32 1.442695, %v2599_v20 }
 0x81f   :  { %v11903_v36 = vpop.f32.mrf.mxu0 }
 0x820   :  { %10881 = vpow2.f32 %v2610_v23 }
 0x821   :  { %v11905_v19 = vpop.f32.mrf.mxu0 }
 0x823   :  { %v2589_v28 = vpop.xlane.xlu1 %2588  ;;  %v11911_v41 = vpop.f32.mrf.mxu0 }
 0x824   :  { %v2601_v33 = vsub.f32 %v2467_v60, %v2589_v28 }
 0x825   :  { %v11899_v17 = vpop.eup %10879 }
 0x826   :  { %v2614_v26 = vmul.f32 1.442695, %v2601_v33  ;;  %v2623_v35 = vsel %vm256_vm2, %v11899_v17, 0.0 }
 0x827   :  { %2624 = vadd.xlane.f32.xlu1 %v2623_v35 }
 0x828   :  { %10883 = vpow2.f32 %v2614_v26 }
 0x82b   :  { %v2595_v37 = vpop.xlane.xlu1 %2594 }
 0x82c   :  { %v2603_v15 = vsub.f32 %v2567_v10, %v2595_v37 }
 0x82d   :  { %v11907_v44 = vpop.eup %10881 }
 0x82e   :  { %v2618_v57 = vmul.f32 1.442695, %v2603_v15  ;;  %v2629_v59 = vsel %vm256_vm2, %v11907_v44, 0.0 }
 0x82f   :  { %2630 = vadd.xlane.f32.xlu1 %v2629_v59 }
 0x830   :  { %10885 = vpow2.f32 %v2618_v57 }
 0x831   :  { %v11913_v42 = vpop.f32.mrf.mxu0 }
 0x833   :  { %v11915_v34 = vpop.f32.mrf.mxu0 }
 0x835   :  { %v11917_v40 = vpop.eup %10883  ;;  %v11919_v39 = vpop.f32.mrf.mxu0 }
 0x836   :  { %v2635_v43 = vsel %vm256_vm2, %v11917_v40, 0.0 }
 0x837   :  { %v11923_v22 = vpop.f32.mrf.mxu0  ;;  %2636 = vadd.xlane.f32.xlu1 %v2635_v43 }
 0x839   :  { %v2216_v45 = vpop.f32.mrf.mxu0 }
 0x83a   :  { %v2217_v32 = vadd.f32 %v11879_v7, %v2216_v45 }
 0x83b   :  { %v10052_v48 = vpop.f32.mrf.mxu0 }
 0x83c   :  { %v2572_v50 = vsel %vm256_vm2, %v2217_v32, -inf }
 0x83d   :  { %v11927_v52 = vpop.eup %10885  ;;  %2573 = vmax.xlane.f32.xlu0 %v2572_v50  ;;  %v2219_v46 = vpop.f32.mrf.mxu0 }
 0x83e   :  { %v2641_v54 = vsel %vm256_vm2, %v11927_v52, 0.0 }
 0x83f   :  { %v10053_v55 = vpop.f32.mrf.mxu0  ;;  %2642 = vadd.xlane.f32.xlu1 %v2641_v54 }
 0x841   :  { %v2316_v61 = vpop.f32.mrf.mxu0 }
 0x842   :  { %v2317_v60 = vadd.f32 %v11879_v7, %v2316_v61 }
 0x843   :  { %v10064_v51 = vpop.f32.mrf.mxu0 }
 0x844   :  { %v2578_v63 = vsel %vm256_vm2, %v2317_v60, -inf }
 0x845   :  { %2579 = vmax.xlane.f32.xlu0 %v2578_v63  ;;  %v2319_v4 = vpop.f32.mrf.mxu0 }
 0x847   :  { %v10065_v1 = vpop.f32.mrf.mxu0 }
 0x849   :  { %v2416_v56 = vpop.f32.mrf.mxu0 }
 0x84a   :  { %v11934_v10 = vadd.f32 %v11879_v7, %v2416_v56 }
 0x84b   :  { %v10076_v12 = vpop.f32.mrf.mxu0 }
 0x84c   :  { %v2584_v11 = vsel %vm256_vm2, %v11934_v10, -inf }
 0x84d   :  { %2585 = vmax.xlane.f32.xlu0 %v2584_v11  ;;  %v2419_v8 = vpop.f32.mrf.mxu0 }
 0x84f   :  { %v10077_v62 = vpop.f32.mrf.mxu0 }
 0x850   :  { %2716 = vrot.lane.b32.xlu1 %v11329_v21, %s11170_s18 }
 0x851   :  { %v2516_v16 = vpop.f32.mrf.mxu0 }
 0x852   :  { %v11941_v14 = vadd.f32 %v11879_v7, %v2516_v16 }
 0x853   :  { %v10088_v58 = vpop.f32.mrf.mxu0 }
 0x854   :  { %2764 = vrot.lane.b32.xlu1 %v11333_v24, %s11170_s18  ;;  %v2590_v6 = vsel %vm256_vm2, %v11941_v14, -inf }
 0x855   :  { %2591 = vmax.xlane.f32.xlu0 %v2590_v6  ;;  %v2519_v20 = vpop.f32.mrf.mxu0 }
 0x857   :  { %v10089_v23 = vpop.f32.mrf.mxu0 }
 0x858   :  { %2812 = vrot.lane.b32.xlu1 %v11343_v29, %s11170_s18 }
 0x85c   :  { %2908 = vrot.lane.b32.xlu1 %v11349_v30, %s11170_s18 }
 0x860   :  { %3004 = vrot.lane.b32.xlu1 %v11351_v31, %s11170_s18 }
 0x864   :  { %3146 = vrot.lane.b32.xlu1 %v11325_v18, %s11171_s19 }
 0x868   :  { %3196 = vrot.lane.b32.xlu1 %v11329_v21, %s11171_s19 }
 0x86b   :  { %2668 = vrot.lane.b32.xlu0 %v11325_v18, %s11170_s18 }
 0x86c   :  { %3298 = vrot.lane.b32.xlu1 %v11343_v29, %s11172_s22 }
 0x870   :  { %3296 = vrot.lane.b32.xlu1 %v11343_v29, %s11171_s19 }
 0x874   :  { %3398 = vrot.lane.b32.xlu1 %v11349_v30, %s11172_s22 }
 0x878   :  { %3396 = vrot.lane.b32.xlu1 %v11349_v30, %s11171_s19 }
 0x87c   :  { %3498 = vrot.lane.b32.xlu1 %v11351_v31, %s11172_s22 }
 0x880   :  { %3496 = vrot.lane.b32.xlu1 %v11351_v31, %s11171_s19 }
 0x8b0   :  { %v2625_v7 = vpop.xlane.xlu1 %2624 }
 0x8b1   :  { %10887 = vrcp.f32 %v2625_v7 }
 0x8b8   :  { %v2631_v28 = vpop.xlane.xlu1 %2630 }
 0x8b9   :  { %10889 = vrcp.f32 %v2631_v28 }
 0x8be   :  { %v10888_v37 = vpop.eup %10887 }
 0x8bf   :  { %v2653_v59 = vmul.f32 %v10888_v37, %v11899_v17 }
 0x8c0   :  { %v2637_v33 = vpop.xlane.xlu1 %2636 }
 0x8c1   :  { %10891 = vrcp.f32 %v2637_v33  ;;  %v2661_v46 = vpack.c.bf16 %v2653_v59, %v2653_v59 }
 0x8c6   :  { %v2574_v26 = vpop.xlane.xlu0 %2573  ;;  %v10890_v54 = vpop.eup %10889 }
 0x8c7   :  { %v2596_v35 = vsub.f32 %v2217_v32, %v2574_v26  ;;  %v2655_v17 = vmul.f32 %v10890_v54, %v11907_v44 }
 0x8c8   :  { %v2643_v15 = vpop.xlane.xlu1 %2642 }
 0x8c9   :  { %v2604_v57 = vmul.f32 1.442695, %v2596_v35  ;;  %v2663_v63 = vpack.c.bf16 %v2655_v17, %v2655_v17 }
 0x8cb   :  { %10893 = vpow2.f32 %v2604_v57 }
 0x8cc   :  { %v2717_v43 = vpop.permute.xlu1 %2716  ;;  %10895 = vrcp.f32 %v2643_v15 }
 0x8cd   :  { %v2722_v45 = vsel %vm740_vm3, %v2717_v43, 0 }
 0x8ce   :  { %10103 = vmatpush3.bf16.msra.mxu1 %v2722_v45  ;;  %v2580_v48 = vpop.xlane.xlu0 %2579 }
 0x8cf   :  { %v2598_v50 = vsub.f32 %v2317_v60, %v2580_v48  ;;  %10114 = vmatprep.subr.bf16.mxu1 %v11161_v9  ;;  %v10892_v60 = vpop.eup %10891 }
 0x8d0   :  { %v11974_v55 = vpop.permute.xlu1 %2764  ;;  %v2657_v44 = vmul.f32 %v10892_v60, %v11917_v40 }
 0x8d1   :  { %v2608_v32 = vmul.f32 1.442695, %v2598_v50  ;;  %10105 = vmatmul.mubr.msk.bf16.vlgmr.msra.gmra.mxu1 %vm256_vm2, %v2661_v46  ;;  %v2770_v46 = vsel %vm740_vm3, %v11974_v55, 0 }
 0x8d2   :  { %10116 = vmatprep.mubr.msk.bf16.mxu1 %vm11162_vm1, %v11161_v9  ;;  %v2665_v58 = vpack.c.bf16 %v2657_v44, %v2657_v44 }
 0x8d3   :  { %10897 = vpow2.f32 %v2608_v32 }
 0x8d4   :  { %v2813_v61 = vpop.permute.xlu1 %2812 }
 0x8d5   :  { %v2818_v51 = vsel %vm740_vm3, %v2813_v61, 0 }
 0x8d6   :  { %10115 = vmatpush3.bf16.msra.mxu1 %v2818_v51  ;;  %v2586_v11 = vpop.xlane.xlu0 %2585 }
 0x8d7   :  { %10126 = vmatprep.subr.bf16.mxu1 %v11161_v9  ;;  %v2600_v26 = vsub.f32 %v11934_v10, %v2586_v11 }
 0x8d8   :  { %v10894_v4 = vpop.eup %10893  ;;  %v2909_v1 = vpop.permute.xlu1 %2908 }
 0x8d9   :  { %v2914_v56 = vsel %vm740_vm3, %v2909_v1, 0  ;;  %10117 = vmatmul.mubr.msk.bf16.vlgmr.msra.gmra.mxu1 %vm256_vm2, %v2663_v63  ;;  %v2620_v12 = vsel %vm256_vm2, %v10894_v4, 0.0  ;;  %v10896_v16 = vpop.eup %10895  ;;  %v2612_v35 = vmul.f32 1.442695, %v2600_v26 }
 0x8da   :  { %10127 = vmatpush3.bf16.msra.mxu1 %v2914_v56  ;;  %2621 = vadd.xlane.f32.xlu0 %v2620_v12  ;;  %v2659_v40 = vmul.f32 %v10896_v16, %v11927_v52 }
 0x8db   :  { %10128 = vmatprep.mubr.msk.bf16.mxu1 %vm11162_vm1, %v11161_v9  ;;  %10138 = vmatprep.subr.bf16.mxu1 %v11161_v9  ;;  %10899 = vpow2.f32 %v2612_v35 }
 0x8dc   :  { %v3005_v8 = vpop.permute.xlu1 %3004  ;;  %v2667_v33 = vpack.c.bf16 %v2659_v40, %v2659_v40 }
 0x8dd   :  { %v3010_v20 = vsel %vm740_vm3, %v3005_v8, 0 }
 0x8de   :  { %v2592_v62 = vpop.xlane.xlu0 %2591 }
 0x8df   :  { %v2602_v37 = vsub.f32 %v11941_v14, %v2592_v62 }
 0x8e0   :  { %v10898_v6 = vpop.eup %10897 }
 0x8e1   :  { %10129 = vmatmul.mubr.msk.bf16.vlgmr.msra.gmra.mxu1 %vm256_vm2, %v2665_v58  ;;  %v2626_v23 = vsel %vm256_vm2, %v10898_v6, 0.0  ;;  %v2616_v52 = vmul.f32 1.442695, %v2602_v37 }
 0x8e2   :  { %10139 = vmatpush3.bf16.msra.mxu1 %v3010_v20  ;;  %2627 = vadd.xlane.f32.xlu0 %v2626_v23  ;;  %v2669_v7 = vpop.permute.xlu0 %2668 }
 0x8e3   :  { %v2674_v28 = vsel %vm740_vm3, %v2669_v7, 0  ;;  %10140 = vmatprep.mubr.msk.bf16.mxu1 %vm11162_vm1, %v11161_v9  ;;  %10154 = vmatprep.subr.bf16.mxu1 %v11161_v9  ;;  %10901 = vpow2.f32 %v2616_v52 }
 0x8e4   :  { %10097 = vmatpush3.bf16.msra.mxu0 %v2674_v28 }
 0x8e5   :  { %10108 = vmatprep.subr.bf16.mxu0 %v11161_v9 }
 0x8e8   :  { %v12005_v15 = vpop.eup %10899 }
 0x8e9   :  { %10141 = vmatmul.mubr.msk.bf16.vlgmr.msra.gmra.mxu1 %vm256_vm2, %v2667_v33  ;;  %v2632_v57 = vsel %vm256_vm2, %v12005_v15, 0.0 }
 0x8ea   :  { %10156 = vmatprep.mubr.msk.bf16.mxu1 %vm11162_vm1, %v11161_v9 }
 0x8f0   :  { %v12009_v59 = vpop.eup %10901 }
 0x8f1   :  { %v2638_v43 = vsel %vm256_vm2, %v12009_v59, 0.0 }
 0x8f8   :  { %2860 = vrot.lane.b32.xlu0 %v11335_v25, %s11170_s18 }
 0x917   :  { %2633 = vadd.xlane.f32.xlu0 %v2632_v57 }
 0x91b   :  { %2639 = vadd.xlane.f32.xlu0 %v2638_v43 }
 0x931   :  { %2956 = vrot.lane.b32.xlu0 %v11337_v27, %s11170_s18 }
 0x935   :  { %3148 = vrot.lane.b32.xlu0 %v11325_v18, %s11172_s22 }
 0x939   :  { %3198 = vrot.lane.b32.xlu0 %v11329_v21, %s11172_s22 }
 0x93d   :  { %3248 = vrot.lane.b32.xlu0 %v11333_v24, %s11172_s22 }
 0x941   :  { %3246 = vrot.lane.b32.xlu0 %v11333_v24, %s11171_s19 }
 0x945   :  { %3348 = vrot.lane.b32.xlu0 %v11335_v25, %s11172_s22 }
 0x949   :  { %3346 = vrot.lane.b32.xlu0 %v11335_v25, %s11171_s19 }
 0x94d   :  { %3448 = vrot.lane.b32.xlu0 %v11337_v27, %s11172_s22 }
 0x951   :  { %3446 = vrot.lane.b32.xlu0 %v11337_v27, %s11171_s19 }
 0x963   :  { %v2622_v10 = vpop.xlane.xlu0 %2621 }
 0x964   :  { %10903 = vrcp.f32 %v2622_v10 }
 0x96b   :  { %v2628_v14 = vpop.xlane.xlu0 %2627 }
 0x96c   :  { %10905 = vrcp.f32 %v2628_v14 }
 0x96f   :  { %v2861_v17 = vpop.permute.xlu0 %2860 }
 0x970   :  { %v2866_v51 = vsel %vm740_vm3, %v2861_v17, 0 }
 0x971   :  { %v10904_v45 = vpop.eup %10903 }
 0x972   :  { %v2652_v48 = vmul.f32 %v10904_v45, %v10894_v4 }
 0x974   :  { %v2660_v50 = vpack.c.bf16 %v2652_v48, %v2652_v48 }
 0x976   :  { %10099 = vmatmul.mubr.msk.bf16.vlgmr.msra.gmra.mxu0 %vm256_vm2, %v2660_v50 }
 0x977   :  { %10109 = vmatpush3.bf16.msra.mxu0 %v2770_v46  ;;  %10110 = vmatprep.mubr.msk.bf16.mxu0 %vm11162_vm1, %v11161_v9 }
 0x978   :  { %10120 = vmatprep.subr.bf16.mxu0 %v11161_v9 }
 0x979   :  { %v10906_v54 = vpop.eup %10905 }
 0x97a   :  { %v2654_v32 = vmul.f32 %v10906_v54, %v10898_v6  ;;  %v3147_v6 = vpop.permute.xlu1 %3146 }
 0x97c   :  { %v2662_v61 = vpack.c.bf16 %v2654_v32, %v2654_v32  ;;  %v251_v32 = vld [vmem:[%s13605_s4 + $0x8] sm:$0xf] }
 0x97e   :  { %10111 = vmatmul.mubr.msk.bf16.vlgmr.msra.gmra.mxu0 %vm256_vm2, %v2662_v61  ;;  %v3197_v40 = vpop.permute.xlu1 %3196 }
 0x97f   :  { %10121 = vmatpush3.bf16.msra.mxu0 %v2866_v51  ;;  %10122 = vmatprep.mubr.msk.bf16.mxu0 %vm11162_vm1, %v11161_v9 }
 0x980   :  { %10132 = vmatprep.subr.bf16.mxu0 %v11161_v9 }
 0x982   :  { %v3299_v14 = vpop.permute.xlu1 %3298 }
 0x983   :  { %v3304_v17 = vsel %vm256_vm2, %v3299_v14, 0 }
 0x986   :  { %v3297_v46 = vpop.permute.xlu1 %3296 }
 0x98a   :  { %v3399_v61 = vpop.permute.xlu1 %3398 }
 0x98e   :  { %v3397_v51 = vpop.permute.xlu1 %3396 }
 0x991   :  { %v12042_v55 = vpop.f32.mrf.mxu1 }
 0x993   :  { %v10106_v60 = vpop.f32.mrf.mxu1 }
 0x994   :  { %v3404_v60 = vsel %vm256_vm2, %v3399_v61, 0 }
 0x995   :  { %v2761_v63 = vpop.f32.mrf.mxu1 }
 0x996   :  { %v3499_v63 = vpop.permute.xlu1 %3498 }
 0x997   :  { %v10107_v4 = vpop.f32.mrf.mxu1 }
 0x998   :  { %v3504_v4 = vsel %vm256_vm2, %v3499_v63, 0 }
 0x999   :  { %v12044_v1 = vpop.f32.mrf.mxu1 }
 0x99b   :  { %v10118_v56 = vpop.f32.mrf.mxu1 }
 0x99c   :  { %v3497_v56 = vpop.permute.xlu1 %3496 }
 0x99d   :  { %v2857_v12 = vpop.f32.mrf.mxu1 }
 0x99f   :  { %v10119_v11 = vpop.f32.mrf.mxu1 }
 0x9a0   :  { %v2634_v44 = vpop.xlane.xlu0 %2633 }
 0x9a1   :  { %10907 = vrcp.f32 %v2634_v44  ;;  %v12046_v8 = vpop.f32.mrf.mxu1 }
 0x9a3   :  { %v10130_v62 = vpop.f32.mrf.mxu1 }
 0x9a4   :  { %v2640_v16 = vpop.xlane.xlu0 %2639 }
 0x9a5   :  { %10909 = vrcp.f32 %v2640_v16  ;;  %v2953_v58 = vpop.f32.mrf.mxu1 }
 0x9a7   :  { %v10131_v20 = vpop.f32.mrf.mxu1 }
 0x9a8   :  { %v2957_v23 = vpop.permute.xlu0 %2956 }
 0x9a9   :  { %v12048_v7 = vpop.f32.mrf.mxu1  ;;  %v2962_v48 = vsel %vm740_vm3, %v2957_v23, 0 }
 0x9ab   :  { %v10142_v28 = vpop.f32.mrf.mxu1 }
 0x9ac   :  { %v3149_v33 = vpop.permute.xlu0 %3148 }
 0x9ad   :  { %v3154_v26 = vsel %vm256_vm2, %v3149_v33, 0  ;;  %v3049_v35 = vpop.f32.mrf.mxu1 }
 0x9ae   :  { %v10908_v37 = vpop.eup %10907  ;;  %10155 = vmatpush3.bf16.xpose.msra.mxu1 %v3154_v26  ;;  %v12097_v26 = vld [vmem:[%s13604_s1 + $0x18] sm:$0xff] }
 0x9af   :  { %v10143_v52 = vpop.f32.mrf.mxu1  ;;  %v2656_v57 = vmul.f32 %v10908_v37, %v12005_v15  ;;  %10160 = vmatprep.subr.bf16.mxu1 %v11161_v9 }
 0x9b0   :  { %v3199_v45 = vpop.permute.xlu0 %3198 }
 0x9b1   :  { %v2664_v43 = vpack.c.bf16 %v2656_v57, %v2656_v57  ;;  %v3204_v50 = vsel %vm256_vm2, %v3199_v45, 0 }
 0x9b2   :  { %v10910_v10 = vpop.eup %10909 }
 0x9b3   :  { %10123 = vmatmul.mubr.msk.bf16.vlgmr.msra.gmra.mxu0 %vm256_vm2, %v2664_v43  ;;  %v2658_v15 = vmul.f32 %v10910_v10, %v12009_v59  ;;  %v3069_v59 = vsel %vm740_vm3, %v251_v32, 0 }
 0x9b4   :  { %10133 = vmatpush3.bf16.msra.mxu0 %v2962_v48  ;;  %10134 = vmatprep.mubr.msk.bf16.mxu0 %vm11162_vm1, %v11161_v9  ;;  %v3249_v58 = vpop.permute.xlu0 %3248 }
 0x9b5   :  { %10157 = vmatmul.mubr.msk.bf16.vlgmr.msra.gmra.mxu1 %vm256_vm2, %v3147_v6  ;;  %v2666_v54 = vpack.c.bf16 %v2658_v15, %v2658_v15  ;;  %10762 = vmatprep.subr.msk.bf16.mxu0 %vm740_vm3, %v251_v32  ;;  %v3254_v28 = vsel %vm256_vm2, %v3249_v58, 0 }
 0x9b6   :  { %10161 = vmatpush3.bf16.xpose.msra.mxu1 %v3204_v50  ;;  %10162 = vmatprep.mubr.msk.bf16.mxu1 %vm11162_vm1, %v11161_v9 }
 0x9b7   :  { %10172 = vmatprep.subr.bf16.mxu1 %v11161_v9 }
 0x9b8   :  { %v3247_v10 = vpop.permute.xlu0 %3246 }
 0x9bb   :  { %10135 = vmatmul.mubr.msk.bf16.vlgmr.msra.gmra.mxu0 %vm256_vm2, %v2666_v54 }
 0x9bc   :  { %10145 = vmatpush3.bf16.msra.mxu0 %v3069_v59  ;;  %v3349_v32 = vpop.permute.xlu0 %3348 }
 0x9bd   :  { %10163 = vmatmul.mubr.msk.bf16.vlgmr.msra.gmra.mxu1 %vm256_vm2, %v3197_v40  ;;  %10166 = vmatprep.subr.bf16.mxu0 %v11161_v9 }
 0x9be   :  { %10173 = vmatpush3.bf16.xpose.msra.mxu1 %v3304_v17  ;;  %10174 = vmatprep.mubr.msk.bf16.mxu1 %vm11162_vm1, %v11161_v9 }
 0x9bf   :  { %10184 = vmatprep.subr.bf16.mxu1 %v11161_v9 }
 0x9c5   :  { %10175 = vmatmul.mubr.msk.bf16.vlgmr.msra.gmra.mxu1 %vm256_vm2, %v3297_v46 }
 0x9c6   :  { %10185 = vmatpush3.bf16.xpose.msra.mxu1 %v3404_v60  ;;  %10186 = vmatprep.mubr.msk.bf16.mxu1 %vm11162_vm1, %v11161_v9 }
 0x9c7   :  { %10196 = vmatprep.subr.bf16.mxu1 %v11161_v9 }
 0x9cd   :  { %10187 = vmatmul.mubr.msk.bf16.vlgmr.msra.gmra.mxu1 %vm256_vm2, %v3397_v51 }
 0x9ce   :  { %10197 = vmatpush3.bf16.xpose.msra.mxu1 %v3504_v4  ;;  %10198 = vmatprep.mubr.msk.bf16.mxu1 %vm11162_vm1, %v11161_v9 }
 0x9cf   :  { %10208 = vmatprep.subr.bf16.mxu1 %v11161_v9 }
 0x9d5   :  { %10199 = vmatmul.mubr.msk.bf16.vlgmr.msra.gmra.mxu1 %vm256_vm2, %v3497_v56  ;;  %v3347_v56 = vpop.permute.xlu0 %3346 }
 0x9d6   :  { %10210 = vmatprep.mubr.msk.bf16.mxu1 %vm11162_vm1, %v11161_v9 }
 0x9d9   :  { %v3449_v58 = vpop.permute.xlu0 %3448 }
 0xa36   :  { %v2710_v12 = vpop.f32.mrf.mxu0 }
 0xa37   :  { %v3052_v11 = vpack.c.bf16 %v12042_v55, %v2710_v12  ;;  %v3354_v12 = vsel %vm256_vm2, %v3349_v32, 0 }
 0xa38   :  { %v10100_v44 = vpop.f32.mrf.mxu0 }
 0xa39   :  { %10146 = vmatprep.mubr.msk.bf16.mxu0 %vm256_vm2, %v3052_v11 }
 0xa3a   :  { %v2713_v62 = vpop.f32.mrf.mxu0 }
 0xa3c   :  { %v10101_v16 = vpop.f32.mrf.mxu0 }
 0xa3e   :  { %v2806_v6 = vpop.f32.mrf.mxu0 }
 0xa3f   :  { %v3053_v20 = vpack.c.bf16 %v12044_v1, %v2806_v6 }
 0xa40   :  { %v10112_v23 = vpop.f32.mrf.mxu0 }
 0xa41   :  { %10147 = vmatmul.mubr.msk.bf16.vlgmr.msra.gmra.mxu0 %vm256_vm2, %v3053_v20  ;;  %v3454_v23 = vsel %vm256_vm2, %v3449_v58, 0 }
 0xa42   :  { %10167 = vmatpush3.bf16.xpose.msra.mxu0 %v3254_v28  ;;  %v2809_v40 = vpop.f32.mrf.mxu0 }
 0xa43   :  { %10178 = vmatprep.subr.bf16.mxu0 %v11161_v9 }
 0xa44   :  { %v10113_v33 = vpop.f32.mrf.mxu0 }
 0xa73   :  { %v2902_v55 = vpop.f32.mrf.mxu0 }
 0xa74   :  { %v3054_v35 = vpack.c.bf16 %v12046_v8, %v2902_v55 }
 0xa75   :  { %v10124_v37 = vpop.f32.mrf.mxu0  ;;  %v3190_v1 = vpop.f32.mrf.mxu1 }
 0xa76   :  { %v12101_v52 = vadd.f32 %v12097_v26, %v3190_v1  ;;  %10150 = vmatprep.mubr.msk.bf16.mxu0 %vm256_vm2, %v3054_v35  ;;  %v3447_v37 = vpop.permute.xlu0 %3446 }
 0xa77   :  { %v2905_v57 = vpop.f32.mrf.mxu0  ;;  %v10158_v43 = vpop.f32.mrf.mxu1 }
 0xa78   :  { %v3546_v14 = vsel %vm256_vm2, %v12101_v52, -inf }
 0xa79   :  { %v10125_v45 = vpop.f32.mrf.mxu0  ;;  %3547 = vmax.xlane.f32.xlu0 %v3546_v14  ;;  %v3193_v48 = vpop.f32.mrf.mxu1 }
 0xa7a   :  { %v2148_v48 = vadd.f32 %v11850_v38, %v11897_v2 }
 0xa7b   :  { %v2998_v50 = vpop.f32.mrf.mxu0  ;;  %v10159_v15 = vpop.f32.mrf.mxu1 }
 0xa7c   :  { %v3055_v8 = vpack.c.bf16 %v12048_v7, %v2998_v50  ;;  %v2140_v15 = vadd.f32 %v11852_v13, %v11903_v36 }
 0xa7d   :  { %v10136_v46 = vpop.f32.mrf.mxu0  ;;  %v3240_v54 = vpop.f32.mrf.mxu1 }
 0xa7e   :  { %v3241_v17 = vadd.f32 %v12097_v26, %v3240_v54  ;;  %10151 = vmatmul.mubr.msk.bf16.gmra.mxu0 %vm256_vm2, %v3055_v8 }
 0xa7f   :  { %v3001_v59 = vpop.f32.mrf.mxu0  ;;  %v10164_v61 = vpop.f32.mrf.mxu1  ;;  %10168 = vmatprep.mubr.msk.bf16.mxu0 %vm11162_vm1, %v11161_v9 }
 0xa80   :  { %v3549_v51 = vsel %vm256_vm2, %v3241_v17, -inf  ;;  %v2151_v59 = vadd.f32 %v11856_v49, %v11905_v19 }
 0xa81   :  { %v10137_v60 = vpop.f32.mrf.mxu0  ;;  %3550 = vmax.xlane.f32.xlu1 %v3549_v51  ;;  %v3243_v63 = vpop.f32.mrf.mxu1 }
 0xa83   :  { %v10165_v4 = vpop.f32.mrf.mxu1 }
 0xa85   :  { %v3340_v7 = vpop.f32.mrf.mxu1 }
 0xa86   :  { %v3341_v11 = vadd.f32 %v12097_v26, %v3340_v7  ;;  %10169 = vmatmul.mubr.msk.bf16.vlgmr.msra.gmra.mxu0 %vm256_vm2, %v3247_v10 }
 0xa87   :  { %10179 = vmatpush3.bf16.xpose.msra.mxu0 %v3354_v12  ;;  %v10176_v44 = vpop.f32.mrf.mxu1  ;;  %10180 = vmatprep.mubr.msk.bf16.mxu0 %vm11162_vm1, %v11161_v9 }
 0xa88   :  { %v3555_v62 = vsel %vm256_vm2, %v3341_v11, -inf  ;;  %10190 = vmatprep.subr.bf16.mxu0 %v11161_v9 }
 0xa89   :  { %3556 = vmax.xlane.f32.xlu0 %v3555_v62  ;;  %v3343_v16 = vpop.f32.mrf.mxu1 }
 0xa8b   :  { %v10177_v6 = vpop.f32.mrf.mxu1 }
 0xa8d   :  { %v3440_v20 = vpop.f32.mrf.mxu1 }
 0xa8e   :  { %v3441_v28 = vadd.f32 %v12097_v26, %v3440_v20  ;;  %10181 = vmatmul.mubr.msk.bf16.vlgmr.msra.gmra.mxu0 %vm256_vm2, %v3347_v56 }
 0xa8f   :  { %10191 = vmatpush3.bf16.xpose.msra.mxu0 %v3454_v23  ;;  %v10188_v40 = vpop.f32.mrf.mxu1  ;;  %10192 = vmatprep.mubr.msk.bf16.mxu0 %vm11162_vm1, %v11161_v9 }
 0xa90   :  { %v3561_v33 = vsel %vm256_vm2, %v3441_v28, -inf  ;;  %10202 = vmatprep.subr.bf16.mxu0 %v11161_v9 }
 0xa91   :  { %3562 = vmax.xlane.f32.xlu1 %v3561_v33  ;;  %v3443_v55 = vpop.f32.mrf.mxu1 }
 0xa92   :  { %v2164_v55 = vadd.f32 %v11863_v53, %v11913_v42 }
 0xa93   :  { %v10189_v35 = vpop.f32.mrf.mxu1 }
 0xa95   :  { %v3540_v1 = vpop.f32.mrf.mxu1 }
 0xa96   :  { %v3541_v57 = vadd.f32 %v12097_v26, %v3540_v1  ;;  %10193 = vmatmul.mubr.msk.bf16.vlgmr.msra.gmra.mxu0 %vm256_vm2, %v3447_v37  ;;  %v2156_v37 = vadd.f32 %v11865_v3, %v11915_v34 }
 0xa97   :  { %v10200_v43 = vpop.f32.mrf.mxu1  ;;  %10204 = vmatprep.mubr.msk.bf16.mxu0 %vm11162_vm1, %v11161_v9 }
 0xa98   :  { %v3567_v10 = vsel %vm256_vm2, %v3541_v57, -inf  ;;  %v2167_v43 = vadd.f32 %v11869_v0, %v11919_v39 }
 0xa99   :  { %3568 = vmax.xlane.f32.xlu1 %v3567_v10  ;;  %v3543_v14 = vpop.f32.mrf.mxu1 }
 0xa9b   :  { %v10201_v45 = vpop.f32.mrf.mxu1 }
 0xb01   :  { %v10148_v50 = vpop.f32.mrf.mxu0 }
 0xb02   :  { %v12135_v8 = vadd.f32 %v10148_v50, %v2148_v48  ;;  %v3548_v46 = vpop.xlane.xlu0 %3547 }
 0xb03   :  { %v3570_v54 = vsub.f32 %v12101_v52, %v3548_v46  ;;  %v3105_v32 = vpop.f32.mrf.mxu0 }
 0xb04   :  { %v12140_v61 = vadd.f32 %v3105_v32, %v2140_v15 }
 0xb05   :  { %v3578_v51 = vmul.f32 1.442695, %v3570_v54  ;;  %v10149_v60 = vpop.f32.mrf.mxu0 }
 0xb06   :  { %v12142_v63 = vadd.f32 %v10149_v60, %v2151_v59 }
 0xb07   :  { %10911 = vpow2.f32 %v3578_v51  ;;  %v12164_v33 = vpop.f32.mrf.mxu0 }
 0xb0a   :  { %v3551_v38 = vpop.xlane.xlu1 %3550 }
 0xb0b   :  { %v3571_v2 = vsub.f32 %v3241_v17, %v3551_v38 }
 0xb0d   :  { %v3580_v4 = vmul.f32 1.442695, %v3571_v2 }
 0xb0f   :  { %10913 = vpow2.f32 %v3580_v4 }
 0xb12   :  { %v3557_v13 = vpop.xlane.xlu0 %3556 }
 0xb13   :  { %v3573_v36 = vsub.f32 %v3341_v11, %v3557_v13 }
 0xb14   :  { %v12144_v56 = vpop.eup %10911 }
 0xb15   :  { %v3584_v52 = vmul.f32 1.442695, %v3573_v36  ;;  %v3594_v7 = vsel %vm256_vm2, %v12144_v56, 0.0 }
 0xb16   :  { %3595 = vadd.xlane.f32.xlu0 %v3594_v7 }
 0xb17   :  { %10915 = vpow2.f32 %v3584_v52 }
 0xb1a   :  { %v3563_v49 = vpop.xlane.xlu1 %3562 }
 0xb1b   :  { %v3575_v19 = vsub.f32 %v3441_v28, %v3563_v49 }
 0xb1c   :  { %v12148_v12 = vpop.eup %10913 }
 0xb1d   :  { %v3588_v44 = vmul.f32 1.442695, %v3575_v19  ;;  %v3597_v17 = vsel %vm256_vm2, %v12148_v12, 0.0 }
 0xb1e   :  { %3598 = vadd.xlane.f32.xlu1 %v3597_v17 }
 0xb1f   :  { %10917 = vpow2.f32 %v3588_v44 }
 0xb22   :  { %v3569_v62 = vpop.xlane.xlu1 %3568 }
 0xb23   :  { %v3577_v11 = vsub.f32 %v3541_v57, %v3569_v62 }
 0xb24   :  { %v12152_v16 = vpop.eup %10915 }
 0xb25   :  { %v3592_v58 = vmul.f32 1.442695, %v3577_v11  ;;  %v3603_v6 = vsel %vm256_vm2, %v12152_v16, 0.0 }
 0xb26   :  { %3604 = vadd.xlane.f32.xlu1 %v3603_v6 }
 0xb27   :  { %10919 = vpow2.f32 %v3592_v58 }
 0xb2c   :  { %v12156_v20 = vpop.eup %10917 }
 0xb2d   :  { %v3609_v23 = vsel %vm256_vm2, %v12156_v20, 0.0 }
 0xb2e   :  { %3610 = vadd.xlane.f32.xlu1 %v3609_v23 }
 0xb34   :  { %v12160_v28 = vpop.eup %10919 }
 0xb35   :  { %v3615_v40 = vsel %vm256_vm2, %v12160_v28, 0.0 }
 0xb36   :  { %3616 = vadd.xlane.f32.xlu1 %v3615_v40 }
 0xb3e   :  { %v10152_v35 = vpop.f32.mrf.mxu0 }
 0xb3f   :  { %v12170_v1 = vadd.f32 %v10152_v35, %v2164_v55 }
 0xb40   :  { %v3121_v57 = vpop.f32.mrf.mxu0 }
 0xb41   :  { %v12174_v10 = vadd.f32 %v3121_v57, %v2156_v37 }
 0xb42   :  { %v10153_v14 = vpop.f32.mrf.mxu0 }
 0xb43   :  { %v12176_v45 = vadd.f32 %v10153_v14, %v2167_v43 }
 0xb44   :  { %v12178_v48 = vpop.f32.mrf.mxu0 }
 0xb46   :  { %v3290_v50 = vpop.f32.mrf.mxu0 }
 0xb47   :  { %v12181_v53 = vadd.f32 %v12097_v26, %v3290_v50  ;;  %3690 = vrot.lane.b32.xlu1 %v11329_v21, %s11173_s13 }
 0xb48   :  { %v10170_v3 = vpop.f32.mrf.mxu0 }
 0xb49   :  { %v3552_v42 = vsel %vm256_vm2, %v12181_v53, -inf }
 0xb4a   :  { %v3293_v0 = vpop.f32.mrf.mxu0  ;;  %3553 = vmax.xlane.f32.xlu0 %v3552_v42 }
 0xb4b   :  { %3738 = vrot.lane.b32.xlu1 %v11333_v24, %s11173_s13 }
 0xb4c   :  { %v10171_v34 = vpop.f32.mrf.mxu0 }
 0xb4e   :  { %v3390_v39 = vpop.f32.mrf.mxu0 }
 0xb4f   :  { %v12190_v15 = vadd.f32 %v12097_v26, %v3390_v39  ;;  %3786 = vrot.lane.b32.xlu1 %v11343_v29, %s11173_s13 }
 0xb50   :  { %v10182_v46 = vpop.f32.mrf.mxu0 }
 0xb51   :  { %v3558_v21 = vsel %vm256_vm2, %v12190_v15, -inf }
 0xb52   :  { %v3393_v54 = vpop.f32.mrf.mxu0  ;;  %3559 = vmax.xlane.f32.xlu0 %v3558_v21 }
 0xb53   :  { %3882 = vrot.lane.b32.xlu1 %v11349_v30, %s11173_s13 }
 0xb54   :  { %v10183_v32 = vpop.f32.mrf.mxu0 }
 0xb56   :  { %v3490_v59 = vpop.f32.mrf.mxu0 }
 0xb57   :  { %v12199_v24 = vadd.f32 %v12097_v26, %v3490_v59  ;;  %3978 = vrot.lane.b32.xlu1 %v11351_v31, %s11173_s13 }
 0xb58   :  { %v10194_v51 = vpop.f32.mrf.mxu0 }
 0xb59   :  { %v3564_v29 = vsel %vm256_vm2, %v12199_v24, -inf }
 0xb5a   :  { %v3493_v60 = vpop.f32.mrf.mxu0  ;;  %3565 = vmax.xlane.f32.xlu0 %v3564_v29 }
 0xb5c   :  { %v10195_v38 = vpop.f32.mrf.mxu0 }
 0xb70   :  { %3642 = vrot.lane.b32.xlu0 %v11325_v18, %s11173_s13 }
 0xb9f   :  { %v3596_v11 = vpop.xlane.xlu0 %3595 }
 0xba7   :  { %v3599_v2 = vpop.xlane.xlu1 %3598 }
 0xba8   :  { %10921 = vrcp.f32 %v3599_v2 }
 0xbaf   :  { %v3605_v30 = vpop.xlane.xlu1 %3604 }
 0xbb0   :  { %10923 = vrcp.f32 %v3605_v30 }
 0xbb5   :  { %v10922_v26 = vpop.eup %10921 }
 0xbb6   :  { %v3627_v36 = vmul.f32 %v10922_v26, %v12148_v12 }
 0xbb7   :  { %v3611_v4 = vpop.xlane.xlu1 %3610 }
 0xbb8   :  { %10925 = vrcp.f32 %v3611_v4  ;;  %v3635_v7 = vpack.c.bf16 %v3627_v36, %v3627_v36 }
 0xbbd   :  { %v10924_v49 = vpop.eup %10923 }
 0xbbe   :  { %v3629_v18 = vmul.f32 %v10924_v49, %v12152_v16 }
 0xbbf   :  { %v3617_v13 = vpop.xlane.xlu1 %3616 }
 0xbc0   :  { %10927 = vrcp.f32 %v3617_v13  ;;  %v3637_v17 = vpack.c.bf16 %v3629_v18, %v3629_v18 }
 0xbc1   :  { %10929 = vrcp.f32 %v3596_v11 }
 0xbc3   :  { %v3691_v31 = vpop.permute.xlu1 %3690 }
 0xbc4   :  { %v3696_v52 = vsel %vm740_vm3, %v3691_v31, 0 }
 0xbc5   :  { %10209 = vmatpush3.bf16.msra.mxu1 %v3696_v52  ;;  %v10926_v62 = vpop.eup %10925 }
 0xbc6   :  { %10220 = vmatprep.subr.bf16.mxu1 %v11161_v9  ;;  %v3631_v16 = vmul.f32 %v10926_v62, %v12156_v20 }
 0xbc7   :  { %v3739_v19 = vpop.permute.xlu1 %3738 }
 0xbc8   :  { %10211 = vmatmul.mubr.msk.bf16.vlgmr.msra.gmra.mxu1 %vm256_vm2, %v3635_v7  ;;  %v3639_v35 = vpack.c.bf16 %v3631_v16, %v3631_v16 }
 0xbc9   :  { %10222 = vmatprep.mubr.msk.bf16.mxu1 %vm11162_vm1, %v11161_v9 }
 0xbcb   :  { %v3787_v44 = vpop.permute.xlu1 %3786 }
 0xbcc   :  { %v3792_v12 = vsel %vm740_vm3, %v3787_v44, 0 }
 0xbcd   :  { %10221 = vmatpush3.bf16.msra.mxu1 %v3792_v12  ;;  %v10928_v57 = vpop.eup %10927 }
 0xbce   :  { %10232 = vmatprep.subr.bf16.mxu1 %v11161_v9  ;;  %v3633_v20 = vmul.f32 %v10928_v57, %v12160_v28  ;;  %v3744_v28 = vsel %vm740_vm3, %v3739_v19, 0 }
 0xbcf   :  { %v3883_v58 = vpop.permute.xlu1 %3882 }
 0xbd0   :  { %v3888_v6 = vsel %vm740_vm3, %v3883_v58, 0  ;;  %10223 = vmatmul.mubr.msk.bf16.vlgmr.msra.gmra.mxu1 %vm256_vm2, %v3637_v17  ;;  %v3641_v14 = vpack.c.bf16 %v3633_v20, %v3633_v20 }
 0xbd1   :  { %10233 = vmatpush3.bf16.msra.mxu1 %v3888_v6  ;;  %10234 = vmatprep.mubr.msk.bf16.mxu1 %vm11162_vm1, %v11161_v9 }
 0xbd2   :  { %10244 = vmatprep.subr.bf16.mxu1 %v11161_v9 }
 0xbd3   :  { %v3554_v23 = vpop.xlane.xlu0 %3553  ;;  %v3979_v55 = vpop.permute.xlu1 %3978 }
 0xbd4   :  { %v3572_v40 = vsub.f32 %v12181_v53, %v3554_v23  ;;  %v3984_v43 = vsel %vm740_vm3, %v3979_v55, 0  ;;  %v10930_v53 = vpop.eup %10929 }
 0xbd5   :  { %v3626_v0 = vmul.f32 %v10930_v53, %v12144_v56 }
 0xbd6   :  { %v3582_v37 = vmul.f32 1.442695, %v3572_v40 }
 0xbd7   :  { %v3634_v21 = vpack.c.bf16 %v3626_v0, %v3626_v0 }
 0xbd8   :  { %10931 = vpow2.f32 %v3582_v37  ;;  %10235 = vmatmul.mubr.msk.bf16.vlgmr.msra.gmra.mxu1 %vm256_vm2, %v3639_v35 }
 0xbd9   :  { %10245 = vmatpush3.bf16.msra.mxu1 %v3984_v43  ;;  %10246 = vmatprep.mubr.msk.bf16.mxu1 %vm11162_vm1, %v11161_v9 }
 0xbdb   :  { %v3560_v50 = vpop.xlane.xlu0 %3559 }
 0xbdc   :  { %v3574_v56 = vsub.f32 %v12190_v15, %v3560_v50  ;;  %v252_v50 = vld [vmem:[%s13605_s4 + $0xc] sm:$0xf] }
 0xbde   :  { %v3586_v54 = vmul.f32 1.442695, %v3574_v56 }
 0xbe0   :  { %10247 = vmatmul.mubr.msk.bf16.vlgmr.msra.gmra.mxu1 %vm256_vm2, %v3641_v14  ;;  %10933 = vpow2.f32 %v3586_v54 }
 0xbe3   :  { %v3566_v3 = vpop.xlane.xlu0 %3565 }
 0xbe4   :  { %v3576_v32 = vsub.f32 %v12199_v24, %v3566_v3 }
 0xbe5   :  { %v10932_v42 = vpop.eup %10931 }
 0xbe6   :  { %v3600_v34 = vsel %vm256_vm2, %v10932_v42, 0.0  ;;  %v3590_v59 = vmul.f32 1.442695, %v3576_v32 }
 0xbe7   :  { %3601 = vadd.xlane.f32.xlu0 %v3600_v34  ;;  %v3643_v39 = vpop.permute.xlu0 %3642  ;;  %v4043_v34 = vsel %vm740_vm3, %v252_v50, 0 }
 0xbe8   :  { %v3648_v46 = vsel %vm740_vm3, %v3643_v39, 0  ;;  %10935 = vpow2.f32 %v3590_v59 }
 0xbe9   :  { %10203 = vmatpush3.bf16.msra.mxu0 %v3648_v46 }
 0xbea   :  { %10214 = vmatprep.subr.bf16.mxu0 %v11161_v9 }
 0xbec   :  { %10205 = vmatmul.mubr.msk.bf16.vlgmr.msra.gmra.mxu0 %vm256_vm2, %v3634_v21 }
 0xbed   :  { %10215 = vmatpush3.bf16.msra.mxu0 %v3744_v28  ;;  %10216 = vmatprep.mubr.msk.bf16.mxu0 %vm11162_vm1, %v11161_v9  ;;  %v10934_v51 = vpop.eup %10933 }
 0xbee   :  { %10226 = vmatprep.subr.bf16.mxu0 %v11161_v9  ;;  %v3606_v29 = vsel %vm256_vm2, %v10934_v51, 0.0 }
 0xbf5   :  { %v10936_v60 = vpop.eup %10935 }
 0xbf6   :  { %v3612_v38 = vsel %vm256_vm2, %v10936_v60, 0.0 }
 0xbfd   :  { %3834 = vrot.lane.b32.xlu0 %v11335_v25, %s11173_s13 }
 0xc1c   :  { %3607 = vadd.xlane.f32.xlu0 %v3606_v29 }
 0xc20   :  { %3613 = vadd.xlane.f32.xlu0 %v3612_v38 }
 0xc36   :  { %3930 = vrot.lane.b32.xlu0 %v11337_v27, %s11173_s13 }
 0xc70   :  { %v3602_v25 = vpop.xlane.xlu0 %3601 }
 0xc71   :  { %10937 = vrcp.f32 %v3602_v25 }
 0xc74   :  { %v3835_v30 = vpop.permute.xlu0 %3834 }
 0xc75   :  { %v3840_v4 = vsel %vm740_vm3, %v3835_v30, 0 }
 0xc7e   :  { %v10938_v15 = vpop.eup %10937 }
 0xc7f   :  { %v3628_v2 = vmul.f32 %v10938_v15, %v10932_v42 }
 0xc81   :  { %v3636_v24 = vpack.c.bf16 %v3628_v2, %v3628_v2 }
 0xc83   :  { %10217 = vmatmul.mubr.msk.bf16.vlgmr.msra.gmra.mxu0 %vm256_vm2, %v3636_v24 }
 0xc84   :  { %10227 = vmatpush3.bf16.msra.mxu0 %v3840_v4  ;;  %10228 = vmatprep.mubr.msk.bf16.mxu0 %vm11162_vm1, %v11161_v9 }
 0xc85   :  { %10238 = vmatprep.subr.bf16.mxu0 %v11161_v9 }
 0xc88   :  { %v3732_v26 = vpop.f32.mrf.mxu1 }
 0xc8a   :  { %v10212_v13 = vpop.f32.mrf.mxu1 }
 0xc8c   :  { %v3735_v36 = vpop.f32.mrf.mxu1 }
 0xc8e   :  { %v10213_v27 = vpop.f32.mrf.mxu1 }
 0xc90   :  { %v3828_v31 = vpop.f32.mrf.mxu1 }
 0xc92   :  { %v10224_v52 = vpop.f32.mrf.mxu1 }
 0xc94   :  { %v3831_v7 = vpop.f32.mrf.mxu1 }
 0xc95   :  { %v11154_v7 = vld [vmem:[%s13601_s0] sm:$0xff] }
 0xc96   :  { %v10225_v49 = vpop.f32.mrf.mxu1 }
 0xc98   :  { %v3924_v19 = vpop.f32.mrf.mxu1 }
 0xc9a   :  { %v10236_v18 = vpop.f32.mrf.mxu1 }
 0xc9b   :  { %v11156_v18 = vld [vmem:[%s13601_s0 + $0x8] sm:$0xff] }
 0xc9c   :  { %v3927_v44 = vpop.f32.mrf.mxu1 }
 0xc9e   :  { %v10237_v12 = vpop.f32.mrf.mxu1 }
 0xca0   :  { %v4020_v17 = vpop.f32.mrf.mxu1 }
 0xca2   :  { %v10248_v62 = vpop.f32.mrf.mxu1 }
 0xca4   :  { %v4023_v11 = vpop.f32.mrf.mxu1 }
 0xca5   :  { %v3608_v58 = vpop.xlane.xlu0 %3607 }
 0xca6   :  { %10939 = vrcp.f32 %v3608_v58  ;;  %v10249_v6 = vpop.f32.mrf.mxu1 }
 0xca9   :  { %v3614_v16 = vpop.xlane.xlu0 %3613 }
 0xcaa   :  { %10941 = vrcp.f32 %v3614_v16  ;;  %v10783_v16 = vld [vmem:[%s13606_s6 + $0x8] sm:$0xff]  }
 0xcab   :  { %10260 = vmatprep.subr.bf16.mxu1 %v10783_v16 }
 0xcac   :  { %v3684_v23 = vpop.f32.mrf.mxu0  ;;  %10261 = vmatpush3.bf16.msra.mxu1 %v10783_v16 }
 0xcad   :  { %v3931_v43 = vpop.permute.xlu0 %3930  ;;  %v4026_v0 = vpack.c.bf16 %v3732_v26, %v3684_v23  ;;  %v2143_v26 = vadd.f32 %v11861_v47, %v11911_v41  ;;  %v10784_v23 = vld [vmem:[%s13606_s6] sm:$0xff]  }
 0xcae   :  { %v10206_v40 = vpop.f32.mrf.mxu0  ;;  %v3936_v53 = vsel %vm740_vm3, %v3931_v43, 0  ;;  %10262 = vmatprep.subr.bf16.mxu1 %v10784_v23 }
 0xcaf   :  { %v3137_v27 = vadd.f32 %v12164_v33, %v2143_v26  ;;  %v11155_v33 = vld [vmem:[%s13601_s0 + $0x18] sm:$0xff] }
 0xcb0   :  { %v3687_v55 = vpop.f32.mrf.mxu0  ;;  %10263 = vmatpush3.bf16.msra.mxu1 %v10784_v23 }
 0xcb2   :  { %v10207_v35 = vpop.f32.mrf.mxu0 }
 0xcb3   :  { %v10940_v37 = vpop.eup %10939 }
 0xcb4   :  { %v3630_v57 = vmul.f32 %v10940_v37, %v10934_v51  ;;  %v2159_v37 = vadd.f32 %v11874_v5, %v11923_v22 }
 0xcb6   :  { %v3638_v20 = vpack.c.bf16 %v3630_v57, %v3630_v57 }
 0xcb7   :  { %v10942_v14 = vpop.eup %10941 }
 0xcb8   :  { %10229 = vmatmul.mubr.msk.bf16.vlgmr.msra.gmra.mxu0 %vm256_vm2, %v3638_v20  ;;  %v3632_v3 = vmul.f32 %v10942_v14, %v10936_v60  ;;  %v3141_v20 = vadd.f32 %v12178_v48, %v2159_v37  ;;  %v11157_v14 = vld [vmem:[%s13601_s0 + $0x30] sm:$0xff]  ;;  %v11159_v48 = vld [vmem:[%s13601_s0 + $0x38] sm:$0xff] }
 0xcb9   :  { %10239 = vmatpush3.bf16.msra.mxu0 %v3936_v53  ;;  %10240 = vmatprep.mubr.msk.bf16.mxu0 %vm11162_vm1, %v11161_v9  ;;  %v11158_v53 = vld [vmem:[%s13601_s0 + $0x20] sm:$0xff] }
 0xcba   :  { %10763 = vmatprep.subr.msk.bf16.mxu0 %vm740_vm3, %v252_v50  ;;  %v3640_v42 = vpack.c.bf16 %v3632_v3, %v3632_v3 }
 0xcc0   :  { %10241 = vmatmul.mubr.msk.bf16.vlgmr.msra.gmra.mxu0 %vm256_vm2, %v3640_v42 }
 0xcc1   :  { %10252 = vmatprep.mubr.msk.bf16.mxu0 %vm256_vm2, %v4026_v0  ;;  %10251 = vmatpush3.bf16.msra.mxu0 %v4043_v34  ;;  %v11160_v0 = vld [vmem:[%s13601_s0 + $0x28] sm:$0xff] }
 0xd43   :  { %v3780_v39 = vpop.f32.mrf.mxu0 }
 0xd44   :  { %v4027_v46 = vpack.c.bf16 %v3828_v31, %v3780_v39  ;;  %v11153_v31 = vld [vmem:[%s13601_s0 + $0x10] sm:$0xff] }
 0xd45   :  { %v10218_v21 = vpop.f32.mrf.mxu0 }
 0xd46   :  { %10253 = vmatmul.mubr.msk.bf16.vlgmr.msra.gmra.mxu0 %vm256_vm2, %v4027_v46 }
 0xd47   :  { %v3783_v28 = vpop.f32.mrf.mxu0 }
 0xd49   :  { %v10219_v56 = vpop.f32.mrf.mxu0 }
 0xd78   :  { %v3876_v54 = vpop.f32.mrf.mxu0 }
 0xd79   :  { %v4028_v32 = vpack.c.bf16 %v3924_v19, %v3876_v54 }
 0xd7a   :  { %v10230_v59 = vpop.f32.mrf.mxu0 }
 0xd7b   :  { %10256 = vmatprep.mubr.msk.bf16.mxu0 %vm256_vm2, %v4028_v32 }
 0xd7c   :  { %v3879_v51 = vpop.f32.mrf.mxu0 }
 0xd7e   :  { %v10231_v29 = vpop.f32.mrf.mxu0 }
 0xd80   :  { %v3972_v60 = vpop.f32.mrf.mxu0 }
 0xd81   :  { %v4029_v38 = vpack.c.bf16 %v4020_v17, %v3972_v60 }
 0xd82   :  { %v10242_v25 = vpop.f32.mrf.mxu0 }
 0xd83   :  { %10257 = vmatmul.mubr.msk.bf16.gmra.mxu0 %vm256_vm2, %v4029_v38 }
 0xd84   :  { %v3975_v15 = vpop.f32.mrf.mxu0 }
 0xd86   :  { %v10243_v2 = vpop.f32.mrf.mxu0 }
 0xe06   :  { %v10254_v30 = vpop.f32.mrf.mxu0 }
 0xe07   :  { %v4112_v24 = vadd.f32 %v10254_v30, %v12135_v8 }
 0xe08   :  { %v4079_v4 = vpop.f32.mrf.mxu0 }
 0xe09   :  { %v4110_v13 = vadd.f32 %v4079_v4, %v12140_v61  ;;  %v12273_v52 = vadd.f32 %v11153_v31, %v4112_v24  ;;  %v9314_v31 = vld [vmem:[%s13607_s5] ss:$0 sm:$0xff] }
 0xe0a   :  { %v10255_v36 = vpop.f32.mrf.mxu0 }
 0xe0b   :  { %v12278_v8 = vadd.f32 %v11154_v7, %v4110_v13  ;;  %v4113_v49 = vadd.f32 %v10255_v36, %v12142_v63  ;;  %v4129_v63 = vmul.f32 %v12273_v52, %v12273_v52 }
 0xe0c   :  { %v4082_v47 = vpop.f32.mrf.mxu0 }
 0xe0d   :  { %v4111_v41 = vadd.f32 %v4082_v47, %v3137_v27  ;;  %v4127_v61 = vmul.f32 %v12278_v8, %v12278_v8  ;;  %v12286_v19 = vadd.f32 %v11155_v33, %v4113_v49  ;;  %v4141_v62 = vsel %vm56_vm0, %v4129_v63, 0.0 }
 0xe0f   :  { %v12291_v44 = vadd.f32 %v11156_v18, %v4111_v41  ;;  %v4135_v12 = vsel %vm56_vm0, %v4127_v61, 0.0  ;;  %v4130_v58 = vmul.f32 %v12286_v19, %v12286_v19 }
 0xe10   :  { %4136 = vadd.xlane.f32.xlu0 %v4135_v12 }
 0xe11   :  { %v4128_v17 = vmul.f32 %v12291_v44, %v12291_v44  ;;  %v4144_v6 = vsel %vm56_vm0, %v4130_v58, 0.0 }
 0xe13   :  { %v4138_v11 = vsel %vm56_vm0, %v4128_v17, 0.0 }
 0xe14   :  { %4142 = vadd.xlane.f32.xlu0 %v4141_v62  ;;  %4139 = vadd.xlane.f32.xlu1 %v4138_v11 }
 0xe18   :  { %4145 = vadd.xlane.f32.xlu0 %v4144_v6 }
 0xe43   :  { %v10258_v40 = vpop.f32.mrf.mxu0 }
 0xe44   :  { %v4116_v55 = vadd.f32 %v10258_v40, %v12170_v1 }
 0xe45   :  { %v4095_v35 = vpop.f32.mrf.mxu0 }
 0xe46   :  { %v4114_v57 = vadd.f32 %v4095_v35, %v12174_v10  ;;  %v12317_v50 = vadd.f32 %v11157_v14, %v4116_v55 }
 0xe47   :  { %v10259_v43 = vpop.f32.mrf.mxu0 }
 0xe48   :  { %v12322_v1 = vadd.f32 %v11158_v53, %v4114_v57  ;;  %v4117_v3 = vadd.f32 %v10259_v43, %v12176_v45  ;;  %v4133_v45 = vmul.f32 %v12317_v50, %v12317_v50 }
 0xe49   :  { %v4098_v5 = vpop.f32.mrf.mxu0 }
 0xe4a   :  { %v4115_v22 = vadd.f32 %v4098_v5, %v3141_v20  ;;  %v4131_v10 = vmul.f32 %v12322_v1, %v12322_v1  ;;  %v12330_v42 = vadd.f32 %v11159_v48, %v4117_v3  ;;  %v4153_v21 = vsel %vm56_vm0, %v4133_v45, 0.0 }
 0xe4c   :  { %v12335_v34 = vadd.f32 %v11160_v0, %v4115_v22  ;;  %v4147_v39 = vsel %vm56_vm0, %v4131_v10, 0.0  ;;  %v4134_v56 = vmul.f32 %v12330_v42, %v12330_v42 }
 0xe4d   :  { %4148 = vadd.xlane.f32.xlu0 %v4147_v39 }
 0xe4e   :  { %v4132_v46 = vmul.f32 %v12335_v34, %v12335_v34  ;;  %v4156_v54 = vsel %vm56_vm0, %v4134_v56, 0.0  ;;  %v10785_v56 = vld [vmem:[%s13608_s7 + $0x18] sm:$0xff]  }
 0xe4f   :  { %10272 = vmatprep.subr.bf16.mxu0 %v10785_v56 }
 0xe50   :  { %v4150_v28 = vsel %vm56_vm0, %v4132_v46, 0.0  ;;  %10273 = vmatpush3.bf16.msra.mxu0 %v10785_v56 }
 0xe51   :  { %4154 = vadd.xlane.f32.xlu0 %v4153_v21  ;;  %4151 = vadd.xlane.f32.xlu1 %v4150_v28 }
 0xe55   :  { %4157 = vadd.xlane.f32.xlu1 %v4156_v54  ;;  %v10786_v54 = vld [vmem:[%s13608_s7 + $0x10] sm:$0xff]  }
 0xe56   :  { %10274 = vmatprep.subr.bf16.mxu0 %v10786_v54 }
 0xe57   :  { %10275 = vmatpush3.bf16.msra.mxu0 %v10786_v54 }
 0xe99   :  { %v4137_v32 = vpop.xlane.xlu0 %4136 }
 0xe9a   :  { %v4159_v59 = vmul.f32 0.03125, %v4137_v32  ;;  %v10787_v32 = vld [vmem:[%s13608_s7 + $0x8] sm:$0xff]  }
 0xe9b   :  { %10276 = vmatprep.subr.bf16.mxu0 %v10787_v32 }
 0xe9c   :  { %v4167_v51 = vadd.f32 1e-06, %v4159_v59  ;;  %10277 = vmatpush3.bf16.msra.mxu0 %v10787_v32  ;;  %v10788_v59 = vld [vmem:[%s13608_s7] sm:$0xff]  }
 0xe9d   :  { %v4143_v29 = vpop.xlane.xlu0 %4142  ;;  %v4140_v60 = vpop.xlane.xlu1 %4139  ;;  %10278 = vmatprep.subr.bf16.mxu0 %v10788_v59 }
 0xe9e   :  { %v4161_v38 = vmul.f32 0.03125, %v4143_v29  ;;  %v4160_v25 = vmul.f32 0.03125, %v4140_v60  ;;  %10943 = vrsqrt.f32 %v4167_v51 }
 0xea0   :  { %v4169_v15 = vadd.f32 1e-06, %v4161_v38  ;;  %v4168_v2 = vadd.f32 1e-06, %v4160_v25  ;;  %10279 = vmatpush3.bf16.msra.mxu0 %v10788_v59 }
 0xea1   :  { %v4146_v30 = vpop.xlane.xlu0 %4145  ;;  %10300 = vmatprep.subr.bf16.mxu0 %v11161_v9 }
 0xea2   :  { %10945 = vrsqrt.f32 %v4169_v15  ;;  %v4162_v24 = vmul.f32 0.03125, %v4146_v30 }
 0xea3   :  { %10947 = vrsqrt.f32 %v4168_v2 }
 0xea4   :  { %v4170_v4 = vadd.f32 1e-06, %v4162_v24 }
 0xea6   :  { %10949 = vrsqrt.f32 %v4170_v4 }
 0xeab   :  { %v10944_v26 = vpop.eup %10943 }
 0xeac   :  { %v4183_v36 = vmul.f32 %v10944_v26, %v12278_v8 }
 0xeae   :  { %v4197_v41 = vmul.f32 %v9314_v31, %v4183_v36 }
 0xeaf   :  { %v10946_v13 = vpop.eup %10945 }
 0xeb0   :  { %v10948_v27 = vpop.eup %10947  ;;  %v4185_v49 = vmul.f32 %v10946_v13, %v12273_v52 }
 0xeb1   :  { %v4184_v7 = vmul.f32 %v10948_v27, %v12291_v44 }
 0xeb2   :  { %v4199_v12 = vmul.f32 %v9314_v31, %v4185_v49 }
 0xeb3   :  { %v10950_v47 = vpop.eup %10949  ;;  %v4198_v61 = vmul.f32 %v9314_v31, %v4184_v7 }
 0xeb4   :  { %v4186_v33 = vmul.f32 %v10950_v47, %v12286_v19 }
 0xeb5   :  { %v4205_v18 = vpack.c.bf16 %v4198_v61, %v4197_v41 }
 0xeb6   :  { %v4200_v63 = vmul.f32 %v9314_v31, %v4186_v33 }
 0xeb7   :  { %10264 = vmatprep.mubr.msk.bf16.mxu1 %vm56_vm0, %v4205_v18 }
 0xeb8   :  { %v4206_v17 = vpack.c.bf16 %v4200_v63, %v4199_v12 }
 0xeba   :  { %10265 = vmatmul.mubr.msk.bf16.vlgmr.msra.gmra.mxu1 %vm56_vm0, %v4206_v17 }
 0xed6   :  { %v4149_v62 = vpop.xlane.xlu0 %4148 }
 0xed7   :  { %v4163_v11 = vmul.f32 0.03125, %v4149_v62 }
 0xed9   :  { %v4171_v58 = vadd.f32 1e-06, %v4163_v11 }
 0xeda   :  { %v4155_v6 = vpop.xlane.xlu0 %4154  ;;  %v4152_v16 = vpop.xlane.xlu1 %4151 }
 0xedb   :  { %v4165_v23 = vmul.f32 0.03125, %v4155_v6  ;;  %v4164_v40 = vmul.f32 0.03125, %v4152_v16  ;;  %10951 = vrsqrt.f32 %v4171_v58 }
 0xedd   :  { %v4173_v55 = vadd.f32 1e-06, %v4165_v23  ;;  %v4172_v35 = vadd.f32 1e-06, %v4164_v40 }
 0xede   :  { %v4158_v37 = vpop.xlane.xlu1 %4157 }
 0xedf   :  { %10953 = vrsqrt.f32 %v4173_v55  ;;  %v4166_v57 = vmul.f32 0.03125, %v4158_v37 }
 0xee0   :  { %10955 = vrsqrt.f32 %v4172_v35 }
 0xee1   :  { %v4174_v43 = vadd.f32 1e-06, %v4166_v57 }
 0xee3   :  { %10957 = vrsqrt.f32 %v4174_v43 }
 0xee8   :  { %v10952_v20 = vpop.eup %10951 }
 0xee9   :  { %v4187_v53 = vmul.f32 %v10952_v20, %v12322_v1 }
 0xeeb   :  { %v4201_v48 = vmul.f32 %v9314_v31, %v4187_v53 }
 0xeec   :  { %v10954_v14 = vpop.eup %10953 }
 0xeed   :  { %v10956_v3 = vpop.eup %10955  ;;  %v4189_v22 = vmul.f32 %v10954_v14, %v12317_v50 }
 0xeee   :  { %v4188_v5 = vmul.f32 %v10956_v3, %v12335_v34 }
 0xeef   :  { %v4203_v46 = vmul.f32 %v9314_v31, %v4189_v22 }
 0xef0   :  { %v10958_v10 = vpop.eup %10957  ;;  %v4202_v0 = vmul.f32 %v9314_v31, %v4188_v5 }
 0xef1   :  { %v4190_v39 = vmul.f32 %v10958_v10, %v12330_v42 }
 0xef2   :  { %v4207_v45 = vpack.c.bf16 %v4202_v0, %v4201_v48 }
 0xef3   :  { %v4204_v21 = vmul.f32 %v9314_v31, %v4190_v39 }
 0xef4   :  { %10268 = vmatprep.mubr.msk.bf16.mxu1 %vm56_vm0, %v4207_v45 }
 0xef5   :  { %v4208_v28 = vpack.c.bf16 %v4204_v21, %v4203_v46 }
 0xef7   :  { %10269 = vmatmul.mubr.msk.bf16.gmra.mxu1 %vm56_vm0, %v4208_v28 }
 0xf7a   :  { %v10266_v51 = vpop.f32.mrf.mxu1 }
 0xf7b   :  { %4386 = vrot.lane.b32.xlu1 %v10266_v51, %s11164_s21  ;;  %v4312_v26 = vmul.f32 0.044715, %v10266_v51  ;;  %v4304_v10 = vmul.f32 0.5, %v10266_v51 }
 0xf7c   :  { %v4271_v29 = vpop.f32.mrf.mxu1 }
 0xf7d   :  { %4382 = vrot.lane.b32.xlu0 %v4271_v29, %s11164_s21  ;;  %v4310_v24 = vmul.f32 0.044715, %v4271_v29  ;;  %v4320_v31 = vmul.f32 %v10266_v51, %v4312_v26  ;;  %v4302_v57 = vmul.f32 0.5, %v4271_v29 }
 0xf7e   :  { %v10267_v60 = vpop.f32.mrf.mxu1 }
 0xf7f   :  { %v4318_v13 = vmul.f32 %v4310_v24, %v4271_v29  ;;  %v4313_v36 = vmul.f32 0.044715, %v10267_v60  ;;  %v4328_v41 = vmul.f32 %v10266_v51, %v4320_v31  ;;  %v4305_v39 = vmul.f32 0.5, %v10267_v60 }
 0xf80   :  { %v4274_v38 = vpop.f32.mrf.mxu1 }
 0xf81   :  { %4384 = vrot.lane.b32.xlu1 %v4274_v38, %s11164_s21  ;;  %v4311_v4 = vmul.f32 0.044715, %v4274_v38  ;;  %v4326_v7 = vmul.f32 %v4318_v13, %v4271_v29  ;;  %v4321_v49 = vmul.f32 %v10267_v60, %v4313_v36  ;;  %v4336_v12 = vadd.f32 %v10266_v51, %v4328_v41 }
 0xf82   :  { %v4303_v43 = vmul.f32 0.5, %v4274_v38 }
 0xf83   :  { %v4319_v27 = vmul.f32 %v4311_v4, %v4274_v38  ;;  %v4334_v61 = vadd.f32 %v4326_v7, %v4271_v29  ;;  %v4329_v33 = vmul.f32 %v10267_v60, %v4321_v49  ;;  %v4344_v11 = vmul.f32 0.7978846, %v4336_v12 }
 0xf85   :  { %4388 = vrot.lane.b32.xlu1 %v10267_v60, %s11164_s21  ;;  %v4327_v47 = vmul.f32 %v4319_v27, %v4274_v38  ;;  %v4342_v63 = vmul.f32 0.7978846, %v4334_v61  ;;  %v4337_v62 = vadd.f32 %v10267_v60, %v4329_v33 }
 0xf87   :  { %v4335_v18 = vadd.f32 %v4327_v47, %v4274_v38  ;;  %10959 = vtanh.f32 %v4342_v63  ;;  %v4345_v58 = vmul.f32 0.7978846, %v4337_v62 }
 0xf89   :  { %v4343_v17 = vmul.f32 0.7978846, %v4335_v18 }
 0xf8b   :  { %10961 = vtanh.f32 %v4343_v17 }
 0xf8c   :  { %10963 = vtanh.f32 %v4344_v11 }
 0xf8d   :  { %10965 = vtanh.f32 %v4345_v58 }
 0xf94   :  { %v10960_v6 = vpop.eup %10959 }
 0xf95   :  { %v4358_v40 = vadd.f32 1.0, %v10960_v6 }
 0xf97   :  { %v4366_v53 = vmul.f32 %v4358_v40, %v4302_v57 }
 0xf98   :  { %v10962_v16 = vpop.eup %10961 }
 0xf99   :  { %v10964_v23 = vpop.eup %10963  ;;  %v4359_v55 = vadd.f32 1.0, %v10962_v16 }
 0xf9a   :  { %v10966_v35 = vpop.eup %10965  ;;  %v4360_v14 = vadd.f32 1.0, %v10964_v23 }
 0xf9b   :  { %v4367_v3 = vmul.f32 %v4359_v55, %v4303_v43  ;;  %v4361_v5 = vadd.f32 1.0, %v10966_v35 }
 0xf9c   :  { %v4368_v45 = vmul.f32 %v4360_v14, %v4304_v10 }
 0xf9d   :  { %v4369_v21 = vmul.f32 %v4361_v5, %v4305_v39 }
 0xfb7   :  { %v12379_v25 = vpop.f32.mrf.mxu1 }
 0xfb8   :  { %v4316_v51 = vmul.f32 0.044715, %v12379_v25  ;;  %v4308_v14 = vmul.f32 0.5, %v12379_v25 }
 0xfb9   :  { %v12381_v15 = vpop.f32.mrf.mxu1 }
 0xfba   :  { %4390 = vrot.lane.b32.xlu0 %v12381_v15, %s11164_s21  ;;  %v4314_v59 = vmul.f32 0.044715, %v12381_v15  ;;  %v4324_v4 = vmul.f32 %v12379_v25, %v4316_v51  ;;  %v4306_v23 = vmul.f32 0.5, %v12381_v15 }
 0xfbb   :  { %v12385_v2 = vpop.f32.mrf.mxu1 }
 0xfbc   :  { %v4322_v60 = vmul.f32 %v4314_v59, %v12381_v15  ;;  %v4317_v38 = vmul.f32 0.044715, %v12385_v2  ;;  %v4332_v27 = vmul.f32 %v12379_v25, %v4324_v4 }
 0xfbd   :  { %v12387_v30 = vpop.f32.mrf.mxu1 }
 0xfbe   :  { %4394 = vrot.lane.b32.xlu0 %v12379_v25, %s11164_s21  ;;  %4392 = vrot.lane.b32.xlu1 %v12387_v30, %s11164_s21  ;;  %v4315_v29 = vmul.f32 0.044715, %v12387_v30  ;;  %v4330_v26 = vmul.f32 %v4322_v60, %v12381_v15  ;;  %v4325_v13 = vmul.f32 %v12385_v2, %v4317_v38  ;;  %v4340_v41 = vadd.f32 %v12379_v25, %v4332_v27  ;;  %v10789_v60 = vld [vmem:[%s13602_s3 + $0x18] sm:$0xff]   ;;  %v10790_v38 = vld [vmem:[%s13602_s3 + $0x10] sm:$0xff]  }
 0xfbf   :  { %v4307_v40 = vmul.f32 0.5, %v12387_v30  ;;  %10288 = vmatprep.subr.bf16.mxu1 %v10789_v60 }
 0xfc0   :  { %v4323_v24 = vmul.f32 %v4315_v29, %v12387_v30  ;;  %v4338_v31 = vadd.f32 %v4330_v26, %v12381_v15  ;;  %v4333_v7 = vmul.f32 %v12385_v2, %v4325_v13  ;;  %v4348_v18 = vmul.f32 0.7978846, %v4340_v41  ;;  %10289 = vmatpush3.bf16.msra.mxu1 %v10789_v60 }
 0xfc1   :  { %10290 = vmatprep.subr.bf16.mxu1 %v10790_v38 }
 0xfc2   :  { %4396 = vrot.lane.b32.xlu1 %v12385_v2, %s11164_s21  ;;  %v4331_v36 = vmul.f32 %v4323_v24, %v12387_v30  ;;  %v4346_v47 = vmul.f32 0.7978846, %v4338_v31  ;;  %v4341_v33 = vadd.f32 %v12385_v2, %v4333_v7 }
 0xfc4   :  { %v4339_v49 = vadd.f32 %v4331_v36, %v12387_v30  ;;  %10967 = vtanh.f32 %v4346_v47  ;;  %v4349_v12 = vmul.f32 0.7978846, %v4341_v33  ;;  %10291 = vmatpush3.bf16.msra.mxu1 %v10790_v38 }
 0xfc5   :  { %10306 = vmatprep.subr.bf16.mxu1 %v11161_v9 }
 0xfc6   :  { %v4347_v61 = vmul.f32 0.7978846, %v4339_v49 }
 0xfc8   :  { %10969 = vtanh.f32 %v4347_v61 }
 0xfc9   :  { %10971 = vtanh.f32 %v4348_v18 }
 0xfca   :  { %10973 = vtanh.f32 %v4349_v12 }
 0xfd1   :  { %v10968_v63 = vpop.eup %10967 }
 0xfd2   :  { %v4362_v11 = vadd.f32 1.0, %v10968_v63 }
 0xfd4   :  { %v4370_v55 = vmul.f32 %v4362_v11, %v4306_v23 }
 0xfd5   :  { %v10970_v17 = vpop.eup %10969 }
 0xfd6   :  { %v10972_v62 = vpop.eup %10971  ;;  %v4363_v58 = vadd.f32 1.0, %v10970_v17 }
 0xfd7   :  { %v10974_v6 = vpop.eup %10973  ;;  %v4364_v35 = vadd.f32 1.0, %v10972_v62 }
 0xfd8   :  { %v4365_v57 = vadd.f32 1.0, %v10974_v6 }
 0xfed   :  { %v4387_v37 = vpop.permute.xlu1 %4386 }
 0xfee   :  { %v4408_v56 = vmul.f32 %v4387_v37, %v4368_v45  ;;  %v4371_v37 = vmul.f32 %v4363_v58, %v4307_v40 }
 0xfef   :  { %v4383_v20 = vpop.permute.xlu0 %4382 }
 0xff0   :  { %v4406_v48 = vmul.f32 %v4383_v20, %v4366_v53 }
 0xff3   :  { %v4385_v22 = vpop.permute.xlu1 %4384 }
 0xff4   :  { %v4407_v0 = vmul.f32 %v4385_v22, %v4367_v3  ;;  %v4309_v3 = vmul.f32 0.5, %v12385_v2  ;;  %v4372_v22 = vmul.f32 %v4364_v35, %v4308_v14 }
 0xff6   :  { %v4414_v46 = vpack.c.bf16 %v4407_v0, %v4406_v48  ;;  %v4373_v48 = vmul.f32 %v4365_v57, %v4309_v3 }
 0xff7   :  { %v4389_v28 = vpop.permute.xlu1 %4388 }
 0xff8   :  { %v4409_v54 = vmul.f32 %v4389_v28, %v4369_v21  ;;  %10280 = vmatprep.mubr.msk.bf16.mxu0 %vm4450_vm4, %v4414_v46 }
 0xffa   :  { %v4415_v32 = vpack.c.bf16 %v4409_v54, %v4408_v56 }
 0xffc   :  { %10281 = vmatmul.mubr.msk.bf16.vlgmr.msra.gmra.mxu0 %vm4450_vm4, %v4415_v32 }
0x102c   :  { %v4391_v16 = vpop.permute.xlu0 %4390 }
0x102d   :  { %v4410_v20 = vmul.f32 %v4391_v16, %v4370_v55 }
0x1030   :  { %v4393_v43 = vpop.permute.xlu1 %4392  ;;  %v4395_v5 = vpop.permute.xlu0 %4394 }
0x1031   :  { %v4411_v53 = vmul.f32 %v4393_v43, %v4371_v37  ;;  %v4412_v39 = vmul.f32 %v4395_v5, %v4372_v22  ;;  %v9330_v43 = vld [vmem:[%s13603_s2 + $0x1] ss:$0 sm:$0xff] }
0x1033   :  { %v4416_v10 = vpack.c.bf16 %v4411_v53, %v4410_v20 }
0x1034   :  { %v4397_v0 = vpop.permute.xlu1 %4396 }
0x1035   :  { %v4413_v15 = vmul.f32 %v4397_v0, %v4373_v48  ;;  %10284 = vmatprep.mubr.msk.bf16.mxu0 %vm4450_vm4, %v4416_v10 }
0x1037   :  { %v4417_v30 = vpack.c.bf16 %v4413_v15, %v4412_v39 }
0x1039   :  { %10285 = vmatmul.mubr.msk.bf16.gmra.mxu0 %vm4450_vm4, %v4417_v30 }
0x103a   :  { %10302 = vmatprep.mubr.msk.bf16.mxu0 %vm11162_vm1, %v11161_v9 }
0x10bc   :  { %v10282_v45 = vpop.f32.mrf.mxu0 }
0x10bd   :  { %v12422_v46 = vadd.f32 %v10282_v45, %v12273_v52 }
0x10be   :  { %v4497_v25 = vpop.f32.mrf.mxu0 }
0x10bf   :  { %v12425_v2 = vadd.f32 %v4497_v25, %v12278_v8  ;;  %v4540_v52 = vmul.f32 %v12422_v46, %v12422_v46 }
0x10c0   :  { %v10283_v21 = vpop.f32.mrf.mxu0 }
0x10c1   :  { %v4538_v28 = vmul.f32 %v12425_v2, %v12425_v2  ;;  %v12430_v54 = vadd.f32 %v10283_v21, %v12286_v19  ;;  %v4552_v29 = vsel %vm56_vm0, %v4540_v52, 0.0 }
0x10c2   :  { %v4500_v56 = vpop.f32.mrf.mxu0 }
0x10c3   :  { %v12433_v32 = vadd.f32 %v4500_v56, %v12291_v44  ;;  %v4546_v59 = vsel %vm56_vm0, %v4538_v28, 0.0  ;;  %v4541_v19 = vmul.f32 %v12430_v54, %v12430_v54 }
0x10c4   :  { %4547 = vadd.xlane.f32.xlu0 %v4546_v59 }
0x10c5   :  { %v4539_v8 = vmul.f32 %v12433_v32, %v12433_v32  ;;  %v4555_v44 = vsel %vm56_vm0, %v4541_v19, 0.0 }
0x10c7   :  { %v4549_v51 = vsel %vm56_vm0, %v4539_v8, 0.0 }
0x10c8   :  { %4553 = vadd.xlane.f32.xlu0 %v4552_v29  ;;  %4550 = vadd.xlane.f32.xlu1 %v4549_v51 }
0x10cc   :  { %4556 = vadd.xlane.f32.xlu0 %v4555_v44 }
0x10f9   :  { %v10286_v24 = vpop.f32.mrf.mxu0 }
0x10fa   :  { %v12453_v26 = vadd.f32 %v10286_v24, %v12317_v50 }
0x10fb   :  { %v4513_v4 = vpop.f32.mrf.mxu0 }
0x10fc   :  { %v12456_v13 = vadd.f32 %v4513_v4, %v12322_v1  ;;  %v4544_v50 = vmul.f32 %v12453_v26, %v12453_v26 }
0x10fd   :  { %v10287_v36 = vpop.f32.mrf.mxu0 }
0x10fe   :  { %v4542_v27 = vmul.f32 %v12456_v13, %v12456_v13  ;;  %v12461_v7 = vadd.f32 %v10287_v36, %v12330_v42  ;;  %v4564_v41 = vsel %vm56_vm0, %v4544_v50, 0.0 }
0x10ff   :  { %v4516_v31 = vpop.f32.mrf.mxu0 }
0x1100   :  { %v12464_v49 = vadd.f32 %v4516_v31, %v12335_v34  ;;  %v4558_v47 = vsel %vm56_vm0, %v4542_v27, 0.0  ;;  %v4545_v42 = vmul.f32 %v12461_v7, %v12461_v7 }
0x1101   :  { %4559 = vadd.xlane.f32.xlu0 %v4558_v47 }
0x1102   :  { %v4543_v1 = vmul.f32 %v12464_v49, %v12464_v49  ;;  %v4567_v34 = vsel %vm56_vm0, %v4545_v42, 0.0 }
0x1104   :  { %v4561_v61 = vsel %vm56_vm0, %v4543_v1, 0.0 }
0x1105   :  { %4565 = vadd.xlane.f32.xlu0 %v4564_v41  ;;  %4562 = vadd.xlane.f32.xlu1 %v4561_v61 }
0x1109   :  { %4568 = vadd.xlane.f32.xlu1 %v4567_v34 }
0x114d   :  { %v4548_v33 = vpop.xlane.xlu0 %4547 }
0x114e   :  { %v4570_v18 = vmul.f32 0.03125, %v4548_v33 }
0x1150   :  { %v4578_v12 = vadd.f32 1e-06, %v4570_v18 }
0x1151   :  { %v4554_v63 = vpop.xlane.xlu0 %4553  ;;  %v4551_v17 = vpop.xlane.xlu1 %4550 }
0x1152   :  { %v4572_v62 = vmul.f32 0.03125, %v4554_v63  ;;  %v4571_v11 = vmul.f32 0.03125, %v4551_v17  ;;  %10975 = vrsqrt.f32 %v4578_v12 }
0x1154   :  { %v4580_v58 = vadd.f32 1e-06, %v4572_v62  ;;  %v4579_v6 = vadd.f32 1e-06, %v4571_v11 }
0x1155   :  { %v4557_v16 = vpop.xlane.xlu0 %4556 }
0x1156   :  { %10977 = vrsqrt.f32 %v4580_v58  ;;  %v4573_v23 = vmul.f32 0.03125, %v4557_v16 }
0x1157   :  { %10979 = vrsqrt.f32 %v4579_v6 }
0x1158   :  { %v4581_v40 = vadd.f32 1e-06, %v4573_v23 }
0x115a   :  { %10981 = vrsqrt.f32 %v4581_v40 }
0x115f   :  { %v10976_v55 = vpop.eup %10975 }
0x1160   :  { %v4594_v37 = vmul.f32 %v10976_v55, %v12425_v2 }
0x1162   :  { %v4608_v3 = vmul.f32 %v9330_v43, %v4594_v37 }
0x1163   :  { %v10978_v35 = vpop.eup %10977 }
0x1164   :  { %v10980_v57 = vpop.eup %10979  ;;  %v4596_v14 = vmul.f32 %v10978_v35, %v12422_v46 }
0x1165   :  { %v4595_v20 = vmul.f32 %v10980_v57, %v12433_v32 }
0x1166   :  { %v4610_v48 = vmul.f32 %v9330_v43, %v4596_v14 }
0x1167   :  { %v10982_v53 = vpop.eup %10981  ;;  %v4609_v5 = vmul.f32 %v9330_v43, %v4595_v20 }
0x1168   :  { %v4597_v22 = vmul.f32 %v10982_v53, %v12430_v54 }
0x1169   :  { %v4616_v10 = vpack.c.bf16 %v4609_v5, %v4608_v3 }
0x116a   :  { %v4611_v0 = vmul.f32 %v9330_v43, %v4597_v22 }
0x116b   :  { %10292 = vmatprep.mubr.msk.bf16.mxu1 %vm56_vm0, %v4616_v10 }
0x116c   :  { %v4617_v39 = vpack.c.bf16 %v4611_v0, %v4610_v48 }
0x116e   :  { %10293 = vmatmul.mubr.msk.bf16.vlgmr.msra.gmra.mxu1 %vm56_vm0, %v4617_v39 }
0x118a   :  { %v4560_v15 = vpop.xlane.xlu0 %4559 }
0x118b   :  { %v4574_v30 = vmul.f32 0.03125, %v4560_v15 }
0x118d   :  { %v4582_v45 = vadd.f32 1e-06, %v4574_v30 }
0x118e   :  { %v4566_v25 = vpop.xlane.xlu0 %4565  ;;  %v4563_v21 = vpop.xlane.xlu1 %4562 }
0x118f   :  { %v4576_v28 = vmul.f32 0.03125, %v4566_v25  ;;  %v4575_v56 = vmul.f32 0.03125, %v4563_v21  ;;  %10983 = vrsqrt.f32 %v4582_v45 }
0x1191   :  { %v4584_v59 = vadd.f32 1e-06, %v4576_v28  ;;  %v4583_v52 = vadd.f32 1e-06, %v4575_v56 }
0x1192   :  { %v4569_v8 = vpop.xlane.xlu1 %4568 }
0x1193   :  { %10985 = vrsqrt.f32 %v4584_v59  ;;  %v4577_v29 = vmul.f32 0.03125, %v4569_v8  ;;  %v4743_v59 = vld [vmem:[%s13604_s1] sm:$0xff] }
0x1194   :  { %10987 = vrsqrt.f32 %v4583_v52 }
0x1195   :  { %v4585_v51 = vadd.f32 1e-06, %v4577_v29 }
0x1197   :  { %10989 = vrsqrt.f32 %v4585_v51 }
0x119c   :  { %v10984_v19 = vpop.eup %10983 }
0x119d   :  { %v4598_v60 = vmul.f32 %v10984_v19, %v12456_v13 }
0x119f   :  { %v4612_v27 = vmul.f32 %v9330_v43, %v4598_v60 }
0x11a0   :  { %v10986_v44 = vpop.eup %10985 }
0x11a1   :  { %v10988_v38 = vpop.eup %10987  ;;  %v4600_v4 = vmul.f32 %v10986_v44, %v12453_v26 }
0x11a2   :  { %v4599_v24 = vmul.f32 %v10988_v38, %v12464_v49 }
0x11a3   :  { %v4614_v1 = vmul.f32 %v9330_v43, %v4600_v4 }
0x11a4   :  { %v10990_v36 = vpop.eup %10989  ;;  %v4613_v31 = vmul.f32 %v9330_v43, %v4599_v24 }
0x11a5   :  { %v4601_v47 = vmul.f32 %v10990_v36, %v12461_v7 }
0x11a6   :  { %v4618_v50 = vpack.c.bf16 %v4613_v31, %v4612_v27 }
0x11a7   :  { %v4615_v41 = vmul.f32 %v9330_v43, %v4601_v47 }
0x11a8   :  { %10296 = vmatprep.mubr.msk.bf16.mxu1 %vm56_vm0, %v4618_v50 }
0x11a9   :  { %v4619_v61 = vpack.c.bf16 %v4615_v41, %v4614_v1 }
0x11ab   :  { %10297 = vmatmul.mubr.msk.bf16.gmra.mxu1 %vm56_vm0, %v4619_v61 }
0x11ac   :  { %10308 = vmatprep.mubr.msk.bf16.mxu1 %vm11162_vm1, %v11161_v9 }
0x122e   :  { %v10294_v42 = vpop.f32.mrf.mxu1 }
0x122f   :  { %v12501_v17 = vpack.c.bf16 %v10294_v42, %v10294_v42 }
0x1230   :  { %v4683_v34 = vpop.f32.mrf.mxu1 }
0x1231   :  { %v12493_v33 = vpack.c.bf16 %v4683_v34, %v4683_v34 }
0x1232   :  { %v10295_v18 = vpop.f32.mrf.mxu1 }
0x1233   :  { %4744 = vrot.lane.b32.xlu0 %v12493_v33, %s11163_s20  ;;  %v12505_v62 = vpack.c.bf16 %v10295_v18, %v10295_v18 }
0x1234   :  { %v4686_v12 = vpop.f32.mrf.mxu1 }
0x1235   :  { %v12497_v63 = vpack.c.bf16 %v4686_v12, %v4686_v12 }
0x1237   :  { %4792 = vrot.lane.b32.xlu1 %v12497_v63, %s11163_s20 }
0x123b   :  { %4840 = vrot.lane.b32.xlu1 %v12501_v17, %s11163_s20 }
0x123f   :  { %4888 = vrot.lane.b32.xlu1 %v12505_v62, %s11163_s20 }
0x126b   :  { %v10298_v11 = vpop.f32.mrf.mxu1 }
0x126c   :  { %v12513_v40 = vpack.c.bf16 %v10298_v11, %v10298_v11 }
0x126d   :  { %v4699_v58 = vpop.f32.mrf.mxu1 }
0x126e   :  { %v12509_v6 = vpack.c.bf16 %v4699_v58, %v4699_v58 }
0x126f   :  { %v10299_v16 = vpop.f32.mrf.mxu1 }
0x1270   :  { %4936 = vrot.lane.b32.xlu0 %v12509_v6, %s11163_s20  ;;  %v12521_v35 = vpack.c.bf16 %v10299_v16, %v10299_v16 }
0x1271   :  { %v4702_v23 = vpop.f32.mrf.mxu1 }
0x1272   :  { %v12515_v55 = vpack.c.bf16 %v4702_v23, %v4702_v23 }
0x1274   :  { %5032 = vrot.lane.b32.xlu0 %v12513_v40, %s11163_s20  ;;  %4984 = vrot.lane.b32.xlu1 %v12515_v55, %s11163_s20 }
0x1278   :  { %5224 = vrot.lane.b32.xlu0 %v12493_v33, %s11164_s21  ;;  %5080 = vrot.lane.b32.xlu1 %v12521_v35, %s11163_s20 }
0x127c   :  { %5272 = vrot.lane.b32.xlu1 %v12497_v63, %s11164_s21 }
0x1280   :  { %5320 = vrot.lane.b32.xlu1 %v12501_v17, %s11164_s21 }
0x1284   :  { %5368 = vrot.lane.b32.xlu1 %v12505_v62, %s11164_s21 }
0x12a5   :  { %v4745_v37 = vpop.permute.xlu0 %4744 }
0x12a6   :  { %v4750_v57 = vsel %vm256_vm2, %v4745_v37, 0 }
0x12a7   :  { %10301 = vmatpush3.bf16.xpose.msra.mxu0 %v4750_v57 }
0x12a8   :  { %10312 = vmatprep.subr.bf16.mxu0 %v11161_v9 }
0x12a9   :  { %v4793_v43 = vpop.permute.xlu1 %4792 }
0x12aa   :  { %v4798_v20 = vsel %vm256_vm2, %v4793_v43, 0 }
0x12ab   :  { %10307 = vmatpush3.bf16.xpose.msra.mxu1 %v4798_v20 }
0x12ac   :  { %10318 = vmatprep.subr.bf16.mxu1 %v11161_v9 }
0x12ad   :  { %v4841_v14 = vpop.permute.xlu1 %4840 }
0x12ae   :  { %v4846_v53 = vsel %vm256_vm2, %v4841_v14, 0  ;;  %10303 = vmatmul.mubr.msk.bf16.vlgmr.msra.gmra.mxu0 %vm256_vm2, %v12493_v33 }
0x12af   :  { %10313 = vmatpush3.bf16.xpose.msra.mxu0 %v4846_v53  ;;  %10314 = vmatprep.mubr.msk.bf16.mxu0 %vm11162_vm1, %v11161_v9 }
0x12b0   :  { %10324 = vmatprep.subr.bf16.mxu0 %v11161_v9 }
0x12b1   :  { %v4889_v3 = vpop.permute.xlu1 %4888 }
0x12b2   :  { %v4894_v5 = vsel %vm256_vm2, %v4889_v3, 0  ;;  %10309 = vmatmul.mubr.msk.bf16.vlgmr.msra.gmra.mxu1 %vm256_vm2, %v12497_v63 }
0x12b3   :  { %10319 = vmatpush3.bf16.xpose.msra.mxu1 %v4894_v5  ;;  %10320 = vmatprep.mubr.msk.bf16.mxu1 %vm11162_vm1, %v11161_v9 }
0x12b4   :  { %10330 = vmatprep.subr.bf16.mxu1 %v11161_v9 }
0x12b6   :  { %10315 = vmatmul.mubr.msk.bf16.vlgmr.msra.gmra.mxu0 %vm256_vm2, %v12501_v17 }
0x12b7   :  { %10326 = vmatprep.mubr.msk.bf16.mxu0 %vm11162_vm1, %v11161_v9 }
0x12ba   :  { %10321 = vmatmul.mubr.msk.bf16.vlgmr.msra.gmra.mxu1 %vm256_vm2, %v12505_v62 }
0x12bb   :  { %10332 = vmatprep.mubr.msk.bf16.mxu1 %vm11162_vm1, %v11161_v9 }
0x12e2   :  { %v4937_v22 = vpop.permute.xlu0 %4936 }
0x12e3   :  { %v4942_v10 = vsel %vm256_vm2, %v4937_v22, 0 }
0x12e4   :  { %10325 = vmatpush3.bf16.xpose.msra.mxu0 %v4942_v10 }
0x12e5   :  { %10336 = vmatprep.subr.bf16.mxu0 %v11161_v9 }
0x12e6   :  { %v4985_v48 = vpop.permute.xlu1 %4984  ;;  %v5033_v39 = vpop.permute.xlu0 %5032 }
0x12e7   :  { %v4990_v0 = vsel %vm256_vm2, %v4985_v48, 0  ;;  %v5038_v15 = vsel %vm256_vm2, %v5033_v39, 0 }
0x12e8   :  { %10331 = vmatpush3.bf16.xpose.msra.mxu1 %v4990_v0 }
0x12e9   :  { %10342 = vmatprep.subr.bf16.mxu1 %v11161_v9 }
0x12ea   :  { %v5081_v30 = vpop.permute.xlu1 %5080  ;;  %v5225_v25 = vpop.permute.xlu0 %5224 }
0x12eb   :  { %10327 = vmatmul.mubr.msk.bf16.vlgmr.msra.gmra.mxu0 %vm256_vm2, %v12509_v6  ;;  %v5086_v45 = vsel %vm256_vm2, %v5081_v30, 0  ;;  %v5230_v21 = vsel %vm740_vm3, %v5225_v25, 0 }
0x12ec   :  { %10337 = vmatpush3.bf16.xpose.msra.mxu0 %v5038_v15  ;;  %10338 = vmatprep.mubr.msk.bf16.mxu0 %vm11162_vm1, %v11161_v9 }
0x12ed   :  { %10348 = vmatprep.subr.bf16.mxu0 %v11161_v9 }
0x12ee   :  { %v5273_v28 = vpop.permute.xlu1 %5272 }
0x12ef   :  { %10333 = vmatmul.mubr.msk.bf16.vlgmr.msra.gmra.mxu1 %vm256_vm2, %v12515_v55  ;;  %v5278_v56 = vsel %vm740_vm3, %v5273_v28, 0 }
0x12f0   :  { %10343 = vmatpush3.bf16.xpose.msra.mxu1 %v5086_v45  ;;  %10344 = vmatprep.mubr.msk.bf16.mxu1 %vm11162_vm1, %v11161_v9 }
0x12f1   :  { %10354 = vmatprep.subr.bf16.mxu1 %v11161_v9 }
0x12f3   :  { %10339 = vmatmul.mubr.msk.bf16.vlgmr.msra.gmra.mxu0 %vm256_vm2, %v12513_v40 }
0x12f4   :  { %10349 = vmatpush3.bf16.msra.mxu0 %v5230_v21  ;;  %10350 = vmatprep.mubr.msk.bf16.mxu0 %vm11162_vm1, %v11161_v9 }
0x12f5   :  { %10360 = vmatprep.subr.bf16.mxu0 %v11161_v9 }
0x12f7   :  { %10345 = vmatmul.mubr.msk.bf16.vlgmr.msra.gmra.mxu1 %vm256_vm2, %v12521_v35 }
0x12f8   :  { %10355 = vmatpush3.bf16.msra.mxu1 %v5278_v56  ;;  %10356 = vmatprep.mubr.msk.bf16.mxu1 %vm11162_vm1, %v11161_v9 }
0x12f9   :  { %10366 = vmatprep.subr.bf16.mxu1 %v11161_v9 }
0x136e   :  { %v4786_v52 = vpop.f32.mrf.mxu0 }
0x136f   :  { %v4787_v8 = vadd.f32 %v4786_v52, %v4743_v59 }
0x1370   :  { %v10304_v29 = vpop.f32.mrf.mxu0 }
0x1371   :  { %v5128_v51 = vsel %vm256_vm2, %v4787_v8, -inf }
0x1372   :  { %v4789_v19 = vpop.f32.mrf.mxu0  ;;  %5129 = vmax.xlane.f32.xlu0 %v5128_v51  ;;  %v4834_v44 = vpop.f32.mrf.mxu1 }
0x1373   :  { %v4835_v60 = vadd.f32 %v4834_v44, %v4743_v59  ;;  %v12603_v51 = vpop.permute.xlu1 %5320 }
0x1374   :  { %v10305_v38 = vpop.f32.mrf.mxu0  ;;  %v10310_v24 = vpop.f32.mrf.mxu1 }
0x1375   :  { %v5131_v4 = vsel %vm256_vm2, %v4835_v60, -inf }
0x1376   :  { %5132 = vmax.xlane.f32.xlu1 %v5131_v4  ;;  %v4837_v36 = vpop.f32.mrf.mxu1  ;;  %v4882_v27 = vpop.f32.mrf.mxu0 }
0x1377   :  { %v4883_v31 = vadd.f32 %v4882_v27, %v4743_v59  ;;  %v12605_v19 = vpop.permute.xlu1 %5368 }
0x1378   :  { %v10311_v47 = vpop.f32.mrf.mxu1  ;;  %v10316_v50 = vpop.f32.mrf.mxu0 }
0x1379   :  { %v5134_v1 = vsel %vm256_vm2, %v4883_v31, -inf }
0x137a   :  { %5135 = vmax.xlane.f32.xlu0 %v5134_v1  ;;  %v4885_v41 = vpop.f32.mrf.mxu0  ;;  %v4930_v61 = vpop.f32.mrf.mxu1 }
0x137b   :  { %v4931_v42 = vadd.f32 %v4930_v61, %v4743_v59 }
0x137c   :  { %v10317_v34 = vpop.f32.mrf.mxu0  ;;  %v10322_v18 = vpop.f32.mrf.mxu1 }
0x137d   :  { %v5137_v12 = vsel %vm256_vm2, %v4931_v42, -inf }
0x137e   :  { %5138 = vmax.xlane.f32.xlu0 %v5137_v12  ;;  %v4933_v11 = vpop.f32.mrf.mxu1 }
0x1380   :  { %v10323_v58 = vpop.f32.mrf.mxu1 }
0x13ab   :  { %v4978_v16 = vpop.f32.mrf.mxu0 }
0x13ac   :  { %v4979_v23 = vadd.f32 %v4978_v16, %v4743_v59 }
0x13ad   :  { %v10328_v37 = vpop.f32.mrf.mxu0 }
0x13ae   :  { %v5140_v57 = vsel %vm256_vm2, %v4979_v23, -inf }
0x13af   :  { %v4981_v43 = vpop.f32.mrf.mxu0  ;;  %5141 = vmax.xlane.f32.xlu0 %v5140_v57  ;;  %v5026_v20 = vpop.f32.mrf.mxu1 }
0x13b0   :  { %v5027_v14 = vadd.f32 %v5026_v20, %v4743_v59 }
0x13b1   :  { %v10329_v53 = vpop.f32.mrf.mxu0  ;;  %v10334_v3 = vpop.f32.mrf.mxu1 }
0x13b2   :  { %v5143_v5 = vsel %vm256_vm2, %v5027_v14, -inf }
0x13b3   :  { %v5074_v22 = vpop.f32.mrf.mxu0  ;;  %5144 = vmax.xlane.f32.xlu1 %v5143_v5  ;;  %v5029_v10 = vpop.f32.mrf.mxu1 }
0x13b4   :  { %v12594_v48 = vadd.f32 %v5074_v22, %v4743_v59 }
0x13b5   :  { %v10335_v0 = vpop.f32.mrf.mxu1  ;;  %v10340_v39 = vpop.f32.mrf.mxu0 }
0x13b6   :  { %v5146_v15 = vsel %vm256_vm2, %v12594_v48, -inf }
0x13b7   :  { %v5077_v30 = vpop.f32.mrf.mxu0  ;;  %5147 = vmax.xlane.f32.xlu0 %v5146_v15  ;;  %v5122_v45 = vpop.f32.mrf.mxu1 }
0x13b8   :  { %v5123_v52 = vadd.f32 %v5122_v45, %v4743_v59 }
0x13b9   :  { %v10341_v25 = vpop.f32.mrf.mxu0  ;;  %v10346_v21 = vpop.f32.mrf.mxu1 }
0x13ba   :  { %v5149_v29 = vsel %vm256_vm2, %v5123_v52, -inf }
0x13bb   :  { %v5125_v28 = vpop.f32.mrf.mxu1 }
0x13bd   :  { %v10347_v56 = vpop.f32.mrf.mxu1 }
0x13c4   :  { %5464 = vrot.lane.b32.xlu1 %v12515_v55, %s11164_s21 }
0x13cd   :  { %5416 = vrot.lane.b32.xlu0 %v12509_v6, %s11164_s21 }
0x13e8   :  { %5150 = vmax.xlane.f32.xlu1 %v5149_v29 }
0x13fb   :  { %v5130_v44 = vpop.xlane.xlu0 %5129 }
0x13fc   :  { %v5152_v38 = vsub.f32 %v4787_v8, %v5130_v44 }
0x13fe   :  { %v5160_v24 = vmul.f32 1.442695, %v5152_v38 }
0x13ff   :  { %v5133_v4 = vpop.xlane.xlu1 %5132 }
0x1400   :  { %10991 = vpow2.f32 %v5160_v24  ;;  %v5153_v36 = vsub.f32 %v4835_v60, %v5133_v4 }
0x1402   :  { %v5162_v27 = vmul.f32 1.442695, %v5153_v36 }
0x1403   :  { %v5136_v47 = vpop.xlane.xlu0 %5135 }
0x1404   :  { %10993 = vpow2.f32 %v5162_v27  ;;  %v5154_v50 = vsub.f32 %v4883_v31, %v5136_v47  ;;  %v5326_v27 = vsel %vm740_vm3, %v12603_v51, 0  ;;  %v5374_v51 = vsel %vm740_vm3, %v12605_v19, 0 }
0x1406   :  { %v5164_v1 = vmul.f32 1.442695, %v5154_v50 }
0x1407   :  { %v5139_v41 = vpop.xlane.xlu0 %5138 }
0x1408   :  { %10995 = vpow2.f32 %v5164_v1  ;;  %v5155_v59 = vsub.f32 %v4931_v42, %v5139_v41 }
0x140a   :  { %v5166_v61 = vmul.f32 1.442695, %v5155_v59 }
0x140c   :  { %10997 = vpow2.f32 %v5166_v61 }
0x140d   :  { %v12607_v34 = vpop.eup %10991 }
0x140e   :  { %v5176_v18 = vsel %vm256_vm2, %v12607_v34, 0.0 }
0x140f   :  { %5177 = vadd.xlane.f32.xlu0 %v5176_v18 }
0x1411   :  { %v12611_v8 = vpop.eup %10993 }
0x1412   :  { %v5179_v60 = vsel %vm256_vm2, %v12611_v8, 0.0 }
0x1413   :  { %5180 = vadd.xlane.f32.xlu1 %v5179_v60 }
0x1415   :  { %v12615_v12 = vpop.eup %10995 }
0x1416   :  { %v5182_v31 = vsel %vm256_vm2, %v12615_v12, 0.0 }
0x1417   :  { %5183 = vadd.xlane.f32.xlu0 %v5182_v31 }
0x1419   :  { %v12619_v42 = vpop.eup %10997 }
0x141a   :  { %v5185_v11 = vsel %vm256_vm2, %v12619_v42, 0.0 }
0x141b   :  { %5186 = vadd.xlane.f32.xlu1 %v5185_v11 }
0x142c   :  { %5560 = vrot.lane.b32.xlu1 %v12521_v35, %s11164_s21 }
0x1438   :  { %v5142_v58 = vpop.xlane.xlu0 %5141 }
0x1439   :  { %v5156_v16 = vsub.f32 %v4979_v23, %v5142_v58 }
0x143b   :  { %v5168_v37 = vmul.f32 1.442695, %v5156_v16 }
0x143c   :  { %v5145_v57 = vpop.xlane.xlu1 %5144 }
0x143d   :  { %10999 = vpow2.f32 %v5168_v37  ;;  %v5157_v43 = vsub.f32 %v5027_v14, %v5145_v57 }
0x143f   :  { %v5170_v20 = vmul.f32 1.442695, %v5157_v43 }
0x1440   :  { %v5148_v23 = vpop.xlane.xlu0 %5147  ;;  %v12638_v0 = vpop.permute.xlu1 %5464 }
0x1441   :  { %11001 = vpow2.f32 %v5170_v20  ;;  %v5158_v14 = vsub.f32 %v12594_v48, %v5148_v23 }
0x1443   :  { %v5172_v10 = vmul.f32 1.442695, %v5158_v14 }
0x1444   :  { %v5417_v48 = vpop.permute.xlu0 %5416 }
0x1445   :  { %11003 = vpow2.f32 %v5172_v10 }
0x144a   :  { %v12625_v53 = vpop.eup %10999 }
0x144b   :  { %v5188_v3 = vsel %vm256_vm2, %v12625_v53, 0.0 }
0x144c   :  { %5189 = vadd.xlane.f32.xlu0 %v5188_v3 }
0x144e   :  { %v12629_v5 = vpop.eup %11001 }
0x144f   :  { %v5191_v22 = vsel %vm256_vm2, %v12629_v5, 0.0 }
0x1450   :  { %5192 = vadd.xlane.f32.xlu1 %v5191_v22 }
0x1452   :  { %v12640_v45 = vpop.eup %11003 }
0x1453   :  { %v5194_v25 = vsel %vm256_vm2, %v12640_v45, 0.0 }
0x1461   :  { %5665 = vrot.lane.b32.xlu1 %v12497_v63, %s11165_s24 }
0x1462   :  { %5512 = vrot.lane.b32.xlu0 %v12513_v40, %s11164_s21 }
0x1471   :  { %v5151_v39 = vpop.xlane.xlu1 %5150 }
0x1472   :  { %v5159_v15 = vsub.f32 %v5123_v52, %v5151_v39 }
0x1474   :  { %v5174_v30 = vmul.f32 1.442695, %v5159_v15 }
0x1476   :  { %11005 = vpow2.f32 %v5174_v30 }
0x1481   :  { %5195 = vadd.xlane.f32.xlu0 %v5194_v25 }
0x1483   :  { %v12644_v21 = vpop.eup %11005 }
0x1484   :  { %v5197_v28 = vsel %vm256_vm2, %v12644_v21, 0.0 }
0x1485   :  { %5198 = vadd.xlane.f32.xlu1 %v5197_v28 }
0x1496   :  { %5663 = vrot.lane.b32.xlu1 %v12497_v63, %s11166_s25 }
0x1497   :  { %5615 = vrot.lane.b32.xlu0 %v12493_v33, %s11165_s24 }
0x1498   :  { %v5178_v56 = vpop.xlane.xlu0 %5177 }
0x1499   :  { %11007 = vrcp.f32 %v5178_v56 }
0x149a   :  { %5765 = vrot.lane.b32.xlu1 %v12505_v62, %s11165_s24 }
0x149b   :  { %5613 = vrot.lane.b32.xlu0 %v12493_v33, %s11166_s25 }
0x149c   :  { %v5181_v52 = vpop.xlane.xlu1 %5180 }
0x149d   :  { %11009 = vrcp.f32 %v5181_v52 }
0x149e   :  { %5763 = vrot.lane.b32.xlu1 %v12505_v62, %s11166_s25 }
0x149f   :  { %5715 = vrot.lane.b32.xlu0 %v12501_v17, %s11165_s24 }
0x14a0   :  { %v5184_v29 = vpop.xlane.xlu0 %5183 }
0x14a1   :  { %11011 = vrcp.f32 %v5184_v29 }
0x14a2   :  { %5865 = vrot.lane.b32.xlu1 %v12515_v55, %s11165_s24 }
0x14a3   :  { %5713 = vrot.lane.b32.xlu0 %v12501_v17, %s11166_s25 }
0x14a4   :  { %v5187_v44 = vpop.xlane.xlu1 %5186 }
0x14a5   :  { %11013 = vrcp.f32 %v5187_v44 }
0x14a6   :  { %v11008_v38 = vpop.eup %11007  ;;  %5863 = vrot.lane.b32.xlu1 %v12515_v55, %s11166_s25 }
0x14a7   :  { %v5208_v24 = vmul.f32 %v11008_v38, %v12607_v34  ;;  %5815 = vrot.lane.b32.xlu0 %v12509_v6, %s11165_s24  ;;  %v5422_v34 = vsel %vm740_vm3, %v5417_v48, 0 }
0x14a8   :  { %v5561_v60 = vpop.permute.xlu1 %5560 }
0x14a9   :  { %v5216_v4 = vpack.c.bf16 %v5208_v24, %v5208_v24  ;;  %v5566_v3 = vsel %vm740_vm3, %v5561_v60, 0 }
0x14aa   :  { %v11010_v36 = vpop.eup %11009  ;;  %5965 = vrot.lane.b32.xlu1 %v12521_v35, %s11165_s24 }
0x14ab   :  { %v5209_v47 = vmul.f32 %v11010_v36, %v12611_v8  ;;  %5813 = vrot.lane.b32.xlu0 %v12509_v6, %s11166_s25  ;;  %10351 = vmatmul.mubr.msk.bf16.vlgmr.msra.gmra.mxu0 %vm256_vm2, %v5216_v4  ;;  %v5470_v8 = vsel %vm740_vm3, %v12638_v0, 0 }
0x14ac   :  { %10361 = vmatpush3.bf16.msra.mxu0 %v5326_v27  ;;  %10362 = vmatprep.mubr.msk.bf16.mxu0 %vm11162_vm1, %v11161_v9 }
0x14ad   :  { %v5217_v50 = vpack.c.bf16 %v5209_v47, %v5209_v47  ;;  %10372 = vmatprep.subr.bf16.mxu0 %v11161_v9 }
0x14ae   :  { %v11012_v1 = vpop.eup %11011  ;;  %5963 = vrot.lane.b32.xlu1 %v12521_v35, %s11166_s25 }
0x14af   :  { %v5210_v41 = vmul.f32 %v11012_v1, %v12615_v12  ;;  %5915 = vrot.lane.b32.xlu0 %v12513_v40, %s11165_s24  ;;  %10357 = vmatmul.mubr.msk.bf16.vlgmr.msra.gmra.mxu1 %vm256_vm2, %v5217_v50 }
0x14b0   :  { %10367 = vmatpush3.bf16.msra.mxu1 %v5374_v51  ;;  %10368 = vmatprep.mubr.msk.bf16.mxu1 %vm11162_vm1, %v11161_v9 }
0x14b1   :  { %v5218_v59 = vpack.c.bf16 %v5210_v41, %v5210_v41  ;;  %10378 = vmatprep.subr.bf16.mxu1 %v11161_v9 }
0x14b2   :  { %v11014_v61 = vpop.eup %11013 }
0x14b3   :  { %v5211_v18 = vmul.f32 %v11014_v61, %v12619_v42  ;;  %5913 = vrot.lane.b32.xlu0 %v12513_v40, %s11166_s25  ;;  %10363 = vmatmul.mubr.msk.bf16.vlgmr.msra.gmra.mxu0 %vm256_vm2, %v5218_v59 }
0x14b4   :  { %10373 = vmatpush3.bf16.msra.mxu0 %v5422_v34  ;;  %10374 = vmatprep.mubr.msk.bf16.mxu0 %vm11162_vm1, %v11161_v9 }
0x14b5   :  { %v5219_v19 = vpack.c.bf16 %v5211_v18, %v5211_v18  ;;  %10384 = vmatprep.subr.bf16.mxu0 %v11161_v9 }
0x14b7   :  { %10369 = vmatmul.mubr.msk.bf16.vlgmr.msra.gmra.mxu1 %vm256_vm2, %v5219_v19 }
0x14b8   :  { %10379 = vmatpush3.bf16.msra.mxu1 %v5470_v8  ;;  %10380 = vmatprep.mubr.msk.bf16.mxu1 %vm11162_vm1, %v11161_v9 }
0x14b9   :  { %10390 = vmatprep.subr.bf16.mxu1 %v11161_v9 }
0x14d5   :  { %v5190_v12 = vpop.xlane.xlu0 %5189 }
0x14d6   :  { %11015 = vrcp.f32 %v5190_v12 }
0x14d9   :  { %v5193_v31 = vpop.xlane.xlu1 %5192  ;;  %v5513_v58 = vpop.permute.xlu0 %5512 }
0x14da   :  { %11017 = vrcp.f32 %v5193_v31  ;;  %v5518_v57 = vsel %vm740_vm3, %v5513_v58, 0 }
0x14e3   :  { %v11016_v42 = vpop.eup %11015 }
0x14e4   :  { %v5212_v11 = vmul.f32 %v11016_v42, %v12625_v53  ;;  %v5666_v53 = vpop.permute.xlu1 %5665 }
0x14e6   :  { %v5220_v16 = vpack.c.bf16 %v5212_v11, %v5212_v11 }
0x14e7   :  { %v11018_v37 = vpop.eup %11017 }
0x14e8   :  { %v5213_v43 = vmul.f32 %v11018_v37, %v12629_v5  ;;  %10375 = vmatmul.mubr.msk.bf16.vlgmr.msra.gmra.mxu0 %vm256_vm2, %v5220_v16 }
0x14e9   :  { %10385 = vmatpush3.bf16.msra.mxu0 %v5518_v57  ;;  %10386 = vmatprep.mubr.msk.bf16.mxu0 %vm11162_vm1, %v11161_v9 }
0x14ea   :  { %v5221_v20 = vpack.c.bf16 %v5213_v43, %v5213_v43  ;;  %10396 = vmatprep.subr.bf16.mxu0 %v11161_v9 }
0x14ec   :  { %10381 = vmatmul.mubr.msk.bf16.vlgmr.msra.gmra.mxu1 %vm256_vm2, %v5221_v20 }
0x14ed   :  { %10391 = vmatpush3.bf16.msra.mxu1 %v5566_v3  ;;  %10392 = vmatprep.mubr.msk.bf16.mxu1 %vm11162_vm1, %v11161_v9 }
0x14ee   :  { %10402 = vmatprep.subr.bf16.mxu1 %v11161_v9 }
0x150a   :  { %v5196_v5 = vpop.xlane.xlu0 %5195 }
0x150b   :  { %11019 = vrcp.f32 %v5196_v5 }
0x150e   :  { %v5616_v22 = vpop.permute.xlu0 %5615  ;;  %v5199_v23 = vpop.xlane.xlu1 %5198 }
0x150f   :  { %11021 = vrcp.f32 %v5199_v23  ;;  %v5621_v28 = vsel %vm256_vm2, %v5616_v22, 0 }
0x1512   :  { %v5614_v14 = vpop.permute.xlu0 %5613  ;;  %v5664_v0 = vpop.permute.xlu1 %5663 }
0x1516   :  { %v5716_v15 = vpop.permute.xlu0 %5715  ;;  %v5766_v56 = vpop.permute.xlu1 %5765 }
0x1517   :  { %v5721_v44 = vsel %vm256_vm2, %v5716_v15, 0  ;;  %v5771_v24 = vsel %vm256_vm2, %v5766_v56, 0 }
0x1518   :  { %v11020_v10 = vpop.eup %11019 }
0x1519   :  { %v5214_v39 = vmul.f32 %v11020_v10, %v12640_v45  ;;  %v5671_v45 = vsel %vm256_vm2, %v5666_v53, 0 }
0x151a   :  { %v5714_v29 = vpop.permute.xlu0 %5713 }
0x151b   :  { %v5222_v30 = vpack.c.bf16 %v5214_v39, %v5214_v39 }
0x151c   :  { %v11022_v25 = vpop.eup %11021 }
0x151d   :  { %v5215_v48 = vmul.f32 %v11022_v25, %v12644_v21  ;;  %10387 = vmatmul.mubr.msk.bf16.vlgmr.msra.gmra.mxu0 %vm256_vm2, %v5222_v30  ;;  %v5764_v21 = vpop.permute.xlu1 %5763 }
0x151e   :  { %10397 = vmatpush3.bf16.xpose.msra.mxu0 %v5621_v28  ;;  %10398 = vmatprep.mubr.msk.bf16.mxu0 %vm11162_vm1, %v11161_v9  ;;  %v5816_v38 = vpop.permute.xlu0 %5815 }
0x151f   :  { %v5223_v52 = vpack.c.bf16 %v5215_v48, %v5215_v48  ;;  %10408 = vmatprep.subr.bf16.mxu0 %v11161_v9  ;;  %v5821_v27 = vsel %vm256_vm2, %v5816_v38, 0  ;;  %v9369_v38 = vld [vmem:[%s13604_s1 + $0x8] sm:$0xff] }
0x1521   :  { %10393 = vmatmul.mubr.msk.bf16.vlgmr.msra.gmra.mxu1 %vm256_vm2, %v5223_v52  ;;  %v5866_v4 = vpop.permute.xlu1 %5865 }
0x1522   :  { %10403 = vmatpush3.bf16.xpose.msra.mxu1 %v5671_v45  ;;  %10404 = vmatprep.mubr.msk.bf16.mxu1 %vm11162_vm1, %v11161_v9  ;;  %v5814_v36 = vpop.permute.xlu0 %5813  ;;  %v5871_v50 = vsel %vm256_vm2, %v5866_v4, 0 }
0x1523   :  { %10414 = vmatprep.subr.bf16.mxu1 %v11161_v9 }
0x1525   :  { %10399 = vmatmul.mubr.msk.bf16.vlgmr.msra.gmra.mxu0 %vm256_vm2, %v5614_v14  ;;  %v5864_v47 = vpop.permute.xlu1 %5863 }
0x1526   :  { %10409 = vmatpush3.bf16.xpose.msra.mxu0 %v5721_v44  ;;  %10410 = vmatprep.mubr.msk.bf16.mxu0 %vm11162_vm1, %v11161_v9  ;;  %v5916_v1 = vpop.permute.xlu0 %5915 }
0x1527   :  { %10420 = vmatprep.subr.bf16.mxu0 %v11161_v9  ;;  %v5921_v51 = vsel %vm256_vm2, %v5916_v1, 0 }
0x1529   :  { %10405 = vmatmul.mubr.msk.bf16.vlgmr.msra.gmra.mxu1 %vm256_vm2, %v5664_v0  ;;  %v5966_v41 = vpop.permute.xlu1 %5965 }
0x152a   :  { %10415 = vmatpush3.bf16.xpose.msra.mxu1 %v5771_v24  ;;  %10416 = vmatprep.mubr.msk.bf16.mxu1 %vm11162_vm1, %v11161_v9  ;;  %v5971_v59 = vsel %vm256_vm2, %v5966_v41, 0  ;;  %v5914_v61 = vpop.permute.xlu0 %5913 }
0x152b   :  { %10426 = vmatprep.subr.bf16.mxu1 %v11161_v9 }
0x152d   :  { %10411 = vmatmul.mubr.msk.bf16.vlgmr.msra.gmra.mxu0 %vm256_vm2, %v5714_v29  ;;  %v5964_v34 = vpop.permute.xlu1 %5963 }
0x152e   :  { %10421 = vmatpush3.bf16.xpose.msra.mxu0 %v5821_v27  ;;  %10422 = vmatprep.mubr.msk.bf16.mxu0 %vm11162_vm1, %v11161_v9 }
0x152f   :  { %10432 = vmatprep.subr.bf16.mxu0 %v11161_v9 }
0x1531   :  { %10417 = vmatmul.mubr.msk.bf16.vlgmr.msra.gmra.mxu1 %vm256_vm2, %v5764_v21 }
0x1532   :  { %10427 = vmatpush3.bf16.xpose.msra.mxu1 %v5871_v50  ;;  %10428 = vmatprep.mubr.msk.bf16.mxu1 %vm11162_vm1, %v11161_v9 }
0x1533   :  { %10438 = vmatprep.subr.bf16.mxu1 %v11161_v9 }
0x1535   :  { %10423 = vmatmul.mubr.msk.bf16.vlgmr.msra.gmra.mxu0 %vm256_vm2, %v5814_v36 }
0x1536   :  { %10433 = vmatpush3.bf16.xpose.msra.mxu0 %v5921_v51  ;;  %10434 = vmatprep.mubr.msk.bf16.mxu0 %vm11162_vm1, %v11161_v9 }
0x1537   :  { %10444 = vmatprep.subr.bf16.mxu0 %v11161_v9 }
0x1539   :  { %10429 = vmatmul.mubr.msk.bf16.vlgmr.msra.gmra.mxu1 %vm256_vm2, %v5864_v47 }
0x153a   :  { %10439 = vmatpush3.bf16.xpose.msra.mxu1 %v5971_v59  ;;  %10440 = vmatprep.mubr.msk.bf16.mxu1 %vm11162_vm1, %v11161_v9 }
0x153b   :  { %10450 = vmatprep.subr.bf16.mxu1 %v11161_v9 }
0x153d   :  { %10435 = vmatmul.mubr.msk.bf16.vlgmr.msra.gmra.mxu0 %vm256_vm2, %v5914_v61 }
0x153e   :  { %10446 = vmatprep.mubr.msk.bf16.mxu0 %vm11162_vm1, %v11161_v9 }
0x1541   :  { %10441 = vmatmul.mubr.msk.bf16.vlgmr.msra.gmra.mxu1 %vm256_vm2, %v5964_v34 }
0x1542   :  { %10452 = vmatprep.mubr.msk.bf16.mxu1 %vm11162_vm1, %v11161_v9 }
0x156b   :  { %v12765_v18 = vpop.f32.mrf.mxu0 }
0x156d   :  { %v10352_v19 = vpop.f32.mrf.mxu0 }
0x156f   :  { %v5269_v8 = vpop.f32.mrf.mxu0  ;;  %v12767_v60 = vpop.f32.mrf.mxu1 }
0x1570   :  { %v5608_v12 = vpack.c.bf16 %v12767_v60, %v12765_v18 }
0x1571   :  { %v10353_v31 = vpop.f32.mrf.mxu0  ;;  %v10358_v42 = vpop.f32.mrf.mxu1 }
0x1573   :  { %v5317_v11 = vpop.f32.mrf.mxu1  ;;  %v12771_v58 = vpop.f32.mrf.mxu0 }
0x1575   :  { %v10359_v16 = vpop.f32.mrf.mxu1  ;;  %v10364_v37 = vpop.f32.mrf.mxu0 }
0x1577   :  { %v5365_v57 = vpop.f32.mrf.mxu0  ;;  %v12773_v43 = vpop.f32.mrf.mxu1 }
0x1578   :  { %v5609_v20 = vpack.c.bf16 %v12773_v43, %v12771_v58 }
0x1579   :  { %v10365_v3 = vpop.f32.mrf.mxu0  ;;  %v10370_v53 = vpop.f32.mrf.mxu1 }
0x157b   :  { %v5413_v5 = vpop.f32.mrf.mxu1 }
0x157d   :  { %v10371_v22 = vpop.f32.mrf.mxu1 }
0x15a8   :  { %v12777_v23 = vpop.f32.mrf.mxu0 }
0x15aa   :  { %v10376_v14 = vpop.f32.mrf.mxu0 }
0x15ac   :  { %v5461_v10 = vpop.f32.mrf.mxu0  ;;  %v12779_v0 = vpop.f32.mrf.mxu1 }
0x15ad   :  { %v5610_v39 = vpack.c.bf16 %v12779_v0, %v12777_v23 }
0x15ae   :  { %v10377_v15 = vpop.f32.mrf.mxu0  ;;  %v10382_v30 = vpop.f32.mrf.mxu1 }
0x15b0   :  { %v5509_v25 = vpop.f32.mrf.mxu1 }
0x15b2   :  { %v10383_v28 = vpop.f32.mrf.mxu1 }
0x15dd   :  { %v12783_v48 = vpop.f32.mrf.mxu0 }
0x15df   :  { %v10388_v56 = vpop.f32.mrf.mxu0 }
0x15e1   :  { %v5557_v52 = vpop.f32.mrf.mxu0  ;;  %v12785_v29 = vpop.f32.mrf.mxu1 }
0x15e2   :  { %v5611_v45 = vpack.c.bf16 %v12785_v29, %v12783_v48 }
0x15e3   :  { %v10389_v21 = vpop.f32.mrf.mxu0  ;;  %v10394_v44 = vpop.f32.mrf.mxu1 }
0x15e5   :  { %v5605_v24 = vpop.f32.mrf.mxu1  ;;  %v5657_v4 = vpop.f32.mrf.mxu0 }
0x15e6   :  { %v5658_v36 = vadd.f32 %v9369_v38, %v5657_v4 }
0x15e7   :  { %v10395_v27 = vpop.f32.mrf.mxu1  ;;  %v10400_v47 = vpop.f32.mrf.mxu0 }
0x15e8   :  { %v6013_v50 = vsel %vm256_vm2, %v5658_v36, -inf }
0x15e9   :  { %6014 = vmax.xlane.f32.xlu0 %v6013_v50  ;;  %v5660_v1 = vpop.f32.mrf.mxu0  ;;  %v5707_v51 = vpop.f32.mrf.mxu1 }
0x15ea   :  { %v5708_v41 = vadd.f32 %v9369_v38, %v5707_v51 }
0x15eb   :  { %v10401_v59 = vpop.f32.mrf.mxu0  ;;  %v10406_v61 = vpop.f32.mrf.mxu1 }
0x15ec   :  { %v6016_v34 = vsel %vm256_vm2, %v5708_v41, -inf }
0x15ed   :  { %v5757_v19 = vpop.f32.mrf.mxu0  ;;  %6017 = vmax.xlane.f32.xlu1 %v6016_v34  ;;  %v5710_v8 = vpop.f32.mrf.mxu1 }
0x15ee   :  { %v5758_v31 = vadd.f32 %v9369_v38, %v5757_v19 }
0x15ef   :  { %v10407_v42 = vpop.f32.mrf.mxu1  ;;  %v10412_v11 = vpop.f32.mrf.mxu0 }
0x15f0   :  { %v6019_v16 = vsel %vm256_vm2, %v5758_v31, -inf }
0x15f1   :  { %6020 = vmax.xlane.f32.xlu0 %v6019_v16  ;;  %v5760_v37 = vpop.f32.mrf.mxu0  ;;  %v5807_v57 = vpop.f32.mrf.mxu1 }
0x15f2   :  { %v12795_v3 = vadd.f32 %v9369_v38, %v5807_v57 }
0x15f3   :  { %v10413_v53 = vpop.f32.mrf.mxu0  ;;  %v10418_v5 = vpop.f32.mrf.mxu1 }
0x15f4   :  { %v6022_v22 = vsel %vm256_vm2, %v12795_v3, -inf }
0x15f5   :  { %v5857_v14 = vpop.f32.mrf.mxu0  ;;  %6023 = vmax.xlane.f32.xlu0 %v6022_v22  ;;  %v5810_v10 = vpop.f32.mrf.mxu1 }
0x15f6   :  { %v12799_v15 = vadd.f32 %v9369_v38, %v5857_v14 }
0x15f7   :  { %v10419_v30 = vpop.f32.mrf.mxu1  ;;  %v10424_v25 = vpop.f32.mrf.mxu0 }
0x15f8   :  { %v6025_v28 = vsel %vm256_vm2, %v12799_v15, -inf }
0x15f9   :  { %v5860_v56 = vpop.f32.mrf.mxu0  ;;  %6026 = vmax.xlane.f32.xlu0 %v6025_v28  ;;  %v5907_v52 = vpop.f32.mrf.mxu1 }
0x15fa   :  { %v12803_v21 = vadd.f32 %v9369_v38, %v5907_v52 }
0x15fb   :  { %v10425_v44 = vpop.f32.mrf.mxu0  ;;  %v10430_v24 = vpop.f32.mrf.mxu1 }
0x15fc   :  { %v6028_v4 = vsel %vm256_vm2, %v12803_v21, -inf }
0x15fd   :  { %v5957_v27 = vpop.f32.mrf.mxu0  ;;  %6029 = vmax.xlane.f32.xlu1 %v6028_v4  ;;  %v5910_v47 = vpop.f32.mrf.mxu1 }
0x15fe   :  { %v12807_v50 = vadd.f32 %v9369_v38, %v5957_v27 }
0x15ff   :  { %v10431_v1 = vpop.f32.mrf.mxu1  ;;  %v10436_v51 = vpop.f32.mrf.mxu0 }
0x1600   :  { %v6031_v59 = vsel %vm256_vm2, %v12807_v50, -inf }
0x1601   :  { %v5960_v61 = vpop.f32.mrf.mxu0  ;;  %6032 = vmax.xlane.f32.xlu0 %v6031_v59  ;;  %v6007_v34 = vpop.f32.mrf.mxu1 }
0x1602   :  { %v6008_v16 = vadd.f32 %v9369_v38, %v6007_v34 }
0x1603   :  { %v10437_v19 = vpop.f32.mrf.mxu0  ;;  %v10442_v8 = vpop.f32.mrf.mxu1 }
0x1604   :  { %v6034_v37 = vsel %vm256_vm2, %v6008_v16, -inf }
0x1605   :  { %v6010_v42 = vpop.f32.mrf.mxu1 }
0x1607   :  { %v10443_v11 = vpop.f32.mrf.mxu1 }
0x160e   :  { %6157 = vrot.lane.b32.xlu1 %v12497_v63, %s11167_s28 }
0x1612   :  { %6205 = vrot.lane.b32.xlu1 %v12501_v17, %s11167_s28 }
0x1617   :  { %6109 = vrot.lane.b32.xlu0 %v12493_v33, %s11167_s28 }
0x1636   :  { %6035 = vmax.xlane.f32.xlu1 %v6034_v37 }
0x1647   :  { %6253 = vrot.lane.b32.xlu1 %v12505_v62, %s11167_s28 }
0x1672   :  { %v6015_v57 = vpop.xlane.xlu0 %6014 }
0x1673   :  { %v6037_v53 = vsub.f32 %v5658_v36, %v6015_v57 }
0x1675   :  { %v6045_v5 = vmul.f32 1.442695, %v6037_v53 }
0x1676   :  { %v6018_v22 = vpop.xlane.xlu1 %6017 }
0x1677   :  { %11023 = vpow2.f32 %v6045_v5  ;;  %v6038_v14 = vsub.f32 %v5708_v41, %v6018_v22 }
0x1679   :  { %v6047_v10 = vmul.f32 1.442695, %v6038_v14 }
0x167a   :  { %v6021_v30 = vpop.xlane.xlu0 %6020 }
0x167b   :  { %11025 = vpow2.f32 %v6047_v10  ;;  %v6039_v25 = vsub.f32 %v5758_v31, %v6021_v30 }
0x167d   :  { %v6049_v28 = vmul.f32 1.442695, %v6039_v25 }
0x167e   :  { %v6024_v56 = vpop.xlane.xlu0 %6023 }
0x167f   :  { %11027 = vpow2.f32 %v6049_v28  ;;  %v6040_v61 = vsub.f32 %v12795_v3, %v6024_v56 }
0x1681   :  { %v6051_v19 = vmul.f32 1.442695, %v6040_v61 }
0x1682   :  { %v6027_v44 = vpop.xlane.xlu0 %6026 }
0x1683   :  { %v6041_v34 = vsub.f32 %v12799_v15, %v6027_v44  ;;  %11029 = vpow2.f32 %v6051_v19 }
0x1684   :  { %v12820_v38 = vpop.eup %11023 }
0x1685   :  { %v6061_v52 = vsel %vm256_vm2, %v12820_v38, 0.0  ;;  %v6053_v42 = vmul.f32 1.442695, %v6041_v34 }
0x1686   :  { %6062 = vadd.xlane.f32.xlu0 %v6061_v52  ;;  %v6030_v24 = vpop.xlane.xlu1 %6029 }
0x1687   :  { %v6042_v8 = vsub.f32 %v12803_v21, %v6030_v24  ;;  %11031 = vpow2.f32 %v6053_v42 }
0x1688   :  { %v12824_v36 = vpop.eup %11025 }
0x1689   :  { %v6064_v41 = vsel %vm256_vm2, %v12824_v36, 0.0  ;;  %v6055_v11 = vmul.f32 1.442695, %v6042_v8 }
0x168a   :  { %v6033_v4 = vpop.xlane.xlu0 %6032  ;;  %6065 = vadd.xlane.f32.xlu1 %v6064_v41  ;;  %v6158_v27 = vpop.permute.xlu1 %6157 }
0x168b   :  { %v6163_v31 = vsel %vm740_vm3, %v6158_v27, 0  ;;  %v6043_v37 = vsub.f32 %v12807_v50, %v6033_v4  ;;  %11033 = vpow2.f32 %v6055_v11 }
0x168c   :  { %v12829_v47 = vpop.eup %11027  ;;  %10451 = vmatpush3.bf16.msra.mxu1 %v6163_v31 }
0x168d   :  { %v6067_v1 = vsel %vm256_vm2, %v12829_v47, 0.0  ;;  %10462 = vmatprep.subr.bf16.mxu1 %v11161_v9  ;;  %v6057_v57 = vmul.f32 1.442695, %v6043_v37 }
0x168e   :  { %6068 = vadd.xlane.f32.xlu0 %v6067_v1  ;;  %v6110_v51 = vpop.permute.xlu0 %6109  ;;  %v6206_v5 = vpop.permute.xlu1 %6205 }
0x168f   :  { %v6115_v59 = vsel %vm740_vm3, %v6110_v51, 0  ;;  %11035 = vpow2.f32 %v6057_v57  ;;  %v6211_v51 = vsel %vm740_vm3, %v6206_v5, 0 }
0x1690   :  { %10445 = vmatpush3.bf16.msra.mxu0 %v6115_v59  ;;  %v12844_v53 = vpop.eup %11029 }
0x1691   :  { %10456 = vmatprep.subr.bf16.mxu0 %v11161_v9  ;;  %v6070_v3 = vsel %vm256_vm2, %v12844_v53, 0.0 }
0x1694   :  { %v12846_v22 = vpop.eup %11031 }
0x1695   :  { %v6073_v50 = vsel %vm256_vm2, %v12846_v22, 0.0 }
0x1698   :  { %v12850_v15 = vpop.eup %11033 }
0x1699   :  { %v6076_v30 = vsel %vm256_vm2, %v12850_v15, 0.0 }
0x169b   :  { %6349 = vrot.lane.b32.xlu1 %v12515_v55, %s11167_s28 }
0x169c   :  { %v12856_v25 = vpop.eup %11035 }
0x169d   :  { %v6079_v28 = vsel %vm256_vm2, %v12856_v25, 0.0 }
0x16a4   :  { %6301 = vrot.lane.b32.xlu0 %v12509_v6, %s11167_s28 }
0x16bf   :  { %6071 = vadd.xlane.f32.xlu1 %v6070_v3  ;;  %v6036_v21 = vpop.xlane.xlu1 %6035 }
0x16c0   :  { %v6044_v14 = vsub.f32 %v6008_v16, %v6036_v21 }
0x16c2   :  { %v6059_v10 = vmul.f32 1.442695, %v6044_v14 }
0x16c3   :  { %6074 = vadd.xlane.f32.xlu0 %v6073_v50  ;;  %6077 = vadd.xlane.f32.xlu1 %v6076_v30  ;;  %v6254_v52 = vpop.permute.xlu1 %6253 }
0x16c4   :  { %11037 = vpow2.f32 %v6059_v10  ;;  %v6259_v19 = vsel %vm740_vm3, %v6254_v52, 0 }
0x16c7   :  { %6080 = vadd.xlane.f32.xlu0 %v6079_v28 }
0x16d1   :  { %v12860_v56 = vpop.eup %11037 }
0x16d2   :  { %v6082_v16 = vsel %vm256_vm2, %v12860_v56, 0.0 }
0x16d3   :  { %6083 = vadd.xlane.f32.xlu1 %v6082_v16 }
0x16dd   :  { %6397 = vrot.lane.b32.xlu0 %v12513_v40, %s11167_s28 }
0x16e1   :  { %6660 = vrot.lane.b32.xlu0 %v12493_v33, %s11168_s29 }
0x16e4   :  { %6445 = vrot.lane.b32.xlu1 %v12521_v35, %s11167_s28 }
0x16e5   :  { %6658 = vrot.lane.b32.xlu0 %v12493_v33, %s11169_s30 }
0x16e8   :  { %6710 = vrot.lane.b32.xlu1 %v12497_v63, %s11168_s29 }
0x16e9   :  { %6760 = vrot.lane.b32.xlu0 %v12501_v17, %s11168_s29 }
0x16ec   :  { %6708 = vrot.lane.b32.xlu1 %v12497_v63, %s11169_s30 }
0x16ed   :  { %6758 = vrot.lane.b32.xlu0 %v12501_v17, %s11169_s30 }
0x16f0   :  { %6810 = vrot.lane.b32.xlu1 %v12505_v62, %s11168_s29 }
0x16f1   :  { %6860 = vrot.lane.b32.xlu0 %v12509_v6, %s11168_s29 }
0x16f4   :  { %6808 = vrot.lane.b32.xlu1 %v12505_v62, %s11169_s30 }
0x16f5   :  { %6858 = vrot.lane.b32.xlu0 %v12509_v6, %s11169_s30 }
0x16f8   :  { %6910 = vrot.lane.b32.xlu1 %v12515_v55, %s11168_s29 }
0x16f9   :  { %6960 = vrot.lane.b32.xlu0 %v12513_v40, %s11168_s29 }
0x16fc   :  { %6908 = vrot.lane.b32.xlu1 %v12515_v55, %s11169_s30 }
0x16fd   :  { %6958 = vrot.lane.b32.xlu0 %v12513_v40, %s11169_s30 }
0x1700   :  { %7010 = vrot.lane.b32.xlu1 %v12521_v35, %s11168_s29 }
0x1704   :  { %7008 = vrot.lane.b32.xlu1 %v12521_v35, %s11169_s30 }
0x170f   :  { %v6063_v44 = vpop.xlane.xlu0 %6062 }
0x1710   :  { %11039 = vrcp.f32 %v6063_v44 }
0x1713   :  { %v6066_v24 = vpop.xlane.xlu1 %6065 }
0x1714   :  { %11041 = vrcp.f32 %v6066_v24 }
0x1717   :  { %v6069_v41 = vpop.xlane.xlu0 %6068 }
0x1718   :  { %11043 = vrcp.f32 %v6069_v41 }
0x171b   :  { %v6302_v8 = vpop.permute.xlu0 %6301 }
0x171c   :  { %v6307_v42 = vsel %vm740_vm3, %v6302_v8, 0 }
0x171d   :  { %v11040_v4 = vpop.eup %11039 }
0x171e   :  { %v6093_v27 = vmul.f32 %v11040_v4, %v12820_v38 }
0x1720   :  { %v6101_v31 = vpack.c.bf16 %v6093_v27, %v6093_v27 }
0x1721   :  { %v11042_v1 = vpop.eup %11041 }
0x1722   :  { %v6094_v59 = vmul.f32 %v11042_v1, %v12824_v36  ;;  %10447 = vmatmul.mubr.msk.bf16.vlgmr.msra.gmra.mxu0 %vm256_vm2, %v6101_v31 }
0x1723   :  { %10457 = vmatpush3.bf16.msra.mxu0 %v6211_v51  ;;  %10458 = vmatprep.mubr.msk.bf16.mxu0 %vm11162_vm1, %v11161_v9 }
0x1724   :  { %v6102_v61 = vpack.c.bf16 %v6094_v59, %v6094_v59  ;;  %10468 = vmatprep.subr.bf16.mxu0 %v11161_v9 }
0x1725   :  { %v11044_v34 = vpop.eup %11043 }
0x1726   :  { %v6095_v38 = vmul.f32 %v11044_v34, %v12829_v47  ;;  %10453 = vmatmul.mubr.msk.bf16.vlgmr.msra.gmra.mxu1 %vm256_vm2, %v6102_v61  ;;  %v6350_v47 = vpop.permute.xlu1 %6349 }
0x1727   :  { %10463 = vmatpush3.bf16.msra.mxu1 %v6259_v19  ;;  %10464 = vmatprep.mubr.msk.bf16.mxu1 %vm11162_vm1, %v11161_v9  ;;  %v6355_v30 = vsel %vm740_vm3, %v6350_v47, 0  ;;  %v9350_v19 = vld [vmem:[%s13605_s4 + $0x14] sm:$0xf] }
0x1728   :  { %v6103_v36 = vpack.c.bf16 %v6095_v38, %v6095_v38  ;;  %10474 = vmatprep.subr.bf16.mxu1 %v11161_v9 }
0x172a   :  { %10459 = vmatmul.mubr.msk.bf16.vlgmr.msra.gmra.mxu0 %vm256_vm2, %v6103_v36 }
0x172b   :  { %10469 = vmatpush3.bf16.msra.mxu0 %v6307_v42  ;;  %10470 = vmatprep.mubr.msk.bf16.mxu0 %vm11162_vm1, %v11161_v9 }
0x172c   :  { %10480 = vmatprep.subr.bf16.mxu0 %v11161_v9 }
0x1748   :  { %v6072_v11 = vpop.xlane.xlu1 %6071 }
0x1749   :  { %11045 = vrcp.f32 %v6072_v11 }
0x174c   :  { %v6075_v37 = vpop.xlane.xlu0 %6074  ;;  %v6078_v57 = vpop.xlane.xlu1 %6077 }
0x174d   :  { %11047 = vrcp.f32 %v6075_v37 }
0x174e   :  { %11049 = vrcp.f32 %v6078_v57 }
0x1750   :  { %v6081_v5 = vpop.xlane.xlu0 %6080 }
0x1751   :  { %11051 = vrcp.f32 %v6081_v5 }
0x1754   :  { %v6398_v16 = vpop.permute.xlu0 %6397 }
0x1755   :  { %v6403_v41 = vsel %vm740_vm3, %v6398_v16, 0 }
0x1756   :  { %v11046_v3 = vpop.eup %11045 }
0x1757   :  { %v6096_v21 = vmul.f32 %v11046_v3, %v12844_v53 }
0x1759   :  { %v6104_v14 = vpack.c.bf16 %v6096_v21, %v6096_v21 }
0x175a   :  { %v11048_v10 = vpop.eup %11047 }
0x175b   :  { %v11050_v50 = vpop.eup %11049  ;;  %v6097_v28 = vmul.f32 %v11048_v10, %v12846_v22  ;;  %10465 = vmatmul.mubr.msk.bf16.vlgmr.msra.gmra.mxu1 %vm256_vm2, %v6104_v14  ;;  %v6661_v10 = vpop.permute.xlu0 %6660 }
0x175c   :  { %10475 = vmatpush3.bf16.msra.mxu1 %v6355_v30  ;;  %v6084_v52 = vpop.xlane.xlu1 %6083  ;;  %10476 = vmatprep.mubr.msk.bf16.mxu1 %vm11162_vm1, %v11161_v9  ;;  %v6098_v24 = vmul.f32 %v11050_v50, %v12850_v15  ;;  %v9349_v15 = vld [vmem:[%s13605_s4 + $0x10] sm:$0xf]  ;;  %v6666_v16 = vsel %vm256_vm2, %v6661_v10, 0 }
0x175d   :  { %v6105_v44 = vpack.c.bf16 %v6097_v28, %v6097_v28  ;;  %11053 = vrcp.f32 %v6084_v52  ;;  %10486 = vmatprep.subr.bf16.mxu1 %v11161_v9  ;;  %v6590_v61 = vsel %vm740_vm3, %v9349_v15, 0 }
0x175e   :  { %v11052_v53 = vpop.eup %11051  ;;  %v6106_v4 = vpack.c.bf16 %v6098_v24, %v6098_v24 }
0x175f   :  { %10471 = vmatmul.mubr.msk.bf16.vlgmr.msra.gmra.mxu0 %vm256_vm2, %v6105_v44  ;;  %v6099_v27 = vmul.f32 %v11052_v53, %v12856_v25 }
0x1760   :  { %10481 = vmatpush3.bf16.msra.mxu0 %v6403_v41  ;;  %v6446_v22 = vpop.permute.xlu1 %6445  ;;  %10482 = vmatprep.mubr.msk.bf16.mxu0 %vm11162_vm1, %v11161_v9 }
0x1761   :  { %v6451_v31 = vsel %vm740_vm3, %v6446_v22, 0  ;;  %v6107_v1 = vpack.c.bf16 %v6099_v27, %v6099_v27  ;;  %10764 = vmatprep.subr.msk.bf16.mxu0 %vm740_vm3, %v9350_v19 }
0x1763   :  { %10477 = vmatmul.mubr.msk.bf16.vlgmr.msra.gmra.mxu1 %vm256_vm2, %v6106_v4 }
0x1764   :  { %10487 = vmatpush3.bf16.msra.mxu1 %v6451_v31  ;;  %10488 = vmatprep.mubr.msk.bf16.mxu1 %vm11162_vm1, %v11161_v9  ;;  %v6711_v34 = vpop.permute.xlu1 %6710 }
0x1765   :  { %10765 = vmatprep.subr.msk.bf16.mxu1 %vm740_vm3, %v9349_v15  ;;  %v6716_v8 = vsel %vm256_vm2, %v6711_v34, 0 }
0x1767   :  { %10483 = vmatmul.mubr.msk.bf16.vlgmr.msra.gmra.mxu0 %vm256_vm2, %v6107_v1 }
0x1768   :  { %v6709_v38 = vpop.permute.xlu1 %6708 }
0x176a   :  { %v11054_v51 = vpop.eup %11053 }
0x176b   :  { %v6100_v25 = vmul.f32 %v11054_v51, %v12860_v56  ;;  %v6510_v56 = vsel %vm740_vm3, %v9350_v19, 0  ;;  %v6659_v51 = vpop.permute.xlu0 %6658 }
0x176c   :  { %10493 = vmatpush3.bf16.msra.mxu0 %v6510_v56  ;;  %v6811_v18 = vpop.permute.xlu1 %6810 }
0x176d   :  { %v6108_v59 = vpack.c.bf16 %v6100_v25, %v6100_v25  ;;  %10512 = vmatprep.subr.bf16.mxu0 %v11161_v9 }
0x176f   :  { %10489 = vmatmul.mubr.msk.bf16.vlgmr.msra.gmra.mxu1 %vm256_vm2, %v6108_v59  ;;  %v6761_v19 = vpop.permute.xlu0 %6760 }
0x1770   :  { %10504 = vmatprep.mubr.msk.bf16.mxu1 %vm256_vm2, %v5608_v12  ;;  %10503 = vmatpush3.bf16.msra.mxu1 %v6590_v61  ;;  %v6809_v60 = vpop.permute.xlu1 %6808  ;;  %v6816_v12 = vsel %vm256_vm2, %v6811_v18, 0 }
0x1771   :  { %10518 = vmatprep.subr.bf16.mxu1 %v11161_v9 }
0x1774   :  { %v6911_v58 = vpop.permute.xlu1 %6910 }
0x1777   :  { %10505 = vmatmul.mubr.msk.bf16.vlgmr.msra.gmra.mxu1 %vm256_vm2, %v5609_v20  ;;  %v6916_v20 = vsel %vm256_vm2, %v6911_v58, 0 }
0x1778   :  { %10519 = vmatpush3.bf16.xpose.msra.mxu1 %v6716_v8  ;;  %10508 = vmatprep.mubr.msk.bf16.mxu1 %vm256_vm2, %v5610_v39  ;;  %v6909_v43 = vpop.permute.xlu1 %6908 }
0x1779   :  { %10530 = vmatprep.subr.bf16.mxu1 %v11161_v9 }
0x177c   :  { %v7011_v23 = vpop.permute.xlu1 %7010 }
0x177d   :  { %v7016_v0 = vsel %vm256_vm2, %v7011_v23, 0 }
0x177f   :  { %10509 = vmatmul.mubr.msk.bf16.gmra.mxu1 %vm256_vm2, %v5611_v45 }
0x1780   :  { %10520 = vmatprep.mubr.msk.bf16.mxu1 %vm11162_vm1, %v11161_v9  ;;  %v7009_v39 = vpop.permute.xlu1 %7008 }
0x1787   :  { %10521 = vmatmul.mubr.msk.bf16.vlgmr.msra.gmra.mxu1 %vm256_vm2, %v6709_v38 }
0x1788   :  { %10531 = vmatpush3.bf16.xpose.msra.mxu1 %v6816_v12  ;;  %10532 = vmatprep.mubr.msk.bf16.mxu1 %vm11162_vm1, %v11161_v9 }
0x1789   :  { %10542 = vmatprep.subr.bf16.mxu1 %v11161_v9 }
0x178f   :  { %10533 = vmatmul.mubr.msk.bf16.vlgmr.msra.gmra.mxu1 %vm256_vm2, %v6809_v60  ;;  %v6759_v60 = vpop.permute.xlu0 %6758 }
0x1790   :  { %10543 = vmatpush3.bf16.xpose.msra.mxu1 %v6916_v20  ;;  %10544 = vmatprep.mubr.msk.bf16.mxu1 %vm11162_vm1, %v11161_v9  ;;  %v6766_v20 = vsel %vm256_vm2, %v6761_v19, 0 }
0x1791   :  { %10554 = vmatprep.subr.bf16.mxu1 %v11161_v9 }
0x1793   :  { %v6861_v23 = vpop.permute.xlu0 %6860 }
0x1797   :  { %10545 = vmatmul.mubr.msk.bf16.vlgmr.msra.gmra.mxu1 %vm256_vm2, %v6909_v43 }
0x1798   :  { %10555 = vmatpush3.bf16.xpose.msra.mxu1 %v7016_v0  ;;  %10556 = vmatprep.mubr.msk.bf16.mxu1 %vm11162_vm1, %v11161_v9 }
0x1799   :  { %10566 = vmatprep.subr.bf16.mxu1 %v11161_v9 }
0x179f   :  { %10557 = vmatmul.mubr.msk.bf16.vlgmr.msra.gmra.mxu1 %vm256_vm2, %v7009_v39 }
0x17a0   :  { %10568 = vmatprep.mubr.msk.bf16.mxu1 %vm11162_vm1, %v11161_v9 }
0x17e2   :  { %v6151_v48 = vpop.f32.mrf.mxu0 }
0x17e4   :  { %v10448_v29 = vpop.f32.mrf.mxu0 }
0x17e5   :  { %v6859_v29 = vpop.permute.xlu0 %6858 }
0x17e6   :  { %v6154_v45 = vpop.f32.mrf.mxu0  ;;  %v6199_v36 = vpop.f32.mrf.mxu1 }
0x17e7   :  { %v6493_v42 = vpack.c.bf16 %v6199_v36, %v6151_v48  ;;  %v6866_v36 = vsel %vm256_vm2, %v6861_v23, 0 }
0x17e8   :  { %v10449_v47 = vpop.f32.mrf.mxu0  ;;  %v10454_v11 = vpop.f32.mrf.mxu1 }
0x17e9   :  { %10494 = vmatprep.mubr.msk.bf16.mxu0 %vm256_vm2, %v6493_v42  ;;  %v13025_v11 = vld [vmem:[%s13604_s1 + $0x10] sm:$0xff] }
0x17ea   :  { %v6202_v37 = vpop.f32.mrf.mxu1  ;;  %v6247_v57 = vpop.f32.mrf.mxu0 }
0x17eb   :  { %v6961_v37 = vpop.permute.xlu0 %6960 }
0x17ec   :  { %v10455_v5 = vpop.f32.mrf.mxu1  ;;  %v10460_v3 = vpop.f32.mrf.mxu0 }
0x17ee   :  { %v6250_v21 = vpop.f32.mrf.mxu0 }
0x17ef   :  { %v6966_v21 = vsel %vm256_vm2, %v6961_v37, 0 }
0x17f0   :  { %v10461_v14 = vpop.f32.mrf.mxu0 }
0x181b   :  { %v6295_v50 = vpop.f32.mrf.mxu1 }
0x181c   :  { %v6494_v30 = vpack.c.bf16 %v6295_v50, %v6247_v57 }
0x181d   :  { %v10466_v28 = vpop.f32.mrf.mxu1 }
0x181e   :  { %10495 = vmatmul.mubr.msk.bf16.vlgmr.msra.gmra.mxu0 %vm256_vm2, %v6494_v30 }
0x181f   :  { %10513 = vmatpush3.bf16.xpose.msra.mxu0 %v6666_v16  ;;  %v6298_v52 = vpop.f32.mrf.mxu1  ;;  %v6343_v44 = vpop.f32.mrf.mxu0 }
0x1820   :  { %10524 = vmatprep.subr.bf16.mxu0 %v11161_v9  ;;  %v6959_v16 = vpop.permute.xlu0 %6958 }
0x1821   :  { %v10467_v24 = vpop.f32.mrf.mxu1  ;;  %v10472_v53 = vpop.f32.mrf.mxu0 }
0x1823   :  { %v6346_v41 = vpop.f32.mrf.mxu0  ;;  %v6391_v22 = vpop.f32.mrf.mxu1 }
0x1824   :  { %v6495_v4 = vpack.c.bf16 %v6391_v22, %v6343_v44 }
0x1825   :  { %v10473_v27 = vpop.f32.mrf.mxu0  ;;  %v10478_v31 = vpop.f32.mrf.mxu1 }
0x1826   :  { %10498 = vmatprep.mubr.msk.bf16.mxu0 %vm256_vm2, %v6495_v4 }
0x1827   :  { %v6394_v15 = vpop.f32.mrf.mxu1  ;;  %v6439_v1 = vpop.f32.mrf.mxu0 }
0x1829   :  { %v10479_v25 = vpop.f32.mrf.mxu1  ;;  %v10484_v59 = vpop.f32.mrf.mxu0 }
0x182b   :  { %v6442_v61 = vpop.f32.mrf.mxu0 }
0x182d   :  { %v10485_v34 = vpop.f32.mrf.mxu0 }
0x182f   :  { %v6487_v56 = vpop.f32.mrf.mxu1 }
0x1830   :  { %v6496_v38 = vpack.c.bf16 %v6487_v56, %v6439_v1 }
0x1831   :  { %v10490_v8 = vpop.f32.mrf.mxu1 }
0x1832   :  { %10499 = vmatmul.mubr.msk.bf16.gmra.mxu0 %vm256_vm2, %v6496_v38 }
0x1833   :  { %v6490_v18 = vpop.f32.mrf.mxu1  ;;  %10514 = vmatprep.mubr.msk.bf16.mxu0 %vm11162_vm1, %v11161_v9 }
0x1835   :  { %v10491_v12 = vpop.f32.mrf.mxu1 }
0x1837   :  { %v12996_v58 = vpop.f32.mrf.mxu1 }
0x1839   :  { %v12998_v43 = vpop.f32.mrf.mxu1 }
0x183a   :  { %10515 = vmatmul.mubr.msk.bf16.vlgmr.msra.gmra.mxu0 %vm256_vm2, %v6659_v51 }
0x183b   :  { %10525 = vmatpush3.bf16.xpose.msra.mxu0 %v6766_v20  ;;  %v13002_v0 = vpop.f32.mrf.mxu1  ;;  %10526 = vmatprep.mubr.msk.bf16.mxu0 %vm11162_vm1, %v11161_v9 }
0x183c   :  { %10536 = vmatprep.subr.bf16.mxu0 %v11161_v9 }
0x183d   :  { %v13007_v39 = vpop.f32.mrf.mxu1 }
0x183f   :  { %v13009_v48 = vpop.f32.mrf.mxu1 }
0x1841   :  { %v13011_v45 = vpop.f32.mrf.mxu1 }
0x1842   :  { %10527 = vmatmul.mubr.msk.bf16.vlgmr.msra.gmra.mxu0 %vm256_vm2, %v6759_v60 }
0x1843   :  { %10537 = vmatpush3.bf16.xpose.msra.mxu0 %v6866_v36  ;;  %v13015_v42 = vpop.f32.mrf.mxu1  ;;  %10538 = vmatprep.mubr.msk.bf16.mxu0 %vm11162_vm1, %v11161_v9 }
0x1844   :  { %10548 = vmatprep.subr.bf16.mxu0 %v11161_v9 }
0x1845   :  { %v13020_v47 = vpop.f32.mrf.mxu1 }
0x1847   :  { %v6752_v57 = vpop.f32.mrf.mxu1 }
0x1848   :  { %v6753_v5 = vadd.f32 %v13025_v11, %v6752_v57 }
0x1849   :  { %v10522_v3 = vpop.f32.mrf.mxu1 }
0x184a   :  { %10539 = vmatmul.mubr.msk.bf16.vlgmr.msra.gmra.mxu0 %vm256_vm2, %v6859_v29  ;;  %v7061_v14 = vsel %vm256_vm2, %v6753_v5, -inf }
0x184b   :  { %10549 = vmatpush3.bf16.xpose.msra.mxu0 %v6966_v21  ;;  %7062 = vmax.xlane.f32.xlu1 %v7061_v14  ;;  %v6755_v10 = vpop.f32.mrf.mxu1 }
0x184c   :  { %10550 = vmatprep.mubr.msk.bf16.mxu0 %vm11162_vm1, %v11161_v9  ;;  %10560 = vmatprep.subr.bf16.mxu0 %v11161_v9 }
0x184d   :  { %v10523_v50 = vpop.f32.mrf.mxu1 }
0x184f   :  { %v6852_v30 = vpop.f32.mrf.mxu1 }
0x1850   :  { %v6853_v28 = vadd.f32 %v13025_v11, %v6852_v30 }
0x1851   :  { %v10534_v52 = vpop.f32.mrf.mxu1 }
0x1852   :  { %10551 = vmatmul.mubr.msk.bf16.vlgmr.msra.gmra.mxu0 %vm256_vm2, %v6959_v16  ;;  %v7067_v44 = vsel %vm256_vm2, %v6853_v28, -inf }
0x1853   :  { %7068 = vmax.xlane.f32.xlu0 %v7067_v44  ;;  %v6855_v24 = vpop.f32.mrf.mxu1  ;;  %10562 = vmatprep.mubr.msk.bf16.mxu0 %vm11162_vm1, %v11161_v9 }
0x1855   :  { %v10535_v53 = vpop.f32.mrf.mxu1 }
0x1857   :  { %v6952_v41 = vpop.f32.mrf.mxu1 }
0x1858   :  { %v6953_v22 = vadd.f32 %v13025_v11, %v6952_v41 }
0x1859   :  { %v10546_v4 = vpop.f32.mrf.mxu1 }
0x185a   :  { %v7073_v27 = vsel %vm256_vm2, %v6953_v22, -inf }
0x185b   :  { %7074 = vmax.xlane.f32.xlu1 %v7073_v27  ;;  %v6955_v31 = vpop.f32.mrf.mxu1 }
0x185d   :  { %v10547_v15 = vpop.f32.mrf.mxu1 }
0x185f   :  { %v7052_v1 = vpop.f32.mrf.mxu1 }
0x1860   :  { %v7053_v51 = vadd.f32 %v13025_v11, %v7052_v1 }
0x1861   :  { %v10558_v25 = vpop.f32.mrf.mxu1 }
0x1862   :  { %v7079_v59 = vsel %vm256_vm2, %v7053_v51, -inf }
0x1863   :  { %7080 = vmax.xlane.f32.xlu1 %v7079_v59  ;;  %v7055_v61 = vpop.f32.mrf.mxu1 }
0x1865   :  { %v10559_v34 = vpop.f32.mrf.mxu1 }
0x18d4   :  { %v7063_v19 = vpop.xlane.xlu1 %7062 }
0x18d5   :  { %v7083_v56 = vsub.f32 %v6753_v5, %v7063_v19 }
0x18d7   :  { %v7092_v38 = vmul.f32 1.442695, %v7083_v56 }
0x18d9   :  { %11055 = vpow2.f32 %v7092_v38 }
0x18dc   :  { %v7069_v8 = vpop.xlane.xlu0 %7068 }
0x18dd   :  { %v7085_v18 = vsub.f32 %v6853_v28, %v7069_v8 }
0x18de   :  { %v13043_v12 = vpop.f32.mrf.mxu0 }
0x18df   :  { %v7096_v60 = vmul.f32 1.442695, %v7085_v18 }
0x18e0   :  { %v13049_v57 = vpop.f32.mrf.mxu0 }
0x18e1   :  { %11057 = vpow2.f32 %v7096_v60 }
0x18e2   :  { %v13051_v5 = vpop.f32.mrf.mxu0 }
0x18e4   :  { %v7075_v20 = vpop.xlane.xlu1 %7074  ;;  %v13057_v30 = vpop.f32.mrf.mxu0 }
0x18e5   :  { %v7087_v23 = vsub.f32 %v6953_v22, %v7075_v20 }
0x18e6   :  { %v13045_v29 = vpop.eup %11055 }
0x18e7   :  { %v7100_v36 = vmul.f32 1.442695, %v7087_v23  ;;  %v7109_v37 = vsel %vm256_vm2, %v13045_v29, 0.0 }
0x18e8   :  { %7110 = vadd.xlane.f32.xlu1 %v7109_v37 }
0x18e9   :  { %11059 = vpow2.f32 %v7100_v36 }
0x18ec   :  { %v7081_v3 = vpop.xlane.xlu1 %7080 }
0x18ed   :  { %v7089_v21 = vsub.f32 %v7053_v51, %v7081_v3 }
0x18ee   :  { %v13053_v14 = vpop.eup %11057 }
0x18ef   :  { %v7104_v10 = vmul.f32 1.442695, %v7089_v21  ;;  %v7115_v50 = vsel %vm256_vm2, %v13053_v14, 0.0 }
0x18f0   :  { %7116 = vadd.xlane.f32.xlu1 %v7115_v50 }
0x18f1   :  { %11061 = vpow2.f32 %v7104_v10 }
0x18f2   :  { %v13059_v28 = vpop.f32.mrf.mxu0 }
0x18f4   :  { %v13061_v16 = vpop.f32.mrf.mxu0 }
0x18f6   :  { %v13063_v52 = vpop.eup %11059  ;;  %v13065_v44 = vpop.f32.mrf.mxu0 }
0x18f7   :  { %v7121_v24 = vsel %vm256_vm2, %v13063_v52, 0.0 }
0x18f8   :  { %v13069_v53 = vpop.f32.mrf.mxu0  ;;  %7122 = vadd.xlane.f32.xlu1 %v7121_v24 }
0x18fa   :  { %v6702_v41 = vpop.f32.mrf.mxu0 }
0x18fb   :  { %v6703_v22 = vadd.f32 %v13025_v11, %v6702_v41 }
0x18fc   :  { %v10516_v4 = vpop.f32.mrf.mxu0 }
0x18fd   :  { %v7058_v27 = vsel %vm256_vm2, %v6703_v22, -inf }
0x18fe   :  { %v13073_v31 = vpop.eup %11061  ;;  %v6705_v15 = vpop.f32.mrf.mxu0  ;;  %7059 = vmax.xlane.f32.xlu0 %v7058_v27 }
0x18ff   :  { %v7127_v1 = vsel %vm256_vm2, %v13073_v31, 0.0 }
0x1900   :  { %v10517_v51 = vpop.f32.mrf.mxu0  ;;  %7128 = vadd.xlane.f32.xlu1 %v7127_v1 }
0x1902   :  { %v6802_v25 = vpop.f32.mrf.mxu0 }
0x1903   :  { %v6803_v59 = vadd.f32 %v13025_v11, %v6802_v25 }
0x1904   :  { %v10528_v61 = vpop.f32.mrf.mxu0 }
0x1905   :  { %v7064_v34 = vsel %vm256_vm2, %v6803_v59, -inf }
0x1906   :  { %v6805_v19 = vpop.f32.mrf.mxu0  ;;  %7065 = vmax.xlane.f32.xlu0 %v7064_v34 }
0x1908   :  { %v10529_v56 = vpop.f32.mrf.mxu0 }
0x190a   :  { %v6902_v38 = vpop.f32.mrf.mxu0 }
0x190b   :  { %v13080_v8 = vadd.f32 %v13025_v11, %v6902_v38 }
0x190c   :  { %v10540_v18 = vpop.f32.mrf.mxu0 }
0x190d   :  { %v7070_v60 = vsel %vm256_vm2, %v13080_v8, -inf }
0x190e   :  { %v6905_v20 = vpop.f32.mrf.mxu0  ;;  %7071 = vmax.xlane.f32.xlu0 %v7070_v60 }
0x1910   :  { %v10541_v23 = vpop.f32.mrf.mxu0 }
0x1911   :  { %7202 = vrot.lane.b32.xlu1 %v12497_v63, %s11170_s18 }
0x1912   :  { %v7002_v36 = vpop.f32.mrf.mxu0 }
0x1913   :  { %v13087_v37 = vadd.f32 %v13025_v11, %v7002_v36 }
0x1914   :  { %v10552_v3 = vpop.f32.mrf.mxu0 }
0x1915   :  { %7250 = vrot.lane.b32.xlu1 %v12501_v17, %s11170_s18  ;;  %v7076_v21 = vsel %vm256_vm2, %v13087_v37, -inf }
0x1916   :  { %v7005_v10 = vpop.f32.mrf.mxu0  ;;  %7077 = vmax.xlane.f32.xlu0 %v7076_v21 }
0x1918   :  { %v10553_v50 = vpop.f32.mrf.mxu0 }
0x1919   :  { %7298 = vrot.lane.b32.xlu1 %v12505_v62, %s11170_s18 }
0x191d   :  { %7394 = vrot.lane.b32.xlu1 %v12515_v55, %s11170_s18 }
0x1921   :  { %7490 = vrot.lane.b32.xlu1 %v12521_v35, %s11170_s18 }
0x1925   :  { %7631 = vrot.lane.b32.xlu1 %v12493_v33, %s11171_s19 }
0x1929   :  { %7681 = vrot.lane.b32.xlu1 %v12497_v63, %s11171_s19 }
0x192c   :  { %7154 = vrot.lane.b32.xlu0 %v12493_v33, %s11170_s18 }
0x192d   :  { %7783 = vrot.lane.b32.xlu1 %v12505_v62, %s11172_s22 }
0x1931   :  { %7781 = vrot.lane.b32.xlu1 %v12505_v62, %s11171_s19 }
0x1935   :  { %7883 = vrot.lane.b32.xlu1 %v12515_v55, %s11172_s22 }
0x1939   :  { %7881 = vrot.lane.b32.xlu1 %v12515_v55, %s11171_s19 }
0x193d   :  { %7983 = vrot.lane.b32.xlu1 %v12521_v35, %s11172_s22 }
0x1941   :  { %7981 = vrot.lane.b32.xlu1 %v12521_v35, %s11171_s19 }
0x1971   :  { %v7111_v11 = vpop.xlane.xlu1 %7110 }
0x1972   :  { %11063 = vrcp.f32 %v7111_v11 }
0x1979   :  { %v7117_v24 = vpop.xlane.xlu1 %7116 }
0x197a   :  { %11065 = vrcp.f32 %v7117_v24 }
0x197f   :  { %v11064_v15 = vpop.eup %11063 }
0x1980   :  { %v7139_v25 = vmul.f32 %v11064_v15, %v13045_v29 }
0x1981   :  { %v7123_v41 = vpop.xlane.xlu1 %7122 }
0x1982   :  { %11067 = vrcp.f32 %v7123_v41  ;;  %v7147_v56 = vpack.c.bf16 %v7139_v25, %v7139_v25 }
0x1987   :  { %v7060_v4 = vpop.xlane.xlu0 %7059  ;;  %v11066_v18 = vpop.eup %11065 }
0x1988   :  { %v7082_v27 = vsub.f32 %v6703_v22, %v7060_v4  ;;  %v7141_v29 = vmul.f32 %v11066_v18, %v13053_v14 }
0x1989   :  { %v7129_v1 = vpop.xlane.xlu1 %7128 }
0x198a   :  { %v7090_v51 = vmul.f32 1.442695, %v7082_v27  ;;  %v7149_v36 = vpack.c.bf16 %v7141_v29, %v7141_v29 }
0x198c   :  { %11069 = vpow2.f32 %v7090_v51 }
0x198d   :  { %v7203_v61 = vpop.permute.xlu1 %7202  ;;  %11071 = vrcp.f32 %v7129_v1 }
0x198e   :  { %v7208_v34 = vsel %vm740_vm3, %v7203_v61, 0 }
0x198f   :  { %v7066_v19 = vpop.xlane.xlu0 %7065  ;;  %10567 = vmatpush3.bf16.msra.mxu1 %v7208_v34 }
0x1990   :  { %v7084_v38 = vsub.f32 %v6803_v59, %v7066_v19  ;;  %10578 = vmatprep.subr.bf16.mxu1 %v11161_v9  ;;  %v11068_v59 = vpop.eup %11067 }
0x1991   :  { %v13120_v60 = vpop.permute.xlu1 %7250  ;;  %v7143_v14 = vmul.f32 %v11068_v59, %v13063_v52 }
0x1992   :  { %v7094_v22 = vmul.f32 1.442695, %v7084_v38  ;;  %10569 = vmatmul.mubr.msk.bf16.vlgmr.msra.gmra.mxu1 %vm256_vm2, %v7147_v56 }
0x1993   :  { %10580 = vmatprep.mubr.msk.bf16.mxu1 %vm11162_vm1, %v11161_v9  ;;  %v7151_v27 = vpack.c.bf16 %v7143_v14, %v7143_v14 }
0x1994   :  { %11073 = vpow2.f32 %v7094_v22 }
0x1995   :  { %v7299_v20 = vpop.permute.xlu1 %7298 }
0x1996   :  { %v7304_v23 = vsel %vm740_vm3, %v7299_v20, 0 }
0x1997   :  { %10579 = vmatpush3.bf16.msra.mxu1 %v7304_v23  ;;  %v7072_v11 = vpop.xlane.xlu0 %7071 }
0x1998   :  { %10590 = vmatprep.subr.bf16.mxu1 %v11161_v9 }
0x1999   :  { %v11070_v3 = vpop.eup %11069  ;;  %v7395_v21 = vpop.permute.xlu1 %7394 }
0x199a   :  { %v7400_v10 = vsel %vm740_vm3, %v7395_v21, 0  ;;  %10581 = vmatmul.mubr.msk.bf16.vlgmr.msra.gmra.mxu1 %vm256_vm2, %v7149_v36  ;;  %v7106_v50 = vsel %vm256_vm2, %v11070_v3, 0.0  ;;  %v11072_v4 = vpop.eup %11071  ;;  %v7256_v21 = vsel %vm740_vm3, %v13120_v60, 0 }
0x199b   :  { %7107 = vadd.xlane.f32.xlu0 %v7106_v50  ;;  %10591 = vmatpush3.bf16.msra.mxu1 %v7400_v10  ;;  %v7145_v52 = vmul.f32 %v11072_v4, %v13073_v31  ;;  %v7086_v31 = vsub.f32 %v13080_v8, %v7072_v11 }
0x199c   :  { %10592 = vmatprep.mubr.msk.bf16.mxu1 %vm11162_vm1, %v11161_v9  ;;  %10602 = vmatprep.subr.bf16.mxu1 %v11161_v9 }
0x199d   :  { %v7491_v24 = vpop.permute.xlu1 %7490  ;;  %v7153_v34 = vpack.c.bf16 %v7145_v52, %v7145_v52  ;;  %v7098_v19 = vmul.f32 1.442695, %v7086_v31 }
0x199e   :  { %v7496_v1 = vsel %vm740_vm3, %v7491_v24, 0 }
0x199f   :  { %v7078_v41 = vpop.xlane.xlu0 %7077  ;;  %11075 = vpow2.f32 %v7098_v19 }
0x19a0   :  { %v7088_v56 = vsub.f32 %v13087_v37, %v7078_v41 }
0x19a1   :  { %v11074_v15 = vpop.eup %11073  ;;  %v7632_v19 = vpop.permute.xlu1 %7631 }
0x19a2   :  { %10593 = vmatmul.mubr.msk.bf16.vlgmr.msra.gmra.mxu1 %vm256_vm2, %v7151_v27  ;;  %v7112_v51 = vsel %vm256_vm2, %v11074_v15, 0.0  ;;  %v7102_v38 = vmul.f32 1.442695, %v7088_v56 }
0x19a3   :  { %10603 = vmatpush3.bf16.msra.mxu1 %v7496_v1  ;;  %7113 = vadd.xlane.f32.xlu0 %v7112_v51  ;;  %v7155_v25 = vpop.permute.xlu0 %7154 }
0x19a4   :  { %v7160_v61 = vsel %vm740_vm3, %v7155_v25, 0  ;;  %10604 = vmatprep.mubr.msk.bf16.mxu1 %vm11162_vm1, %v11161_v9  ;;  %10618 = vmatprep.subr.bf16.mxu1 %v11161_v9  ;;  %11077 = vpow2.f32 %v7102_v38 }
0x19a5   :  { %10561 = vmatpush3.bf16.msra.mxu0 %v7160_v61 }
0x19a6   :  { %10572 = vmatprep.subr.bf16.mxu0 %v11161_v9 }
0x19aa   :  { %10605 = vmatmul.mubr.msk.bf16.vlgmr.msra.gmra.mxu1 %vm256_vm2, %v7153_v34 }
0x19ab   :  { %10620 = vmatprep.mubr.msk.bf16.mxu1 %vm11162_vm1, %v11161_v9 }
0x19ac   :  { %v11076_v18 = vpop.eup %11075 }
0x19ad   :  { %v7118_v22 = vsel %vm256_vm2, %v11076_v18, 0.0 }
0x19b1   :  { %v13152_v29 = vpop.eup %11077 }
0x19b2   :  { %v7124_v20 = vsel %vm256_vm2, %v13152_v29, 0.0 }
0x19b9   :  { %7346 = vrot.lane.b32.xlu0 %v12509_v6, %s11170_s18 }
0x19d8   :  { %7119 = vadd.xlane.f32.xlu0 %v7118_v22 }
0x19dc   :  { %7125 = vadd.xlane.f32.xlu0 %v7124_v20 }
0x19f2   :  { %7442 = vrot.lane.b32.xlu0 %v12513_v40, %s11170_s18 }
0x19f6   :  { %7633 = vrot.lane.b32.xlu0 %v12493_v33, %s11172_s22 }
0x19fa   :  { %7683 = vrot.lane.b32.xlu0 %v12497_v63, %s11172_s22 }
0x19fe   :  { %7733 = vrot.lane.b32.xlu0 %v12501_v17, %s11172_s22 }
0x1a02   :  { %7731 = vrot.lane.b32.xlu0 %v12501_v17, %s11171_s19 }
0x1a06   :  { %7833 = vrot.lane.b32.xlu0 %v12509_v6, %s11172_s22 }
0x1a0a   :  { %7831 = vrot.lane.b32.xlu0 %v12509_v6, %s11171_s19 }
0x1a0e   :  { %7933 = vrot.lane.b32.xlu0 %v12513_v40, %s11172_s22 }
0x1a12   :  { %7931 = vrot.lane.b32.xlu0 %v12513_v40, %s11171_s19 }
0x1a24   :  { %v7108_v8 = vpop.xlane.xlu0 %7107 }
0x1a25   :  { %11079 = vrcp.f32 %v7108_v8  ;;  %v7682_v8 = vpop.permute.xlu1 %7681 }
0x1a2c   :  { %v7114_v37 = vpop.xlane.xlu0 %7113 }
0x1a2d   :  { %11081 = vrcp.f32 %v7114_v37 }
0x1a30   :  { %v7347_v11 = vpop.permute.xlu0 %7346 }
0x1a31   :  { %v7352_v24 = vsel %vm740_vm3, %v7347_v11, 0 }
0x1a32   :  { %v11080_v23 = vpop.eup %11079 }
0x1a33   :  { %v7138_v59 = vmul.f32 %v11080_v23, %v11070_v3 }
0x1a35   :  { %v7146_v36 = vpack.c.bf16 %v7138_v59, %v7138_v59 }
0x1a37   :  { %10563 = vmatmul.mubr.msk.bf16.vlgmr.msra.gmra.mxu0 %vm256_vm2, %v7146_v36 }
0x1a38   :  { %10573 = vmatpush3.bf16.msra.mxu0 %v7256_v21  ;;  %10574 = vmatprep.mubr.msk.bf16.mxu0 %vm11162_vm1, %v11161_v9 }
0x1a39   :  { %10584 = vmatprep.subr.bf16.mxu0 %v11161_v9 }
0x1a3a   :  { %v11082_v10 = vpop.eup %11081 }
0x1a3b   :  { %v7140_v50 = vmul.f32 %v11082_v10, %v11074_v15 }
0x1a3d   :  { %v7148_v14 = vpack.c.bf16 %v7140_v50, %v7140_v50 }
0x1a3f   :  { %10575 = vmatmul.mubr.msk.bf16.vlgmr.msra.gmra.mxu0 %vm256_vm2, %v7148_v14  ;;  %v7784_v14 = vpop.permute.xlu1 %7783 }
0x1a40   :  { %10585 = vmatpush3.bf16.msra.mxu0 %v7352_v24  ;;  %10586 = vmatprep.mubr.msk.bf16.mxu0 %vm11162_vm1, %v11161_v9 }
0x1a41   :  { %10596 = vmatprep.subr.bf16.mxu0 %v11161_v9 }
0x1a52   :  { %v13185_v60 = vpop.f32.mrf.mxu1 }
0x1a54   :  { %v10570_v3 = vpop.f32.mrf.mxu1 }
0x1a56   :  { %v7247_v41 = vpop.f32.mrf.mxu1 }
0x1a58   :  { %v10571_v4 = vpop.f32.mrf.mxu1 }
0x1a5a   :  { %v13187_v27 = vpop.f32.mrf.mxu1 }
0x1a5c   :  { %v10582_v15 = vpop.f32.mrf.mxu1 }
0x1a5e   :  { %v7343_v1 = vpop.f32.mrf.mxu1 }
0x1a5f   :  { %v9351_v1 = vld [vmem:[%s13605_s4 + $0x18] sm:$0xf] }
0x1a60   :  { %v10583_v51 = vpop.f32.mrf.mxu1 }
0x1a61   :  { %v7120_v25 = vpop.xlane.xlu0 %7119  ;;  %v7555_v51 = vsel %vm740_vm3, %v9351_v1, 0 }
0x1a62   :  { %11083 = vrcp.f32 %v7120_v25  ;;  %v13189_v52 = vpop.f32.mrf.mxu1 }
0x1a64   :  { %v10594_v61 = vpop.f32.mrf.mxu1 }
0x1a65   :  { %v7126_v34 = vpop.xlane.xlu0 %7125 }
0x1a66   :  { %11085 = vrcp.f32 %v7126_v34  ;;  %v7439_v31 = vpop.f32.mrf.mxu1 }
0x1a68   :  { %v10595_v56 = vpop.f32.mrf.mxu1 }
0x1a69   :  { %v7443_v38 = vpop.permute.xlu0 %7442 }
0x1a6a   :  { %v13191_v22 = vpop.f32.mrf.mxu1  ;;  %v7448_v3 = vsel %vm740_vm3, %v7443_v38, 0 }
0x1a6c   :  { %v10606_v20 = vpop.f32.mrf.mxu1 }
0x1a6d   :  { %v7634_v37 = vpop.permute.xlu0 %7633 }
0x1a6e   :  { %v7639_v23 = vsel %vm256_vm2, %v7634_v37, 0  ;;  %v7535_v59 = vpop.f32.mrf.mxu1 }
0x1a6f   :  { %v11084_v36 = vpop.eup %11083  ;;  %10619 = vmatpush3.bf16.xpose.msra.mxu1 %v7639_v23 }
0x1a70   :  { %v7142_v21 = vmul.f32 %v11084_v36, %v11076_v18  ;;  %v10607_v10 = vpop.f32.mrf.mxu1  ;;  %10624 = vmatprep.subr.bf16.mxu1 %v11161_v9  ;;  %v7782_v18 = vpop.permute.xlu1 %7781 }
0x1a71   :  { %v7684_v24 = vpop.permute.xlu0 %7683 }
0x1a72   :  { %v7150_v50 = vpack.c.bf16 %v7142_v21, %v7142_v21  ;;  %v7689_v4 = vsel %vm256_vm2, %v7684_v24, 0  ;;  %v13239_v24 = vld [vmem:[%s13604_s1 + $0x18] sm:$0xff] }
0x1a73   :  { %v11086_v11 = vpop.eup %11085 }
0x1a74   :  { %10587 = vmatmul.mubr.msk.bf16.vlgmr.msra.gmra.mxu0 %vm256_vm2, %v7150_v50  ;;  %v7144_v41 = vmul.f32 %v11086_v11, %v13152_v29  ;;  %v7789_v29 = vsel %vm256_vm2, %v7784_v14, 0  ;;  %v7884_v25 = vpop.permute.xlu1 %7883 }
0x1a75   :  { %10597 = vmatpush3.bf16.msra.mxu0 %v7448_v3  ;;  %10598 = vmatprep.mubr.msk.bf16.mxu0 %vm11162_vm1, %v11161_v9  ;;  %v7889_v34 = vsel %vm256_vm2, %v7884_v25, 0  ;;  %v7734_v59 = vpop.permute.xlu0 %7733 }
0x1a76   :  { %10621 = vmatmul.mubr.msk.bf16.vlgmr.msra.gmra.mxu1 %vm256_vm2, %v7632_v19  ;;  %v7152_v15 = vpack.c.bf16 %v7144_v41, %v7144_v41  ;;  %10766 = vmatprep.subr.msk.bf16.mxu0 %vm740_vm3, %v9351_v1  ;;  %v7739_v50 = vsel %vm256_vm2, %v7734_v59, 0 }
0x1a77   :  { %10625 = vmatpush3.bf16.xpose.msra.mxu1 %v7689_v4  ;;  %10626 = vmatprep.mubr.msk.bf16.mxu1 %vm11162_vm1, %v11161_v9 }
0x1a78   :  { %10636 = vmatprep.subr.bf16.mxu1 %v11161_v9  ;;  %v7882_v61 = vpop.permute.xlu1 %7881 }
0x1a79   :  { %v7732_v1 = vpop.permute.xlu0 %7731 }
0x1a7c   :  { %10599 = vmatmul.mubr.msk.bf16.vlgmr.msra.gmra.mxu0 %vm256_vm2, %v7152_v15  ;;  %v7984_v31 = vpop.permute.xlu1 %7983 }
0x1a7d   :  { %10609 = vmatpush3.bf16.msra.mxu0 %v7555_v51  ;;  %v7989_v19 = vsel %vm256_vm2, %v7984_v31, 0 }
0x1a7e   :  { %10627 = vmatmul.mubr.msk.bf16.vlgmr.msra.gmra.mxu1 %vm256_vm2, %v7682_v8  ;;  %10630 = vmatprep.subr.bf16.mxu0 %v11161_v9 }
0x1a7f   :  { %10637 = vmatpush3.bf16.xpose.msra.mxu1 %v7789_v29  ;;  %10638 = vmatprep.mubr.msk.bf16.mxu1 %vm11162_vm1, %v11161_v9 }
0x1a80   :  { %10648 = vmatprep.subr.bf16.mxu1 %v11161_v9  ;;  %v7982_v56 = vpop.permute.xlu1 %7981 }
0x1a86   :  { %10639 = vmatmul.mubr.msk.bf16.vlgmr.msra.gmra.mxu1 %vm256_vm2, %v7782_v18 }
0x1a87   :  { %10649 = vmatpush3.bf16.xpose.msra.mxu1 %v7889_v34  ;;  %10650 = vmatprep.mubr.msk.bf16.mxu1 %vm11162_vm1, %v11161_v9 }
0x1a88   :  { %10660 = vmatprep.subr.bf16.mxu1 %v11161_v9 }
0x1a8e   :  { %10651 = vmatmul.mubr.msk.bf16.vlgmr.msra.gmra.mxu1 %vm256_vm2, %v7882_v61 }
0x1a8f   :  { %10661 = vmatpush3.bf16.xpose.msra.mxu1 %v7989_v19  ;;  %10662 = vmatprep.mubr.msk.bf16.mxu1 %vm11162_vm1, %v11161_v9 }
0x1a90   :  { %10672 = vmatprep.subr.bf16.mxu1 %v11161_v9 }
0x1a96   :  { %10663 = vmatmul.mubr.msk.bf16.vlgmr.msra.gmra.mxu1 %vm256_vm2, %v7982_v56  ;;  %v7834_v56 = vpop.permute.xlu0 %7833 }
0x1a97   :  { %10674 = vmatprep.mubr.msk.bf16.mxu1 %vm11162_vm1, %v11161_v9 }
0x1af7   :  { %v7196_v38 = vpop.f32.mrf.mxu0 }
0x1af8   :  { %v7538_v20 = vpack.c.bf16 %v13185_v60, %v7196_v38 }
0x1af9   :  { %v10564_v8 = vpop.f32.mrf.mxu0 }
0x1afa   :  { %10610 = vmatprep.mubr.msk.bf16.mxu0 %vm256_vm2, %v7538_v20 }
0x1afb   :  { %v7199_v37 = vpop.f32.mrf.mxu0 }
0x1afd   :  { %v10565_v23 = vpop.f32.mrf.mxu0 }
0x1aff   :  { %v7292_v36 = vpop.f32.mrf.mxu0 }
0x1b00   :  { %v7539_v21 = vpack.c.bf16 %v13187_v27, %v7292_v36  ;;  %v7832_v36 = vpop.permute.xlu0 %7831 }
0x1b01   :  { %v10576_v10 = vpop.f32.mrf.mxu0 }
0x1b02   :  { %10611 = vmatmul.mubr.msk.bf16.vlgmr.msra.gmra.mxu0 %vm256_vm2, %v7539_v21  ;;  %v7839_v10 = vsel %vm256_vm2, %v7834_v56, 0 }
0x1b03   :  { %10631 = vmatpush3.bf16.xpose.msra.mxu0 %v7739_v50  ;;  %v7295_v11 = vpop.f32.mrf.mxu0 }
0x1b04   :  { %10642 = vmatprep.subr.bf16.mxu0 %v11161_v9 }
0x1b05   :  { %v10577_v14 = vpop.f32.mrf.mxu0 }
0x1b34   :  { %v7388_v60 = vpop.f32.mrf.mxu0 }
0x1b35   :  { %v7540_v3 = vpack.c.bf16 %v13189_v52, %v7388_v60 }
0x1b36   :  { %v10588_v41 = vpop.f32.mrf.mxu0  ;;  %v7675_v27 = vpop.f32.mrf.mxu1 }
0x1b37   :  { %v13243_v4 = vadd.f32 %v13239_v24, %v7675_v27  ;;  %10614 = vmatprep.mubr.msk.bf16.mxu0 %vm256_vm2, %v7540_v3  ;;  %v7934_v3 = vpop.permute.xlu0 %7933 }
0x1b38   :  { %v7391_v18 = vpop.f32.mrf.mxu0  ;;  %v10622_v15 = vpop.f32.mrf.mxu1 }
0x1b39   :  { %v8031_v29 = vsel %vm256_vm2, %v13243_v4, -inf  ;;  %v7939_v18 = vsel %vm256_vm2, %v7934_v3, 0 }
0x1b3a   :  { %v10589_v51 = vpop.f32.mrf.mxu0  ;;  %8032 = vmax.xlane.f32.xlu0 %v8031_v29  ;;  %v7678_v25 = vpop.f32.mrf.mxu1 }
0x1b3c   :  { %v7484_v61 = vpop.f32.mrf.mxu0  ;;  %v10623_v34 = vpop.f32.mrf.mxu1 }
0x1b3d   :  { %v7541_v52 = vpack.c.bf16 %v13191_v22, %v7484_v61  ;;  %v7932_v61 = vpop.permute.xlu0 %7931 }
0x1b3e   :  { %v10600_v31 = vpop.f32.mrf.mxu0  ;;  %v7725_v19 = vpop.f32.mrf.mxu1 }
0x1b3f   :  { %v13250_v38 = vadd.f32 %v13239_v24, %v7725_v19  ;;  %10615 = vmatmul.mubr.msk.bf16.gmra.mxu0 %vm256_vm2, %v7541_v52 }
0x1b40   :  { %v7487_v20 = vpop.f32.mrf.mxu0  ;;  %v10628_v8 = vpop.f32.mrf.mxu1  ;;  %10632 = vmatprep.mubr.msk.bf16.mxu0 %vm11162_vm1, %v11161_v9 }
0x1b41   :  { %v8034_v37 = vsel %vm256_vm2, %v13250_v38, -inf  ;;  %v6635_v8 = vadd.f32 %v12996_v58, %v13043_v12  ;;  %v6630_v58 = vadd.f32 %v13007_v39, %v13057_v30 }
0x1b42   :  { %v10601_v23 = vpop.f32.mrf.mxu0  ;;  %8035 = vmax.xlane.f32.xlu1 %v8034_v37  ;;  %v7728_v59 = vpop.f32.mrf.mxu1 }
0x1b43   :  { %v6627_v23 = vadd.f32 %v12998_v43, %v13049_v57 }
0x1b44   :  { %v10629_v22 = vpop.f32.mrf.mxu1 }
0x1b46   :  { %v7825_v21 = vpop.f32.mrf.mxu1 }
0x1b47   :  { %v7826_v50 = vadd.f32 %v13239_v24, %v7825_v21  ;;  %10633 = vmatmul.mubr.msk.bf16.vlgmr.msra.gmra.mxu0 %vm256_vm2, %v7732_v1 }
0x1b48   :  { %10643 = vmatpush3.bf16.xpose.msra.mxu0 %v7839_v10  ;;  %v10640_v11 = vpop.f32.mrf.mxu1  ;;  %10644 = vmatprep.mubr.msk.bf16.mxu0 %vm11162_vm1, %v11161_v9  ;;  %v6638_v10 = vadd.f32 %v13002_v0, %v13051_v5 }
0x1b49   :  { %v8040_v14 = vsel %vm256_vm2, %v7826_v50, -inf  ;;  %10654 = vmatprep.subr.bf16.mxu0 %v11161_v9 }
0x1b4a   :  { %8041 = vmax.xlane.f32.xlu0 %v8040_v14  ;;  %v7828_v60 = vpop.f32.mrf.mxu1 }
0x1b4c   :  { %v10641_v41 = vpop.f32.mrf.mxu1 }
0x1b4e   :  { %v7925_v27 = vpop.f32.mrf.mxu1 }
0x1b4f   :  { %v7926_v15 = vadd.f32 %v13239_v24, %v7925_v27  ;;  %10645 = vmatmul.mubr.msk.bf16.vlgmr.msra.gmra.mxu0 %vm256_vm2, %v7832_v36 }
0x1b50   :  { %10655 = vmatpush3.bf16.xpose.msra.mxu0 %v7939_v18  ;;  %v10652_v1 = vpop.f32.mrf.mxu1  ;;  %10656 = vmatprep.mubr.msk.bf16.mxu0 %vm11162_vm1, %v11161_v9 }
0x1b51   :  { %v8046_v29 = vsel %vm256_vm2, %v7926_v15, -inf  ;;  %10666 = vmatprep.subr.bf16.mxu0 %v11161_v9 }
0x1b52   :  { %8047 = vmax.xlane.f32.xlu1 %v8046_v29  ;;  %v7928_v51 = vpop.f32.mrf.mxu1 }
0x1b54   :  { %v10653_v25 = vpop.f32.mrf.mxu1 }
0x1b56   :  { %v8025_v34 = vpop.f32.mrf.mxu1 }
0x1b57   :  { %v8026_v52 = vadd.f32 %v13239_v24, %v8025_v34  ;;  %10657 = vmatmul.mubr.msk.bf16.vlgmr.msra.gmra.mxu0 %vm256_vm2, %v7932_v61 }
0x1b58   :  { %v10664_v31 = vpop.f32.mrf.mxu1  ;;  %10668 = vmatprep.mubr.msk.bf16.mxu0 %vm11162_vm1, %v11161_v9 }
0x1b59   :  { %v8052_v19 = vsel %vm256_vm2, %v8026_v52, -inf }
0x1b5a   :  { %8053 = vmax.xlane.f32.xlu1 %v8052_v19  ;;  %v8028_v56 = vpop.f32.mrf.mxu1 }
0x1b5c   :  { %v10665_v20 = vpop.f32.mrf.mxu1 }
0x1bc2   :  { %v10612_v37 = vpop.f32.mrf.mxu0 }
0x1bc3   :  { %v13280_v59 = vadd.f32 %v10612_v37, %v6635_v8  ;;  %v8033_v22 = vpop.xlane.xlu0 %8032  ;;  %v6643_v37 = vadd.f32 %v13011_v45, %v13061_v16 }
0x1bc4   :  { %v8055_v36 = vsub.f32 %v13243_v4, %v8033_v22  ;;  %v7591_v21 = vpop.f32.mrf.mxu0 }
0x1bc5   :  { %v13285_v11 = vadd.f32 %v7591_v21, %v6627_v23 }
0x1bc6   :  { %v8063_v14 = vmul.f32 1.442695, %v8055_v36  ;;  %v10613_v60 = vpop.f32.mrf.mxu0  ;;  %v6654_v36 = vadd.f32 %v13015_v42, %v13065_v44 }
0x1bc7   :  { %v13289_v12 = vadd.f32 %v10613_v60, %v6638_v10 }
0x1bc8   :  { %11087 = vpow2.f32 %v8063_v14  ;;  %v7594_v43 = vpop.f32.mrf.mxu0  ;;  %v6646_v14 = vadd.f32 %v13020_v47, %v13069_v53 }
0x1bc9   :  { %v13291_v57 = vadd.f32 %v7594_v43, %v6630_v58 }
0x1bcb   :  { %v8036_v3 = vpop.xlane.xlu1 %8035 }
0x1bcc   :  { %v8056_v4 = vsub.f32 %v13250_v38, %v8036_v3 }
0x1bce   :  { %v8065_v41 = vmul.f32 1.442695, %v8056_v4 }
0x1bd0   :  { %11089 = vpow2.f32 %v8065_v41 }
0x1bd3   :  { %v8042_v27 = vpop.xlane.xlu0 %8041 }
0x1bd4   :  { %v8058_v0 = vsub.f32 %v7826_v50, %v8042_v27 }
0x1bd5   :  { %v13294_v5 = vpop.eup %11087 }
0x1bd6   :  { %v8069_v18 = vmul.f32 1.442695, %v8058_v0  ;;  %v8079_v1 = vsel %vm256_vm2, %v13294_v5, 0.0 }
0x1bd7   :  { %8080 = vadd.xlane.f32.xlu0 %v8079_v1 }
0x1bd8   :  { %11091 = vpow2.f32 %v8069_v18 }
0x1bdb   :  { %v8048_v39 = vpop.xlane.xlu1 %8047 }
0x1bdc   :  { %v8060_v30 = vsub.f32 %v7926_v15, %v8048_v39 }
0x1bdd   :  { %v13298_v29 = vpop.eup %11089 }
0x1bde   :  { %v8073_v51 = vmul.f32 1.442695, %v8060_v30  ;;  %v8082_v38 = vsel %vm256_vm2, %v13298_v29, 0.0 }
0x1bdf   :  { %8083 = vadd.xlane.f32.xlu1 %v8082_v38 }
0x1be0   :  { %11093 = vpow2.f32 %v8073_v51 }
0x1be3   :  { %v8054_v25 = vpop.xlane.xlu1 %8053 }
0x1be4   :  { %v8062_v50 = vsub.f32 %v8026_v52, %v8054_v25  ;;  %v6651_v52 = vadd.f32 %v13009_v48, %v13059_v28 }
0x1be5   :  { %v13302_v61 = vpop.eup %11091 }
0x1be6   :  { %v8077_v34 = vmul.f32 1.442695, %v8062_v50  ;;  %v8088_v31 = vsel %vm256_vm2, %v13302_v61, 0.0 }
0x1be7   :  { %8089 = vadd.xlane.f32.xlu1 %v8088_v31 }
0x1be8   :  { %11095 = vpow2.f32 %v8077_v34 }
0x1bed   :  { %v13306_v19 = vpop.eup %11093 }
0x1bee   :  { %v8094_v15 = vsel %vm256_vm2, %v13306_v19, 0.0 }
0x1bef   :  { %8095 = vadd.xlane.f32.xlu1 %v8094_v15 }
0x1bf5   :  { %v13310_v56 = vpop.eup %11095 }
0x1bf6   :  { %v8100_v20 = vsel %vm256_vm2, %v13310_v56, 0.0 }
0x1bf7   :  { %8101 = vadd.xlane.f32.xlu1 %v8100_v20 }
0x1bff   :  { %v10616_v8 = vpop.f32.mrf.mxu0 }
0x1c00   :  { %v13318_v23 = vadd.f32 %v10616_v8, %v6651_v52 }
0x1c01   :  { %v7607_v22 = vpop.f32.mrf.mxu0 }
0x1c02   :  { %v13322_v21 = vadd.f32 %v7607_v22, %v6643_v37 }
0x1c03   :  { %v10617_v10 = vpop.f32.mrf.mxu0 }
0x1c04   :  { %v13326_v60 = vadd.f32 %v10617_v10, %v6654_v36 }
0x1c05   :  { %v7610_v58 = vpop.f32.mrf.mxu0 }
0x1c06   :  { %v13328_v48 = vadd.f32 %v7610_v58, %v6646_v14 }
0x1c07   :  { %v7775_v28 = vpop.f32.mrf.mxu0 }
0x1c08   :  { %v13331_v45 = vadd.f32 %v13239_v24, %v7775_v28  ;;  %8175 = vrot.lane.b32.xlu1 %v12497_v63, %s11173_s13 }
0x1c09   :  { %v10634_v16 = vpop.f32.mrf.mxu0 }
0x1c0a   :  { %v8037_v42 = vsel %vm256_vm2, %v13331_v45, -inf }
0x1c0b   :  { %v7778_v44 = vpop.f32.mrf.mxu0  ;;  %8038 = vmax.xlane.f32.xlu0 %v8037_v42 }
0x1c0c   :  { %8223 = vrot.lane.b32.xlu1 %v12501_v17, %s11173_s13 }
0x1c0d   :  { %v10635_v47 = vpop.f32.mrf.mxu0 }
0x1c0f   :  { %v7875_v53 = vpop.f32.mrf.mxu0 }
0x1c10   :  { %v13340_v43 = vadd.f32 %v13239_v24, %v7875_v53  ;;  %8271 = vrot.lane.b32.xlu1 %v12505_v62, %s11173_s13 }
0x1c11   :  { %v10646_v3 = vpop.f32.mrf.mxu0 }
0x1c12   :  { %v8043_v63 = vsel %vm256_vm2, %v13340_v43, -inf }
0x1c13   :  { %v7878_v4 = vpop.f32.mrf.mxu0  ;;  %8044 = vmax.xlane.f32.xlu0 %v8043_v63 }
0x1c14   :  { %8367 = vrot.lane.b32.xlu1 %v12515_v55, %s11173_s13 }
0x1c15   :  { %v10647_v41 = vpop.f32.mrf.mxu0 }
0x1c17   :  { %v7975_v27 = vpop.f32.mrf.mxu0 }
0x1c18   :  { %v13349_v17 = vadd.f32 %v13239_v24, %v7975_v27  ;;  %8463 = vrot.lane.b32.xlu1 %v12521_v35, %s11173_s13 }
0x1c19   :  { %v10658_v0 = vpop.f32.mrf.mxu0 }
0x1c1a   :  { %v8049_v62 = vsel %vm256_vm2, %v13349_v17, -inf }
0x1c1b   :  { %v7978_v18 = vpop.f32.mrf.mxu0  ;;  %8050 = vmax.xlane.f32.xlu0 %v8049_v62 }
0x1c1d   :  { %v10659_v1 = vpop.f32.mrf.mxu0 }
0x1c31   :  { %8127 = vrot.lane.b32.xlu0 %v12493_v33, %s11173_s13 }
0x1c60   :  { %v8081_v8 = vpop.xlane.xlu0 %8080 }
0x1c68   :  { %v8084_v39 = vpop.xlane.xlu1 %8083 }
0x1c69   :  { %11097 = vrcp.f32 %v8084_v39 }
0x1c70   :  { %v8090_v55 = vpop.xlane.xlu1 %8089 }
0x1c71   :  { %11099 = vrcp.f32 %v8090_v55 }
0x1c76   :  { %v11098_v24 = vpop.eup %11097 }
0x1c77   :  { %v8112_v38 = vmul.f32 %v11098_v24, %v13298_v29 }
0x1c78   :  { %v8096_v30 = vpop.xlane.xlu1 %8095 }
0x1c79   :  { %11101 = vrcp.f32 %v8096_v30  ;;  %v8120_v50 = vpack.c.bf16 %v8112_v38, %v8112_v38 }
0x1c7e   :  { %v11100_v34 = vpop.eup %11099 }
0x1c7f   :  { %v8114_v33 = vmul.f32 %v11100_v34, %v13302_v61 }
0x1c80   :  { %v8102_v51 = vpop.xlane.xlu1 %8101 }
0x1c81   :  { %11103 = vrcp.f32 %v8102_v51  ;;  %v8122_v20 = vpack.c.bf16 %v8114_v33, %v8114_v33 }
0x1c82   :  { %11105 = vrcp.f32 %v8081_v8 }
0x1c84   :  { %v8176_v35 = vpop.permute.xlu1 %8175 }
0x1c85   :  { %v8181_v25 = vsel %vm740_vm3, %v8176_v35, 0 }
0x1c86   :  { %10673 = vmatpush3.bf16.msra.mxu1 %v8181_v25  ;;  %v11102_v52 = vpop.eup %11101 }
0x1c87   :  { %10684 = vmatprep.subr.bf16.mxu1 %v11161_v9  ;;  %v8116_v61 = vmul.f32 %v11102_v52, %v13306_v19 }
0x1c88   :  { %v8224_v31 = vpop.permute.xlu1 %8223 }
0x1c89   :  { %10675 = vmatmul.mubr.msk.bf16.vlgmr.msra.gmra.mxu1 %vm256_vm2, %v8120_v50  ;;  %v8124_v58 = vpack.c.bf16 %v8116_v61, %v8116_v61 }
0x1c8a   :  { %10686 = vmatprep.mubr.msk.bf16.mxu1 %vm11162_vm1, %v11161_v9 }
0x1c8c   :  { %v8272_v15 = vpop.permute.xlu1 %8271 }
0x1c8d   :  { %v8277_v29 = vsel %vm740_vm3, %v8272_v15, 0 }
0x1c8e   :  { %10685 = vmatpush3.bf16.msra.mxu1 %v8277_v29  ;;  %v11104_v16 = vpop.eup %11103 }
0x1c8f   :  { %10696 = vmatprep.subr.bf16.mxu1 %v11161_v9  ;;  %v8118_v19 = vmul.f32 %v11104_v16, %v13310_v56  ;;  %v8229_v56 = vsel %vm740_vm3, %v8224_v31, 0 }
0x1c90   :  { %v8368_v37 = vpop.permute.xlu1 %8367 }
0x1c91   :  { %v8373_v22 = vsel %vm740_vm3, %v8368_v37, 0  ;;  %10687 = vmatmul.mubr.msk.bf16.vlgmr.msra.gmra.mxu1 %vm256_vm2, %v8122_v20  ;;  %v8126_v44 = vpack.c.bf16 %v8118_v19, %v8118_v19 }
0x1c92   :  { %10697 = vmatpush3.bf16.msra.mxu1 %v8373_v22  ;;  %10698 = vmatprep.mubr.msk.bf16.mxu1 %vm11162_vm1, %v11161_v9 }
0x1c93   :  { %10708 = vmatprep.subr.bf16.mxu1 %v11161_v9 }
0x1c94   :  { %v8039_v36 = vpop.xlane.xlu0 %8038  ;;  %v8464_v14 = vpop.permute.xlu1 %8463 }
0x1c95   :  { %v8057_v10 = vsub.f32 %v13331_v45, %v8039_v36  ;;  %v8469_v42 = vsel %vm740_vm3, %v8464_v14, 0  ;;  %v11106_v45 = vpop.eup %11105 }
0x1c96   :  { %v8111_v63 = vmul.f32 %v11106_v45, %v13294_v5 }
0x1c97   :  { %v8067_v28 = vmul.f32 1.442695, %v8057_v10 }
0x1c98   :  { %v8119_v0 = vpack.c.bf16 %v8111_v63, %v8111_v63  ;;  %v9352_v63 = vld [vmem:[%s13605_s4 + $0x1c] sm:$0xf] }
0x1c99   :  { %11107 = vpow2.f32 %v8067_v28  ;;  %10699 = vmatmul.mubr.msk.bf16.vlgmr.msra.gmra.mxu1 %vm256_vm2, %v8124_v58 }
0x1c9a   :  { %10709 = vmatpush3.bf16.msra.mxu1 %v8469_v42  ;;  %10710 = vmatprep.mubr.msk.bf16.mxu1 %vm11162_vm1, %v11161_v9 }
0x1c9c   :  { %v8045_v47 = vpop.xlane.xlu0 %8044 }
0x1c9d   :  { %v8059_v5 = vsub.f32 %v13340_v43, %v8045_v47 }
0x1c9f   :  { %v8071_v62 = vmul.f32 1.442695, %v8059_v5 }
0x1ca1   :  { %10711 = vmatmul.mubr.msk.bf16.vlgmr.msra.gmra.mxu1 %vm256_vm2, %v8126_v44  ;;  %11109 = vpow2.f32 %v8071_v62 }
0x1ca4   :  { %v8051_v53 = vpop.xlane.xlu0 %8050 }
0x1ca5   :  { %v8061_v18 = vsub.f32 %v13349_v17, %v8051_v53 }
0x1ca6   :  { %v11108_v3 = vpop.eup %11107 }
0x1ca7   :  { %v8085_v4 = vsel %vm256_vm2, %v11108_v3, 0.0  ;;  %v8075_v1 = vmul.f32 1.442695, %v8061_v18 }
0x1ca8   :  { %8086 = vadd.xlane.f32.xlu0 %v8085_v4  ;;  %v8128_v41 = vpop.permute.xlu0 %8127 }
0x1ca9   :  { %v8133_v27 = vsel %vm740_vm3, %v8128_v41, 0  ;;  %11111 = vpow2.f32 %v8075_v1 }
0x1caa   :  { %10667 = vmatpush3.bf16.msra.mxu0 %v8133_v27 }
0x1cab   :  { %10678 = vmatprep.subr.bf16.mxu0 %v11161_v9 }
0x1cad   :  { %10669 = vmatmul.mubr.msk.bf16.vlgmr.msra.gmra.mxu0 %vm256_vm2, %v8119_v0 }
0x1cae   :  { %10679 = vmatpush3.bf16.msra.mxu0 %v8229_v56  ;;  %10680 = vmatprep.mubr.msk.bf16.mxu0 %vm11162_vm1, %v11161_v9  ;;  %v11110_v39 = vpop.eup %11109  ;;  %v8528_v56 = vsel %vm740_vm3, %v9352_v63, 0 }
0x1caf   :  { %10690 = vmatprep.subr.bf16.mxu0 %v11161_v9  ;;  %v8091_v55 = vsel %vm256_vm2, %v11110_v39, 0.0 }
0x1cb6   :  { %v11112_v30 = vpop.eup %11111 }
0x1cb7   :  { %v8097_v24 = vsel %vm256_vm2, %v11112_v30, 0.0 }
0x1cbe   :  { %8319 = vrot.lane.b32.xlu0 %v12509_v6, %s11173_s13 }
0x1cdd   :  { %8092 = vadd.xlane.f32.xlu0 %v8091_v55 }
0x1ce1   :  { %8098 = vadd.xlane.f32.xlu0 %v8097_v24 }
0x1cf7   :  { %8415 = vrot.lane.b32.xlu0 %v12513_v40, %s11173_s13 }
0x1d31   :  { %v8087_v6 = vpop.xlane.xlu0 %8086 }
0x1d32   :  { %11113 = vrcp.f32 %v8087_v6 }
0x1d35   :  { %v8320_v38 = vpop.permute.xlu0 %8319 }
0x1d36   :  { %v8325_v35 = vsel %vm740_vm3, %v8320_v38, 0 }
0x1d3f   :  { %v11114_v43 = vpop.eup %11113 }
0x1d40   :  { %v8113_v51 = vmul.f32 %v11114_v43, %v11108_v3 }
0x1d42   :  { %v8121_v17 = vpack.c.bf16 %v8113_v51, %v8113_v51 }
0x1d44   :  { %10681 = vmatmul.mubr.msk.bf16.vlgmr.msra.gmra.mxu0 %vm256_vm2, %v8121_v17 }
0x1d45   :  { %10691 = vmatpush3.bf16.msra.mxu0 %v8325_v35  ;;  %10692 = vmatprep.mubr.msk.bf16.mxu0 %vm11162_vm1, %v11161_v9 }
0x1d46   :  { %10702 = vmatprep.subr.bf16.mxu0 %v11161_v9 }
0x1d49   :  { %v8217_v25 = vpop.f32.mrf.mxu1 }
0x1d4b   :  { %v10676_v50 = vpop.f32.mrf.mxu1 }
0x1d4d   :  { %v8220_v34 = vpop.f32.mrf.mxu1 }
0x1d4f   :  { %v10677_v40 = vpop.f32.mrf.mxu1 }
0x1d51   :  { %v8313_v31 = vpop.f32.mrf.mxu1 }
0x1d53   :  { %v10688_v33 = vpop.f32.mrf.mxu1 }
0x1d55   :  { %v8316_v15 = vpop.f32.mrf.mxu1 }
0x1d57   :  { %v10689_v29 = vpop.f32.mrf.mxu1 }
0x1d59   :  { %v8409_v20 = vpop.f32.mrf.mxu1 }
0x1d5b   :  { %v10700_v52 = vpop.f32.mrf.mxu1 }
0x1d5d   :  { %v8412_v8 = vpop.f32.mrf.mxu1 }
0x1d5f   :  { %v10701_v37 = vpop.f32.mrf.mxu1 }
0x1d61   :  { %v8505_v22 = vpop.f32.mrf.mxu1 }
0x1d63   :  { %v10712_v61 = vpop.f32.mrf.mxu1 }
0x1d64   :  { %v10791_v61 = vld [vmem:[%s13606_s6 + $0x18] sm:$0xff]  }
0x1d65   :  { %v8508_v36 = vpop.f32.mrf.mxu1  ;;  %10724 = vmatprep.subr.bf16.mxu1 %v10791_v61 }
0x1d66   :  { %v8093_v10 = vpop.xlane.xlu0 %8092  ;;  %10725 = vmatpush3.bf16.msra.mxu1 %v10791_v61  ;;  %v10792_v36 = vld [vmem:[%s13606_s6 + $0x10] sm:$0xff]  }
0x1d67   :  { %11115 = vrcp.f32 %v8093_v10  ;;  %v10713_v14 = vpop.f32.mrf.mxu1  ;;  %10726 = vmatprep.subr.bf16.mxu1 %v10792_v36 }
0x1d6a   :  { %v8099_v58 = vpop.xlane.xlu0 %8098  ;;  %10727 = vmatpush3.bf16.msra.mxu1 %v10792_v36 }
0x1d6b   :  { %11117 = vrcp.f32 %v8099_v58  ;;  %10752 = vmatprep.subr.bf16.mxu1 %v11161_v9 }
0x1d6d   :  { %v8169_v28 = vpop.f32.mrf.mxu0 }
0x1d6e   :  { %v8416_v45 = vpop.permute.xlu0 %8415  ;;  %v8511_v0 = vpack.c.bf16 %v8217_v25, %v8169_v28 }
0x1d6f   :  { %v10670_v16 = vpop.f32.mrf.mxu0  ;;  %v8421_v4 = vsel %vm740_vm3, %v8416_v45, 0 }
0x1d71   :  { %v8172_v42 = vpop.f32.mrf.mxu0 }
0x1d73   :  { %v10671_v19 = vpop.f32.mrf.mxu0 }
0x1d74   :  { %v11116_v44 = vpop.eup %11115 }
0x1d75   :  { %v8115_v47 = vmul.f32 %v11116_v44, %v11110_v39 }
0x1d77   :  { %v8123_v53 = vpack.c.bf16 %v8115_v47, %v8115_v47 }
0x1d78   :  { %v11118_v3 = vpop.eup %11117 }
0x1d79   :  { %10693 = vmatmul.mubr.msk.bf16.vlgmr.msra.gmra.mxu0 %vm256_vm2, %v8123_v53  ;;  %v8117_v41 = vmul.f32 %v11118_v3, %v11112_v30 }
0x1d7a   :  { %10703 = vmatpush3.bf16.msra.mxu0 %v8421_v4  ;;  %10704 = vmatprep.mubr.msk.bf16.mxu0 %vm11162_vm1, %v11161_v9 }
0x1d7b   :  { %10767 = vmatprep.subr.msk.bf16.mxu0 %vm740_vm3, %v9352_v63  ;;  %v8125_v27 = vpack.c.bf16 %v8117_v41, %v8117_v41 }
0x1d81   :  { %10705 = vmatmul.mubr.msk.bf16.vlgmr.msra.gmra.mxu0 %vm256_vm2, %v8125_v27 }
0x1d82   :  { %10716 = vmatprep.mubr.msk.bf16.mxu0 %vm256_vm2, %v8511_v0  ;;  %10715 = vmatpush3.bf16.msra.mxu0 %v8528_v56 }
0x1e04   :  { %v8265_v5 = vpop.f32.mrf.mxu0 }
0x1e05   :  { %v8512_v62 = vpack.c.bf16 %v8313_v31, %v8265_v5 }
0x1e06   :  { %v10682_v18 = vpop.f32.mrf.mxu0 }
0x1e07   :  { %10717 = vmatmul.mubr.msk.bf16.vlgmr.msra.gmra.mxu0 %vm256_vm2, %v8512_v62 }
0x1e08   :  { %v8268_v1 = vpop.f32.mrf.mxu0 }
0x1e0a   :  { %v10683_v39 = vpop.f32.mrf.mxu0 }
0x1e39   :  { %v8361_v55 = vpop.f32.mrf.mxu0 }
0x1e3a   :  { %v8513_v30 = vpack.c.bf16 %v8409_v20, %v8361_v55 }
0x1e3b   :  { %v10694_v24 = vpop.f32.mrf.mxu0 }
0x1e3c   :  { %10720 = vmatprep.mubr.msk.bf16.mxu0 %vm256_vm2, %v8513_v30 }
0x1e3d   :  { %v8364_v6 = vpop.f32.mrf.mxu0 }
0x1e3f   :  { %v10695_v43 = vpop.f32.mrf.mxu0 }
0x1e41   :  { %v8457_v51 = vpop.f32.mrf.mxu0 }
0x1e42   :  { %v8514_v38 = vpack.c.bf16 %v8505_v22, %v8457_v51  ;;  %v9437_v51 = vld [vmem:[%s13607_s5 + $0x1] ss:$0 sm:$0xff] }
0x1e43   :  { %v10706_v17 = vpop.f32.mrf.mxu0 }
0x1e44   :  { %10721 = vmatmul.mubr.msk.bf16.gmra.mxu0 %vm256_vm2, %v8514_v38 }
0x1e45   :  { %v8460_v35 = vpop.f32.mrf.mxu0 }
0x1e47   :  { %v10707_v25 = vpop.f32.mrf.mxu0 }
0x1ec7   :  { %v10718_v50 = vpop.f32.mrf.mxu0 }
0x1ec8   :  { %v8597_v34 = vadd.f32 %v10718_v50, %v13280_v59 }
0x1ec9   :  { %v8564_v40 = vpop.f32.mrf.mxu0 }
0x1eca   :  { %v8595_v31 = vadd.f32 %v8564_v40, %v13285_v11  ;;  %v13418_v15 = vadd.f32 %v8597_v34, %v12422_v46 }
0x1ecb   :  { %v10719_v33 = vpop.f32.mrf.mxu0 }
0x1ecc   :  { %v13421_v29 = vadd.f32 %v8595_v31, %v12425_v2  ;;  %v8598_v20 = vadd.f32 %v10719_v33, %v13289_v12  ;;  %v8615_v2 = vmul.f32 %v13418_v15, %v13418_v15 }
0x1ecd   :  { %v8567_v52 = vpop.f32.mrf.mxu0 }
0x1ece   :  { %v8596_v8 = vadd.f32 %v8567_v52, %v13291_v57  ;;  %v8613_v37 = vmul.f32 %v13421_v29, %v13421_v29  ;;  %v13428_v59 = vadd.f32 %v8598_v20, %v12430_v54  ;;  %v8627_v57 = vsel %vm56_vm0, %v8615_v2, 0.0 }
0x1ed0   :  { %v13431_v11 = vadd.f32 %v8596_v8, %v12433_v32  ;;  %v8621_v46 = vsel %vm56_vm0, %v8613_v37, 0.0  ;;  %v8616_v54 = vmul.f32 %v13428_v59, %v13428_v59 }
0x1ed1   :  { %8622 = vadd.xlane.f32.xlu0 %v8621_v46 }
0x1ed2   :  { %v8614_v12 = vmul.f32 %v13431_v11, %v13431_v11  ;;  %v8630_v32 = vsel %vm56_vm0, %v8616_v54, 0.0 }
0x1ed4   :  { %v8624_v22 = vsel %vm56_vm0, %v8614_v12, 0.0 }
0x1ed5   :  { %8628 = vadd.xlane.f32.xlu0 %v8627_v57  ;;  %8625 = vadd.xlane.f32.xlu1 %v8624_v22 }
0x1ed9   :  { %8631 = vadd.xlane.f32.xlu0 %v8630_v32 }
0x1f04   :  { %v10722_v10 = vpop.f32.mrf.mxu0 }
0x1f05   :  { %v8601_v14 = vadd.f32 %v10722_v10, %v13318_v23 }
0x1f06   :  { %v8580_v58 = vpop.f32.mrf.mxu0 }
0x1f07   :  { %v8599_v28 = vadd.f32 %v8580_v58, %v13322_v21  ;;  %v13453_v42 = vadd.f32 %v8601_v14, %v12453_v26 }
0x1f08   :  { %v10723_v16 = vpop.f32.mrf.mxu0 }
0x1f09   :  { %v13456_v19 = vadd.f32 %v8599_v28, %v12456_v13  ;;  %v8602_v44 = vadd.f32 %v10723_v16, %v13326_v60  ;;  %v8619_v13 = vmul.f32 %v13453_v42, %v13453_v42 }
0x1f0a   :  { %v8583_v47 = vpop.f32.mrf.mxu0 }
0x1f0b   :  { %v8600_v45 = vadd.f32 %v8583_v47, %v13328_v48  ;;  %v8617_v53 = vmul.f32 %v13456_v19, %v13456_v19  ;;  %v13463_v23 = vadd.f32 %v8602_v44, %v12461_v7  ;;  %v8639_v48 = vsel %vm56_vm0, %v8619_v13, 0.0 }
0x1f0d   :  { %v13466_v21 = vadd.f32 %v8600_v45, %v12464_v49  ;;  %v8633_v26 = vsel %vm56_vm0, %v8617_v53, 0.0  ;;  %v8620_v7 = vmul.f32 %v13463_v23, %v13463_v23 }
0x1f0e   :  { %8634 = vadd.xlane.f32.xlu0 %v8633_v26 }
0x1f0f   :  { %v8618_v60 = vmul.f32 %v13466_v21, %v13466_v21  ;;  %v8642_v49 = vsel %vm56_vm0, %v8620_v7, 0.0  ;;  %v10793_v7 = vld [vmem:[%s13608_s7 + $0x38] sm:$0xff]  }
0x1f10   :  { %10736 = vmatprep.subr.bf16.mxu0 %v10793_v7 }
0x1f11   :  { %v8636_v3 = vsel %vm56_vm0, %v8618_v60, 0.0  ;;  %10737 = vmatpush3.bf16.msra.mxu0 %v10793_v7 }
0x1f12   :  { %8640 = vadd.xlane.f32.xlu0 %v8639_v48  ;;  %8637 = vadd.xlane.f32.xlu1 %v8636_v3 }
0x1f16   :  { %8643 = vadd.xlane.f32.xlu1 %v8642_v49  ;;  %v10794_v49 = vld [vmem:[%s13608_s7 + $0x30] sm:$0xff]  }
0x1f17   :  { %10738 = vmatprep.subr.bf16.mxu0 %v10794_v49 }
0x1f18   :  { %10739 = vmatpush3.bf16.msra.mxu0 %v10794_v49 }
0x1f5a   :  { %v8623_v63 = vpop.xlane.xlu0 %8622 }
0x1f5b   :  { %v8645_v4 = vmul.f32 0.03125, %v8623_v63  ;;  %v10795_v63 = vld [vmem:[%s13608_s7 + $0x28] sm:$0xff]  }
0x1f5c   :  { %10740 = vmatprep.subr.bf16.mxu0 %v10795_v63 }
0x1f5d   :  { %v8653_v41 = vadd.f32 1e-06, %v8645_v4  ;;  %10741 = vmatpush3.bf16.msra.mxu0 %v10795_v63  ;;  %v10796_v4 = vld [vmem:[%s13608_s7 + $0x20] sm:$0xff]  }
0x1f5e   :  { %v8629_v27 = vpop.xlane.xlu0 %8628  ;;  %v8626_v0 = vpop.xlane.xlu1 %8625  ;;  %10742 = vmatprep.subr.bf16.mxu0 %v10796_v4 }
0x1f5f   :  { %v8647_v56 = vmul.f32 0.03125, %v8629_v27  ;;  %v8646_v5 = vmul.f32 0.03125, %v8626_v0  ;;  %11119 = vrsqrt.f32 %v8653_v41 }
0x1f61   :  { %v8655_v62 = vadd.f32 1e-06, %v8647_v56  ;;  %v8654_v18 = vadd.f32 1e-06, %v8646_v5  ;;  %10743 = vmatpush3.bf16.msra.mxu0 %v10796_v4 }
0x1f62   :  { %v8632_v1 = vpop.xlane.xlu0 %8631 }
0x1f63   :  { %11121 = vrsqrt.f32 %v8655_v62  ;;  %v8648_v39 = vmul.f32 0.03125, %v8632_v1 }
0x1f64   :  { %11123 = vrsqrt.f32 %v8654_v18 }
0x1f65   :  { %v8656_v55 = vadd.f32 1e-06, %v8648_v39 }
0x1f67   :  { %11125 = vrsqrt.f32 %v8656_v55 }
0x1f6c   :  { %v11120_v30 = vpop.eup %11119 }
0x1f6d   :  { %v8669_v6 = vmul.f32 %v11120_v30, %v13421_v29 }
0x1f6f   :  { %v8683_v25 = vmul.f32 %v9437_v51, %v8669_v6 }
0x1f70   :  { %v11122_v24 = vpop.eup %11121 }
0x1f71   :  { %v11124_v43 = vpop.eup %11123  ;;  %v8671_v17 = vmul.f32 %v11122_v24, %v13418_v15 }
0x1f72   :  { %v8670_v38 = vmul.f32 %v11124_v43, %v13431_v11 }
0x1f73   :  { %v8685_v31 = vmul.f32 %v9437_v51, %v8671_v17 }
0x1f74   :  { %v11126_v35 = vpop.eup %11125  ;;  %v8684_v50 = vmul.f32 %v9437_v51, %v8670_v38 }
0x1f75   :  { %v8672_v34 = vmul.f32 %v11126_v35, %v13428_v59 }
0x1f76   :  { %v8691_v40 = vpack.c.bf16 %v8684_v50, %v8683_v25 }
0x1f77   :  { %v8686_v33 = vmul.f32 %v9437_v51, %v8672_v34 }
0x1f78   :  { %10728 = vmatprep.mubr.msk.bf16.mxu1 %vm56_vm0, %v8691_v40 }
0x1f79   :  { %v8692_v20 = vpack.c.bf16 %v8686_v33, %v8685_v31 }
0x1f7b   :  { %10729 = vmatmul.mubr.msk.bf16.vlgmr.msra.gmra.mxu1 %vm56_vm0, %v8692_v20 }
0x1f97   :  { %v8635_v52 = vpop.xlane.xlu0 %8634 }
0x1f98   :  { %v8649_v8 = vmul.f32 0.03125, %v8635_v52 }
0x1f9a   :  { %v8657_v37 = vadd.f32 1e-06, %v8649_v8 }
0x1f9b   :  { %v8641_v46 = vpop.xlane.xlu0 %8640  ;;  %v8638_v2 = vpop.xlane.xlu1 %8637 }
0x1f9c   :  { %v8651_v12 = vmul.f32 0.03125, %v8641_v46  ;;  %v8650_v57 = vmul.f32 0.03125, %v8638_v2  ;;  %11127 = vrsqrt.f32 %v8657_v37 }
0x1f9e   :  { %v8659_v22 = vadd.f32 1e-06, %v8651_v12  ;;  %v8658_v54 = vadd.f32 1e-06, %v8650_v57 }
0x1f9f   :  { %v8644_v32 = vpop.xlane.xlu1 %8643 }
0x1fa0   :  { %11129 = vrsqrt.f32 %v8659_v22  ;;  %v8652_v61 = vmul.f32 0.03125, %v8644_v32 }
0x1fa1   :  { %11131 = vrsqrt.f32 %v8658_v54 }
0x1fa2   :  { %v8660_v36 = vadd.f32 1e-06, %v8652_v61 }
0x1fa4   :  { %11133 = vrsqrt.f32 %v8660_v36 }
0x1fa9   :  { %v11128_v10 = vpop.eup %11127 }
0x1faa   :  { %v8673_v58 = vmul.f32 %v11128_v10, %v13456_v19 }
0x1fac   :  { %v8687_v45 = vmul.f32 %v9437_v51, %v8673_v58 }
0x1fad   :  { %v11130_v14 = vpop.eup %11129 }
0x1fae   :  { %v11132_v28 = vpop.eup %11131  ;;  %v8675_v44 = vmul.f32 %v11130_v14, %v13453_v42 }
0x1faf   :  { %v8674_v16 = vmul.f32 %v11132_v28, %v13466_v21 }
0x1fb0   :  { %v8689_v60 = vmul.f32 %v9437_v51, %v8675_v44 }
0x1fb1   :  { %v11134_v47 = vpop.eup %11133  ;;  %v8688_v53 = vmul.f32 %v9437_v51, %v8674_v16 }
0x1fb2   :  { %v8676_v26 = vmul.f32 %v11134_v47, %v13463_v23 }
0x1fb3   :  { %v8693_v13 = vpack.c.bf16 %v8688_v53, %v8687_v45 }
0x1fb4   :  { %v8690_v48 = vmul.f32 %v9437_v51, %v8676_v26 }
0x1fb5   :  { %10732 = vmatprep.mubr.msk.bf16.mxu1 %vm56_vm0, %v8693_v13 }
0x1fb6   :  { %v8694_v3 = vpack.c.bf16 %v8690_v48, %v8689_v60 }
0x1fb8   :  { %10733 = vmatmul.mubr.msk.bf16.gmra.mxu1 %vm56_vm0, %v8694_v3 }
0x1fb9   :  { %10756 = vmatprep.mubr.msk.bf16.mxu1 %vm11162_vm1, %v11161_v9 }
0x203b   :  { %v10730_v41 = vpop.f32.mrf.mxu1 }
0x203c   :  { %8873 = vrot.lane.b32.xlu1 %v10730_v41, %s11164_s21  ;;  %v8799_v30 = vmul.f32 0.044715, %v10730_v41  ;;  %v8791_v47 = vmul.f32 0.5, %v10730_v41 }
0x203d   :  { %v8758_v27 = vpop.f32.mrf.mxu1 }
0x203e   :  { %8869 = vrot.lane.b32.xlu0 %v8758_v27, %s11164_s21  ;;  %v8797_v39 = vmul.f32 0.044715, %v8758_v27  ;;  %v8807_v51 = vmul.f32 %v10730_v41, %v8799_v30  ;;  %v8789_v61 = vmul.f32 0.5, %v8758_v27 }
0x203f   :  { %v10731_v0 = vpop.f32.mrf.mxu1 }
0x2040   :  { %v8805_v24 = vmul.f32 %v8797_v39, %v8758_v27  ;;  %v8800_v6 = vmul.f32 0.044715, %v10731_v0  ;;  %v8815_v25 = vmul.f32 %v10730_v41, %v8807_v51  ;;  %v8792_v26 = vmul.f32 0.5, %v10731_v0 }
0x2041   :  { %v8761_v56 = vpop.f32.mrf.mxu1 }
0x2042   :  { %8871 = vrot.lane.b32.xlu1 %v8761_v56, %s11164_s21  ;;  %v8798_v55 = vmul.f32 0.044715, %v8761_v56  ;;  %v8813_v38 = vmul.f32 %v8805_v24, %v8758_v27  ;;  %v8808_v17 = vmul.f32 %v10731_v0, %v8800_v6  ;;  %v8823_v31 = vadd.f32 %v10730_v41, %v8815_v25 }
0x2043   :  { %v8790_v36 = vmul.f32 0.5, %v8761_v56 }
0x2044   :  { %v8806_v43 = vmul.f32 %v8798_v55, %v8761_v56  ;;  %v8821_v50 = vadd.f32 %v8813_v38, %v8758_v27  ;;  %v8816_v40 = vmul.f32 %v10731_v0, %v8808_v17  ;;  %v8831_v8 = vmul.f32 0.7978846, %v8823_v31 }
0x2046   :  { %8875 = vrot.lane.b32.xlu1 %v10731_v0, %s11164_s21  ;;  %v8814_v35 = vmul.f32 %v8806_v43, %v8761_v56  ;;  %v8829_v33 = vmul.f32 0.7978846, %v8821_v50  ;;  %v8824_v52 = vadd.f32 %v10731_v0, %v8816_v40 }
0x2048   :  { %v8822_v34 = vadd.f32 %v8814_v35, %v8761_v56  ;;  %11135 = vtanh.f32 %v8829_v33  ;;  %v8832_v37 = vmul.f32 0.7978846, %v8824_v52 }
0x204a   :  { %v8830_v20 = vmul.f32 0.7978846, %v8822_v34 }
0x204c   :  { %11137 = vtanh.f32 %v8830_v20 }
0x204d   :  { %11139 = vtanh.f32 %v8831_v8 }
0x204e   :  { %11141 = vtanh.f32 %v8832_v37 }
0x2055   :  { %v11136_v46 = vpop.eup %11135 }
0x2056   :  { %v8845_v57 = vadd.f32 1.0, %v11136_v46 }
0x2058   :  { %v8853_v58 = vmul.f32 %v8845_v57, %v8789_v61 }
0x2059   :  { %v11138_v2 = vpop.eup %11137 }
0x205a   :  { %v11140_v12 = vpop.eup %11139  ;;  %v8846_v22 = vadd.f32 1.0, %v11138_v2 }
0x205b   :  { %v11142_v54 = vpop.eup %11141  ;;  %v8847_v14 = vadd.f32 1.0, %v11140_v12 }
0x205c   :  { %v8854_v28 = vmul.f32 %v8846_v22, %v8790_v36  ;;  %v8848_v16 = vadd.f32 1.0, %v11142_v54 }
0x205d   :  { %v8855_v13 = vmul.f32 %v8847_v14, %v8791_v47 }
0x205e   :  { %v8856_v48 = vmul.f32 %v8848_v16, %v8792_v26 }
0x2078   :  { %v13511_v5 = vpop.f32.mrf.mxu1 }
0x2079   :  { %v8803_v41 = vmul.f32 0.044715, %v13511_v5  ;;  %v8795_v14 = vmul.f32 0.5, %v13511_v5 }
0x207a   :  { %v13513_v62 = vpop.f32.mrf.mxu1 }
0x207b   :  { %8877 = vrot.lane.b32.xlu0 %v13513_v62, %s11164_s21  ;;  %v8801_v4 = vmul.f32 0.044715, %v13513_v62  ;;  %v8811_v55 = vmul.f32 %v13511_v5, %v8803_v41  ;;  %v8793_v12 = vmul.f32 0.5, %v13513_v62 }
0x207c   :  { %v13517_v18 = vpop.f32.mrf.mxu1 }
0x207d   :  { %v8809_v56 = vmul.f32 %v8801_v4, %v13513_v62  ;;  %v8804_v0 = vmul.f32 0.044715, %v13517_v18  ;;  %v8819_v51 = vmul.f32 %v13511_v5, %v8811_v55 }
0x207e   :  { %v13519_v1 = vpop.f32.mrf.mxu1 }
0x207f   :  { %8881 = vrot.lane.b32.xlu0 %v13511_v5, %s11164_s21  ;;  %8879 = vrot.lane.b32.xlu1 %v13519_v1, %s11164_s21  ;;  %v8802_v27 = vmul.f32 0.044715, %v13519_v1  ;;  %v8817_v30 = vmul.f32 %v8809_v56, %v13513_v62  ;;  %v8812_v24 = vmul.f32 %v13517_v18, %v8804_v0  ;;  %v8827_v25 = vadd.f32 %v13511_v5, %v8819_v51 }
0x2080   :  { %v8794_v57 = vmul.f32 0.5, %v13519_v1 }
0x2081   :  { %v8810_v39 = vmul.f32 %v8802_v27, %v13519_v1  ;;  %v8825_v43 = vadd.f32 %v8817_v30, %v13513_v62  ;;  %v8820_v17 = vmul.f32 %v13517_v18, %v8812_v24  ;;  %v8835_v40 = vmul.f32 0.7978846, %v8827_v25 }
0x2083   :  { %8883 = vrot.lane.b32.xlu1 %v13517_v18, %s11164_s21  ;;  %v8818_v6 = vmul.f32 %v8810_v39, %v13519_v1  ;;  %v8833_v35 = vmul.f32 0.7978846, %v8825_v43  ;;  %v8828_v34 = vadd.f32 %v13517_v18, %v8820_v17 }
0x2085   :  { %v8826_v38 = vadd.f32 %v8818_v6, %v13519_v1  ;;  %11143 = vtanh.f32 %v8833_v35  ;;  %v8836_v31 = vmul.f32 0.7978846, %v8828_v34 }
0x2087   :  { %v8834_v50 = vmul.f32 0.7978846, %v8826_v38 }
0x2089   :  { %11145 = vtanh.f32 %v8834_v50 }
0x208a   :  { %11147 = vtanh.f32 %v8835_v40 }
0x208b   :  { %11149 = vtanh.f32 %v8836_v31 }
0x2092   :  { %v11144_v33 = vpop.eup %11143 }
0x2093   :  { %v8849_v8 = vadd.f32 1.0, %v11144_v33 }
0x2095   :  { %v8857_v22 = vmul.f32 %v8849_v8, %v8793_v12  ;;  %v10798_v8 = vld [vmem:[%s13609_s9] sm:$0xff]  }
0x2096   :  { %v11146_v20 = vpop.eup %11145 }
0x2097   :  { %v11148_v52 = vpop.eup %11147  ;;  %v8850_v37 = vadd.f32 1.0, %v11146_v20 }
0x2098   :  { %v11150_v46 = vpop.eup %11149  ;;  %v8851_v54 = vadd.f32 1.0, %v11148_v52  ;;  %v10797_v52 = vld [vmem:[%s13609_s9 + $0x8] sm:$0xff]  }
0x2099   :  { %v8852_v61 = vadd.f32 1.0, %v11150_v46  ;;  %10753 = vmatpush3.bf16.msra.mxu1 %v10797_v52 }
0x209a   :  { %10754 = vmatprep.subr.bf16.mxu1 %v11161_v9 }
0x209d   :  { %10755 = vmatpush3.bf16.msra.mxu1 %v10798_v8 }
0x20ae   :  { %v8874_v32 = vpop.permute.xlu1 %8873 }
0x20af   :  { %v8895_v7 = vmul.f32 %v8874_v32, %v8855_v13  ;;  %v8858_v32 = vmul.f32 %v8850_v37, %v8794_v57  ;;  %v9464_v57 = vld [vmem:[%s13610_s8] ss:$0 sm:$0xff] }
0x20b0   :  { %v8870_v10 = vpop.permute.xlu0 %8869 }
0x20b1   :  { %v8893_v45 = vmul.f32 %v8870_v10, %v8853_v58 }
0x20b4   :  { %v8872_v44 = vpop.permute.xlu1 %8871 }
0x20b5   :  { %v8894_v53 = vmul.f32 %v8872_v44, %v8854_v28  ;;  %v8796_v28 = vmul.f32 0.5, %v13517_v18  ;;  %v8859_v44 = vmul.f32 %v8851_v54, %v8795_v14 }
0x20b7   :  { %v8901_v60 = vpack.c.bf16 %v8894_v53, %v8893_v45  ;;  %v8860_v45 = vmul.f32 %v8852_v61, %v8796_v28 }
0x20b8   :  { %v8876_v3 = vpop.permute.xlu1 %8875 }
0x20b9   :  { %v8896_v49 = vmul.f32 %v8876_v3, %v8856_v48  ;;  %10744 = vmatprep.mubr.msk.bf16.mxu0 %vm4450_vm4, %v8901_v60 }
0x20bb   :  { %v8902_v63 = vpack.c.bf16 %v8896_v49, %v8895_v7 }
0x20bd   :  { %10745 = vmatmul.mubr.msk.bf16.vlgmr.msra.gmra.mxu0 %vm4450_vm4, %v8902_v63 }
0x20ed   :  { %v8878_v2 = vpop.permute.xlu0 %8877 }
0x20ee   :  { %v8897_v10 = vmul.f32 %v8878_v2, %v8857_v22 }
0x20f1   :  { %v8880_v36 = vpop.permute.xlu1 %8879  ;;  %v8882_v16 = vpop.permute.xlu0 %8881 }
0x20f2   :  { %v8898_v58 = vmul.f32 %v8880_v36, %v8858_v32  ;;  %v8899_v26 = vmul.f32 %v8882_v16, %v8859_v44 }
0x20f4   :  { %v8903_v47 = vpack.c.bf16 %v8898_v58, %v8897_v10 }
0x20f5   :  { %v8884_v53 = vpop.permute.xlu1 %8883 }
0x20f6   :  { %v8900_v62 = vmul.f32 %v8884_v53, %v8860_v45  ;;  %10748 = vmatprep.mubr.msk.bf16.mxu0 %vm4450_vm4, %v8903_v47 }
0x20f8   :  { %v8904_v1 = vpack.c.bf16 %v8900_v62, %v8899_v26 }
0x20fa   :  { %10749 = vmatmul.mubr.msk.bf16.gmra.mxu0 %vm4450_vm4, %v8904_v1 }
0x217d   :  { %v10746_v13 = vpop.f32.mrf.mxu0 }
0x217e   :  { %v13557_v7 = vadd.f32 %v10746_v13, %v13418_v15 }
0x217f   :  { %v8984_v60 = vpop.f32.mrf.mxu0 }
0x2180   :  { %v9015_v49 = vadd.f32 %v8984_v60, %v13421_v29  ;;  %v9026_v41 = vmul.f32 %v13557_v7, %v13557_v7 }
0x2181   :  { %v10747_v48 = vpop.f32.mrf.mxu0 }
0x2182   :  { %v9018_v4 = vadd.f32 %v10747_v48, %v13428_v59  ;;  %v9024_v0 = vmul.f32 %v9015_v49, %v9015_v49  ;;  %v9043_v59 = vrot.slane %v9026_v41, 6 }
0x2183   :  { %v8987_v3 = vpop.f32.mrf.mxu0 }
0x2184   :  { %v13552_v5 = vadd.f32 %v8987_v3, %v13431_v11  ;;  %v9027_v15 = vmul.f32 %v9018_v4, %v9018_v4 }
0x2186   :  { %v9025_v18 = vmul.f32 %v13552_v5, %v13552_v5 }
0x2188   :  { %v9040_v27 = vrot.slane %v9025_v18, 7 }
0x218a   :  { %v9042_v30 = vsel %vm9041_vm5, %v9040_v27, %v9024_v0 }
0x218b   :  { %v9045_v51 = vsel %vm9044_vm6, %v9043_v59, %v9042_v30 }
0x21ba   :  { %v10750_v63 = vpop.f32.mrf.mxu0 }
0x21bb   :  { %v9021_v39 = vadd.f32 %v10750_v63, %v13453_v42 }
0x21bc   :  { %v9000_v56 = vpop.f32.mrf.mxu0 }
0x21bd   :  { %v9019_v11 = vadd.f32 %v9000_v56, %v13456_v19  ;;  %v9030_v38 = vmul.f32 %v9021_v39, %v9021_v39  ;;  %v9046_v19 = vrot.slane %v9027_v15, 5 }
0x21be   :  { %v10751_v55 = vpop.f32.mrf.mxu0 }
0x21bf   :  { %v9028_v29 = vmul.f32 %v9019_v11, %v9019_v11  ;;  %v9022_v24 = vadd.f32 %v10751_v55, %v13463_v23  ;;  %v9048_v25 = vsel %vm9047_vm7, %v9046_v19, %v9045_v51  ;;  %v9055_v34 = vrot.slane %v9030_v38, 2 }
0x21c0   :  { %v9003_v6 = vpop.f32.mrf.mxu0 }
0x21c1   :  { %v9020_v43 = vadd.f32 %v9003_v6, %v13466_v21  ;;  %v9049_v17 = vrot.slane %v9028_v29, 4  ;;  %v9031_v35 = vmul.f32 %v9022_v24, %v9022_v24 }
0x21c3   :  { %v9029_v42 = vmul.f32 %v9020_v43, %v9020_v43  ;;  %v9051_v23 = vsel %vm9050_vm8, %v9049_v17, %v9048_v25  ;;  %v9058_v40 = vrot.slane %v9031_v35, 1 }
0x21c5   :  { %v9052_v50 = vrot.slane %v9029_v42, 3 }
0x21c7   :  { %v9054_v21 = vsel %vm9053_vm9, %v9052_v50, %v9051_v23 }
0x21c8   :  { %v9057_v31 = vsel %vm9056_vm10, %v9055_v34, %v9054_v21 }
0x21c9   :  { %v9060_v33 = vsel %vm9059_vm11, %v9058_v40, %v9057_v31  ;;  %v9465_v31 = vld [vmem:[%s13611_s10] ss:$0 sm:$0xff] }
0x21ca   :  { %v9062_v20 = vsel %vm56_vm0, %v9060_v33, 0.0 }
0x21cb   :  { %9063 = vadd.xlane.f32.xlu0 %v9062_v20 }
0x2254   :  { %v9064_v37 = vpop.xlane.xlu0 %9063 }
0x2255   :  { %v9065_v46 = vmul.f32 0.03125, %v9064_v37 }
0x2257   :  { %v9066_v2 = vadd.f32 1e-06, %v9065_v46 }
0x2259   :  { %11151 = vrsqrt.f32 %v9066_v2 }
0x2266   :  { %v11152_v12 = vpop.eup %11151 }
0x2267   :  { %v9069_v22 = vrot.slane %v11152_v12, 1  ;;  %v9070_v54 = vrot.slane %v11152_v12, 2  ;;  %v9071_v32 = vrot.slane %v11152_v12, 3  ;;  %v9072_v61 = vrot.slane %v11152_v12, 4 }
0x2268   :  { %v9073_v36 = vrot.slane %v11152_v12, 5  ;;  %v9074_v10 = vrot.slane %v11152_v12, 6  ;;  %v9075_v14 = vrot.slane %v11152_v12, 7  ;;  %v9084_v58 = vmul.f32 %v11152_v12, %v9015_v49 }
0x2269   :  { %v9085_v9 = vmul.f32 %v9069_v22, %v13552_v5  ;;  %v9086_v28 = vmul.f32 %v9070_v54, %v13557_v7  ;;  %v9087_v16 = vmul.f32 %v9071_v32, %v9018_v4  ;;  %v9088_v44 = vmul.f32 %v9072_v61, %v9019_v11 }
0x226a   :  { %v9089_v47 = vmul.f32 %v9073_v36, %v9020_v43  ;;  %v9090_v45 = vmul.f32 %v9074_v10, %v9021_v39  ;;  %v9091_v53 = vmul.f32 %v9075_v14, %v9022_v24  ;;  %v9098_v26 = vmul.f32 %v9464_v57, %v9084_v58 }
0x226b   :  { %v9099_v62 = vmul.f32 %v9464_v57, %v9085_v9  ;;  %v9100_v1 = vmul.f32 %v9464_v57, %v9086_v28  ;;  %v9101_v13 = vmul.f32 %v9464_v57, %v9087_v16  ;;  %v9102_v60 = vmul.f32 %v9464_v57, %v9088_v44 }
0x226c   :  { %v9103_v48 = vmul.f32 %v9464_v57, %v9089_v47  ;;  %v9104_v3 = vmul.f32 %v9464_v57, %v9090_v45  ;;  %v9105_v18 = vmul.f32 %v9464_v57, %v9091_v53  ;;  %v9106_v63 = vpack.c.bf16 %v9098_v26, %v9098_v26 }
0x226d   :  { %v9107_v27 = vpack.c.bf16 %v9099_v62, %v9099_v62  ;;  %v9108_v49 = vpack.c.bf16 %v9100_v1, %v9100_v1  ;;  %v9109_v41 = vpack.c.bf16 %v9101_v13, %v9101_v13  ;;  %v9110_v5 = vpack.c.bf16 %v9102_v60, %v9102_v60 }
0x226e   :  { %v9111_v56 = vpack.c.bf16 %v9103_v48, %v9103_v48  ;;  %v9112_v7 = vpack.c.bf16 %v9104_v3, %v9104_v3  ;;  %v9113_v4 = vpack.c.bf16 %v9105_v18, %v9105_v18  ;;  %v9133_v15 = vunpack.c.l.b16 %v9106_v63 }
0x226f   :  { %v9134_v0 = vunpack.c.l.b16 %v9107_v27  ;;  %v9135_v11 = vunpack.c.l.b16 %v9108_v49  ;;  %v9136_v39 = vunpack.c.l.b16 %v9109_v41  ;;  %v9137_v55 = vunpack.c.l.b16 %v9110_v5 }
0x2270   :  { %v9138_v30 = vunpack.c.l.b16 %v9111_v56  ;;  %v9139_v59 = vunpack.c.l.b16 %v9112_v7  ;;  %v9140_v6 = vunpack.c.l.b16 %v9113_v4 }
0x2271   :  { %v9141_v29 = vrot.slane %v9134_v0, 7  ;;  %v9143_v24 = vrot.slane %v9135_v11, 6  ;;  %v9145_v51 = vrot.slane %v9136_v39, 5  ;;  %v9147_v17 = vrot.slane %v9137_v55, 4 }
0x2272   :  { %v9149_v35 = vrot.slane %v9138_v30, 3  ;;  %v9151_v25 = vrot.slane %v9139_v59, 2  ;;  %v9153_v34 = vrot.slane %v9140_v6, 1 }
0x2273   :  { %v9142_v43 = vsel %vm9041_vm5, %v9141_v29, %v9133_v15 }
0x2274   :  { %v9144_v38 = vsel %vm9044_vm6, %v9143_v24, %v9142_v43 }
0x2275   :  { %v9146_v19 = vsel %vm9047_vm7, %v9145_v51, %v9144_v38 }
0x2276   :  { %v9148_v42 = vsel %vm9050_vm8, %v9147_v17, %v9146_v19 }
0x2277   :  { %v9150_v50 = vsel %vm9053_vm9, %v9149_v35, %v9148_v42 }
0x2278   :  { %v9152_v23 = vsel %vm9056_vm10, %v9151_v25, %v9150_v50 }
0x2279   :  { %v9154_v40 = vsel %vm9059_vm11, %v9153_v34, %v9152_v23 }
0x227a   :  { %v9155_v21 = vpack.c.b16 %v9154_v40, %v9154_v40 }
0x227c   :  { %10757 = vmatmul.mubr.msk.bf16.vlgmr.msra.gmra.mxu1 %vm56_vm0, %v9155_v21 }
0x233c   :  { %v9205_v33 = vpop.f32.mrf.mxu1 }
0x233d   :  { %v9206_v20 = vadd.f32 %v9465_v31, %v9205_v33 }
0x233e   :  { %v10758_v52 = vpop.f32.mrf.mxu1 }
0x233f   :  { %9211 = vst [vmem:[%s13612_s11] sm:$0xff] %v9206_v20 }
0x2340   :  { %v9208_v8 = vpop.f32.mrf.mxu1 }
0x2342   :  { %v10759_v37 = vpop.f32.mrf.mxu1 }

</bundles_post_ra>
